<compile_context>
chip_gen: v6e
topology: v6e:2x2x1
jax: 0.10.0
libtpu: 0.0.40
codegen_flags: <defaults>
</compile_context>

<pallas_src>
import math

import jax
import jax.numpy as jnp
from jax import lax
from jax.experimental import pallas as pl
from jax.experimental.pallas import tpu as pltpu

# Both the kernel's MXU matmuls and the pure-JAX reference must use accurate f32
# matmuls; otherwise the comparison measures MXU rounding, not kernel correctness.
jax.config.update("jax_default_matmul_precision", "highest")

_MAX_TIME_CHUNK = 32   # timesteps resident per grid step (per direction)


def _pick_time_chunk(T, max_chunk=_MAX_TIME_CHUNK):
    """Largest divisor of T that is <= max_chunk (exact blocks, no masking)."""
    for c in range(min(T, max_chunk), 0, -1):
        if T % c == 0:
            return c
    return 1


def _vmem_limit_bytes(TC, Bp, d_in, H):
    f32 = 4
    streamed = 2 * 2 * TC * Bp * (d_in + H) * f32           # x chunks + outputs, 2 dirs, double-buffered
    resident = (2 * d_in + 2 * H + 2) * 4 * H * f32          # w_ih + w_hh + b
    live = 2 * TC * Bp * 4 * H * f32                          # on-chip gx_f / gx_b values
    scratch = 4 * Bp * H * f32                                # h/c for both directions
    need = streamed + 2 * resident + live + scratch
    return int(min(max(2 * need, 32 * 1024 * 1024), 128 * 1024 * 1024))


# -----------------------------------------------------------------------------
# Kernel: one time-chunk grid step running BOTH directions, interleaved.
#
# Ref order: [x_p0_fwd, x_p0_bwd, x_p1_fwd, x_p1_bwd, ...,   (streamed chunks)
#             w_ih (2, D_in, 4H), w_hh (2, H, 4H), b (2, 1, 4H),   (resident)
#             out_fwd (TC*Bp, H), out_bwd (TC*Bp, H),              (outputs)
#             h_f, c_f, h_b, c_b (Bp, H)]                          (scratch)
# Gate column order everywhere in the kernel params: [i | f | o | g].
# -----------------------------------------------------------------------------
def _make_bilstm_kernel(num_parts, time_chunk, batch_pad, hidden):
    TC, Bp, H = time_chunk, batch_pad, hidden
    H3 = 3 * H

    def kernel(*refs):
        x_refs = refs[:2 * num_parts]
        (w_ih_ref, w_hh_ref, b_ref,
         out_f_ref, out_b_ref,
         h_f_ref, c_f_ref, h_b_ref, c_b_ref) = refs[2 * num_parts:]

        @pl.when(pl.program_id(0) == 0)
        def _():
            for r in (h_f_ref, c_f_ref, h_b_ref, c_b_ref):
                r[...] = jnp.zeros(r.shape, r.dtype)

        # --- Fused input projection: one big MXU matmul per direction per chunk,
        #     bias folded in.  Split input parts (prev layer's fwd/bwd halves) hit
        #     the matching row-slices of the resident weight, so the previous
        #     layer never had to concatenate them in HBM.
        def project(x_dir_refs, d):
            acc = None
            off = 0
            for xr in x_dir_refs:
                di = xr.shape[-1]
                p = jnp.dot(xr[...], w_ih_ref[d, off:off + di, :],
                            preferred_element_type=jnp.float32,
                            precision=lax.Precision.HIGHEST)
                acc = p if acc is None else acc + p
                off += di
            return acc + b_ref[d]                       # (TC*Bp, 4H)

        gx_f = project(x_refs[0::2], 0)                  # forward chunk t
        gx_b = project(x_refs[1::2], 1)                  # backward chunk nc-1-t
        w_hh_f = w_hh_ref[0]
        w_hh_b = w_hh_ref[1]

        def cell(gx_rows, h, c, w_hh):
            gates = gx_rows + jnp.dot(h, w_hh,
                                      preferred_element_type=jnp.float32,
                                      precision=lax.Precision.HIGHEST)
            sig = jax.nn.sigmoid(gates[:, :H3])          # [i | f | o] in one pass
            g = jnp.tanh(gates[:, H3:])
            c_new = sig[:, H:2 * H] * c + sig[:, :H] * g
            h_new = sig[:, 2 * H:H3] * jnp.tanh(c_new)
            return h_new, c_new

        h_f, c_f = h_f_ref[...], c_f_ref[...]
        h_b, c_b = h_b_ref[...], c_b_ref[...]
        # Fully unrolled, interleaved recurrence: every gx slice / out store uses
        # a STATIC sublane offset, and the two independent chains give the LLO
        # scheduler work to overlap (single-TC v5e/v6e).
        for s in range(TC):
            sb = TC - 1 - s
            h_f, c_f = cell(gx_f[s * Bp:(s + 1) * Bp], h_f, c_f, w_hh_f)
            out_f_ref[s * Bp:(s + 1) * Bp, :] = h_f
            h_b, c_b = cell(gx_b[sb * Bp:(sb + 1) * Bp], h_b, c_b, w_hh_b)
            out_b_ref[sb * Bp:(sb + 1) * Bp, :] = h_b

        h_f_ref[...] = h_f
        c_f_ref[...] = c_f
        h_b_ref[...] = h_b
        c_b_ref[...] = c_b

    return kernel


def bilstm_layer(x_parts, w_ih, w_hh, b, *, seq_len, batch_pad, time_chunk):
    """One bidirectional LSTM layer.

    x_parts: tuple of flattened time-major inputs, each (T*Bp, D_i); the layer's
             input is their feature concatenation (kept split in HBM).
    w_ih:    (2, D_in, 4H)  [dir, in, gate]  gate order [i|f|o|g]
    w_hh:    (2, H, 4H)
    b:       (2, 1, 4H)     b_ih + b_hh
    Returns (out_fwd, out_bwd), each (T*Bp, H).
    """
    T, Bp, TC = seq_len, batch_pad, time_chunk
    H = w_hh.shape[1]
    d_in = w_ih.shape[1]
    nc = T // TC
    num_parts = len(x_parts)

    in_specs = []
    operands = []
    for xp in x_parts:
        dp = xp.shape[-1]
        # Same array streamed twice: forward chunk t and backward chunk nc-1-t
        # (direction reversal is pure index arithmetic, no x[::-1] copy).
        in_specs.append(pl.BlockSpec((TC * Bp, dp), lambda t: (t, 0)))
        in_specs.append(pl.BlockSpec((TC * Bp, dp), lambda t: (nc - 1 - t, 0)))
        operands += [xp, xp]
    # Weights / bias: resident across the whole grid (block index never changes).
    in_specs += [
        pl.BlockSpec((2, d_in, 4 * H), lambda t: (0, 0, 0)),
        pl.BlockSpec((2, H, 4 * H), lambda t: (0, 0, 0)),
        pl.BlockSpec((2, 1, 4 * H), lambda t: (0, 0, 0)),
    ]
    operands += [w_ih, w_hh, b]

    out_f, out_b = pl.pallas_call(
        _make_bilstm_kernel(num_parts, TC, Bp, H),
        out_shape=(jax.ShapeDtypeStruct((T * Bp, H), jnp.float32),
                   jax.ShapeDtypeStruct((T * Bp, H), jnp.float32)),
        grid=(nc,),
        in_specs=in_specs,
        out_specs=(pl.BlockSpec((TC * Bp, H), lambda t: (t, 0)),
                   pl.BlockSpec((TC * Bp, H), lambda t: (nc - 1 - t, 0))),
        scratch_shapes=[pltpu.VMEM((Bp, H), jnp.float32) for _ in range(4)],
        compiler_params=pltpu.CompilerParams(
            dimension_semantics=("arbitrary",),          # h/c carry across chunks
            vmem_limit_bytes=_vmem_limit_bytes(TC, Bp, d_in, H)),
    )(*operands)
    return out_f, out_b


# -----------------------------------------------------------------------------
# SequenceEncoder forward (BiLSTM stack; dropout is identity in eval mode).
# -----------------------------------------------------------------------------
@jax.jit
def sequence_encoder_forward(x_btd, params):
    B, T, D = x_btd.shape
    Bp = ((B + 7) // 8) * 8                  # pad batch to a sublane multiple
    tc = _pick_time_chunk(T)
    x = jnp.transpose(x_btd, (1, 0, 2))      # time-major (T, B, D)
    if Bp != B:
        # Padded rows run sigmoid/tanh on zero inputs (finite) and are sliced off.
        x = jnp.pad(x, ((0, 0), (0, Bp - B), (0, 0)))
    parts = (x.reshape(T * Bp, D),)          # contiguous (free) reshape
    for p in params:
        parts = bilstm_layer(parts, p["w_ih"], p["w_hh"], p["b"],
                             seq_len=T, batch_pad=Bp, time_chunk=tc)
        # inter-layer LSTM dropout: identity in eval mode
    # The ONLY feature concat in the whole stack: the user-visible output.
    out = jnp.concatenate(parts, axis=-1).reshape(T, Bp, -1)
    # final self.dropout: identity in eval mode
    return jnp.transpose(out[:, :B], (1, 0, 2))          # (B, T, 2H)


# -----------------------------------------------------------------------------
# Pure-JAX reference (lax.scan, standard PyTorch [i, f, g, o] gate order).
# -----------------------------------------------------------------------------
def _lstm_dir_ref(x_tbd, w_ih_t, w_hh_t, b):
    H = w_hh_t.shape[0]

    def step(carry, x_t):
        h, c = carry
        gates = x_t @ w_ih_t + h @ w_hh_t + b
        i_g = jax.nn.sigmoid(gates[:, :H])
        f_g = jax.nn.sigmoid(gates[:, H:2 * H])
        g_g = jnp.tanh(gates[:, 2 * H:3 * H])
        o_g = jax.nn.sigmoid(gates[:, 3 * H:])
        c = f_g * c + i_g * g_g
        h = o_g * jnp.tanh(c)
        return (h, c), h

    B = x_tbd.shape[1]
    init = (jnp.zeros((B, H), jnp.float32), jnp.zeros((B, H), jnp.float32))
    _, hs = lax.scan(step, init, x_tbd)
    return hs


def sequence_encoder_ref(x_btd, layers):
    x = jnp.transpose(x_btd, (1, 0, 2))
    for L in layers:
        fwd = _lstm_dir_ref(x, L["fwd"]["w_ih"], L["fwd"]["w_hh"], L["fwd"]["b"])
        bwd = _lstm_dir_ref(x[::-1], L["bwd"]["w_ih"], L["bwd"]["w_hh"],
                            L["bwd"]["b"])[::-1]
        x = jnp.concatenate([fwd, bwd], axis=-1)
    return jnp.transpose(x, (1, 0, 2))


# -----------------------------------------------------------------------------
# Parameter init (PyTorch LSTM: U(-1/sqrt(H), 1/sqrt(H))) and kernel packing.
# -----------------------------------------------------------------------------
def init_params(key, input_size, hidden_size, num_layers):
    """Canonical per-direction params, transposed, PyTorch [i, f, g, o] order."""
    bound = 1.0 / math.sqrt(hidden_size)
    layers = []
    d_in = input_size
    for _ in range(num_layers):
        key, *ks = jax.random.split(key, 9)

        def u(k, shape):
            return jax.random.uniform(k, shape, jnp.float32, -bound, bound)

        layer = {}
        for name, kk in (("fwd", ks[:4]), ("bwd", ks[4:])):
            layer[name] = {
                "w_ih": u(kk[0], (d_in, 4 * hidden_size)),
                "w_hh": u(kk[1], (hidden_size, 4 * hidden_size)),
                "b": u(kk[2], (1, 4 * hidden_size)) + u(kk[3], (1, 4 * hidden_size)),
            }
        layers.append(layer)
        d_in = 2 * hidden_size      # next layer consumes [fwd | bwd]
    return layers


_GATE_PERM = (0, 1, 3, 2)   # PyTorch [i, f, g, o] -> kernel [i, f, o, g]


def _permute_gates(w, H):
    s = w.shape
    return w.reshape(s[:-1] + (4, H))[..., _GATE_PERM, :].reshape(s)


def pack_params_for_kernel(layers, hidden_size):
    """Stack directions and permute gate columns to the kernel layout."""
    H = hidden_size
    packed = []
    for L in layers:
        packed.append({
            "w_ih": jnp.stack([_permute_gates(L["fwd"]["w_ih"], H),
                               _permute_gates(L["bwd"]["w_ih"], H)], axis=0),
            "w_hh": jnp.stack([_permute_gates(L["fwd"]["w_hh"], H),
                               _permute_gates(L["bwd"]["w_hh"], H)], axis=0),
            "b": jnp.stack([_permute_gates(L["fwd"]["b"], H),
                            _permute_gates(L["bwd"]["b"], H)], axis=0),
        })
    return packed


if __name__ == "__main__":
    batch, seq, input_size, hidden_size, num_layers = 2, 8, 16, 32, 2

    key = jax.random.PRNGKey(0)
    k_x, k_p = jax.random.split(key)
    x = jax.random.normal(k_x, (batch, seq, input_size), dtype=jnp.float32)

    canonical = init_params(k_p, input_size, hidden_size, num_layers)
    kernel_params = pack_params_for_kernel(canonical, hidden_size)

    out = jax.block_until_ready(sequence_encoder_forward(x, kernel_params))
    ref = jax.block_until_ready(sequence_encoder_ref(x, canonical))

    assert out.shape == (batch, seq, 2 * hidden_size), out.shape
    max_err = float(jnp.max(jnp.abs(out - ref)))
    # 1e-4: allows for MXU multi-pass f32 rounding / op-reordering differences.
    assert jnp.allclose(out, ref, atol=1e-4, rtol=1e-4), max_err

    print("KERNEL_OK")
</pallas_src>

<mosaic_0001>
module attributes {stable_mosaic.version = 11 : i64} {
  func.func @kernel(%arg0: i32, %arg1: memref<64x16xf32, #tpu.memory_space<vmem>>, %arg2: memref<64x16xf32, #tpu.memory_space<vmem>>, %arg3: memref<2x16x128xf32, #tpu.memory_space<vmem>>, %arg4: memref<2x32x128xf32, #tpu.memory_space<vmem>>, %arg5: memref<2x1x128xf32, #tpu.memory_space<vmem>>, %arg6: memref<64x32xf32, #tpu.memory_space<vmem>>, %arg7: memref<64x32xf32, #tpu.memory_space<vmem>>, %arg8: memref<8x32xf32, #tpu.memory_space<vmem>>, %arg9: memref<8x32xf32, #tpu.memory_space<vmem>>, %arg10: memref<8x32xf32, #tpu.memory_space<vmem>>, %arg11: memref<8x32xf32, #tpu.memory_space<vmem>>) attributes {dimension_semantics = [#tpu.dimension_semantics<arbitrary>], iteration_bounds = array<i64: 1>, scalar_prefetch = 0 : i64, scratch_operands = 4 : i64, tpu.core_type = #tpu.core_type<tc>, window_params = [{transform_indices = @transform_0, window_bounds = array<i64: 64, 16>}, {transform_indices = @transform_1, window_bounds = array<i64: 64, 16>}, {pipeline_mode = #tpu.pipeline_mode<synchronous>, transform_indices = @transform_2, window_bounds = array<i64: 2, 16, 128>}, {pipeline_mode = #tpu.pipeline_mode<synchronous>, transform_indices = @transform_3, window_bounds = array<i64: 2, 32, 128>}, {pipeline_mode = #tpu.pipeline_mode<synchronous>, transform_indices = @transform_4, window_bounds = array<i64: 2, 1, 128>}, {transform_indices = @transform_5, window_bounds = array<i64: 64, 32>}, {transform_indices = @transform_6, window_bounds = array<i64: 64, 32>}]} {
    %c0_i32 = arith.constant 0 : i32
    %0 = arith.cmpi eq, %arg0, %c0_i32 : i32
    %1 = arith.extui %0 : i1 to i32
    %c0_i32_0 = arith.constant 0 : i32
    %2 = arith.cmpi ne, %1, %c0_i32_0 : i32
    scf.if %2 {
      %cst_95 = arith.constant 0.000000e+00 : f32
      %351 = vector.broadcast %cst_95 : f32 to vector<8x32xf32>
      %c0_96 = arith.constant 0 : index
      %c0_97 = arith.constant 0 : index
      %352 = vector.load %arg8[%c0_96, %c0_97] : memref<8x32xf32, #tpu.memory_space<vmem>>, vector<8x32xf32>
      tpu.vector_store %arg8[%c0_96, %c0_97], %351 {strides = array<i32>} : memref<8x32xf32, #tpu.memory_space<vmem>>, vector<8x32xf32>,
      %cst_98 = arith.constant 0.000000e+00 : f32
      %353 = vector.broadcast %cst_98 : f32 to vector<8x32xf32>
      %c0_99 = arith.constant 0 : index
      %c0_100 = arith.constant 0 : index
      %354 = vector.load %arg9[%c0_99, %c0_100] : memref<8x32xf32, #tpu.memory_space<vmem>>, vector<8x32xf32>
      tpu.vector_store %arg9[%c0_99, %c0_100], %353 {strides = array<i32>} : memref<8x32xf32, #tpu.memory_space<vmem>>, vector<8x32xf32>,
      %cst_101 = arith.constant 0.000000e+00 : f32
      %355 = vector.broadcast %cst_101 : f32 to vector<8x32xf32>
      %c0_102 = arith.constant 0 : index
      %c0_103 = arith.constant 0 : index
      %356 = vector.load %arg10[%c0_102, %c0_103] : memref<8x32xf32, #tpu.memory_space<vmem>>, vector<8x32xf32>
      tpu.vector_store %arg10[%c0_102, %c0_103], %355 {strides = array<i32>} : memref<8x32xf32, #tpu.memory_space<vmem>>, vector<8x32xf32>,
      %cst_104 = arith.constant 0.000000e+00 : f32
      %357 = vector.broadcast %cst_104 : f32 to vector<8x32xf32>
      %c0_105 = arith.constant 0 : index
      %c0_106 = arith.constant 0 : index
      %358 = vector.load %arg11[%c0_105, %c0_106] : memref<8x32xf32, #tpu.memory_space<vmem>>, vector<8x32xf32>
      tpu.vector_store %arg11[%c0_105, %c0_106], %357 {strides = array<i32>} : memref<8x32xf32, #tpu.memory_space<vmem>>, vector<8x32xf32>,
    } else {
    }
    %c0 = arith.constant 0 : index
    %c0_1 = arith.constant 0 : index
    %3 = vector.load %arg1[%c0, %c0_1] : memref<64x16xf32, #tpu.memory_space<vmem>>, vector<64x16xf32>
    %c0_2 = arith.constant 0 : index
    %c0_3 = arith.constant 0 : index
    %c0_4 = arith.constant 0 : index
    %4 = vector.load %arg3[%c0_2, %c0_3, %c0_4] : memref<2x16x128xf32, #tpu.memory_space<vmem>>, vector<1x16x128xf32>
    %5 = vector.shape_cast %4 : vector<1x16x128xf32> to vector<16x128xf32>
    %cst = arith.constant dense<0.000000e+00> : vector<64x128xf32>
    %6 = tpu.matmul %3, %5, %cst {dimension_numbers = #tpu.dot_dimension_numbers<[1], [0], [0], [1], [0, 0, 1, 1], [], []>, precision = #tpu.contract_precision<fp32>} : vector<64x16xf32>, vector<16x128xf32>, vector<64x128xf32> -> vector<64x128xf32>
    %c0_5 = arith.constant 0 : index
    %c0_6 = arith.constant 0 : index
    %c0_7 = arith.constant 0 : index
    %7 = vector.load %arg5[%c0_5, %c0_6, %c0_7] : memref<2x1x128xf32, #tpu.memory_space<vmem>>, vector<1x1x128xf32>
    %8 = vector.shape_cast %7 : vector<1x1x128xf32> to vector<1x128xf32>
    %9 = vector.broadcast %8 : vector<1x128xf32> to vector<64x128xf32>
    %10 = arith.addf %6, %9 : vector<64x128xf32>
    %c0_8 = arith.constant 0 : index
    %c0_9 = arith.constant 0 : index
    %11 = vector.load %arg2[%c0_8, %c0_9] : memref<64x16xf32, #tpu.memory_space<vmem>>, vector<64x16xf32>
    %c1 = arith.constant 1 : index
    %c0_10 = arith.constant 0 : index
    %c0_11 = arith.constant 0 : index
    %12 = vector.load %arg3[%c1, %c0_10, %c0_11] : memref<2x16x128xf32, #tpu.memory_space<vmem>>, vector<1x16x128xf32>
    %13 = vector.shape_cast %12 : vector<1x16x128xf32> to vector<16x128xf32>
    %cst_12 = arith.constant dense<0.000000e+00> : vector<64x128xf32>
    %14 = tpu.matmul %11, %13, %cst_12 {dimension_numbers = #tpu.dot_dimension_numbers<[1], [0], [0], [1], [0, 0, 1, 1], [], []>, precision = #tpu.contract_precision<fp32>} : vector<64x16xf32>, vector<16x128xf32>, vector<64x128xf32> -> vector<64x128xf32>
    %c1_13 = arith.constant 1 : index
    %c0_14 = arith.constant 0 : index
    %c0_15 = arith.constant 0 : index
    %15 = vector.load %arg5[%c1_13, %c0_14, %c0_15] : memref<2x1x128xf32, #tpu.memory_space<vmem>>, vector<1x1x128xf32>
    %16 = vector.shape_cast %15 : vector<1x1x128xf32> to vector<1x128xf32>
    %17 = vector.broadcast %16 : vector<1x128xf32> to vector<64x128xf32>
    %18 = arith.addf %14, %17 : vector<64x128xf32>
    %c0_16 = arith.constant 0 : index
    %c0_17 = arith.constant 0 : index
    %c0_18 = arith.constant 0 : index
    %19 = vector.load %arg4[%c0_16, %c0_17, %c0_18] : memref<2x32x128xf32, #tpu.memory_space<vmem>>, vector<1x32x128xf32>
    %20 = vector.shape_cast %19 : vector<1x32x128xf32> to vector<32x128xf32>
    %c1_19 = arith.constant 1 : index
    %c0_20 = arith.constant 0 : index
    %c0_21 = arith.constant 0 : index
    %21 = vector.load %arg4[%c1_19, %c0_20, %c0_21] : memref<2x32x128xf32, #tpu.memory_space<vmem>>, vector<1x32x128xf32>
    %22 = vector.shape_cast %21 : vector<1x32x128xf32> to vector<32x128xf32>
    %c0_22 = arith.constant 0 : index
    %c0_23 = arith.constant 0 : index
    %23 = vector.load %arg8[%c0_22, %c0_23] : memref<8x32xf32, #tpu.memory_space<vmem>>, vector<8x32xf32>
    %c0_24 = arith.constant 0 : index
    %c0_25 = arith.constant 0 : index
    %24 = vector.load %arg9[%c0_24, %c0_25] : memref<8x32xf32, #tpu.memory_space<vmem>>, vector<8x32xf32>
    %c0_26 = arith.constant 0 : index
    %c0_27 = arith.constant 0 : index
    %25 = vector.load %arg10[%c0_26, %c0_27] : memref<8x32xf32, #tpu.memory_space<vmem>>, vector<8x32xf32>
    %c0_28 = arith.constant 0 : index
    %c0_29 = arith.constant 0 : index
    %26 = vector.load %arg11[%c0_28, %c0_29] : memref<8x32xf32, #tpu.memory_space<vmem>>, vector<8x32xf32>
    %27 = vector.extract_strided_slice %10 {offsets = [0, 0], sizes = [8, 128], strides = [1, 1]} : vector<64x128xf32> to vector<8x128xf32>
    %cst_30 = arith.constant dense<0.000000e+00> : vector<8x128xf32>
    %28 = tpu.matmul %23, %20, %cst_30 {dimension_numbers = #tpu.dot_dimension_numbers<[1], [0], [0], [1], [0, 0, 1, 1], [], []>, precision = #tpu.contract_precision<fp32>} : vector<8x32xf32>, vector<32x128xf32>, vector<8x128xf32> -> vector<8x128xf32>
    %29 = arith.addf %27, %28 : vector<8x128xf32>
    %30 = vector.extract_strided_slice %29 {offsets = [0, 0], sizes = [8, 96], strides = [1, 1]} : vector<8x128xf32> to vector<8x96xf32>
    %31 = arith.negf %30 : vector<8x96xf32>
    %32 = math.exp %31 : vector<8x96xf32>
    %cst_31 = arith.constant 1.000000e+00 : f32
    %33 = vector.broadcast %cst_31 : f32 to vector<8x96xf32>
    %34 = arith.addf %33, %32 : vector<8x96xf32>
    %35 = arith.divf %33, %34 : vector<8x96xf32>
    %36 = vector.extract_strided_slice %29 {offsets = [0, 96], sizes = [8, 32], strides = [1, 1]} : vector<8x128xf32> to vector<8x32xf32>
    %37 = math.tanh %36 : vector<8x32xf32>
    %38 = vector.extract_strided_slice %35 {offsets = [0, 32], sizes = [8, 32], strides = [1, 1]} : vector<8x96xf32> to vector<8x32xf32>
    %39 = arith.mulf %38, %24 : vector<8x32xf32>
    %40 = vector.extract_strided_slice %35 {offsets = [0, 0], sizes = [8, 32], strides = [1, 1]} : vector<8x96xf32> to vector<8x32xf32>
    %41 = arith.mulf %40, %37 : vector<8x32xf32>
    %42 = arith.addf %39, %41 : vector<8x32xf32>
    %43 = vector.extract_strided_slice %35 {offsets = [0, 64], sizes = [8, 32], strides = [1, 1]} : vector<8x96xf32> to vector<8x32xf32>
    %44 = math.tanh %42 : vector<8x32xf32>
    %45 = arith.mulf %43, %44 : vector<8x32xf32>
    %c0_32 = arith.constant 0 : index
    %c0_33 = arith.constant 0 : index
    %46 = vector.load %arg6[%c0_32, %c0_33] : memref<64x32xf32, #tpu.memory_space<vmem>>, vector<8x32xf32>
    tpu.vector_store %arg6[%c0_32, %c0_33], %45 {strides = array<i32>} : memref<64x32xf32, #tpu.memory_space<vmem>>, vector<8x32xf32>,
    %47 = vector.extract_strided_slice %18 {offsets = [56, 0], sizes = [8, 128], strides = [1, 1]} : vector<64x128xf32> to vector<8x128xf32>
    %cst_34 = arith.constant dense<0.000000e+00> : vector<8x128xf32>
    %48 = tpu.matmul %25, %22, %cst_34 {dimension_numbers = #tpu.dot_dimension_numbers<[1], [0], [0], [1], [0, 0, 1, 1], [], []>, precision = #tpu.contract_precision<fp32>} : vector<8x32xf32>, vector<32x128xf32>, vector<8x128xf32> -> vector<8x128xf32>
    %49 = arith.addf %47, %48 : vector<8x128xf32>
    %50 = vector.extract_strided_slice %49 {offsets = [0, 0], sizes = [8, 96], strides = [1, 1]} : vector<8x128xf32> to vector<8x96xf32>
    %51 = arith.negf %50 : vector<8x96xf32>
    %52 = math.exp %51 : vector<8x96xf32>
    %cst_35 = arith.constant 1.000000e+00 : f32
    %53 = vector.broadcast %cst_35 : f32 to vector<8x96xf32>
    %54 = arith.addf %53, %52 : vector<8x96xf32>
    %55 = arith.divf %53, %54 : vector<8x96xf32>
    %56 = vector.extract_strided_slice %49 {offsets = [0, 96], sizes = [8, 32], strides = [1, 1]} : vector<8x128xf32> to vector<8x32xf32>
    %57 = math.tanh %56 : vector<8x32xf32>
    %58 = vector.extract_strided_slice %55 {offsets = [0, 32], sizes = [8, 32], strides = [1, 1]} : vector<8x96xf32> to vector<8x32xf32>
    %59 = arith.mulf %58, %26 : vector<8x32xf32>
    %60 = vector.extract_strided_slice %55 {offsets = [0, 0], sizes = [8, 32], strides = [1, 1]} : vector<8x96xf32> to vector<8x32xf32>
    %61 = arith.mulf %60, %57 : vector<8x32xf32>
    %62 = arith.addf %59, %61 : vector<8x32xf32>
    %63 = vector.extract_strided_slice %55 {offsets = [0, 64], sizes = [8, 32], strides = [1, 1]} : vector<8x96xf32> to vector<8x32xf32>
    %64 = math.tanh %62 : vector<8x32xf32>
    %65 = arith.mulf %63, %64 : vector<8x32xf32>
    %c56 = arith.constant 56 : index
    %c0_36 = arith.constant 0 : index
    %66 = vector.load %arg7[%c56, %c0_36] : memref<64x32xf32, #tpu.memory_space<vmem>>, vector<8x32xf32>
    tpu.vector_store %arg7[%c56, %c0_36], %65 {strides = array<i32>} : memref<64x32xf32, #tpu.memory_space<vmem>>, vector<8x32xf32>,
    %67 = vector.extract_strided_slice %10 {offsets = [8, 0], sizes = [8, 128], strides = [1, 1]} : vector<64x128xf32> to vector<8x128xf32>
    %cst_37 = arith.constant dense<0.000000e+00> : vector<8x128xf32>
    %68 = tpu.matmul %45, %20, %cst_37 {dimension_numbers = #tpu.dot_dimension_numbers<[1], [0], [0], [1], [0, 0, 1, 1], [], []>, precision = #tpu.contract_precision<fp32>} : vector<8x32xf32>, vector<32x128xf32>, vector<8x128xf32> -> vector<8x128xf32>
    %69 = arith.addf %67, %68 : vector<8x128xf32>
    %70 = vector.extract_strided_slice %69 {offsets = [0, 0], sizes = [8, 96], strides = [1, 1]} : vector<8x128xf32> to vector<8x96xf32>
    %71 = arith.negf %70 : vector<8x96xf32>
    %72 = math.exp %71 : vector<8x96xf32>
    %cst_38 = arith.constant 1.000000e+00 : f32
    %73 = vector.broadcast %cst_38 : f32 to vector<8x96xf32>
    %74 = arith.addf %73, %72 : vector<8x96xf32>
    %75 = arith.divf %73, %74 : vector<8x96xf32>
    %76 = vector.extract_strided_slice %69 {offsets = [0, 96], sizes = [8, 32], strides = [1, 1]} : vector<8x128xf32> to vector<8x32xf32>
    %77 = math.tanh %76 : vector<8x32xf32>
    %78 = vector.extract_strided_slice %75 {offsets = [0, 32], sizes = [8, 32], strides = [1, 1]} : vector<8x96xf32> to vector<8x32xf32>
    %79 = arith.mulf %78, %42 : vector<8x32xf32>
    %80 = vector.extract_strided_slice %75 {offsets = [0, 0], sizes = [8, 32], strides = [1, 1]} : vector<8x96xf32> to vector<8x32xf32>
    %81 = arith.mulf %80, %77 : vector<8x32xf32>
    %82 = arith.addf %79, %81 : vector<8x32xf32>
    %83 = vector.extract_strided_slice %75 {offsets = [0, 64], sizes = [8, 32], strides = [1, 1]} : vector<8x96xf32> to vector<8x32xf32>
    %84 = math.tanh %82 : vector<8x32xf32>
    %85 = arith.mulf %83, %84 : vector<8x32xf32>
    %c8 = arith.constant 8 : index
    %c0_39 = arith.constant 0 : index
    %86 = vector.load %arg6[%c8, %c0_39] : memref<64x32xf32, #tpu.memory_space<vmem>>, vector<8x32xf32>
    tpu.vector_store %arg6[%c8, %c0_39], %85 {strides = array<i32>} : memref<64x32xf32, #tpu.memory_space<vmem>>, vector<8x32xf32>,
    %87 = vector.extract_strided_slice %18 {offsets = [48, 0], sizes = [8, 128], strides = [1, 1]} : vector<64x128xf32> to vector<8x128xf32>
    %cst_40 = arith.constant dense<0.000000e+00> : vector<8x128xf32>
    %88 = tpu.matmul %65, %22, %cst_40 {dimension_numbers = #tpu.dot_dimension_numbers<[1], [0], [0], [1], [0, 0, 1, 1], [], []>, precision = #tpu.contract_precision<fp32>} : vector<8x32xf32>, vector<32x128xf32>, vector<8x128xf32> -> vector<8x128xf32>
    %89 = arith.addf %87, %88 : vector<8x128xf32>
    %90 = vector.extract_strided_slice %89 {offsets = [0, 0], sizes = [8, 96], strides = [1, 1]} : vector<8x128xf32> to vector<8x96xf32>
    %91 = arith.negf %90 : vector<8x96xf32>
    %92 = math.exp %91 : vector<8x96xf32>
    %cst_41 = arith.constant 1.000000e+00 : f32
    %93 = vector.broadcast %cst_41 : f32 to vector<8x96xf32>
    %94 = arith.addf %93, %92 : vector<8x96xf32>
    %95 = arith.divf %93, %94 : vector<8x96xf32>
    %96 = vector.extract_strided_slice %89 {offsets = [0, 96], sizes = [8, 32], strides = [1, 1]} : vector<8x128xf32> to vector<8x32xf32>
    %97 = math.tanh %96 : vector<8x32xf32>
    %98 = vector.extract_strided_slice %95 {offsets = [0, 32], sizes = [8, 32], strides = [1, 1]} : vector<8x96xf32> to vector<8x32xf32>
    %99 = arith.mulf %98, %62 : vector<8x32xf32>
    %100 = vector.extract_strided_slice %95 {offsets = [0, 0], sizes = [8, 32], strides = [1, 1]} : vector<8x96xf32> to vector<8x32xf32>
    %101 = arith.mulf %100, %97 : vector<8x32xf32>
    %102 = arith.addf %99, %101 : vector<8x32xf32>
    %103 = vector.extract_strided_slice %95 {offsets = [0, 64], sizes = [8, 32], strides = [1, 1]} : vector<8x96xf32> to vector<8x32xf32>
    %104 = math.tanh %102 : vector<8x32xf32>
    %105 = arith.mulf %103, %104 : vector<8x32xf32>
    %c48 = arith.constant 48 : index
    %c0_42 = arith.constant 0 : index
    %106 = vector.load %arg7[%c48, %c0_42] : memref<64x32xf32, #tpu.memory_space<vmem>>, vector<8x32xf32>
    tpu.vector_store %arg7[%c48, %c0_42], %105 {strides = array<i32>} : memref<64x32xf32, #tpu.memory_space<vmem>>, vector<8x32xf32>,
    %107 = vector.extract_strided_slice %10 {offsets = [16, 0], sizes = [8, 128], strides = [1, 1]} : vector<64x128xf32> to vector<8x128xf32>
    %cst_43 = arith.constant dense<0.000000e+00> : vector<8x128xf32>
    %108 = tpu.matmul %85, %20, %cst_43 {dimension_numbers = #tpu.dot_dimension_numbers<[1], [0], [0], [1], [0, 0, 1, 1], [], []>, precision = #tpu.contract_precision<fp32>} : vector<8x32xf32>, vector<32x128xf32>, vector<8x128xf32> -> vector<8x128xf32>
    %109 = arith.addf %107, %108 : vector<8x128xf32>
    %110 = vector.extract_strided_slice %109 {offsets = [0, 0], sizes = [8, 96], strides = [1, 1]} : vector<8x128xf32> to vector<8x96xf32>
    %111 = arith.negf %110 : vector<8x96xf32>
    %112 = math.exp %111 : vector<8x96xf32>
    %cst_44 = arith.constant 1.000000e+00 : f32
    %113 = vector.broadcast %cst_44 : f32 to vector<8x96xf32>
    %114 = arith.addf %113, %112 : vector<8x96xf32>
    %115 = arith.divf %113, %114 : vector<8x96xf32>
    %116 = vector.extract_strided_slice %109 {offsets = [0, 96], sizes = [8, 32], strides = [1, 1]} : vector<8x128xf32> to vector<8x32xf32>
    %117 = math.tanh %116 : vector<8x32xf32>
    %118 = vector.extract_strided_slice %115 {offsets = [0, 32], sizes = [8, 32], strides = [1, 1]} : vector<8x96xf32> to vector<8x32xf32>
    %119 = arith.mulf %118, %82 : vector<8x32xf32>
    %120 = vector.extract_strided_slice %115 {offsets = [0, 0], sizes = [8, 32], strides = [1, 1]} : vector<8x96xf32> to vector<8x32xf32>
    %121 = arith.mulf %120, %117 : vector<8x32xf32>
    %122 = arith.addf %119, %121 : vector<8x32xf32>
    %123 = vector.extract_strided_slice %115 {offsets = [0, 64], sizes = [8, 32], strides = [1, 1]} : vector<8x96xf32> to vector<8x32xf32>
    %124 = math.tanh %122 : vector<8x32xf32>
    %125 = arith.mulf %123, %124 : vector<8x32xf32>
    %c16 = arith.constant 16 : index
    %c0_45 = arith.constant 0 : index
    %126 = vector.load %arg6[%c16, %c0_45] : memref<64x32xf32, #tpu.memory_space<vmem>>, vector<8x32xf32>
    tpu.vector_store %arg6[%c16, %c0_45], %125 {strides = array<i32>} : memref<64x32xf32, #tpu.memory_space<vmem>>, vector<8x32xf32>,
    %127 = vector.extract_strided_slice %18 {offsets = [40, 0], sizes = [8, 128], strides = [1, 1]} : vector<64x128xf32> to vector<8x128xf32>
    %cst_46 = arith.constant dense<0.000000e+00> : vector<8x128xf32>
    %128 = tpu.matmul %105, %22, %cst_46 {dimension_numbers = #tpu.dot_dimension_numbers<[1], [0], [0], [1], [0, 0, 1, 1], [], []>, precision = #tpu.contract_precision<fp32>} : vector<8x32xf32>, vector<32x128xf32>, vector<8x128xf32> -> vector<8x128xf32>
    %129 = arith.addf %127, %128 : vector<8x128xf32>
    %130 = vector.extract_strided_slice %129 {offsets = [0, 0], sizes = [8, 96], strides = [1, 1]} : vector<8x128xf32> to vector<8x96xf32>
    %131 = arith.negf %130 : vector<8x96xf32>
    %132 = math.exp %131 : vector<8x96xf32>
    %cst_47 = arith.constant 1.000000e+00 : f32
    %133 = vector.broadcast %cst_47 : f32 to vector<8x96xf32>
    %134 = arith.addf %133, %132 : vector<8x96xf32>
    %135 = arith.divf %133, %134 : vector<8x96xf32>
    %136 = vector.extract_strided_slice %129 {offsets = [0, 96], sizes = [8, 32], strides = [1, 1]} : vector<8x128xf32> to vector<8x32xf32>
    %137 = math.tanh %136 : vector<8x32xf32>
    %138 = vector.extract_strided_slice %135 {offsets = [0, 32], sizes = [8, 32], strides = [1, 1]} : vector<8x96xf32> to vector<8x32xf32>
    %139 = arith.mulf %138, %102 : vector<8x32xf32>
    %140 = vector.extract_strided_slice %135 {offsets = [0, 0], sizes = [8, 32], strides = [1, 1]} : vector<8x96xf32> to vector<8x32xf32>
    %141 = arith.mulf %140, %137 : vector<8x32xf32>
    %142 = arith.addf %139, %141 : vector<8x32xf32>
    %143 = vector.extract_strided_slice %135 {offsets = [0, 64], sizes = [8, 32], strides = [1, 1]} : vector<8x96xf32> to vector<8x32xf32>
    %144 = math.tanh %142 : vector<8x32xf32>
    %145 = arith.mulf %143, %144 : vector<8x32xf32>
    %c40 = arith.constant 40 : index
    %c0_48 = arith.constant 0 : index
    %146 = vector.load %arg7[%c40, %c0_48] : memref<64x32xf32, #tpu.memory_space<vmem>>, vector<8x32xf32>
    tpu.vector_store %arg7[%c40, %c0_48], %145 {strides = array<i32>} : memref<64x32xf32, #tpu.memory_space<vmem>>, vector<8x32xf32>,
    %147 = vector.extract_strided_slice %10 {offsets = [24, 0], sizes = [8, 128], strides = [1, 1]} : vector<64x128xf32> to vector<8x128xf32>
    %cst_49 = arith.constant dense<0.000000e+00> : vector<8x128xf32>
    %148 = tpu.matmul %125, %20, %cst_49 {dimension_numbers = #tpu.dot_dimension_numbers<[1], [0], [0], [1], [0, 0, 1, 1], [], []>, precision = #tpu.contract_precision<fp32>} : vector<8x32xf32>, vector<32x128xf32>, vector<8x128xf32> -> vector<8x128xf32>
    %149 = arith.addf %147, %148 : vector<8x128xf32>
    %150 = vector.extract_strided_slice %149 {offsets = [0, 0], sizes = [8, 96], strides = [1, 1]} : vector<8x128xf32> to vector<8x96xf32>
    %151 = arith.negf %150 : vector<8x96xf32>
    %152 = math.exp %151 : vector<8x96xf32>
    %cst_50 = arith.constant 1.000000e+00 : f32
    %153 = vector.broadcast %cst_50 : f32 to vector<8x96xf32>
    %154 = arith.addf %153, %152 : vector<8x96xf32>
    %155 = arith.divf %153, %154 : vector<8x96xf32>
    %156 = vector.extract_strided_slice %149 {offsets = [0, 96], sizes = [8, 32], strides = [1, 1]} : vector<8x128xf32> to vector<8x32xf32>
    %157 = math.tanh %156 : vector<8x32xf32>
    %158 = vector.extract_strided_slice %155 {offsets = [0, 32], sizes = [8, 32], strides = [1, 1]} : vector<8x96xf32> to vector<8x32xf32>
    %159 = arith.mulf %158, %122 : vector<8x32xf32>
    %160 = vector.extract_strided_slice %155 {offsets = [0, 0], sizes = [8, 32], strides = [1, 1]} : vector<8x96xf32> to vector<8x32xf32>
    %161 = arith.mulf %160, %157 : vector<8x32xf32>
    %162 = arith.addf %159, %161 : vector<8x32xf32>
    %163 = vector.extract_strided_slice %155 {offsets = [0, 64], sizes = [8, 32], strides = [1, 1]} : vector<8x96xf32> to vector<8x32xf32>
    %164 = math.tanh %162 : vector<8x32xf32>
    %165 = arith.mulf %163, %164 : vector<8x32xf32>
    %c24 = arith.constant 24 : index
    %c0_51 = arith.constant 0 : index
    %166 = vector.load %arg6[%c24, %c0_51] : memref<64x32xf32, #tpu.memory_space<vmem>>, vector<8x32xf32>
    tpu.vector_store %arg6[%c24, %c0_51], %165 {strides = array<i32>} : memref<64x32xf32, #tpu.memory_space<vmem>>, vector<8x32xf32>,
    %167 = vector.extract_strided_slice %18 {offsets = [32, 0], sizes = [8, 128], strides = [1, 1]} : vector<64x128xf32> to vector<8x128xf32>
    %cst_52 = arith.constant dense<0.000000e+00> : vector<8x128xf32>
    %168 = tpu.matmul %145, %22, %cst_52 {dimension_numbers = #tpu.dot_dimension_numbers<[1], [0], [0], [1], [0, 0, 1, 1], [], []>, precision = #tpu.contract_precision<fp32>} : vector<8x32xf32>, vector<32x128xf32>, vector<8x128xf32> -> vector<8x128xf32>
    %169 = arith.addf %167, %168 : vector<8x128xf32>
    %170 = vector.extract_strided_slice %169 {offsets = [0, 0], sizes = [8, 96], strides = [1, 1]} : vector<8x128xf32> to vector<8x96xf32>
    %171 = arith.negf %170 : vector<8x96xf32>
    %172 = math.exp %171 : vector<8x96xf32>
    %cst_53 = arith.constant 1.000000e+00 : f32
    %173 = vector.broadcast %cst_53 : f32 to vector<8x96xf32>
    %174 = arith.addf %173, %172 : vector<8x96xf32>
    %175 = arith.divf %173, %174 : vector<8x96xf32>
    %176 = vector.extract_strided_slice %169 {offsets = [0, 96], sizes = [8, 32], strides = [1, 1]} : vector<8x128xf32> to vector<8x32xf32>
    %177 = math.tanh %176 : vector<8x32xf32>
    %178 = vector.extract_strided_slice %175 {offsets = [0, 32], sizes = [8, 32], strides = [1, 1]} : vector<8x96xf32> to vector<8x32xf32>
    %179 = arith.mulf %178, %142 : vector<8x32xf32>
    %180 = vector.extract_strided_slice %175 {offsets = [0, 0], sizes = [8, 32], strides = [1, 1]} : vector<8x96xf32> to vector<8x32xf32>
    %181 = arith.mulf %180, %177 : vector<8x32xf32>
    %182 = arith.addf %179, %181 : vector<8x32xf32>
    %183 = vector.extract_strided_slice %175 {offsets = [0, 64], sizes = [8, 32], strides = [1, 1]} : vector<8x96xf32> to vector<8x32xf32>
    %184 = math.tanh %182 : vector<8x32xf32>
    %185 = arith.mulf %183, %184 : vector<8x32xf32>
    %c32 = arith.constant 32 : index
    %c0_54 = arith.constant 0 : index
    %186 = vector.load %arg7[%c32, %c0_54] : memref<64x32xf32, #tpu.memory_space<vmem>>, vector<8x32xf32>
    tpu.vector_store %arg7[%c32, %c0_54], %185 {strides = array<i32>} : memref<64x32xf32, #tpu.memory_space<vmem>>, vector<8x32xf32>,
    %187 = vector.extract_strided_slice %10 {offsets = [32, 0], sizes = [8, 128], strides = [1, 1]} : vector<64x128xf32> to vector<8x128xf32>
    %cst_55 = arith.constant dense<0.000000e+00> : vector<8x128xf32>
    %188 = tpu.matmul %165, %20, %cst_55 {dimension_numbers = #tpu.dot_dimension_numbers<[1], [0], [0], [1], [0, 0, 1, 1], [], []>, precision = #tpu.contract_precision<fp32>} : vector<8x32xf32>, vector<32x128xf32>, vector<8x128xf32> -> vector<8x128xf32>
    %189 = arith.addf %187, %188 : vector<8x128xf32>
    %190 = vector.extract_strided_slice %189 {offsets = [0, 0], sizes = [8, 96], strides = [1, 1]} : vector<8x128xf32> to vector<8x96xf32>
    %191 = arith.negf %190 : vector<8x96xf32>
    %192 = math.exp %191 : vector<8x96xf32>
    %cst_56 = arith.constant 1.000000e+00 : f32
    %193 = vector.broadcast %cst_56 : f32 to vector<8x96xf32>
    %194 = arith.addf %193, %192 : vector<8x96xf32>
    %195 = arith.divf %193, %194 : vector<8x96xf32>
    %196 = vector.extract_strided_slice %189 {offsets = [0, 96], sizes = [8, 32], strides = [1, 1]} : vector<8x128xf32> to vector<8x32xf32>
    %197 = math.tanh %196 : vector<8x32xf32>
    %198 = vector.extract_strided_slice %195 {offsets = [0, 32], sizes = [8, 32], strides = [1, 1]} : vector<8x96xf32> to vector<8x32xf32>
    %199 = arith.mulf %198, %162 : vector<8x32xf32>
    %200 = vector.extract_strided_slice %195 {offsets = [0, 0], sizes = [8, 32], strides = [1, 1]} : vector<8x96xf32> to vector<8x32xf32>
    %201 = arith.mulf %200, %197 : vector<8x32xf32>
    %202 = arith.addf %199, %201 : vector<8x32xf32>
    %203 = vector.extract_strided_slice %195 {offsets = [0, 64], sizes = [8, 32], strides = [1, 1]} : vector<8x96xf32> to vector<8x32xf32>
    %204 = math.tanh %202 : vector<8x32xf32>
    %205 = arith.mulf %203, %204 : vector<8x32xf32>
    %c32_57 = arith.constant 32 : index
    %c0_58 = arith.constant 0 : index
    %206 = vector.load %arg6[%c32_57, %c0_58] : memref<64x32xf32, #tpu.memory_space<vmem>>, vector<8x32xf32>
    tpu.vector_store %arg6[%c32_57, %c0_58], %205 {strides = array<i32>} : memref<64x32xf32, #tpu.memory_space<vmem>>, vector<8x32xf32>,
    %207 = vector.extract_strided_slice %18 {offsets = [24, 0], sizes = [8, 128], strides = [1, 1]} : vector<64x128xf32> to vector<8x128xf32>
    %cst_59 = arith.constant dense<0.000000e+00> : vector<8x128xf32>
    %208 = tpu.matmul %185, %22, %cst_59 {dimension_numbers = #tpu.dot_dimension_numbers<[1], [0], [0], [1], [0, 0, 1, 1], [], []>, precision = #tpu.contract_precision<fp32>} : vector<8x32xf32>, vector<32x128xf32>, vector<8x128xf32> -> vector<8x128xf32>
    %209 = arith.addf %207, %208 : vector<8x128xf32>
    %210 = vector.extract_strided_slice %209 {offsets = [0, 0], sizes = [8, 96], strides = [1, 1]} : vector<8x128xf32> to vector<8x96xf32>
    %211 = arith.negf %210 : vector<8x96xf32>
    %212 = math.exp %211 : vector<8x96xf32>
    %cst_60 = arith.constant 1.000000e+00 : f32
    %213 = vector.broadcast %cst_60 : f32 to vector<8x96xf32>
    %214 = arith.addf %213, %212 : vector<8x96xf32>
    %215 = arith.divf %213, %214 : vector<8x96xf32>
    %216 = vector.extract_strided_slice %209 {offsets = [0, 96], sizes = [8, 32], strides = [1, 1]} : vector<8x128xf32> to vector<8x32xf32>
    %217 = math.tanh %216 : vector<8x32xf32>
    %218 = vector.extract_strided_slice %215 {offsets = [0, 32], sizes = [8, 32], strides = [1, 1]} : vector<8x96xf32> to vector<8x32xf32>
    %219 = arith.mulf %218, %182 : vector<8x32xf32>
    %220 = vector.extract_strided_slice %215 {offsets = [0, 0], sizes = [8, 32], strides = [1, 1]} : vector<8x96xf32> to vector<8x32xf32>
    %221 = arith.mulf %220, %217 : vector<8x32xf32>
    %222 = arith.addf %219, %221 : vector<8x32xf32>
    %223 = vector.extract_strided_slice %215 {offsets = [0, 64], sizes = [8, 32], strides = [1, 1]} : vector<8x96xf32> to vector<8x32xf32>
    %224 = math.tanh %222 : vector<8x32xf32>
    %225 = arith.mulf %223, %224 : vector<8x32xf32>
    %c24_61 = arith.constant 24 : index
    %c0_62 = arith.constant 0 : index
    %226 = vector.load %arg7[%c24_61, %c0_62] : memref<64x32xf32, #tpu.memory_space<vmem>>, vector<8x32xf32>
    tpu.vector_store %arg7[%c24_61, %c0_62], %225 {strides = array<i32>} : memref<64x32xf32, #tpu.memory_space<vmem>>, vector<8x32xf32>,
    %227 = vector.extract_strided_slice %10 {offsets = [40, 0], sizes = [8, 128], strides = [1, 1]} : vector<64x128xf32> to vector<8x128xf32>
    %cst_63 = arith.constant dense<0.000000e+00> : vector<8x128xf32>
    %228 = tpu.matmul %205, %20, %cst_63 {dimension_numbers = #tpu.dot_dimension_numbers<[1], [0], [0], [1], [0, 0, 1, 1], [], []>, precision = #tpu.contract_precision<fp32>} : vector<8x32xf32>, vector<32x128xf32>, vector<8x128xf32> -> vector<8x128xf32>
    %229 = arith.addf %227, %228 : vector<8x128xf32>
    %230 = vector.extract_strided_slice %229 {offsets = [0, 0], sizes = [8, 96], strides = [1, 1]} : vector<8x128xf32> to vector<8x96xf32>
    %231 = arith.negf %230 : vector<8x96xf32>
    %232 = math.exp %231 : vector<8x96xf32>
    %cst_64 = arith.constant 1.000000e+00 : f32
    %233 = vector.broadcast %cst_64 : f32 to vector<8x96xf32>
    %234 = arith.addf %233, %232 : vector<8x96xf32>
    %235 = arith.divf %233, %234 : vector<8x96xf32>
    %236 = vector.extract_strided_slice %229 {offsets = [0, 96], sizes = [8, 32], strides = [1, 1]} : vector<8x128xf32> to vector<8x32xf32>
    %237 = math.tanh %236 : vector<8x32xf32>
    %238 = vector.extract_strided_slice %235 {offsets = [0, 32], sizes = [8, 32], strides = [1, 1]} : vector<8x96xf32> to vector<8x32xf32>
    %239 = arith.mulf %238, %202 : vector<8x32xf32>
    %240 = vector.extract_strided_slice %235 {offsets = [0, 0], sizes = [8, 32], strides = [1, 1]} : vector<8x96xf32> to vector<8x32xf32>
    %241 = arith.mulf %240, %237 : vector<8x32xf32>
    %242 = arith.addf %239, %241 : vector<8x32xf32>
    %243 = vector.extract_strided_slice %235 {offsets = [0, 64], sizes = [8, 32], strides = [1, 1]} : vector<8x96xf32> to vector<8x32xf32>
    %244 = math.tanh %242 : vector<8x32xf32>
    %245 = arith.mulf %243, %244 : vector<8x32xf32>
    %c40_65 = arith.constant 40 : index
    %c0_66 = arith.constant 0 : index
    %246 = vector.load %arg6[%c40_65, %c0_66] : memref<64x32xf32, #tpu.memory_space<vmem>>, vector<8x32xf32>
    tpu.vector_store %arg6[%c40_65, %c0_66], %245 {strides = array<i32>} : memref<64x32xf32, #tpu.memory_space<vmem>>, vector<8x32xf32>,
    %247 = vector.extract_strided_slice %18 {offsets = [16, 0], sizes = [8, 128], strides = [1, 1]} : vector<64x128xf32> to vector<8x128xf32>
    %cst_67 = arith.constant dense<0.000000e+00> : vector<8x128xf32>
    %248 = tpu.matmul %225, %22, %cst_67 {dimension_numbers = #tpu.dot_dimension_numbers<[1], [0], [0], [1], [0, 0, 1, 1], [], []>, precision = #tpu.contract_precision<fp32>} : vector<8x32xf32>, vector<32x128xf32>, vector<8x128xf32> -> vector<8x128xf32>
    %249 = arith.addf %247, %248 : vector<8x128xf32>
    %250 = vector.extract_strided_slice %249 {offsets = [0, 0], sizes = [8, 96], strides = [1, 1]} : vector<8x128xf32> to vector<8x96xf32>
    %251 = arith.negf %250 : vector<8x96xf32>
    %252 = math.exp %251 : vector<8x96xf32>
    %cst_68 = arith.constant 1.000000e+00 : f32
    %253 = vector.broadcast %cst_68 : f32 to vector<8x96xf32>
    %254 = arith.addf %253, %252 : vector<8x96xf32>
    %255 = arith.divf %253, %254 : vector<8x96xf32>
    %256 = vector.extract_strided_slice %249 {offsets = [0, 96], sizes = [8, 32], strides = [1, 1]} : vector<8x128xf32> to vector<8x32xf32>
    %257 = math.tanh %256 : vector<8x32xf32>
    %258 = vector.extract_strided_slice %255 {offsets = [0, 32], sizes = [8, 32], strides = [1, 1]} : vector<8x96xf32> to vector<8x32xf32>
    %259 = arith.mulf %258, %222 : vector<8x32xf32>
    %260 = vector.extract_strided_slice %255 {offsets = [0, 0], sizes = [8, 32], strides = [1, 1]} : vector<8x96xf32> to vector<8x32xf32>
    %261 = arith.mulf %260, %257 : vector<8x32xf32>
    %262 = arith.addf %259, %261 : vector<8x32xf32>
    %263 = vector.extract_strided_slice %255 {offsets = [0, 64], sizes = [8, 32], strides = [1, 1]} : vector<8x96xf32> to vector<8x32xf32>
    %264 = math.tanh %262 : vector<8x32xf32>
    %265 = arith.mulf %263, %264 : vector<8x32xf32>
    %c16_69 = arith.constant 16 : index
    %c0_70 = arith.constant 0 : index
    %266 = vector.load %arg7[%c16_69, %c0_70] : memref<64x32xf32, #tpu.memory_space<vmem>>, vector<8x32xf32>
    tpu.vector_store %arg7[%c16_69, %c0_70], %265 {strides = array<i32>} : memref<64x32xf32, #tpu.memory_space<vmem>>, vector<8x32xf32>,
    %267 = vector.extract_strided_slice %10 {offsets = [48, 0], sizes = [8, 128], strides = [1, 1]} : vector<64x128xf32> to vector<8x128xf32>
    %cst_71 = arith.constant dense<0.000000e+00> : vector<8x128xf32>
    %268 = tpu.matmul %245, %20, %cst_71 {dimension_numbers = #tpu.dot_dimension_numbers<[1], [0], [0], [1], [0, 0, 1, 1], [], []>, precision = #tpu.contract_precision<fp32>} : vector<8x32xf32>, vector<32x128xf32>, vector<8x128xf32> -> vector<8x128xf32>
    %269 = arith.addf %267, %268 : vector<8x128xf32>
    %270 = vector.extract_strided_slice %269 {offsets = [0, 0], sizes = [8, 96], strides = [1, 1]} : vector<8x128xf32> to vector<8x96xf32>
    %271 = arith.negf %270 : vector<8x96xf32>
    %272 = math.exp %271 : vector<8x96xf32>
    %cst_72 = arith.constant 1.000000e+00 : f32
    %273 = vector.broadcast %cst_72 : f32 to vector<8x96xf32>
    %274 = arith.addf %273, %272 : vector<8x96xf32>
    %275 = arith.divf %273, %274 : vector<8x96xf32>
    %276 = vector.extract_strided_slice %269 {offsets = [0, 96], sizes = [8, 32], strides = [1, 1]} : vector<8x128xf32> to vector<8x32xf32>
    %277 = math.tanh %276 : vector<8x32xf32>
    %278 = vector.extract_strided_slice %275 {offsets = [0, 32], sizes = [8, 32], strides = [1, 1]} : vector<8x96xf32> to vector<8x32xf32>
    %279 = arith.mulf %278, %242 : vector<8x32xf32>
    %280 = vector.extract_strided_slice %275 {offsets = [0, 0], sizes = [8, 32], strides = [1, 1]} : vector<8x96xf32> to vector<8x32xf32>
    %281 = arith.mulf %280, %277 : vector<8x32xf32>
    %282 = arith.addf %279, %281 : vector<8x32xf32>
    %283 = vector.extract_strided_slice %275 {offsets = [0, 64], sizes = [8, 32], strides = [1, 1]} : vector<8x96xf32> to vector<8x32xf32>
    %284 = math.tanh %282 : vector<8x32xf32>
    %285 = arith.mulf %283, %284 : vector<8x32xf32>
    %c48_73 = arith.constant 48 : index
    %c0_74 = arith.constant 0 : index
    %286 = vector.load %arg6[%c48_73, %c0_74] : memref<64x32xf32, #tpu.memory_space<vmem>>, vector<8x32xf32>
    tpu.vector_store %arg6[%c48_73, %c0_74], %285 {strides = array<i32>} : memref<64x32xf32, #tpu.memory_space<vmem>>, vector<8x32xf32>,
    %287 = vector.extract_strided_slice %18 {offsets = [8, 0], sizes = [8, 128], strides = [1, 1]} : vector<64x128xf32> to vector<8x128xf32>
    %cst_75 = arith.constant dense<0.000000e+00> : vector<8x128xf32>
    %288 = tpu.matmul %265, %22, %cst_75 {dimension_numbers = #tpu.dot_dimension_numbers<[1], [0], [0], [1], [0, 0, 1, 1], [], []>, precision = #tpu.contract_precision<fp32>} : vector<8x32xf32>, vector<32x128xf32>, vector<8x128xf32> -> vector<8x128xf32>
    %289 = arith.addf %287, %288 : vector<8x128xf32>
    %290 = vector.extract_strided_slice %289 {offsets = [0, 0], sizes = [8, 96], strides = [1, 1]} : vector<8x128xf32> to vector<8x96xf32>
    %291 = arith.negf %290 : vector<8x96xf32>
    %292 = math.exp %291 : vector<8x96xf32>
    %cst_76 = arith.constant 1.000000e+00 : f32
    %293 = vector.broadcast %cst_76 : f32 to vector<8x96xf32>
    %294 = arith.addf %293, %292 : vector<8x96xf32>
    %295 = arith.divf %293, %294 : vector<8x96xf32>
    %296 = vector.extract_strided_slice %289 {offsets = [0, 96], sizes = [8, 32], strides = [1, 1]} : vector<8x128xf32> to vector<8x32xf32>
    %297 = math.tanh %296 : vector<8x32xf32>
    %298 = vector.extract_strided_slice %295 {offsets = [0, 32], sizes = [8, 32], strides = [1, 1]} : vector<8x96xf32> to vector<8x32xf32>
    %299 = arith.mulf %298, %262 : vector<8x32xf32>
    %300 = vector.extract_strided_slice %295 {offsets = [0, 0], sizes = [8, 32], strides = [1, 1]} : vector<8x96xf32> to vector<8x32xf32>
    %301 = arith.mulf %300, %297 : vector<8x32xf32>
    %302 = arith.addf %299, %301 : vector<8x32xf32>
    %303 = vector.extract_strided_slice %295 {offsets = [0, 64], sizes = [8, 32], strides = [1, 1]} : vector<8x96xf32> to vector<8x32xf32>
    %304 = math.tanh %302 : vector<8x32xf32>
    %305 = arith.mulf %303, %304 : vector<8x32xf32>
    %c8_77 = arith.constant 8 : index
    %c0_78 = arith.constant 0 : index
    %306 = vector.load %arg7[%c8_77, %c0_78] : memref<64x32xf32, #tpu.memory_space<vmem>>, vector<8x32xf32>
    tpu.vector_store %arg7[%c8_77, %c0_78], %305 {strides = array<i32>} : memref<64x32xf32, #tpu.memory_space<vmem>>, vector<8x32xf32>,
    %307 = vector.extract_strided_slice %10 {offsets = [56, 0], sizes = [8, 128], strides = [1, 1]} : vector<64x128xf32> to vector<8x128xf32>
    %cst_79 = arith.constant dense<0.000000e+00> : vector<8x128xf32>
    %308 = tpu.matmul %285, %20, %cst_79 {dimension_numbers = #tpu.dot_dimension_numbers<[1], [0], [0], [1], [0, 0, 1, 1], [], []>, precision = #tpu.contract_precision<fp32>} : vector<8x32xf32>, vector<32x128xf32>, vector<8x128xf32> -> vector<8x128xf32>
    %309 = arith.addf %307, %308 : vector<8x128xf32>
    %310 = vector.extract_strided_slice %309 {offsets = [0, 0], sizes = [8, 96], strides = [1, 1]} : vector<8x128xf32> to vector<8x96xf32>
    %311 = arith.negf %310 : vector<8x96xf32>
    %312 = math.exp %311 : vector<8x96xf32>
    %cst_80 = arith.constant 1.000000e+00 : f32
    %313 = vector.broadcast %cst_80 : f32 to vector<8x96xf32>
    %314 = arith.addf %313, %312 : vector<8x96xf32>
    %315 = arith.divf %313, %314 : vector<8x96xf32>
    %316 = vector.extract_strided_slice %309 {offsets = [0, 96], sizes = [8, 32], strides = [1, 1]} : vector<8x128xf32> to vector<8x32xf32>
    %317 = math.tanh %316 : vector<8x32xf32>
    %318 = vector.extract_strided_slice %315 {offsets = [0, 32], sizes = [8, 32], strides = [1, 1]} : vector<8x96xf32> to vector<8x32xf32>
    %319 = arith.mulf %318, %282 : vector<8x32xf32>
    %320 = vector.extract_strided_slice %315 {offsets = [0, 0], sizes = [8, 32], strides = [1, 1]} : vector<8x96xf32> to vector<8x32xf32>
    %321 = arith.mulf %320, %317 : vector<8x32xf32>
    %322 = arith.addf %319, %321 : vector<8x32xf32>
    %323 = vector.extract_strided_slice %315 {offsets = [0, 64], sizes = [8, 32], strides = [1, 1]} : vector<8x96xf32> to vector<8x32xf32>
    %324 = math.tanh %322 : vector<8x32xf32>
    %325 = arith.mulf %323, %324 : vector<8x32xf32>
    %c56_81 = arith.constant 56 : index
    %c0_82 = arith.constant 0 : index
    %326 = vector.load %arg6[%c56_81, %c0_82] : memref<64x32xf32, #tpu.memory_space<vmem>>, vector<8x32xf32>
    tpu.vector_store %arg6[%c56_81, %c0_82], %325 {strides = array<i32>} : memref<64x32xf32, #tpu.memory_space<vmem>>, vector<8x32xf32>,
    %327 = vector.extract_strided_slice %18 {offsets = [0, 0], sizes = [8, 128], strides = [1, 1]} : vector<64x128xf32> to vector<8x128xf32>
    %cst_83 = arith.constant dense<0.000000e+00> : vector<8x128xf32>
    %328 = tpu.matmul %305, %22, %cst_83 {dimension_numbers = #tpu.dot_dimension_numbers<[1], [0], [0], [1], [0, 0, 1, 1], [], []>, precision = #tpu.contract_precision<fp32>} : vector<8x32xf32>, vector<32x128xf32>, vector<8x128xf32> -> vector<8x128xf32>
    %329 = arith.addf %327, %328 : vector<8x128xf32>
    %330 = vector.extract_strided_slice %329 {offsets = [0, 0], sizes = [8, 96], strides = [1, 1]} : vector<8x128xf32> to vector<8x96xf32>
    %331 = arith.negf %330 : vector<8x96xf32>
    %332 = math.exp %331 : vector<8x96xf32>
    %cst_84 = arith.constant 1.000000e+00 : f32
    %333 = vector.broadcast %cst_84 : f32 to vector<8x96xf32>
    %334 = arith.addf %333, %332 : vector<8x96xf32>
    %335 = arith.divf %333, %334 : vector<8x96xf32>
    %336 = vector.extract_strided_slice %329 {offsets = [0, 96], sizes = [8, 32], strides = [1, 1]} : vector<8x128xf32> to vector<8x32xf32>
    %337 = math.tanh %336 : vector<8x32xf32>
    %338 = vector.extract_strided_slice %335 {offsets = [0, 32], sizes = [8, 32], strides = [1, 1]} : vector<8x96xf32> to vector<8x32xf32>
    %339 = arith.mulf %338, %302 : vector<8x32xf32>
    %340 = vector.extract_strided_slice %335 {offsets = [0, 0], sizes = [8, 32], strides = [1, 1]} : vector<8x96xf32> to vector<8x32xf32>
    %341 = arith.mulf %340, %337 : vector<8x32xf32>
    %342 = arith.addf %339, %341 : vector<8x32xf32>
    %343 = vector.extract_strided_slice %335 {offsets = [0, 64], sizes = [8, 32], strides = [1, 1]} : vector<8x96xf32> to vector<8x32xf32>
    %344 = math.tanh %342 : vector<8x32xf32>
    %345 = arith.mulf %343, %344 : vector<8x32xf32>
    %c0_85 = arith.constant 0 : index
    %c0_86 = arith.constant 0 : index
    %346 = vector.load %arg7[%c0_85, %c0_86] : memref<64x32xf32, #tpu.memory_space<vmem>>, vector<8x32xf32>
    tpu.vector_store %arg7[%c0_85, %c0_86], %345 {strides = array<i32>} : memref<64x32xf32, #tpu.memory_space<vmem>>, vector<8x32xf32>,
    %c0_87 = arith.constant 0 : index
    %c0_88 = arith.constant 0 : index
    %347 = vector.load %arg8[%c0_87, %c0_88] : memref<8x32xf32, #tpu.memory_space<vmem>>, vector<8x32xf32>
    tpu.vector_store %arg8[%c0_87, %c0_88], %325 {strides = array<i32>} : memref<8x32xf32, #tpu.memory_space<vmem>>, vector<8x32xf32>,
    %c0_89 = arith.constant 0 : index
    %c0_90 = arith.constant 0 : index
    %348 = vector.load %arg9[%c0_89, %c0_90] : memref<8x32xf32, #tpu.memory_space<vmem>>, vector<8x32xf32>
    tpu.vector_store %arg9[%c0_89, %c0_90], %322 {strides = array<i32>} : memref<8x32xf32, #tpu.memory_space<vmem>>, vector<8x32xf32>,
    %c0_91 = arith.constant 0 : index
    %c0_92 = arith.constant 0 : index
    %349 = vector.load %arg10[%c0_91, %c0_92] : memref<8x32xf32, #tpu.memory_space<vmem>>, vector<8x32xf32>
    tpu.vector_store %arg10[%c0_91, %c0_92], %345 {strides = array<i32>} : memref<8x32xf32, #tpu.memory_space<vmem>>, vector<8x32xf32>,
    %c0_93 = arith.constant 0 : index
    %c0_94 = arith.constant 0 : index
    %350 = vector.load %arg11[%c0_93, %c0_94] : memref<8x32xf32, #tpu.memory_space<vmem>>, vector<8x32xf32>
    tpu.vector_store %arg11[%c0_93, %c0_94], %342 {strides = array<i32>} : memref<8x32xf32, #tpu.memory_space<vmem>>, vector<8x32xf32>,
    return
  }
  func.func @transform_0(%arg0: i32) -> (i32, i32) {
    %c0_i32 = arith.constant 0 : i32
    %c0_i32_0 = arith.constant 0 : i32
    return %arg0, %c0_i32 : i32, i32
  }
  func.func @transform_1(%arg0: i32) -> (i32, i32) {
    %c0_i32 = arith.constant 0 : i32
    %0 = arith.subi %c0_i32, %arg0 : i32
    %c0_i32_0 = arith.constant 0 : i32
    %c0_i32_1 = arith.constant 0 : i32
    return %0, %c0_i32_0 : i32, i32
  }
  func.func @transform_2(%arg0: i32) -> (i32, i32, i32) {
    %c0_i32 = arith.constant 0 : i32
    %c0_i32_0 = arith.constant 0 : i32
    %c0_i32_1 = arith.constant 0 : i32
    %c0_i32_2 = arith.constant 0 : i32
    return %c0_i32, %c0_i32_0, %c0_i32_1 : i32, i32, i32
  }
  func.func @transform_3(%arg0: i32) -> (i32, i32, i32) {
    %c0_i32 = arith.constant 0 : i32
    %c0_i32_0 = arith.constant 0 : i32
    %c0_i32_1 = arith.constant 0 : i32
    %c0_i32_2 = arith.constant 0 : i32
    return %c0_i32, %c0_i32_0, %c0_i32_1 : i32, i32, i32
  }
  func.func @transform_4(%arg0: i32) -> (i32, i32, i32) {
    %c0_i32 = arith.constant 0 : i32
    %c0_i32_0 = arith.constant 0 : i32
    %c0_i32_1 = arith.constant 0 : i32
    %c0_i32_2 = arith.constant 0 : i32
    return %c0_i32, %c0_i32_0, %c0_i32_1 : i32, i32, i32
  }
  func.func @transform_5(%arg0: i32) -> (i32, i32) {
    %c0_i32 = arith.constant 0 : i32
    %c0_i32_0 = arith.constant 0 : i32
    return %arg0, %c0_i32 : i32, i32
  }
  func.func @transform_6(%arg0: i32) -> (i32, i32) {
    %c0_i32 = arith.constant 0 : i32
    %0 = arith.subi %c0_i32, %arg0 : i32
    %c0_i32_0 = arith.constant 0 : i32
    %c0_i32_1 = arith.constant 0 : i32
    return %0, %c0_i32_0 : i32, i32
  }
}

module attributes {stable_mosaic.version = 11 : i64} {
  func.func @kernel(%arg0: i32, %arg1: memref<64x32xf32, #tpu.memory_space<vmem>>, %arg2: memref<64x32xf32, #tpu.memory_space<vmem>>, %arg3: memref<64x32xf32, #tpu.memory_space<vmem>>, %arg4: memref<64x32xf32, #tpu.memory_space<vmem>>, %arg5: memref<2x64x128xf32, #tpu.memory_space<vmem>>, %arg6: memref<2x32x128xf32, #tpu.memory_space<vmem>>, %arg7: memref<2x1x128xf32, #tpu.memory_space<vmem>>, %arg8: memref<64x32xf32, #tpu.memory_space<vmem>>, %arg9: memref<64x32xf32, #tpu.memory_space<vmem>>, %arg10: memref<8x32xf32, #tpu.memory_space<vmem>>, %arg11: memref<8x32xf32, #tpu.memory_space<vmem>>, %arg12: memref<8x32xf32, #tpu.memory_space<vmem>>, %arg13: memref<8x32xf32, #tpu.memory_space<vmem>>) attributes {dimension_semantics = [#tpu.dimension_semantics<arbitrary>], iteration_bounds = array<i64: 1>, scalar_prefetch = 0 : i64, scratch_operands = 4 : i64, tpu.core_type = #tpu.core_type<tc>, window_params = [{transform_indices = @transform_0, window_bounds = array<i64: 64, 32>}, {transform_indices = @transform_1, window_bounds = array<i64: 64, 32>}, {transform_indices = @transform_2, window_bounds = array<i64: 64, 32>}, {transform_indices = @transform_3, window_bounds = array<i64: 64, 32>}, {pipeline_mode = #tpu.pipeline_mode<synchronous>, transform_indices = @transform_4, window_bounds = array<i64: 2, 64, 128>}, {pipeline_mode = #tpu.pipeline_mode<synchronous>, transform_indices = @transform_5, window_bounds = array<i64: 2, 32, 128>}, {pipeline_mode = #tpu.pipeline_mode<synchronous>, transform_indices = @transform_6, window_bounds = array<i64: 2, 1, 128>}, {transform_indices = @transform_7, window_bounds = array<i64: 64, 32>}, {transform_indices = @transform_8, window_bounds = array<i64: 64, 32>}]} {
    %c0_i32 = arith.constant 0 : i32
    %0 = arith.cmpi eq, %arg0, %c0_i32 : i32
    %1 = arith.extui %0 : i1 to i32
    %c0_i32_0 = arith.constant 0 : i32
    %2 = arith.cmpi ne, %1, %c0_i32_0 : i32
    scf.if %2 {
      %cst_107 = arith.constant 0.000000e+00 : f32
      %361 = vector.broadcast %cst_107 : f32 to vector<8x32xf32>
      %c0_108 = arith.constant 0 : index
      %c0_109 = arith.constant 0 : index
      %362 = vector.load %arg10[%c0_108, %c0_109] : memref<8x32xf32, #tpu.memory_space<vmem>>, vector<8x32xf32>
      tpu.vector_store %arg10[%c0_108, %c0_109], %361 {strides = array<i32>} : memref<8x32xf32, #tpu.memory_space<vmem>>, vector<8x32xf32>,
      %cst_110 = arith.constant 0.000000e+00 : f32
      %363 = vector.broadcast %cst_110 : f32 to vector<8x32xf32>
      %c0_111 = arith.constant 0 : index
      %c0_112 = arith.constant 0 : index
      %364 = vector.load %arg11[%c0_111, %c0_112] : memref<8x32xf32, #tpu.memory_space<vmem>>, vector<8x32xf32>
      tpu.vector_store %arg11[%c0_111, %c0_112], %363 {strides = array<i32>} : memref<8x32xf32, #tpu.memory_space<vmem>>, vector<8x32xf32>,
      %cst_113 = arith.constant 0.000000e+00 : f32
      %365 = vector.broadcast %cst_113 : f32 to vector<8x32xf32>
      %c0_114 = arith.constant 0 : index
      %c0_115 = arith.constant 0 : index
      %366 = vector.load %arg12[%c0_114, %c0_115] : memref<8x32xf32, #tpu.memory_space<vmem>>, vector<8x32xf32>
      tpu.vector_store %arg12[%c0_114, %c0_115], %365 {strides = array<i32>} : memref<8x32xf32, #tpu.memory_space<vmem>>, vector<8x32xf32>,
      %cst_116 = arith.constant 0.000000e+00 : f32
      %367 = vector.broadcast %cst_116 : f32 to vector<8x32xf32>
      %c0_117 = arith.constant 0 : index
      %c0_118 = arith.constant 0 : index
      %368 = vector.load %arg13[%c0_117, %c0_118] : memref<8x32xf32, #tpu.memory_space<vmem>>, vector<8x32xf32>
      tpu.vector_store %arg13[%c0_117, %c0_118], %367 {strides = array<i32>} : memref<8x32xf32, #tpu.memory_space<vmem>>, vector<8x32xf32>,
    } else {
    }
    %c0 = arith.constant 0 : index
    %c0_1 = arith.constant 0 : index
    %3 = vector.load %arg1[%c0, %c0_1] : memref<64x32xf32, #tpu.memory_space<vmem>>, vector<64x32xf32>
    %c0_2 = arith.constant 0 : index
    %c0_3 = arith.constant 0 : index
    %c0_4 = arith.constant 0 : index
    %4 = vector.load %arg5[%c0_2, %c0_3, %c0_4] : memref<2x64x128xf32, #tpu.memory_space<vmem>>, vector<1x32x128xf32>
    %5 = vector.shape_cast %4 : vector<1x32x128xf32> to vector<32x128xf32>
    %cst = arith.constant dense<0.000000e+00> : vector<64x128xf32>
    %6 = tpu.matmul %3, %5, %cst {dimension_numbers = #tpu.dot_dimension_numbers<[1], [0], [0], [1], [0, 0, 1, 1], [], []>, precision = #tpu.contract_precision<fp32>} : vector<64x32xf32>, vector<32x128xf32>, vector<64x128xf32> -> vector<64x128xf32>
    %c0_5 = arith.constant 0 : index
    %c0_6 = arith.constant 0 : index
    %7 = vector.load %arg3[%c0_5, %c0_6] : memref<64x32xf32, #tpu.memory_space<vmem>>, vector<64x32xf32>
    %c0_7 = arith.constant 0 : index
    %c32 = arith.constant 32 : index
    %c0_8 = arith.constant 0 : index
    %8 = vector.load %arg5[%c0_7, %c32, %c0_8] : memref<2x64x128xf32, #tpu.memory_space<vmem>>, vector<1x32x128xf32>
    %9 = vector.shape_cast %8 : vector<1x32x128xf32> to vector<32x128xf32>
    %cst_9 = arith.constant dense<0.000000e+00> : vector<64x128xf32>
    %10 = tpu.matmul %7, %9, %cst_9 {dimension_numbers = #tpu.dot_dimension_numbers<[1], [0], [0], [1], [0, 0, 1, 1], [], []>, precision = #tpu.contract_precision<fp32>} : vector<64x32xf32>, vector<32x128xf32>, vector<64x128xf32> -> vector<64x128xf32>
    %11 = arith.addf %6, %10 : vector<64x128xf32>
    %c0_10 = arith.constant 0 : index
    %c0_11 = arith.constant 0 : index
    %c0_12 = arith.constant 0 : index
    %12 = vector.load %arg7[%c0_10, %c0_11, %c0_12] : memref<2x1x128xf32, #tpu.memory_space<vmem>>, vector<1x1x128xf32>
    %13 = vector.shape_cast %12 : vector<1x1x128xf32> to vector<1x128xf32>
    %14 = vector.broadcast %13 : vector<1x128xf32> to vector<64x128xf32>
    %15 = arith.addf %11, %14 : vector<64x128xf32>
    %c0_13 = arith.constant 0 : index
    %c0_14 = arith.constant 0 : index
    %16 = vector.load %arg2[%c0_13, %c0_14] : memref<64x32xf32, #tpu.memory_space<vmem>>, vector<64x32xf32>
    %c1 = arith.constant 1 : index
    %c0_15 = arith.constant 0 : index
    %c0_16 = arith.constant 0 : index
    %17 = vector.load %arg5[%c1, %c0_15, %c0_16] : memref<2x64x128xf32, #tpu.memory_space<vmem>>, vector<1x32x128xf32>
    %18 = vector.shape_cast %17 : vector<1x32x128xf32> to vector<32x128xf32>
    %cst_17 = arith.constant dense<0.000000e+00> : vector<64x128xf32>
    %19 = tpu.matmul %16, %18, %cst_17 {dimension_numbers = #tpu.dot_dimension_numbers<[1], [0], [0], [1], [0, 0, 1, 1], [], []>, precision = #tpu.contract_precision<fp32>} : vector<64x32xf32>, vector<32x128xf32>, vector<64x128xf32> -> vector<64x128xf32>
    %c0_18 = arith.constant 0 : index
    %c0_19 = arith.constant 0 : index
    %20 = vector.load %arg4[%c0_18, %c0_19] : memref<64x32xf32, #tpu.memory_space<vmem>>, vector<64x32xf32>
    %c1_20 = arith.constant 1 : index
    %c32_21 = arith.constant 32 : index
    %c0_22 = arith.constant 0 : index
    %21 = vector.load %arg5[%c1_20, %c32_21, %c0_22] : memref<2x64x128xf32, #tpu.memory_space<vmem>>, vector<1x32x128xf32>
    %22 = vector.shape_cast %21 : vector<1x32x128xf32> to vector<32x128xf32>
    %cst_23 = arith.constant dense<0.000000e+00> : vector<64x128xf32>
    %23 = tpu.matmul %20, %22, %cst_23 {dimension_numbers = #tpu.dot_dimension_numbers<[1], [0], [0], [1], [0, 0, 1, 1], [], []>, precision = #tpu.contract_precision<fp32>} : vector<64x32xf32>, vector<32x128xf32>, vector<64x128xf32> -> vector<64x128xf32>
    %24 = arith.addf %19, %23 : vector<64x128xf32>
    %c1_24 = arith.constant 1 : index
    %c0_25 = arith.constant 0 : index
    %c0_26 = arith.constant 0 : index
    %25 = vector.load %arg7[%c1_24, %c0_25, %c0_26] : memref<2x1x128xf32, #tpu.memory_space<vmem>>, vector<1x1x128xf32>
    %26 = vector.shape_cast %25 : vector<1x1x128xf32> to vector<1x128xf32>
    %27 = vector.broadcast %26 : vector<1x128xf32> to vector<64x128xf32>
    %28 = arith.addf %24, %27 : vector<64x128xf32>
    %c0_27 = arith.constant 0 : index
    %c0_28 = arith.constant 0 : index
    %c0_29 = arith.constant 0 : index
    %29 = vector.load %arg6[%c0_27, %c0_28, %c0_29] : memref<2x32x128xf32, #tpu.memory_space<vmem>>, vector<1x32x128xf32>
    %30 = vector.shape_cast %29 : vector<1x32x128xf32> to vector<32x128xf32>
    %c1_30 = arith.constant 1 : index
    %c0_31 = arith.constant 0 : index
    %c0_32 = arith.constant 0 : index
    %31 = vector.load %arg6[%c1_30, %c0_31, %c0_32] : memref<2x32x128xf32, #tpu.memory_space<vmem>>, vector<1x32x128xf32>
    %32 = vector.shape_cast %31 : vector<1x32x128xf32> to vector<32x128xf32>
    %c0_33 = arith.constant 0 : index
    %c0_34 = arith.constant 0 : index
    %33 = vector.load %arg10[%c0_33, %c0_34] : memref<8x32xf32, #tpu.memory_space<vmem>>, vector<8x32xf32>
    %c0_35 = arith.constant 0 : index
    %c0_36 = arith.constant 0 : index
    %34 = vector.load %arg11[%c0_35, %c0_36] : memref<8x32xf32, #tpu.memory_space<vmem>>, vector<8x32xf32>
    %c0_37 = arith.constant 0 : index
    %c0_38 = arith.constant 0 : index
    %35 = vector.load %arg12[%c0_37, %c0_38] : memref<8x32xf32, #tpu.memory_space<vmem>>, vector<8x32xf32>
    %c0_39 = arith.constant 0 : index
    %c0_40 = arith.constant 0 : index
    %36 = vector.load %arg13[%c0_39, %c0_40] : memref<8x32xf32, #tpu.memory_space<vmem>>, vector<8x32xf32>
    %37 = vector.extract_strided_slice %15 {offsets = [0, 0], sizes = [8, 128], strides = [1, 1]} : vector<64x128xf32> to vector<8x128xf32>
    %cst_41 = arith.constant dense<0.000000e+00> : vector<8x128xf32>
    %38 = tpu.matmul %33, %30, %cst_41 {dimension_numbers = #tpu.dot_dimension_numbers<[1], [0], [0], [1], [0, 0, 1, 1], [], []>, precision = #tpu.contract_precision<fp32>} : vector<8x32xf32>, vector<32x128xf32>, vector<8x128xf32> -> vector<8x128xf32>
    %39 = arith.addf %37, %38 : vector<8x128xf32>
    %40 = vector.extract_strided_slice %39 {offsets = [0, 0], sizes = [8, 96], strides = [1, 1]} : vector<8x128xf32> to vector<8x96xf32>
    %41 = arith.negf %40 : vector<8x96xf32>
    %42 = math.exp %41 : vector<8x96xf32>
    %cst_42 = arith.constant 1.000000e+00 : f32
    %43 = vector.broadcast %cst_42 : f32 to vector<8x96xf32>
    %44 = arith.addf %43, %42 : vector<8x96xf32>
    %45 = arith.divf %43, %44 : vector<8x96xf32>
    %46 = vector.extract_strided_slice %39 {offsets = [0, 96], sizes = [8, 32], strides = [1, 1]} : vector<8x128xf32> to vector<8x32xf32>
    %47 = math.tanh %46 : vector<8x32xf32>
    %48 = vector.extract_strided_slice %45 {offsets = [0, 32], sizes = [8, 32], strides = [1, 1]} : vector<8x96xf32> to vector<8x32xf32>
    %49 = arith.mulf %48, %34 : vector<8x32xf32>
    %50 = vector.extract_strided_slice %45 {offsets = [0, 0], sizes = [8, 32], strides = [1, 1]} : vector<8x96xf32> to vector<8x32xf32>
    %51 = arith.mulf %50, %47 : vector<8x32xf32>
    %52 = arith.addf %49, %51 : vector<8x32xf32>
    %53 = vector.extract_strided_slice %45 {offsets = [0, 64], sizes = [8, 32], strides = [1, 1]} : vector<8x96xf32> to vector<8x32xf32>
    %54 = math.tanh %52 : vector<8x32xf32>
    %55 = arith.mulf %53, %54 : vector<8x32xf32>
    %c0_43 = arith.constant 0 : index
    %c0_44 = arith.constant 0 : index
    %56 = vector.load %arg8[%c0_43, %c0_44] : memref<64x32xf32, #tpu.memory_space<vmem>>, vector<8x32xf32>
    tpu.vector_store %arg8[%c0_43, %c0_44], %55 {strides = array<i32>} : memref<64x32xf32, #tpu.memory_space<vmem>>, vector<8x32xf32>,
    %57 = vector.extract_strided_slice %28 {offsets = [56, 0], sizes = [8, 128], strides = [1, 1]} : vector<64x128xf32> to vector<8x128xf32>
    %cst_45 = arith.constant dense<0.000000e+00> : vector<8x128xf32>
    %58 = tpu.matmul %35, %32, %cst_45 {dimension_numbers = #tpu.dot_dimension_numbers<[1], [0], [0], [1], [0, 0, 1, 1], [], []>, precision = #tpu.contract_precision<fp32>} : vector<8x32xf32>, vector<32x128xf32>, vector<8x128xf32> -> vector<8x128xf32>
    %59 = arith.addf %57, %58 : vector<8x128xf32>
    %60 = vector.extract_strided_slice %59 {offsets = [0, 0], sizes = [8, 96], strides = [1, 1]} : vector<8x128xf32> to vector<8x96xf32>
    %61 = arith.negf %60 : vector<8x96xf32>
    %62 = math.exp %61 : vector<8x96xf32>
    %cst_46 = arith.constant 1.000000e+00 : f32
    %63 = vector.broadcast %cst_46 : f32 to vector<8x96xf32>
    %64 = arith.addf %63, %62 : vector<8x96xf32>
    %65 = arith.divf %63, %64 : vector<8x96xf32>
    %66 = vector.extract_strided_slice %59 {offsets = [0, 96], sizes = [8, 32], strides = [1, 1]} : vector<8x128xf32> to vector<8x32xf32>
    %67 = math.tanh %66 : vector<8x32xf32>
    %68 = vector.extract_strided_slice %65 {offsets = [0, 32], sizes = [8, 32], strides = [1, 1]} : vector<8x96xf32> to vector<8x32xf32>
    %69 = arith.mulf %68, %36 : vector<8x32xf32>
    %70 = vector.extract_strided_slice %65 {offsets = [0, 0], sizes = [8, 32], strides = [1, 1]} : vector<8x96xf32> to vector<8x32xf32>
    %71 = arith.mulf %70, %67 : vector<8x32xf32>
    %72 = arith.addf %69, %71 : vector<8x32xf32>
    %73 = vector.extract_strided_slice %65 {offsets = [0, 64], sizes = [8, 32], strides = [1, 1]} : vector<8x96xf32> to vector<8x32xf32>
    %74 = math.tanh %72 : vector<8x32xf32>
    %75 = arith.mulf %73, %74 : vector<8x32xf32>
    %c56 = arith.constant 56 : index
    %c0_47 = arith.constant 0 : index
    %76 = vector.load %arg9[%c56, %c0_47] : memref<64x32xf32, #tpu.memory_space<vmem>>, vector<8x32xf32>
    tpu.vector_store %arg9[%c56, %c0_47], %75 {strides = array<i32>} : memref<64x32xf32, #tpu.memory_space<vmem>>, vector<8x32xf32>,
    %77 = vector.extract_strided_slice %15 {offsets = [8, 0], sizes = [8, 128], strides = [1, 1]} : vector<64x128xf32> to vector<8x128xf32>
    %cst_48 = arith.constant dense<0.000000e+00> : vector<8x128xf32>
    %78 = tpu.matmul %55, %30, %cst_48 {dimension_numbers = #tpu.dot_dimension_numbers<[1], [0], [0], [1], [0, 0, 1, 1], [], []>, precision = #tpu.contract_precision<fp32>} : vector<8x32xf32>, vector<32x128xf32>, vector<8x128xf32> -> vector<8x128xf32>
    %79 = arith.addf %77, %78 : vector<8x128xf32>
    %80 = vector.extract_strided_slice %79 {offsets = [0, 0], sizes = [8, 96], strides = [1, 1]} : vector<8x128xf32> to vector<8x96xf32>
    %81 = arith.negf %80 : vector<8x96xf32>
    %82 = math.exp %81 : vector<8x96xf32>
    %cst_49 = arith.constant 1.000000e+00 : f32
    %83 = vector.broadcast %cst_49 : f32 to vector<8x96xf32>
    %84 = arith.addf %83, %82 : vector<8x96xf32>
    %85 = arith.divf %83, %84 : vector<8x96xf32>
    %86 = vector.extract_strided_slice %79 {offsets = [0, 96], sizes = [8, 32], strides = [1, 1]} : vector<8x128xf32> to vector<8x32xf32>
    %87 = math.tanh %86 : vector<8x32xf32>
    %88 = vector.extract_strided_slice %85 {offsets = [0, 32], sizes = [8, 32], strides = [1, 1]} : vector<8x96xf32> to vector<8x32xf32>
    %89 = arith.mulf %88, %52 : vector<8x32xf32>
    %90 = vector.extract_strided_slice %85 {offsets = [0, 0], sizes = [8, 32], strides = [1, 1]} : vector<8x96xf32> to vector<8x32xf32>
    %91 = arith.mulf %90, %87 : vector<8x32xf32>
    %92 = arith.addf %89, %91 : vector<8x32xf32>
    %93 = vector.extract_strided_slice %85 {offsets = [0, 64], sizes = [8, 32], strides = [1, 1]} : vector<8x96xf32> to vector<8x32xf32>
    %94 = math.tanh %92 : vector<8x32xf32>
    %95 = arith.mulf %93, %94 : vector<8x32xf32>
    %c8 = arith.constant 8 : index
    %c0_50 = arith.constant 0 : index
    %96 = vector.load %arg8[%c8, %c0_50] : memref<64x32xf32, #tpu.memory_space<vmem>>, vector<8x32xf32>
    tpu.vector_store %arg8[%c8, %c0_50], %95 {strides = array<i32>} : memref<64x32xf32, #tpu.memory_space<vmem>>, vector<8x32xf32>,
    %97 = vector.extract_strided_slice %28 {offsets = [48, 0], sizes = [8, 128], strides = [1, 1]} : vector<64x128xf32> to vector<8x128xf32>
    %cst_51 = arith.constant dense<0.000000e+00> : vector<8x128xf32>
    %98 = tpu.matmul %75, %32, %cst_51 {dimension_numbers = #tpu.dot_dimension_numbers<[1], [0], [0], [1], [0, 0, 1, 1], [], []>, precision = #tpu.contract_precision<fp32>} : vector<8x32xf32>, vector<32x128xf32>, vector<8x128xf32> -> vector<8x128xf32>
    %99 = arith.addf %97, %98 : vector<8x128xf32>
    %100 = vector.extract_strided_slice %99 {offsets = [0, 0], sizes = [8, 96], strides = [1, 1]} : vector<8x128xf32> to vector<8x96xf32>
    %101 = arith.negf %100 : vector<8x96xf32>
    %102 = math.exp %101 : vector<8x96xf32>
    %cst_52 = arith.constant 1.000000e+00 : f32
    %103 = vector.broadcast %cst_52 : f32 to vector<8x96xf32>
    %104 = arith.addf %103, %102 : vector<8x96xf32>
    %105 = arith.divf %103, %104 : vector<8x96xf32>
    %106 = vector.extract_strided_slice %99 {offsets = [0, 96], sizes = [8, 32], strides = [1, 1]} : vector<8x128xf32> to vector<8x32xf32>
    %107 = math.tanh %106 : vector<8x32xf32>
    %108 = vector.extract_strided_slice %105 {offsets = [0, 32], sizes = [8, 32], strides = [1, 1]} : vector<8x96xf32> to vector<8x32xf32>
    %109 = arith.mulf %108, %72 : vector<8x32xf32>
    %110 = vector.extract_strided_slice %105 {offsets = [0, 0], sizes = [8, 32], strides = [1, 1]} : vector<8x96xf32> to vector<8x32xf32>
    %111 = arith.mulf %110, %107 : vector<8x32xf32>
    %112 = arith.addf %109, %111 : vector<8x32xf32>
    %113 = vector.extract_strided_slice %105 {offsets = [0, 64], sizes = [8, 32], strides = [1, 1]} : vector<8x96xf32> to vector<8x32xf32>
    %114 = math.tanh %112 : vector<8x32xf32>
    %115 = arith.mulf %113, %114 : vector<8x32xf32>
    %c48 = arith.constant 48 : index
    %c0_53 = arith.constant 0 : index
    %116 = vector.load %arg9[%c48, %c0_53] : memref<64x32xf32, #tpu.memory_space<vmem>>, vector<8x32xf32>
    tpu.vector_store %arg9[%c48, %c0_53], %115 {strides = array<i32>} : memref<64x32xf32, #tpu.memory_space<vmem>>, vector<8x32xf32>,
    %117 = vector.extract_strided_slice %15 {offsets = [16, 0], sizes = [8, 128], strides = [1, 1]} : vector<64x128xf32> to vector<8x128xf32>
    %cst_54 = arith.constant dense<0.000000e+00> : vector<8x128xf32>
    %118 = tpu.matmul %95, %30, %cst_54 {dimension_numbers = #tpu.dot_dimension_numbers<[1], [0], [0], [1], [0, 0, 1, 1], [], []>, precision = #tpu.contract_precision<fp32>} : vector<8x32xf32>, vector<32x128xf32>, vector<8x128xf32> -> vector<8x128xf32>
    %119 = arith.addf %117, %118 : vector<8x128xf32>
    %120 = vector.extract_strided_slice %119 {offsets = [0, 0], sizes = [8, 96], strides = [1, 1]} : vector<8x128xf32> to vector<8x96xf32>
    %121 = arith.negf %120 : vector<8x96xf32>
    %122 = math.exp %121 : vector<8x96xf32>
    %cst_55 = arith.constant 1.000000e+00 : f32
    %123 = vector.broadcast %cst_55 : f32 to vector<8x96xf32>
    %124 = arith.addf %123, %122 : vector<8x96xf32>
    %125 = arith.divf %123, %124 : vector<8x96xf32>
    %126 = vector.extract_strided_slice %119 {offsets = [0, 96], sizes = [8, 32], strides = [1, 1]} : vector<8x128xf32> to vector<8x32xf32>
    %127 = math.tanh %126 : vector<8x32xf32>
    %128 = vector.extract_strided_slice %125 {offsets = [0, 32], sizes = [8, 32], strides = [1, 1]} : vector<8x96xf32> to vector<8x32xf32>
    %129 = arith.mulf %128, %92 : vector<8x32xf32>
    %130 = vector.extract_strided_slice %125 {offsets = [0, 0], sizes = [8, 32], strides = [1, 1]} : vector<8x96xf32> to vector<8x32xf32>
    %131 = arith.mulf %130, %127 : vector<8x32xf32>
    %132 = arith.addf %129, %131 : vector<8x32xf32>
    %133 = vector.extract_strided_slice %125 {offsets = [0, 64], sizes = [8, 32], strides = [1, 1]} : vector<8x96xf32> to vector<8x32xf32>
    %134 = math.tanh %132 : vector<8x32xf32>
    %135 = arith.mulf %133, %134 : vector<8x32xf32>
    %c16 = arith.constant 16 : index
    %c0_56 = arith.constant 0 : index
    %136 = vector.load %arg8[%c16, %c0_56] : memref<64x32xf32, #tpu.memory_space<vmem>>, vector<8x32xf32>
    tpu.vector_store %arg8[%c16, %c0_56], %135 {strides = array<i32>} : memref<64x32xf32, #tpu.memory_space<vmem>>, vector<8x32xf32>,
    %137 = vector.extract_strided_slice %28 {offsets = [40, 0], sizes = [8, 128], strides = [1, 1]} : vector<64x128xf32> to vector<8x128xf32>
    %cst_57 = arith.constant dense<0.000000e+00> : vector<8x128xf32>
    %138 = tpu.matmul %115, %32, %cst_57 {dimension_numbers = #tpu.dot_dimension_numbers<[1], [0], [0], [1], [0, 0, 1, 1], [], []>, precision = #tpu.contract_precision<fp32>} : vector<8x32xf32>, vector<32x128xf32>, vector<8x128xf32> -> vector<8x128xf32>
    %139 = arith.addf %137, %138 : vector<8x128xf32>
    %140 = vector.extract_strided_slice %139 {offsets = [0, 0], sizes = [8, 96], strides = [1, 1]} : vector<8x128xf32> to vector<8x96xf32>
    %141 = arith.negf %140 : vector<8x96xf32>
    %142 = math.exp %141 : vector<8x96xf32>
    %cst_58 = arith.constant 1.000000e+00 : f32
    %143 = vector.broadcast %cst_58 : f32 to vector<8x96xf32>
    %144 = arith.addf %143, %142 : vector<8x96xf32>
    %145 = arith.divf %143, %144 : vector<8x96xf32>
    %146 = vector.extract_strided_slice %139 {offsets = [0, 96], sizes = [8, 32], strides = [1, 1]} : vector<8x128xf32> to vector<8x32xf32>
    %147 = math.tanh %146 : vector<8x32xf32>
    %148 = vector.extract_strided_slice %145 {offsets = [0, 32], sizes = [8, 32], strides = [1, 1]} : vector<8x96xf32> to vector<8x32xf32>
    %149 = arith.mulf %148, %112 : vector<8x32xf32>
    %150 = vector.extract_strided_slice %145 {offsets = [0, 0], sizes = [8, 32], strides = [1, 1]} : vector<8x96xf32> to vector<8x32xf32>
    %151 = arith.mulf %150, %147 : vector<8x32xf32>
    %152 = arith.addf %149, %151 : vector<8x32xf32>
    %153 = vector.extract_strided_slice %145 {offsets = [0, 64], sizes = [8, 32], strides = [1, 1]} : vector<8x96xf32> to vector<8x32xf32>
    %154 = math.tanh %152 : vector<8x32xf32>
    %155 = arith.mulf %153, %154 : vector<8x32xf32>
    %c40 = arith.constant 40 : index
    %c0_59 = arith.constant 0 : index
    %156 = vector.load %arg9[%c40, %c0_59] : memref<64x32xf32, #tpu.memory_space<vmem>>, vector<8x32xf32>
    tpu.vector_store %arg9[%c40, %c0_59], %155 {strides = array<i32>} : memref<64x32xf32, #tpu.memory_space<vmem>>, vector<8x32xf32>,
    %157 = vector.extract_strided_slice %15 {offsets = [24, 0], sizes = [8, 128], strides = [1, 1]} : vector<64x128xf32> to vector<8x128xf32>
    %cst_60 = arith.constant dense<0.000000e+00> : vector<8x128xf32>
    %158 = tpu.matmul %135, %30, %cst_60 {dimension_numbers = #tpu.dot_dimension_numbers<[1], [0], [0], [1], [0, 0, 1, 1], [], []>, precision = #tpu.contract_precision<fp32>} : vector<8x32xf32>, vector<32x128xf32>, vector<8x128xf32> -> vector<8x128xf32>
    %159 = arith.addf %157, %158 : vector<8x128xf32>
    %160 = vector.extract_strided_slice %159 {offsets = [0, 0], sizes = [8, 96], strides = [1, 1]} : vector<8x128xf32> to vector<8x96xf32>
    %161 = arith.negf %160 : vector<8x96xf32>
    %162 = math.exp %161 : vector<8x96xf32>
    %cst_61 = arith.constant 1.000000e+00 : f32
    %163 = vector.broadcast %cst_61 : f32 to vector<8x96xf32>
    %164 = arith.addf %163, %162 : vector<8x96xf32>
    %165 = arith.divf %163, %164 : vector<8x96xf32>
    %166 = vector.extract_strided_slice %159 {offsets = [0, 96], sizes = [8, 32], strides = [1, 1]} : vector<8x128xf32> to vector<8x32xf32>
    %167 = math.tanh %166 : vector<8x32xf32>
    %168 = vector.extract_strided_slice %165 {offsets = [0, 32], sizes = [8, 32], strides = [1, 1]} : vector<8x96xf32> to vector<8x32xf32>
    %169 = arith.mulf %168, %132 : vector<8x32xf32>
    %170 = vector.extract_strided_slice %165 {offsets = [0, 0], sizes = [8, 32], strides = [1, 1]} : vector<8x96xf32> to vector<8x32xf32>
    %171 = arith.mulf %170, %167 : vector<8x32xf32>
    %172 = arith.addf %169, %171 : vector<8x32xf32>
    %173 = vector.extract_strided_slice %165 {offsets = [0, 64], sizes = [8, 32], strides = [1, 1]} : vector<8x96xf32> to vector<8x32xf32>
    %174 = math.tanh %172 : vector<8x32xf32>
    %175 = arith.mulf %173, %174 : vector<8x32xf32>
    %c24 = arith.constant 24 : index
    %c0_62 = arith.constant 0 : index
    %176 = vector.load %arg8[%c24, %c0_62] : memref<64x32xf32, #tpu.memory_space<vmem>>, vector<8x32xf32>
    tpu.vector_store %arg8[%c24, %c0_62], %175 {strides = array<i32>} : memref<64x32xf32, #tpu.memory_space<vmem>>, vector<8x32xf32>,
    %177 = vector.extract_strided_slice %28 {offsets = [32, 0], sizes = [8, 128], strides = [1, 1]} : vector<64x128xf32> to vector<8x128xf32>
    %cst_63 = arith.constant dense<0.000000e+00> : vector<8x128xf32>
    %178 = tpu.matmul %155, %32, %cst_63 {dimension_numbers = #tpu.dot_dimension_numbers<[1], [0], [0], [1], [0, 0, 1, 1], [], []>, precision = #tpu.contract_precision<fp32>} : vector<8x32xf32>, vector<32x128xf32>, vector<8x128xf32> -> vector<8x128xf32>
    %179 = arith.addf %177, %178 : vector<8x128xf32>
    %180 = vector.extract_strided_slice %179 {offsets = [0, 0], sizes = [8, 96], strides = [1, 1]} : vector<8x128xf32> to vector<8x96xf32>
    %181 = arith.negf %180 : vector<8x96xf32>
    %182 = math.exp %181 : vector<8x96xf32>
    %cst_64 = arith.constant 1.000000e+00 : f32
    %183 = vector.broadcast %cst_64 : f32 to vector<8x96xf32>
    %184 = arith.addf %183, %182 : vector<8x96xf32>
    %185 = arith.divf %183, %184 : vector<8x96xf32>
    %186 = vector.extract_strided_slice %179 {offsets = [0, 96], sizes = [8, 32], strides = [1, 1]} : vector<8x128xf32> to vector<8x32xf32>
    %187 = math.tanh %186 : vector<8x32xf32>
    %188 = vector.extract_strided_slice %185 {offsets = [0, 32], sizes = [8, 32], strides = [1, 1]} : vector<8x96xf32> to vector<8x32xf32>
    %189 = arith.mulf %188, %152 : vector<8x32xf32>
    %190 = vector.extract_strided_slice %185 {offsets = [0, 0], sizes = [8, 32], strides = [1, 1]} : vector<8x96xf32> to vector<8x32xf32>
    %191 = arith.mulf %190, %187 : vector<8x32xf32>
    %192 = arith.addf %189, %191 : vector<8x32xf32>
    %193 = vector.extract_strided_slice %185 {offsets = [0, 64], sizes = [8, 32], strides = [1, 1]} : vector<8x96xf32> to vector<8x32xf32>
    %194 = math.tanh %192 : vector<8x32xf32>
    %195 = arith.mulf %193, %194 : vector<8x32xf32>
    %c32_65 = arith.constant 32 : index
    %c0_66 = arith.constant 0 : index
    %196 = vector.load %arg9[%c32_65, %c0_66] : memref<64x32xf32, #tpu.memory_space<vmem>>, vector<8x32xf32>
    tpu.vector_store %arg9[%c32_65, %c0_66], %195 {strides = array<i32>} : memref<64x32xf32, #tpu.memory_space<vmem>>, vector<8x32xf32>,
    %197 = vector.extract_strided_slice %15 {offsets = [32, 0], sizes = [8, 128], strides = [1, 1]} : vector<64x128xf32> to vector<8x128xf32>
    %cst_67 = arith.constant dense<0.000000e+00> : vector<8x128xf32>
    %198 = tpu.matmul %175, %30, %cst_67 {dimension_numbers = #tpu.dot_dimension_numbers<[1], [0], [0], [1], [0, 0, 1, 1], [], []>, precision = #tpu.contract_precision<fp32>} : vector<8x32xf32>, vector<32x128xf32>, vector<8x128xf32> -> vector<8x128xf32>
    %199 = arith.addf %197, %198 : vector<8x128xf32>
    %200 = vector.extract_strided_slice %199 {offsets = [0, 0], sizes = [8, 96], strides = [1, 1]} : vector<8x128xf32> to vector<8x96xf32>
    %201 = arith.negf %200 : vector<8x96xf32>
    %202 = math.exp %201 : vector<8x96xf32>
    %cst_68 = arith.constant 1.000000e+00 : f32
    %203 = vector.broadcast %cst_68 : f32 to vector<8x96xf32>
    %204 = arith.addf %203, %202 : vector<8x96xf32>
    %205 = arith.divf %203, %204 : vector<8x96xf32>
    %206 = vector.extract_strided_slice %199 {offsets = [0, 96], sizes = [8, 32], strides = [1, 1]} : vector<8x128xf32> to vector<8x32xf32>
    %207 = math.tanh %206 : vector<8x32xf32>
    %208 = vector.extract_strided_slice %205 {offsets = [0, 32], sizes = [8, 32], strides = [1, 1]} : vector<8x96xf32> to vector<8x32xf32>
    %209 = arith.mulf %208, %172 : vector<8x32xf32>
    %210 = vector.extract_strided_slice %205 {offsets = [0, 0], sizes = [8, 32], strides = [1, 1]} : vector<8x96xf32> to vector<8x32xf32>
    %211 = arith.mulf %210, %207 : vector<8x32xf32>
    %212 = arith.addf %209, %211 : vector<8x32xf32>
    %213 = vector.extract_strided_slice %205 {offsets = [0, 64], sizes = [8, 32], strides = [1, 1]} : vector<8x96xf32> to vector<8x32xf32>
    %214 = math.tanh %212 : vector<8x32xf32>
    %215 = arith.mulf %213, %214 : vector<8x32xf32>
    %c32_69 = arith.constant 32 : index
    %c0_70 = arith.constant 0 : index
    %216 = vector.load %arg8[%c32_69, %c0_70] : memref<64x32xf32, #tpu.memory_space<vmem>>, vector<8x32xf32>
    tpu.vector_store %arg8[%c32_69, %c0_70], %215 {strides = array<i32>} : memref<64x32xf32, #tpu.memory_space<vmem>>, vector<8x32xf32>,
    %217 = vector.extract_strided_slice %28 {offsets = [24, 0], sizes = [8, 128], strides = [1, 1]} : vector<64x128xf32> to vector<8x128xf32>
    %cst_71 = arith.constant dense<0.000000e+00> : vector<8x128xf32>
    %218 = tpu.matmul %195, %32, %cst_71 {dimension_numbers = #tpu.dot_dimension_numbers<[1], [0], [0], [1], [0, 0, 1, 1], [], []>, precision = #tpu.contract_precision<fp32>} : vector<8x32xf32>, vector<32x128xf32>, vector<8x128xf32> -> vector<8x128xf32>
    %219 = arith.addf %217, %218 : vector<8x128xf32>
    %220 = vector.extract_strided_slice %219 {offsets = [0, 0], sizes = [8, 96], strides = [1, 1]} : vector<8x128xf32> to vector<8x96xf32>
    %221 = arith.negf %220 : vector<8x96xf32>
    %222 = math.exp %221 : vector<8x96xf32>
    %cst_72 = arith.constant 1.000000e+00 : f32
    %223 = vector.broadcast %cst_72 : f32 to vector<8x96xf32>
    %224 = arith.addf %223, %222 : vector<8x96xf32>
    %225 = arith.divf %223, %224 : vector<8x96xf32>
    %226 = vector.extract_strided_slice %219 {offsets = [0, 96], sizes = [8, 32], strides = [1, 1]} : vector<8x128xf32> to vector<8x32xf32>
    %227 = math.tanh %226 : vector<8x32xf32>
    %228 = vector.extract_strided_slice %225 {offsets = [0, 32], sizes = [8, 32], strides = [1, 1]} : vector<8x96xf32> to vector<8x32xf32>
    %229 = arith.mulf %228, %192 : vector<8x32xf32>
    %230 = vector.extract_strided_slice %225 {offsets = [0, 0], sizes = [8, 32], strides = [1, 1]} : vector<8x96xf32> to vector<8x32xf32>
    %231 = arith.mulf %230, %227 : vector<8x32xf32>
    %232 = arith.addf %229, %231 : vector<8x32xf32>
    %233 = vector.extract_strided_slice %225 {offsets = [0, 64], sizes = [8, 32], strides = [1, 1]} : vector<8x96xf32> to vector<8x32xf32>
    %234 = math.tanh %232 : vector<8x32xf32>
    %235 = arith.mulf %233, %234 : vector<8x32xf32>
    %c24_73 = arith.constant 24 : index
    %c0_74 = arith.constant 0 : index
    %236 = vector.load %arg9[%c24_73, %c0_74] : memref<64x32xf32, #tpu.memory_space<vmem>>, vector<8x32xf32>
    tpu.vector_store %arg9[%c24_73, %c0_74], %235 {strides = array<i32>} : memref<64x32xf32, #tpu.memory_space<vmem>>, vector<8x32xf32>,
    %237 = vector.extract_strided_slice %15 {offsets = [40, 0], sizes = [8, 128], strides = [1, 1]} : vector<64x128xf32> to vector<8x128xf32>
    %cst_75 = arith.constant dense<0.000000e+00> : vector<8x128xf32>
    %238 = tpu.matmul %215, %30, %cst_75 {dimension_numbers = #tpu.dot_dimension_numbers<[1], [0], [0], [1], [0, 0, 1, 1], [], []>, precision = #tpu.contract_precision<fp32>} : vector<8x32xf32>, vector<32x128xf32>, vector<8x128xf32> -> vector<8x128xf32>
    %239 = arith.addf %237, %238 : vector<8x128xf32>
    %240 = vector.extract_strided_slice %239 {offsets = [0, 0], sizes = [8, 96], strides = [1, 1]} : vector<8x128xf32> to vector<8x96xf32>
    %241 = arith.negf %240 : vector<8x96xf32>
    %242 = math.exp %241 : vector<8x96xf32>
    %cst_76 = arith.constant 1.000000e+00 : f32
    %243 = vector.broadcast %cst_76 : f32 to vector<8x96xf32>
    %244 = arith.addf %243, %242 : vector<8x96xf32>
    %245 = arith.divf %243, %244 : vector<8x96xf32>
    %246 = vector.extract_strided_slice %239 {offsets = [0, 96], sizes = [8, 32], strides = [1, 1]} : vector<8x128xf32> to vector<8x32xf32>
    %247 = math.tanh %246 : vector<8x32xf32>
    %248 = vector.extract_strided_slice %245 {offsets = [0, 32], sizes = [8, 32], strides = [1, 1]} : vector<8x96xf32> to vector<8x32xf32>
    %249 = arith.mulf %248, %212 : vector<8x32xf32>
    %250 = vector.extract_strided_slice %245 {offsets = [0, 0], sizes = [8, 32], strides = [1, 1]} : vector<8x96xf32> to vector<8x32xf32>
    %251 = arith.mulf %250, %247 : vector<8x32xf32>
    %252 = arith.addf %249, %251 : vector<8x32xf32>
    %253 = vector.extract_strided_slice %245 {offsets = [0, 64], sizes = [8, 32], strides = [1, 1]} : vector<8x96xf32> to vector<8x32xf32>
    %254 = math.tanh %252 : vector<8x32xf32>
    %255 = arith.mulf %253, %254 : vector<8x32xf32>
    %c40_77 = arith.constant 40 : index
    %c0_78 = arith.constant 0 : index
    %256 = vector.load %arg8[%c40_77, %c0_78] : memref<64x32xf32, #tpu.memory_space<vmem>>, vector<8x32xf32>
    tpu.vector_store %arg8[%c40_77, %c0_78], %255 {strides = array<i32>} : memref<64x32xf32, #tpu.memory_space<vmem>>, vector<8x32xf32>,
    %257 = vector.extract_strided_slice %28 {offsets = [16, 0], sizes = [8, 128], strides = [1, 1]} : vector<64x128xf32> to vector<8x128xf32>
    %cst_79 = arith.constant dense<0.000000e+00> : vector<8x128xf32>
    %258 = tpu.matmul %235, %32, %cst_79 {dimension_numbers = #tpu.dot_dimension_numbers<[1], [0], [0], [1], [0, 0, 1, 1], [], []>, precision = #tpu.contract_precision<fp32>} : vector<8x32xf32>, vector<32x128xf32>, vector<8x128xf32> -> vector<8x128xf32>
    %259 = arith.addf %257, %258 : vector<8x128xf32>
    %260 = vector.extract_strided_slice %259 {offsets = [0, 0], sizes = [8, 96], strides = [1, 1]} : vector<8x128xf32> to vector<8x96xf32>
    %261 = arith.negf %260 : vector<8x96xf32>
    %262 = math.exp %261 : vector<8x96xf32>
    %cst_80 = arith.constant 1.000000e+00 : f32
    %263 = vector.broadcast %cst_80 : f32 to vector<8x96xf32>
    %264 = arith.addf %263, %262 : vector<8x96xf32>
    %265 = arith.divf %263, %264 : vector<8x96xf32>
    %266 = vector.extract_strided_slice %259 {offsets = [0, 96], sizes = [8, 32], strides = [1, 1]} : vector<8x128xf32> to vector<8x32xf32>
    %267 = math.tanh %266 : vector<8x32xf32>
    %268 = vector.extract_strided_slice %265 {offsets = [0, 32], sizes = [8, 32], strides = [1, 1]} : vector<8x96xf32> to vector<8x32xf32>
    %269 = arith.mulf %268, %232 : vector<8x32xf32>
    %270 = vector.extract_strided_slice %265 {offsets = [0, 0], sizes = [8, 32], strides = [1, 1]} : vector<8x96xf32> to vector<8x32xf32>
    %271 = arith.mulf %270, %267 : vector<8x32xf32>
    %272 = arith.addf %269, %271 : vector<8x32xf32>
    %273 = vector.extract_strided_slice %265 {offsets = [0, 64], sizes = [8, 32], strides = [1, 1]} : vector<8x96xf32> to vector<8x32xf32>
    %274 = math.tanh %272 : vector<8x32xf32>
    %275 = arith.mulf %273, %274 : vector<8x32xf32>
    %c16_81 = arith.constant 16 : index
    %c0_82 = arith.constant 0 : index
    %276 = vector.load %arg9[%c16_81, %c0_82] : memref<64x32xf32, #tpu.memory_space<vmem>>, vector<8x32xf32>
    tpu.vector_store %arg9[%c16_81, %c0_82], %275 {strides = array<i32>} : memref<64x32xf32, #tpu.memory_space<vmem>>, vector<8x32xf32>,
    %277 = vector.extract_strided_slice %15 {offsets = [48, 0], sizes = [8, 128], strides = [1, 1]} : vector<64x128xf32> to vector<8x128xf32>
    %cst_83 = arith.constant dense<0.000000e+00> : vector<8x128xf32>
    %278 = tpu.matmul %255, %30, %cst_83 {dimension_numbers = #tpu.dot_dimension_numbers<[1], [0], [0], [1], [0, 0, 1, 1], [], []>, precision = #tpu.contract_precision<fp32>} : vector<8x32xf32>, vector<32x128xf32>, vector<8x128xf32> -> vector<8x128xf32>
    %279 = arith.addf %277, %278 : vector<8x128xf32>
    %280 = vector.extract_strided_slice %279 {offsets = [0, 0], sizes = [8, 96], strides = [1, 1]} : vector<8x128xf32> to vector<8x96xf32>
    %281 = arith.negf %280 : vector<8x96xf32>
    %282 = math.exp %281 : vector<8x96xf32>
    %cst_84 = arith.constant 1.000000e+00 : f32
    %283 = vector.broadcast %cst_84 : f32 to vector<8x96xf32>
    %284 = arith.addf %283, %282 : vector<8x96xf32>
    %285 = arith.divf %283, %284 : vector<8x96xf32>
    %286 = vector.extract_strided_slice %279 {offsets = [0, 96], sizes = [8, 32], strides = [1, 1]} : vector<8x128xf32> to vector<8x32xf32>
    %287 = math.tanh %286 : vector<8x32xf32>
    %288 = vector.extract_strided_slice %285 {offsets = [0, 32], sizes = [8, 32], strides = [1, 1]} : vector<8x96xf32> to vector<8x32xf32>
    %289 = arith.mulf %288, %252 : vector<8x32xf32>
    %290 = vector.extract_strided_slice %285 {offsets = [0, 0], sizes = [8, 32], strides = [1, 1]} : vector<8x96xf32> to vector<8x32xf32>
    %291 = arith.mulf %290, %287 : vector<8x32xf32>
    %292 = arith.addf %289, %291 : vector<8x32xf32>
    %293 = vector.extract_strided_slice %285 {offsets = [0, 64], sizes = [8, 32], strides = [1, 1]} : vector<8x96xf32> to vector<8x32xf32>
    %294 = math.tanh %292 : vector<8x32xf32>
    %295 = arith.mulf %293, %294 : vector<8x32xf32>
    %c48_85 = arith.constant 48 : index
    %c0_86 = arith.constant 0 : index
    %296 = vector.load %arg8[%c48_85, %c0_86] : memref<64x32xf32, #tpu.memory_space<vmem>>, vector<8x32xf32>
    tpu.vector_store %arg8[%c48_85, %c0_86], %295 {strides = array<i32>} : memref<64x32xf32, #tpu.memory_space<vmem>>, vector<8x32xf32>,
    %297 = vector.extract_strided_slice %28 {offsets = [8, 0], sizes = [8, 128], strides = [1, 1]} : vector<64x128xf32> to vector<8x128xf32>
    %cst_87 = arith.constant dense<0.000000e+00> : vector<8x128xf32>
    %298 = tpu.matmul %275, %32, %cst_87 {dimension_numbers = #tpu.dot_dimension_numbers<[1], [0], [0], [1], [0, 0, 1, 1], [], []>, precision = #tpu.contract_precision<fp32>} : vector<8x32xf32>, vector<32x128xf32>, vector<8x128xf32> -> vector<8x128xf32>
    %299 = arith.addf %297, %298 : vector<8x128xf32>
    %300 = vector.extract_strided_slice %299 {offsets = [0, 0], sizes = [8, 96], strides = [1, 1]} : vector<8x128xf32> to vector<8x96xf32>
    %301 = arith.negf %300 : vector<8x96xf32>
    %302 = math.exp %301 : vector<8x96xf32>
    %cst_88 = arith.constant 1.000000e+00 : f32
    %303 = vector.broadcast %cst_88 : f32 to vector<8x96xf32>
    %304 = arith.addf %303, %302 : vector<8x96xf32>
    %305 = arith.divf %303, %304 : vector<8x96xf32>
    %306 = vector.extract_strided_slice %299 {offsets = [0, 96], sizes = [8, 32], strides = [1, 1]} : vector<8x128xf32> to vector<8x32xf32>
    %307 = math.tanh %306 : vector<8x32xf32>
    %308 = vector.extract_strided_slice %305 {offsets = [0, 32], sizes = [8, 32], strides = [1, 1]} : vector<8x96xf32> to vector<8x32xf32>
    %309 = arith.mulf %308, %272 : vector<8x32xf32>
    %310 = vector.extract_strided_slice %305 {offsets = [0, 0], sizes = [8, 32], strides = [1, 1]} : vector<8x96xf32> to vector<8x32xf32>
    %311 = arith.mulf %310, %307 : vector<8x32xf32>
    %312 = arith.addf %309, %311 : vector<8x32xf32>
    %313 = vector.extract_strided_slice %305 {offsets = [0, 64], sizes = [8, 32], strides = [1, 1]} : vector<8x96xf32> to vector<8x32xf32>
    %314 = math.tanh %312 : vector<8x32xf32>
    %315 = arith.mulf %313, %314 : vector<8x32xf32>
    %c8_89 = arith.constant 8 : index
    %c0_90 = arith.constant 0 : index
    %316 = vector.load %arg9[%c8_89, %c0_90] : memref<64x32xf32, #tpu.memory_space<vmem>>, vector<8x32xf32>
    tpu.vector_store %arg9[%c8_89, %c0_90], %315 {strides = array<i32>} : memref<64x32xf32, #tpu.memory_space<vmem>>, vector<8x32xf32>,
    %317 = vector.extract_strided_slice %15 {offsets = [56, 0], sizes = [8, 128], strides = [1, 1]} : vector<64x128xf32> to vector<8x128xf32>
    %cst_91 = arith.constant dense<0.000000e+00> : vector<8x128xf32>
    %318 = tpu.matmul %295, %30, %cst_91 {dimension_numbers = #tpu.dot_dimension_numbers<[1], [0], [0], [1], [0, 0, 1, 1], [], []>, precision = #tpu.contract_precision<fp32>} : vector<8x32xf32>, vector<32x128xf32>, vector<8x128xf32> -> vector<8x128xf32>
    %319 = arith.addf %317, %318 : vector<8x128xf32>
    %320 = vector.extract_strided_slice %319 {offsets = [0, 0], sizes = [8, 96], strides = [1, 1]} : vector<8x128xf32> to vector<8x96xf32>
    %321 = arith.negf %320 : vector<8x96xf32>
    %322 = math.exp %321 : vector<8x96xf32>
    %cst_92 = arith.constant 1.000000e+00 : f32
    %323 = vector.broadcast %cst_92 : f32 to vector<8x96xf32>
    %324 = arith.addf %323, %322 : vector<8x96xf32>
    %325 = arith.divf %323, %324 : vector<8x96xf32>
    %326 = vector.extract_strided_slice %319 {offsets = [0, 96], sizes = [8, 32], strides = [1, 1]} : vector<8x128xf32> to vector<8x32xf32>
    %327 = math.tanh %326 : vector<8x32xf32>
    %328 = vector.extract_strided_slice %325 {offsets = [0, 32], sizes = [8, 32], strides = [1, 1]} : vector<8x96xf32> to vector<8x32xf32>
    %329 = arith.mulf %328, %292 : vector<8x32xf32>
    %330 = vector.extract_strided_slice %325 {offsets = [0, 0], sizes = [8, 32], strides = [1, 1]} : vector<8x96xf32> to vector<8x32xf32>
    %331 = arith.mulf %330, %327 : vector<8x32xf32>
    %332 = arith.addf %329, %331 : vector<8x32xf32>
    %333 = vector.extract_strided_slice %325 {offsets = [0, 64], sizes = [8, 32], strides = [1, 1]} : vector<8x96xf32> to vector<8x32xf32>
    %334 = math.tanh %332 : vector<8x32xf32>
    %335 = arith.mulf %333, %334 : vector<8x32xf32>
    %c56_93 = arith.constant 56 : index
    %c0_94 = arith.constant 0 : index
    %336 = vector.load %arg8[%c56_93, %c0_94] : memref<64x32xf32, #tpu.memory_space<vmem>>, vector<8x32xf32>
    tpu.vector_store %arg8[%c56_93, %c0_94], %335 {strides = array<i32>} : memref<64x32xf32, #tpu.memory_space<vmem>>, vector<8x32xf32>,
    %337 = vector.extract_strided_slice %28 {offsets = [0, 0], sizes = [8, 128], strides = [1, 1]} : vector<64x128xf32> to vector<8x128xf32>
    %cst_95 = arith.constant dense<0.000000e+00> : vector<8x128xf32>
    %338 = tpu.matmul %315, %32, %cst_95 {dimension_numbers = #tpu.dot_dimension_numbers<[1], [0], [0], [1], [0, 0, 1, 1], [], []>, precision = #tpu.contract_precision<fp32>} : vector<8x32xf32>, vector<32x128xf32>, vector<8x128xf32> -> vector<8x128xf32>
    %339 = arith.addf %337, %338 : vector<8x128xf32>
    %340 = vector.extract_strided_slice %339 {offsets = [0, 0], sizes = [8, 96], strides = [1, 1]} : vector<8x128xf32> to vector<8x96xf32>
    %341 = arith.negf %340 : vector<8x96xf32>
    %342 = math.exp %341 : vector<8x96xf32>
    %cst_96 = arith.constant 1.000000e+00 : f32
    %343 = vector.broadcast %cst_96 : f32 to vector<8x96xf32>
    %344 = arith.addf %343, %342 : vector<8x96xf32>
    %345 = arith.divf %343, %344 : vector<8x96xf32>
    %346 = vector.extract_strided_slice %339 {offsets = [0, 96], sizes = [8, 32], strides = [1, 1]} : vector<8x128xf32> to vector<8x32xf32>
    %347 = math.tanh %346 : vector<8x32xf32>
    %348 = vector.extract_strided_slice %345 {offsets = [0, 32], sizes = [8, 32], strides = [1, 1]} : vector<8x96xf32> to vector<8x32xf32>
    %349 = arith.mulf %348, %312 : vector<8x32xf32>
    %350 = vector.extract_strided_slice %345 {offsets = [0, 0], sizes = [8, 32], strides = [1, 1]} : vector<8x96xf32> to vector<8x32xf32>
    %351 = arith.mulf %350, %347 : vector<8x32xf32>
    %352 = arith.addf %349, %351 : vector<8x32xf32>
    %353 = vector.extract_strided_slice %345 {offsets = [0, 64], sizes = [8, 32], strides = [1, 1]} : vector<8x96xf32> to vector<8x32xf32>
    %354 = math.tanh %352 : vector<8x32xf32>
    %355 = arith.mulf %353, %354 : vector<8x32xf32>
    %c0_97 = arith.constant 0 : index
    %c0_98 = arith.constant 0 : index
    %356 = vector.load %arg9[%c0_97, %c0_98] : memref<64x32xf32, #tpu.memory_space<vmem>>, vector<8x32xf32>
    tpu.vector_store %arg9[%c0_97, %c0_98], %355 {strides = array<i32>} : memref<64x32xf32, #tpu.memory_space<vmem>>, vector<8x32xf32>,
    %c0_99 = arith.constant 0 : index
    %c0_100 = arith.constant 0 : index
    %357 = vector.load %arg10[%c0_99, %c0_100] : memref<8x32xf32, #tpu.memory_space<vmem>>, vector<8x32xf32>
    tpu.vector_store %arg10[%c0_99, %c0_100], %335 {strides = array<i32>} : memref<8x32xf32, #tpu.memory_space<vmem>>, vector<8x32xf32>,
    %c0_101 = arith.constant 0 : index
    %c0_102 = arith.constant 0 : index
    %358 = vector.load %arg11[%c0_101, %c0_102] : memref<8x32xf32, #tpu.memory_space<vmem>>, vector<8x32xf32>
    tpu.vector_store %arg11[%c0_101, %c0_102], %332 {strides = array<i32>} : memref<8x32xf32, #tpu.memory_space<vmem>>, vector<8x32xf32>,
    %c0_103 = arith.constant 0 : index
    %c0_104 = arith.constant 0 : index
    %359 = vector.load %arg12[%c0_103, %c0_104] : memref<8x32xf32, #tpu.memory_space<vmem>>, vector<8x32xf32>
    tpu.vector_store %arg12[%c0_103, %c0_104], %355 {strides = array<i32>} : memref<8x32xf32, #tpu.memory_space<vmem>>, vector<8x32xf32>,
    %c0_105 = arith.constant 0 : index
    %c0_106 = arith.constant 0 : index
    %360 = vector.load %arg13[%c0_105, %c0_106] : memref<8x32xf32, #tpu.memory_space<vmem>>, vector<8x32xf32>
    tpu.vector_store %arg13[%c0_105, %c0_106], %352 {strides = array<i32>} : memref<8x32xf32, #tpu.memory_space<vmem>>, vector<8x32xf32>,
    return
  }
  func.func @transform_0(%arg0: i32) -> (i32, i32) {
    %c0_i32 = arith.constant 0 : i32
    %c0_i32_0 = arith.constant 0 : i32
    return %arg0, %c0_i32 : i32, i32
  }
  func.func @transform_1(%arg0: i32) -> (i32, i32) {
    %c0_i32 = arith.constant 0 : i32
    %0 = arith.subi %c0_i32, %arg0 : i32
    %c0_i32_0 = arith.constant 0 : i32
    %c0_i32_1 = arith.constant 0 : i32
    return %0, %c0_i32_0 : i32, i32
  }
  func.func @transform_2(%arg0: i32) -> (i32, i32) {
    %c0_i32 = arith.constant 0 : i32
    %c0_i32_0 = arith.constant 0 : i32
    return %arg0, %c0_i32 : i32, i32
  }
  func.func @transform_3(%arg0: i32) -> (i32, i32) {
    %c0_i32 = arith.constant 0 : i32
    %0 = arith.subi %c0_i32, %arg0 : i32
    %c0_i32_0 = arith.constant 0 : i32
    %c0_i32_1 = arith.constant 0 : i32
    return %0, %c0_i32_0 : i32, i32
  }
  func.func @transform_4(%arg0: i32) -> (i32, i32, i32) {
    %c0_i32 = arith.constant 0 : i32
    %c0_i32_0 = arith.constant 0 : i32
    %c0_i32_1 = arith.constant 0 : i32
    %c0_i32_2 = arith.constant 0 : i32
    return %c0_i32, %c0_i32_0, %c0_i32_1 : i32, i32, i32
  }
  func.func @transform_5(%arg0: i32) -> (i32, i32, i32) {
    %c0_i32 = arith.constant 0 : i32
    %c0_i32_0 = arith.constant 0 : i32
    %c0_i32_1 = arith.constant 0 : i32
    %c0_i32_2 = arith.constant 0 : i32
    return %c0_i32, %c0_i32_0, %c0_i32_1 : i32, i32, i32
  }
  func.func @transform_6(%arg0: i32) -> (i32, i32, i32) {
    %c0_i32 = arith.constant 0 : i32
    %c0_i32_0 = arith.constant 0 : i32
    %c0_i32_1 = arith.constant 0 : i32
    %c0_i32_2 = arith.constant 0 : i32
    return %c0_i32, %c0_i32_0, %c0_i32_1 : i32, i32, i32
  }
  func.func @transform_7(%arg0: i32) -> (i32, i32) {
    %c0_i32 = arith.constant 0 : i32
    %c0_i32_0 = arith.constant 0 : i32
    return %arg0, %c0_i32 : i32, i32
  }
  func.func @transform_8(%arg0: i32) -> (i32, i32) {
    %c0_i32 = arith.constant 0 : i32
    %0 = arith.subi %c0_i32, %arg0 : i32
    %c0_i32_0 = arith.constant 0 : i32
    %c0_i32_1 = arith.constant 0 : i32
    return %0, %c0_i32_0 : i32, i32
  }
}

</mosaic_0001>

<bundles_post_ra>
// kernel: sequence_encoder_forward.3
= control target key start
LH: loop header
LB: loop body
LE: loop exit
PB: predicated region body
PF: predicated region fallthrough
CT: control target
= control target key end

     0   :  { %vm90_vm0 = vcmask 261120   ;;  %vm14236_vm1 = vmmov 0   ;;  %s14238_s21 = smov 64   ;;  %s14239_s27 = smov 96   ;;  %s16837_s4 = inlined_call_operand.vmem [shape: f32[2,64,128], index: 4, kind: input, shape index: {}]   ;;  %s16838_s2 = inlined_call_operand.vmem [shape: f32[64,32], index: 2, kind: input, shape index: {}, may-alias: {2,3}]   ;;  %s16839_s0 = inlined_call_operand.vmem [shape: f32[64,32], index: 0, kind: input, shape index: {}, may-alias: {0,1}]   ;;  %s16840_s3 = inlined_call_operand.vmem [shape: f32[64,32], index: 3, kind: input, shape index: {}, may-alias: {2,3}]   ;;  %s16841_s1 = inlined_call_operand.vmem [shape: f32[64,32], index: 1, kind: input, shape index: {}, may-alias: {0,1}]   ;;  %s16842_s5 = inlined_call_operand.vmem [shape: f32[2,32,128], index: 5, kind: input, shape index: {}]   ;;  %s16843_s6 = inlined_call_operand.vmem [shape: f32[2,1,128], index: 6, kind: input, shape index: {}]   ;;  %s16844_s7 = inlined_call_operand.vmem [shape: f32[64,32], index: 7, kind: output, shape index: {0}]   ;;  %s16845_s8 = inlined_call_operand.vmem [shape: f32[64,32], index: 8, kind: output, shape index: {1}]  }
   0x1   :  { %v118_v0 = vld [vmem:[%s16837_s4 + $0x38] sm:$0xff]  ;;  %v117_v1 = vld [vmem:[%s16837_s4 + $0x30] sm:$0xff]  ;;  %v116_v2 = vld [vmem:[%s16837_s4 + $0x28] sm:$0xff] }
   0x2   :  { %v14294_v3 = vand.u32 4294901760, %v118_v0  ;;  %v14296_v4 = vand.u32 4294901760, %v117_v1  ;;  %v14298_v5 = vand.u32 4294901760, %v116_v2  ;;  %v115_v6 = vld [vmem:[%s16837_s4 + $0x20] sm:$0xff]  ;;  %v108_v8 = vld [vmem:[%s16838_s2 + $0x8] sm:$0xff]  ;;  %v109_v12 = vld [vmem:[%s16838_s2 + $0x10] sm:$0xff] }
   0x3   :  { %v107_v7 = vld [vmem:[%s16838_s2] sm:$0xff]  ;;  %v14309_v9 = vand.u32 4294901760, %v115_v6  ;;  %v124_v11 = vsel %vm90_vm0, %v108_v8, 0  ;;  %v110_v13 = vld [vmem:[%s16838_s2 + $0x18] sm:$0xff]  ;;  %v127_v19 = vsel %vm90_vm0, %v109_v12, 0  ;;  %v112_v39 = vld [vmem:[%s16838_s2 + $0x28] sm:$0xff] }
   0x4   :  { %v121_v10 = vsel %vm90_vm0, %v107_v7, 0  ;;  %12564 = vmatprep.subr.mxu0 %v14294_v3  ;;  %v14321_v14 = vsub.f32 %v118_v0, %v14294_v3  ;;  %v14325_v16 = vand.u32 4294901760, %v124_v11  ;;  %v14328_v17 = vsub.f32 %v117_v1, %v14296_v4  ;;  %v111_v38 = vld [vmem:[%s16838_s2 + $0x20] sm:$0xff]  ;;  %v113_v47 = vld [vmem:[%s16838_s2 + $0x30] sm:$0xff]  ;;  %v114_v48 = vld [vmem:[%s16838_s2 + $0x38] sm:$0xff] }
   0x5   :  { %v14323_v15 = vand.u32 4294901760, %v121_v10  ;;  %12565 = vmatpush3.msra.mxu0 %v14294_v3  ;;  %v14332_v18 = vsub.f32 %v116_v2, %v14298_v5  ;;  %v130_v20 = vsel %vm90_vm0, %v110_v13, 0  ;;  %v14337_v21 = vsub.f32 %v115_v6, %v14309_v9 }
   0x6   :  { %12566 = vmatprep.subr.mxu0 %v14296_v4  ;;  %v14341_v22 = vand.u32 4294901760, %v14321_v14  ;;  %v14347_v24 = vsub.f32 %v124_v11, %v14325_v16  ;;  %v14350_v25 = vand.u32 4294901760, %v14328_v17  ;;  %v14357_v27 = vand.u32 4294901760, %v127_v19 }
   0x7   :  { %v14344_v23 = vsub.f32 %v121_v10, %v14323_v15  ;;  %12592 = vmatprep.mubr.f32.mxu1 %v14323_v15  ;;  %12567 = vmatpush3.msra.mxu0 %v14296_v4  ;;  %v14355_v26 = vand.u32 4294901760, %v14332_v18  ;;  %v14359_v28 = vand.u32 4294901760, %v130_v20  ;;  %v14362_v29 = vand.u32 4294901760, %v14337_v21 }
   0x8   :  { %12568 = vmatprep.subr.mxu0 %v14298_v5  ;;  %v321_v30 = vsub.f32 %v14321_v14, %v14341_v22  ;;  %v225_v32 = vand.u32 4294901760, %v14347_v24  ;;  %v328_v33 = vsub.f32 %v14328_v17, %v14350_v25  ;;  %v14375_v35 = vsub.f32 %v127_v19, %v14357_v27 }
   0x9   :  { %v215_v31 = vand.u32 4294901760, %v14344_v23  ;;  %12569 = vmatpush3.msra.mxu0 %v14298_v5  ;;  %v335_v34 = vsub.f32 %v14332_v18, %v14355_v26  ;;  %v14378_v36 = vsub.f32 %v130_v20, %v14359_v28  ;;  %v342_v37 = vsub.f32 %v14337_v21, %v14362_v29 }
   0xa   :  { %12570 = vmatprep.subr.mxu0 %v14309_v9  ;;  %v322_v40 = vand.u32 4294901760, %v321_v30  ;;  %v226_v42 = vsub.f32 %v14347_v24, %v225_v32  ;;  %v329_v43 = vand.u32 4294901760, %v328_v33  ;;  %v235_v45 = vand.u32 4294901760, %v14375_v35 }
   0xb   :  { %v216_v41 = vsub.f32 %v14344_v23, %v215_v31  ;;  %12571 = vmatpush3.msra.mxu0 %v14309_v9  ;;  %v336_v44 = vand.u32 4294901760, %v335_v34  ;;  %v245_v46 = vand.u32 4294901760, %v14378_v36  ;;  %v133_v51 = vsel %vm90_vm0, %v111_v38, 0 }
   0xc   :  { %12584 = vmatprep.subr.mxu1 %v322_v40  ;;  %v227_v50 = vand.u32 4294901760, %v226_v42  ;;  %12604 = vmatprep.subr.mxu0 %v14321_v14  ;;  %v136_v52 = vsel %vm90_vm0, %v112_v39, 0  ;;  %v236_v53 = vsub.f32 %v14375_v35, %v235_v45  ;;  %v14413_v55 = vand.u32 4294901760, %v133_v51  ;;  %v98_v42 = vld [vmem:[%s16839_s0 + $0x18] sm:$0xff] }
   0xd   :  { %v217_v49 = vand.u32 4294901760, %v216_v41  ;;  %12585 = vmatpush3.msra.mxu1 %v322_v40  ;;  %v246_v54 = vsub.f32 %v14378_v36, %v245_v46  ;;  %v14415_v56 = vand.u32 4294901760, %v136_v52  ;;  %v343_v57 = vand.u32 4294901760, %v342_v37  ;;  %v95_v37 = vld [vmem:[%s16839_s0] sm:$0xff] }
   0xe   :  { %12586 = vmatprep.subr.mxu1 %v329_v43  ;;  %v139_v58 = vsel %vm90_vm0, %v113_v47, 0  ;;  %v142_v59 = vsel %vm90_vm0, %v114_v48, 0  ;;  %v237_v60 = vand.u32 4294901760, %v236_v53  ;;  %v14420_v62 = vsub.f32 %v133_v51, %v14413_v55  ;;  %v100_v51 = vld [vmem:[%s16839_s0 + $0x28] sm:$0xff] }
   0xf   :  { %12572 = vmatprep.mubr.f32.mxu0 %v217_v49  ;;  %12587 = vmatpush3.msra.mxu1 %v329_v43  ;;  %v247_v61 = vand.u32 4294901760, %v246_v54  ;;  %v14423_v63 = vsub.f32 %v136_v52, %v14415_v56  ;;  %v14426_v0 = vand.u32 4294901760, %v139_v58  ;;  %v14428_v1 = vand.u32 4294901760, %v142_v59  ;;  %v101_v54 = vld [vmem:[%s16839_s0 + $0x30] sm:$0xff] }
  0x10   :  { %12573 = vmatmul.mubr.f32.vlgmr.msra.gmra.mxu0 %v227_v50  ;;  %12588 = vmatprep.subr.mxu1 %v336_v44  ;;  %v255_v2 = vand.u32 4294901760, %v14420_v62  ;;  %v940_v49 = vsel %vm90_vm0, %v98_v42, 0 }
  0x11   :  { %12605 = vmatpush3.msra.mxu0 %v14321_v14  ;;  %12575 = vmatprep.mubr.f32.mxu0 %v237_v60  ;;  %v265_v6 = vand.u32 4294901760, %v14423_v63  ;;  %v14434_v7 = vsub.f32 %v139_v58, %v14426_v0  ;;  %v14437_v8 = vsub.f32 %v142_v59, %v14428_v1  ;;  %v14599_v59 = vand.u32 4294901760, %v940_v49 }
  0x12   :  { %12589 = vmatpush3.msra.mxu1 %v336_v44  ;;  %12606 = vmatprep.subr.mxu0 %v14328_v17  ;;  %v256_v10 = vsub.f32 %v14420_v62, %v255_v2 }
  0x13   :  { %12590 = vmatprep.subr.mxu1 %v343_v57  ;;  %v266_v11 = vsub.f32 %v14423_v63, %v265_v6  ;;  %v275_v12 = vand.u32 4294901760, %v14434_v7  ;;  %v285_v13 = vand.u32 4294901760, %v14437_v8  ;;  %12607 = vmatpush3.msra.mxu0 %v14328_v17  ;;  %v106_v17 = vld [vmem:[%s16837_s4 + $0x18] sm:$0xff] }
  0x14   :  { %12576 = vmatmul.mubr.f32.gmra.mxu0 %v247_v61  ;;  %12591 = vmatpush3.msra.mxu1 %v343_v57  ;;  %v257_v14 = vand.u32 4294901760, %v256_v10  ;;  %v14628_v10 = vsub.f32 %v940_v49, %v14599_v59 }
  0x15   :  { %12593 = vmatmul.mubr.f32.vlgmr.msra.gmra.mxu1 %v14325_v16  ;;  %12624 = vmatprep.subr.mxu1 %v14294_v3  ;;  %v267_v19 = vand.u32 4294901760, %v266_v11  ;;  %v276_v20 = vsub.f32 %v14434_v7, %v275_v12  ;;  %v286_v30 = vsub.f32 %v14437_v8, %v285_v13 }
  0x16   :  { %12625 = vmatpush3.msra.mxu1 %v14294_v3  ;;  %12595 = vmatprep.mubr.f32.mxu1 %v14357_v27 }
  0x17   :  { %12626 = vmatprep.subr.mxu1 %v14296_v4  ;;  %12578 = vmatprep.mubr.f32.mxu0 %v257_v14  ;;  %v277_v33 = vand.u32 4294901760, %v276_v20  ;;  %v287_v34 = vand.u32 4294901760, %v286_v30 }
  0x18   :  { %12627 = vmatpush3.msra.mxu1 %v14296_v4  ;;  %12579 = vmatmul.mubr.f32.gmra.mxu0 %v267_v19 }
  0x19   :  { %12596 = vmatmul.mubr.f32.gmra.mxu1 %v14359_v28  ;;  %12608 = vmatprep.subr.mxu0 %v14332_v18 }
  0x1a   :  { %12598 = vmatprep.mubr.f32.mxu1 %v14413_v55  ;;  %12581 = vmatprep.mubr.f32.mxu0 %v277_v33  ;;  %v1055_v33 = vand.u32 4294901760, %v14628_v10 }
  0x1b   :  { %12609 = vmatpush3.msra.mxu0 %v14332_v18  ;;  %12628 = vmatprep.subr.mxu1 %v14298_v5  ;;  %v14476_v18 = vand.u32 4294901760, %v106_v17 }
  0x1c   :  { %12610 = vmatprep.subr.mxu0 %v14337_v21  ;;  %12582 = vmatmul.mubr.f32.gmra.mxu0 %v287_v34 }
  0x1d   :  { %12599 = vmatmul.mubr.f32.gmra.mxu1 %v14415_v56  ;;  %12611 = vmatpush3.msra.mxu0 %v14337_v21  ;;  %v105_v21 = vld [vmem:[%s16837_s4 + $0x10] sm:$0xff]  ;;  %v14494_v38 = vsub.f32 %v106_v17, %v14476_v18 }
  0x1e   :  { %12612 = vmatprep.mubr.f32.mxu0 %v14344_v23  ;;  %12629 = vmatpush3.msra.mxu1 %v14298_v5  ;;  %v14496_v39 = vand.u32 4294901760, %v105_v21  ;;  %v931_v23 = vsel %vm90_vm0, %v95_v37, 0 }
  0x1f   :  { %12601 = vmatprep.mubr.f32.mxu1 %v14426_v0  ;;  %12630 = vmatprep.subr.mxu1 %v14309_v9  ;;  %v14532_v40 = vand.u32 4294901760, %v931_v23 }
  0x20   :  { %12644 = vmatprep.subr.mxu0 %v14341_v22  ;;  %12613 = vmatmul.mubr.f32.vlgmr.msra.gmra.mxu0 %v14347_v24  ;;  %v96_v24 = vld [vmem:[%s16839_s0 + $0x8] sm:$0xff] }
  0x21   :  { %12602 = vmatmul.mubr.f32.gmra.mxu1 %v14428_v1  ;;  %12615 = vmatprep.mubr.f32.mxu0 %v14375_v35  ;;  %v103_v35 = vld [vmem:[%s16837_s4] sm:$0xff]  ;;  %v934_v41 = vsel %vm90_vm0, %v96_v24, 0  ;;  %v1056_v24 = vsub.f32 %v14628_v10, %v1055_v33 }
  0x22   :  { %12631 = vmatpush3.msra.mxu1 %v14309_v9  ;;  %12632 = vmatprep.mubr.f32.mxu1 %v215_v31  ;;  %v14516_v31 = vand.u32 4294901760, %v14494_v38  ;;  %v14551_v44 = vand.u32 4294901760, %v103_v35  ;;  %v14565_v47 = vand.u32 4294901760, %v934_v41 }
  0x23   :  { %12645 = vmatpush3.msra.mxu0 %v14341_v22  ;;  %12664 = vmatprep.subr.mxu1 %v14294_v3  ;;  %v104_v22 = vld [vmem:[%s16837_s4 + $0x8] sm:$0xff] }
  0x24   :  { %12646 = vmatprep.subr.mxu0 %v14350_v25  ;;  %12616 = vmatmul.mubr.f32.gmra.mxu0 %v14378_v36  ;;  %v14597_v58 = vsub.f32 %v934_v41, %v14565_v47 }
  0x25   :  { %12633 = vmatmul.mubr.f32.vlgmr.msra.gmra.mxu1 %v225_v32  ;;  %12618 = vmatprep.mubr.f32.mxu0 %v14420_v62  ;;  %v14521_v32 = vand.u32 4294901760, %v104_v22  ;;  %v946_v62 = vsel %vm90_vm0, %v100_v51, 0 }
  0x26   :  { %12665 = vmatpush3.msra.mxu1 %v14294_v3  ;;  %12635 = vmatprep.mubr.f32.mxu1 %v235_v45  ;;  %v14519_v3 = vsub.f32 %v105_v21, %v14496_v39  ;;  %v99_v45 = vld [vmem:[%s16839_s0 + $0x20] sm:$0xff]  ;;  %v14630_v11 = vand.u32 4294901760, %v946_v62 }
  0x27   :  { %12647 = vmatpush3.msra.mxu0 %v14350_v25  ;;  %12666 = vmatprep.subr.mxu1 %v14296_v4  ;;  %v97_v25 = vld [vmem:[%s16839_s0 + $0x10] sm:$0xff]  ;;  %v943_v50 = vsel %vm90_vm0, %v99_v45, 0 }
  0x28   :  { %12648 = vmatprep.subr.mxu0 %v14355_v26  ;;  %12619 = vmatmul.mubr.f32.gmra.mxu0 %v14423_v63  ;;  %v937_v36 = vsel %vm90_vm0, %v97_v25, 0  ;;  %v14549_v43 = vand.u32 4294901760, %v14519_v3  ;;  %v14606_v61 = vand.u32 4294901760, %v943_v50  ;;  %v949_v63 = vsel %vm90_vm0, %v101_v54, 0 }
  0x29   :  { %12636 = vmatmul.mubr.f32.gmra.mxu1 %v245_v46  ;;  %12621 = vmatprep.mubr.f32.mxu0 %v14434_v7  ;;  %v14563_v46 = vsub.f32 %v931_v23, %v14532_v40  ;;  %v14569_v48 = vand.u32 4294901760, %v937_v36 }
  0x2a   :  { %12667 = vmatpush3.msra.mxu1 %v14296_v4  ;;  %12638 = vmatprep.mubr.f32.mxu1 %v255_v2  ;;  %v1131_v4 = vsub.f32 %v14494_v38, %v14516_v31  ;;  %v1138_v52 = vsub.f32 %v14519_v3, %v14549_v43  ;;  %v102_v2 = vld [vmem:[%s16839_s0 + $0x38] sm:$0xff] }
  0x2b   :  { %12649 = vmatpush3.msra.mxu0 %v14355_v26  ;;  %12668 = vmatprep.subr.mxu1 %v14298_v5  ;;  %v14554_v26 = vsub.f32 %v104_v22, %v14521_v32  ;;  %v1025_v57 = vand.u32 4294901760, %v14563_v46  ;;  %v14604_v60 = vsub.f32 %v937_v36, %v14569_v48  ;;  %v952_v14 = vsel %vm90_vm0, %v102_v2, 0 }
  0x2c   :  { %12650 = vmatprep.subr.mxu0 %v14362_v29  ;;  %12622 = vmatmul.mubr.f32.gmra.mxu0 %v14437_v8  ;;  %v1035_v8 = vand.u32 4294901760, %v14597_v58  ;;  %v14654_v34 = vand.u32 4294901760, %v952_v14  ;;  %v1057_v36 = vand.u32 4294901760, %v1056_v24 }
  0x2d   :  { %12639 = vmatmul.mubr.f32.gmra.mxu1 %v265_v6  ;;  %12651 = vmatpush3.msra.mxu0 %v14362_v29  ;;  %v1132_v29 = vand.u32 4294901760, %v1131_v4  ;;  %v14584_v53 = vand.u32 4294901760, %v14554_v26 }
  0x2e   :  { %12652 = vmatprep.mubr.f32.mxu0 %v14323_v15  ;;  %12669 = vmatpush3.msra.mxu1 %v14298_v5  ;;  %v14587_v5 = vsub.f32 %v103_v35, %v14551_v44  ;;  %v1036_v30 = vsub.f32 %v14597_v58, %v1035_v8  ;;  %v14674_v35 = vsub.f32 %v952_v14, %v14654_v34 }
  0x2f   :  { %12641 = vmatprep.mubr.f32.mxu1 %v275_v12  ;;  %12670 = vmatprep.subr.mxu1 %v14309_v9  ;;  %v1145_v6 = vsub.f32 %v14554_v26, %v14584_v53  ;;  %v1045_v12 = vand.u32 4294901760, %v14604_v60 }
  0x30   :  { %12684 = vmatprep.subr.mxu0 %v14476_v18  ;;  %12653 = vmatmul.mubr.f32.vlgmr.msra.gmra.mxu0 %v14325_v16  ;;  %v14619_v7 = vand.u32 4294901760, %v14587_v5  ;;  %v1037_v23 = vand.u32 4294901760, %v1036_v30  ;;  %v1095_v4 = vand.u32 4294901760, %v14674_v35  ;;  %v1773_v30 = vld [vmem:[%s16840_s3 + $0x28] sm:$0xff] }
  0x31   :  { %12642 = vmatmul.mubr.f32.gmra.mxu1 %v285_v13  ;;  %12655 = vmatprep.mubr.f32.mxu0 %v14357_v27  ;;  %v14635_v13 = vsub.f32 %v943_v50, %v14606_v61  ;;  %v1146_v19 = vand.u32 4294901760, %v1145_v6  ;;  %v1046_v21 = vsub.f32 %v14604_v60, %v1045_v12  ;;  %v16847_v50 = vmov 0.0   ;;  %v1771_v6 = vld [vmem:[%s16840_s3 + $0x18] sm:$0xff] }
  0x32   :  { %12671 = vmatpush3.msra.mxu1 %v14309_v9  ;;  %12672 = vmatprep.mubr.f32.mxu1 %v14323_v15  ;;  %v1139_v9 = vand.u32 4294901760, %v1138_v52  ;;  %v1026_v15 = vsub.f32 %v14563_v46, %v1025_v57  ;;  %v1152_v20 = vsub.f32 %v14587_v5, %v14619_v7  ;;  %v1096_v49 = vsub.f32 %v14674_v35, %v1095_v4  ;;  %v1768_v52 = vld [vmem:[%s16840_s3] sm:$0xff] }
  0x33   :  { %12685 = vmatpush3.msra.mxu0 %v14476_v18  ;;  %12704 = vmatprep.subr.mxu1 %v1132_v29  ;;  %91 = vst.msk [vmem:[#allocation2] sm:$0xff] %vm90_vm0, %v16847_v50  ;;  %92 = vst.msk [vmem:[#allocation3] sm:$0xff] %vm90_vm0, %v16847_v50  ;;  %v1796_v24 = vsel %vm90_vm0, %v1773_v30, 0 }
  0x34   :  { %12686 = vmatprep.subr.mxu0 %v14496_v39  ;;  %12656 = vmatmul.mubr.f32.gmra.mxu0 %v14359_v28  ;;  %v1027_v17 = vand.u32 4294901760, %v1026_v15  ;;  %v1153_v22 = vand.u32 4294901760, %v1152_v20  ;;  %93 = vst.msk [vmem:[#allocation4] sm:$0xff] %vm90_vm0, %v16847_v50  ;;  %94 = vst.msk [vmem:[#allocation5] sm:$0xff] %vm90_vm0, %v16847_v50  ;;  %v1097_v51 = vand.u32 4294901760, %v1096_v49 }
  0x35   :  { %12673 = vmatmul.mubr.f32.vlgmr.msra.gmra.mxu1 %v14325_v16  ;;  %12658 = vmatprep.mubr.f32.mxu0 %v14413_v55  ;;  %v14637_v16 = vand.u32 4294901760, %v949_v63 }
  0x36   :  { %12705 = vmatpush3.msra.mxu1 %v1132_v29  ;;  %12675 = vmatprep.mubr.f32.mxu1 %v14357_v27  ;;  %v14652_v27 = vsub.f32 %v946_v62, %v14630_v11  ;;  %v11772_v29 = vld [vmem:[%s16837_s4 + $0x70] sm:$0xff] }
  0x37   :  { %12687 = vmatpush3.msra.mxu0 %v14496_v39  ;;  %12706 = vmatprep.subr.mxu1 %v1139_v9  ;;  %v14662_v37 = vsub.f32 %v949_v63, %v14637_v16  ;;  %v14748_v54 = vand.u32 4294901760, %v11772_v29 }
  0x38   :  { %12688 = vmatprep.subr.mxu0 %v14521_v32  ;;  %12659 = vmatmul.mubr.f32.gmra.mxu0 %v14415_v56  ;;  %v1075_v25 = vand.u32 4294901760, %v14652_v27 }
  0x39   :  { %12676 = vmatmul.mubr.f32.gmra.mxu1 %v14359_v28  ;;  %12661 = vmatprep.mubr.f32.mxu0 %v14426_v0  ;;  %v1065_v28 = vand.u32 4294901760, %v14635_v13 }
  0x3a   :  { %12707 = vmatpush3.msra.mxu1 %v1139_v9  ;;  %12678 = vmatprep.mubr.f32.mxu1 %v14413_v55  ;;  %v1047_v55 = vand.u32 4294901760, %v1046_v21  ;;  %v1076_v42 = vsub.f32 %v14652_v27, %v1075_v25 }
  0x3b   :  { %12689 = vmatpush3.msra.mxu0 %v14521_v32  ;;  %12708 = vmatprep.subr.mxu1 %v1146_v19  ;;  %v1066_v41 = vsub.f32 %v14635_v13, %v1065_v28 }
  0x3c   :  { %12690 = vmatprep.subr.mxu0 %v14551_v44  ;;  %12662 = vmatmul.mubr.f32.gmra.mxu0 %v14428_v1 }
  0x3d   :  { %12679 = vmatmul.mubr.f32.gmra.mxu1 %v14415_v56  ;;  %12691 = vmatpush3.msra.mxu0 %v14551_v44  ;;  %v1085_v56 = vand.u32 4294901760, %v14662_v37  ;;  %v1067_v45 = vand.u32 4294901760, %v1066_v41 }
  0x3e   :  { %12692 = vmatprep.mubr.f32.mxu0 %v1027_v17  ;;  %12709 = vmatpush3.msra.mxu1 %v1146_v19  ;;  %v1790_v19 = vsel %vm90_vm0, %v1771_v6, 0  ;;  %v1774_v17 = vld [vmem:[%s16840_s3 + $0x30] sm:$0xff] }
  0x3f   :  { %12681 = vmatprep.mubr.f32.mxu1 %v14426_v0  ;;  %12710 = vmatprep.subr.mxu1 %v1153_v22  ;;  %v1086_v0 = vsub.f32 %v14662_v37, %v1085_v56 }
  0x40   :  { %12724 = vmatprep.subr.mxu0 %v14494_v38  ;;  %12693 = vmatmul.mubr.f32.vlgmr.msra.gmra.mxu0 %v1037_v23 }
  0x41   :  { %12682 = vmatmul.mubr.f32.gmra.mxu1 %v14428_v1  ;;  %12695 = vmatprep.mubr.f32.mxu0 %v1047_v55  ;;  %v1077_v1 = vand.u32 4294901760, %v1076_v42  ;;  %v14882_v42 = vand.u32 4294901760, %v1796_v24 }
  0x42   :  { %12711 = vmatpush3.msra.mxu1 %v1153_v22  ;;  %12712 = vmatprep.mubr.f32.mxu1 %v14532_v40 }
  0x43   :  { %12725 = vmatpush3.msra.mxu0 %v14494_v38  ;;  %12744 = vmatprep.subr.mxu1 %v14476_v18  ;;  %v1087_v38 = vand.u32 4294901760, %v1086_v0 }
  0x44   :  { %12726 = vmatprep.subr.mxu0 %v14519_v3  ;;  %12696 = vmatmul.mubr.f32.gmra.mxu0 %v1057_v36 }
  0x45   :  { %12713 = vmatmul.mubr.f32.vlgmr.msra.gmra.mxu1 %v14565_v47  ;;  %12698 = vmatprep.mubr.f32.mxu0 %v1067_v45 }
  0x46   :  { %12745 = vmatpush3.msra.mxu1 %v14476_v18  ;;  %12715 = vmatprep.mubr.f32.mxu1 %v14569_v48 }
  0x47   :  { %12727 = vmatpush3.msra.mxu0 %v14519_v3  ;;  %12746 = vmatprep.subr.mxu1 %v14496_v39  ;;  %v11773_v3 = vld [vmem:[%s16837_s4 + $0x78] sm:$0xff] }
  0x48   :  { %12728 = vmatprep.subr.mxu0 %v14554_v26  ;;  %12699 = vmatmul.mubr.f32.gmra.mxu0 %v1077_v1 }
  0x49   :  { %12716 = vmatmul.mubr.f32.gmra.mxu1 %v14599_v59  ;;  %12701 = vmatprep.mubr.f32.mxu0 %v1087_v38 }
  0x4a   :  { %12747 = vmatpush3.msra.mxu1 %v14496_v39  ;;  %12718 = vmatprep.mubr.f32.mxu1 %v14606_v61 }
  0x4b   :  { %12729 = vmatpush3.msra.mxu0 %v14554_v26  ;;  %12748 = vmatprep.subr.mxu1 %v14521_v32  ;;  %v14728_v26 = vand.u32 4294901760, %v11773_v3 }
  0x4c   :  { %12730 = vmatprep.subr.mxu0 %v14587_v5  ;;  %12702 = vmatmul.mubr.f32.gmra.mxu0 %v1097_v51 }
  0x4d   :  { %12719 = vmatmul.mubr.f32.gmra.mxu1 %v14630_v11  ;;  %12731 = vmatpush3.msra.mxu0 %v14587_v5  ;;  %v14746_v5 = vsub.f32 %v11773_v3, %v14728_v26 }
  0x4e   :  { %12732 = vmatprep.mubr.f32.mxu0 %v14563_v46  ;;  %12749 = vmatpush3.msra.mxu1 %v14521_v32  ;;  %v1781_v46 = vsel %vm90_vm0, %v1768_v52, 0 }
  0x4f   :  { %12721 = vmatprep.mubr.f32.mxu1 %v14637_v16  ;;  %12750 = vmatprep.subr.mxu1 %v14551_v44  ;;  %v14784_v63 = vand.u32 4294901760, %v1781_v46 }
  0x50   :  { %12764 = vmatprep.subr.mxu0 %v14516_v31  ;;  %12733 = vmatmul.mubr.f32.vlgmr.msra.gmra.mxu0 %v14597_v58  ;;  %v14768_v58 = vand.u32 4294901760, %v14746_v5 }
  0x51   :  { %12722 = vmatmul.mubr.f32.gmra.mxu1 %v14654_v34  ;;  %12735 = vmatprep.mubr.f32.mxu0 %v14604_v60  ;;  %v11770_v60 = vld [vmem:[%s16837_s4 + $0x60] sm:$0xff] }
  0x52   :  { %12751 = vmatpush3.msra.mxu1 %v14551_v44  ;;  %12752 = vmatprep.mubr.f32.mxu1 %v1025_v57  ;;  %v1769_v57 = vld [vmem:[%s16840_s3 + $0x8] sm:$0xff] }
  0x53   :  { %12765 = vmatpush3.msra.mxu0 %v14516_v31  ;;  %12784 = vmatprep.subr.mxu1 %v14476_v18  ;;  %v11771_v31 = vld [vmem:[%s16837_s4 + $0x68] sm:$0xff]  ;;  %v1784_v2 = vsel %vm90_vm0, %v1769_v57, 0 }
  0x54   :  { %12766 = vmatprep.subr.mxu0 %v14549_v43  ;;  %12736 = vmatmul.mubr.f32.gmra.mxu0 %v14628_v10  ;;  %v14773_v62 = vand.u32 4294901760, %v11771_v31  ;;  %v1772_v10 = vld [vmem:[%s16840_s3 + $0x20] sm:$0xff] }
  0x55   :  { %12753 = vmatmul.mubr.f32.vlgmr.msra.gmra.mxu1 %v1035_v8  ;;  %12738 = vmatprep.mubr.f32.mxu0 %v14635_v13  ;;  %v14803_v8 = vand.u32 4294901760, %v11770_v60  ;;  %v14817_v13 = vand.u32 4294901760, %v1784_v2  ;;  %v1793_v20 = vsel %vm90_vm0, %v1772_v10, 0 }
  0x56   :  { %12785 = vmatpush3.msra.mxu1 %v14476_v18  ;;  %12755 = vmatprep.mubr.f32.mxu1 %v1045_v12  ;;  %v14771_v18 = vsub.f32 %v11772_v29, %v14748_v54  ;;  %v14815_v12 = vsub.f32 %v1781_v46, %v14784_v63  ;;  %v14858_v23 = vand.u32 4294901760, %v1793_v20 }
  0x57   :  { %12767 = vmatpush3.msra.mxu0 %v14549_v43  ;;  %12786 = vmatprep.subr.mxu1 %v14496_v39  ;;  %v1770_v43 = vld [vmem:[%s16840_s3 + $0x10] sm:$0xff] }
  0x58   :  { %12768 = vmatprep.subr.mxu0 %v14584_v53  ;;  %12739 = vmatmul.mubr.f32.gmra.mxu0 %v14652_v27  ;;  %v1787_v9 = vsel %vm90_vm0, %v1770_v43, 0  ;;  %v14801_v15 = vand.u32 4294901760, %v14771_v18  ;;  %v1875_v21 = vand.u32 4294901760, %v14815_v12  ;;  %v14887_v45 = vsub.f32 %v1793_v20, %v14858_v23 }
  0x59   :  { %12756 = vmatmul.mubr.f32.gmra.mxu1 %v1055_v33  ;;  %12741 = vmatprep.mubr.f32.mxu0 %v14662_v37  ;;  %v14821_v14 = vand.u32 4294901760, %v1787_v9  ;;  %v14851_v37 = vand.u32 4294901760, %v1790_v19 }
  0x5a   :  { %12787 = vmatpush3.msra.mxu1 %v14496_v39  ;;  %12758 = vmatprep.mubr.f32.mxu1 %v1065_v28  ;;  %v1981_v39 = vsub.f32 %v14746_v5, %v14768_v58  ;;  %v1988_v33 = vsub.f32 %v14771_v18, %v14801_v15  ;;  %v14849_v28 = vsub.f32 %v1784_v2, %v14817_v13 }
  0x5b   :  { %12769 = vmatpush3.msra.mxu0 %v14584_v53  ;;  %12788 = vmatprep.subr.mxu1 %v14521_v32  ;;  %v14806_v53 = vsub.f32 %v11771_v31, %v14773_v62  ;;  %v14856_v22 = vsub.f32 %v1787_v9, %v14821_v14  ;;  %v14880_v36 = vsub.f32 %v1790_v19, %v14851_v37 }
  0x5c   :  { %12770 = vmatprep.subr.mxu0 %v14619_v7  ;;  %12742 = vmatmul.mubr.f32.gmra.mxu0 %v14674_v35  ;;  %v1775_v35 = vld [vmem:[%s16840_s3 + $0x38] sm:$0xff] }
  0x5d   :  { %12759 = vmatmul.mubr.f32.gmra.mxu1 %v1075_v25  ;;  %12771 = vmatpush3.msra.mxu0 %v14619_v7  ;;  %v1982_v7 = vand.u32 4294901760, %v1981_v39  ;;  %v14836_v27 = vand.u32 4294901760, %v14806_v53  ;;  %v1799_v25 = vsel %vm90_vm0, %v1774_v17, 0  ;;  %v1802_v0 = vsel %vm90_vm0, %v1775_v35, 0 }
  0x5e   :  { %12772 = vmatprep.mubr.f32.mxu0 %v14532_v40  ;;  %12789 = vmatpush3.msra.mxu1 %v14521_v32  ;;  %v14839_v32 = vsub.f32 %v11770_v60, %v14803_v8  ;;  %v1905_v51 = vand.u32 4294901760, %v14880_v36  ;;  %v14906_v3 = vand.u32 4294901760, %v1802_v0 }
  0x5f   :  { %12761 = vmatprep.mubr.f32.mxu1 %v1085_v56  ;;  %12790 = vmatprep.subr.mxu1 %v14551_v44  ;;  %v1995_v55 = vsub.f32 %v14806_v53, %v14836_v27  ;;  %v1885_v56 = vand.u32 4294901760, %v14849_v28 }
  0x60   :  { %12804 = vmatprep.subr.mxu0 %v14728_v26  ;;  %12773 = vmatmul.mubr.f32.vlgmr.msra.gmra.mxu0 %v14565_v47  ;;  %v14871_v41 = vand.u32 4294901760, %v14839_v32  ;;  %v1906_v43 = vsub.f32 %v14880_v36, %v1905_v51  ;;  %v14926_v2 = vsub.f32 %v1802_v0, %v14906_v3 }
  0x61   :  { %12762 = vmatmul.mubr.f32.gmra.mxu1 %v1095_v4  ;;  %12775 = vmatprep.mubr.f32.mxu0 %v14569_v48  ;;  %v1895_v4 = vand.u32 4294901760, %v14856_v22  ;;  %v1996_v1 = vand.u32 4294901760, %v1995_v55  ;;  %v1886_v38 = vsub.f32 %v14849_v28, %v1885_v56  ;;  %v1758_v55 = vld [vmem:[%s16841_s1 + $0x18] sm:$0xff] }
  0x62   :  { %12791 = vmatpush3.msra.mxu1 %v14551_v44  ;;  %12792 = vmatprep.mubr.f32.mxu1 %v14532_v40  ;;  %v1989_v44 = vand.u32 4294901760, %v1988_v33  ;;  %v1876_v40 = vsub.f32 %v14815_v12, %v1875_v21  ;;  %v2002_v49 = vsub.f32 %v14839_v32, %v14871_v41  ;;  %v1907_v6 = vand.u32 4294901760, %v1906_v43  ;;  %v1755_v33 = vld [vmem:[%s16841_s1] sm:$0xff] }
  0x63   :  { %12805 = vmatpush3.msra.mxu0 %v14728_v26  ;;  %12824 = vmatprep.subr.mxu1 %v1982_v7  ;;  %v1896_v52 = vsub.f32 %v14856_v22, %v1895_v4  ;;  %v1887_v57 = vand.u32 4294901760, %v1886_v38  ;;  %v1945_v10 = vand.u32 4294901760, %v14926_v2  ;;  %v1760_v38 = vld [vmem:[%s16841_s1 + $0x28] sm:$0xff] }
  0x64   :  { %12806 = vmatprep.subr.mxu0 %v14748_v54  ;;  %12776 = vmatmul.mubr.f32.gmra.mxu0 %v14599_v59  ;;  %v1877_v29 = vand.u32 4294901760, %v1876_v40  ;;  %v2003_v46 = vand.u32 4294901760, %v2002_v49  ;;  %v2606_v43 = vsel %vm90_vm0, %v1760_v38, 0 }
  0x65   :  { %12793 = vmatmul.mubr.f32.vlgmr.msra.gmra.mxu1 %v14565_v47  ;;  %12778 = vmatprep.mubr.f32.mxu0 %v14606_v61  ;;  %v14889_v47 = vand.u32 4294901760, %v1799_v25  ;;  %v1946_v20 = vsub.f32 %v14926_v2, %v1945_v10 }
  0x66   :  { %12825 = vmatpush3.msra.mxu1 %v1982_v7  ;;  %12795 = vmatprep.mubr.f32.mxu1 %v14569_v48  ;;  %v14904_v48 = vsub.f32 %v1796_v24, %v14882_v42  ;;  %v11768_v7 = vld [vmem:[%s16837_s4 + $0x50] sm:$0xff] }
  0x67   :  { %12807 = vmatpush3.msra.mxu0 %v14748_v54  ;;  %12826 = vmatprep.subr.mxu1 %v1989_v44  ;;  %v14914_v31 = vsub.f32 %v1799_v25, %v14889_v47  ;;  %v14992_v17 = vand.u32 4294901760, %v11768_v7 }
  0x68   :  { %12808 = vmatprep.subr.mxu0 %v14773_v62  ;;  %12779 = vmatmul.mubr.f32.gmra.mxu0 %v14630_v11  ;;  %v1925_v60 = vand.u32 4294901760, %v14904_v48 }
  0x69   :  { %12796 = vmatmul.mubr.f32.gmra.mxu1 %v14599_v59  ;;  %12781 = vmatprep.mubr.f32.mxu0 %v14637_v16  ;;  %v1915_v59 = vand.u32 4294901760, %v14887_v45 }
  0x6a   :  { %12827 = vmatpush3.msra.mxu1 %v1989_v44  ;;  %12798 = vmatprep.mubr.f32.mxu1 %v14606_v61  ;;  %v1897_v61 = vand.u32 4294901760, %v1896_v52  ;;  %v1926_v39 = vsub.f32 %v14904_v48, %v1925_v60 }
  0x6b   :  { %12809 = vmatpush3.msra.mxu0 %v14773_v62  ;;  %12828 = vmatprep.subr.mxu1 %v1996_v1  ;;  %v1916_v9 = vsub.f32 %v14887_v45, %v1915_v59 }
  0x6c   :  { %12810 = vmatprep.subr.mxu0 %v14803_v8  ;;  %12782 = vmatmul.mubr.f32.gmra.mxu0 %v14654_v34 }
  0x6d   :  { %12799 = vmatmul.mubr.f32.gmra.mxu1 %v14630_v11  ;;  %12811 = vmatpush3.msra.mxu0 %v14803_v8  ;;  %v1935_v11 = vand.u32 4294901760, %v14914_v31  ;;  %v1917_v19 = vand.u32 4294901760, %v1916_v9 }
  0x6e   :  { %12812 = vmatprep.mubr.f32.mxu0 %v1877_v29  ;;  %12829 = vmatpush3.msra.mxu1 %v1996_v1  ;;  %v2600_v1 = vsel %vm90_vm0, %v1758_v55, 0  ;;  %v1761_v29 = vld [vmem:[%s16841_s1 + $0x30] sm:$0xff] }
  0x6f   :  { %12801 = vmatprep.mubr.f32.mxu1 %v14637_v16  ;;  %12830 = vmatprep.subr.mxu1 %v2003_v46  ;;  %v1936_v16 = vsub.f32 %v14914_v31, %v1935_v11 }
  0x70   :  { %12844 = vmatprep.subr.mxu0 %v14746_v5  ;;  %12813 = vmatmul.mubr.f32.vlgmr.msra.gmra.mxu0 %v1887_v57 }
  0x71   :  { %12802 = vmatmul.mubr.f32.gmra.mxu1 %v14654_v34  ;;  %12815 = vmatprep.mubr.f32.mxu0 %v1897_v61  ;;  %v1927_v34 = vand.u32 4294901760, %v1926_v39  ;;  %v1937_v30 = vand.u32 4294901760, %v1936_v16  ;;  %v15126_v39 = vand.u32 4294901760, %v2606_v43 }
  0x72   :  { %12831 = vmatpush3.msra.mxu1 %v2003_v46  ;;  %12832 = vmatprep.mubr.f32.mxu1 %v14784_v63 }
  0x73   :  { %12845 = vmatpush3.msra.mxu0 %v14746_v5  ;;  %12864 = vmatprep.subr.mxu1 %v14728_v26  ;;  %v1947_v5 = vand.u32 4294901760, %v1946_v20 }
  0x74   :  { %12846 = vmatprep.subr.mxu0 %v14771_v18  ;;  %12816 = vmatmul.mubr.f32.gmra.mxu0 %v1907_v6 }
  0x75   :  { %12833 = vmatmul.mubr.f32.vlgmr.msra.gmra.mxu1 %v14817_v13  ;;  %12818 = vmatprep.mubr.f32.mxu0 %v1917_v19 }
  0x76   :  { %12865 = vmatpush3.msra.mxu1 %v14728_v26  ;;  %12835 = vmatprep.mubr.f32.mxu1 %v14821_v14 }
  0x77   :  { %12847 = vmatpush3.msra.mxu0 %v14771_v18  ;;  %12866 = vmatprep.subr.mxu1 %v14748_v54  ;;  %v11769_v18 = vld [vmem:[%s16837_s4 + $0x58] sm:$0xff] }
  0x78   :  { %12848 = vmatprep.subr.mxu0 %v14806_v53  ;;  %12819 = vmatmul.mubr.f32.gmra.mxu0 %v1927_v34 }
  0x79   :  { %12836 = vmatmul.mubr.f32.gmra.mxu1 %v14851_v37  ;;  %12821 = vmatprep.mubr.f32.mxu0 %v1937_v30 }
  0x7a   :  { %12867 = vmatpush3.msra.mxu1 %v14748_v54  ;;  %12838 = vmatprep.mubr.f32.mxu1 %v14858_v23 }
  0x7b   :  { %12849 = vmatpush3.msra.mxu0 %v14806_v53  ;;  %12868 = vmatprep.subr.mxu1 %v14773_v62  ;;  %v14972_v53 = vand.u32 4294901760, %v11769_v18 }
  0x7c   :  { %12850 = vmatprep.subr.mxu0 %v14839_v32  ;;  %12822 = vmatmul.mubr.f32.gmra.mxu0 %v1947_v5 }
  0x7d   :  { %12839 = vmatmul.mubr.f32.gmra.mxu1 %v14882_v42  ;;  %12851 = vmatpush3.msra.mxu0 %v14839_v32  ;;  %v14990_v32 = vsub.f32 %v11769_v18, %v14972_v53 }
  0x7e   :  { %12852 = vmatprep.mubr.f32.mxu0 %v14815_v12  ;;  %12869 = vmatpush3.msra.mxu1 %v14773_v62  ;;  %v2591_v12 = vsel %vm90_vm0, %v1755_v33, 0 }
  0x7f   :  { %12841 = vmatprep.mubr.f32.mxu1 %v14889_v47  ;;  %12870 = vmatprep.subr.mxu1 %v14803_v8  ;;  %v15028_v25 = vand.u32 4294901760, %v2591_v12 }
  0x80   :  { %12884 = vmatprep.subr.mxu0 %v14768_v58  ;;  %12853 = vmatmul.mubr.f32.vlgmr.msra.gmra.mxu0 %v14849_v28  ;;  %v15012_v28 = vand.u32 4294901760, %v14990_v32 }
  0x81   :  { %12842 = vmatmul.mubr.f32.gmra.mxu1 %v14906_v3  ;;  %12855 = vmatprep.mubr.f32.mxu0 %v14856_v22  ;;  %v11766_v22 = vld [vmem:[%s16837_s4 + $0x40] sm:$0xff] }
  0x82   :  { %12871 = vmatpush3.msra.mxu1 %v14803_v8  ;;  %12872 = vmatprep.mubr.f32.mxu1 %v1875_v21  ;;  %v1756_v21 = vld [vmem:[%s16841_s1 + $0x8] sm:$0xff] }
  0x83   :  { %12885 = vmatpush3.msra.mxu0 %v14768_v58  ;;  %12904 = vmatprep.subr.mxu1 %v14728_v26  ;;  %v11767_v58 = vld [vmem:[%s16837_s4 + $0x48] sm:$0xff]  ;;  %v2594_v35 = vsel %vm90_vm0, %v1756_v21, 0 }
  0x84   :  { %12886 = vmatprep.subr.mxu0 %v14801_v15  ;;  %12856 = vmatmul.mubr.f32.gmra.mxu0 %v14880_v36  ;;  %v15017_v24 = vand.u32 4294901760, %v11767_v58  ;;  %v1759_v36 = vld [vmem:[%s16841_s1 + $0x20] sm:$0xff] }
  0x85   :  { %12873 = vmatmul.mubr.f32.vlgmr.msra.gmra.mxu1 %v1885_v56  ;;  %12858 = vmatprep.mubr.f32.mxu0 %v14887_v45  ;;  %v15047_v56 = vand.u32 4294901760, %v11766_v22  ;;  %v15061_v45 = vand.u32 4294901760, %v2594_v35  ;;  %v2603_v49 = vsel %vm90_vm0, %v1759_v36, 0 }
  0x86   :  { %12905 = vmatpush3.msra.mxu1 %v14728_v26  ;;  %12875 = vmatprep.mubr.f32.mxu1 %v1895_v4  ;;  %v15015_v26 = vsub.f32 %v11768_v7, %v14992_v17  ;;  %v15059_v4 = vsub.f32 %v2591_v12, %v15028_v25  ;;  %v15102_v57 = vand.u32 4294901760, %v2603_v49 }
  0x87   :  { %12887 = vmatpush3.msra.mxu0 %v14801_v15  ;;  %12906 = vmatprep.subr.mxu1 %v14748_v54  ;;  %v1757_v15 = vld [vmem:[%s16841_s1 + $0x10] sm:$0xff] }
  0x88   :  { %12888 = vmatprep.subr.mxu0 %v14836_v27  ;;  %12859 = vmatmul.mubr.f32.gmra.mxu0 %v14904_v48  ;;  %v2597_v44 = vsel %vm90_vm0, %v1757_v15, 0  ;;  %v15045_v40 = vand.u32 4294901760, %v15015_v26  ;;  %v2685_v52 = vand.u32 4294901760, %v15059_v4  ;;  %v15131_v19 = vsub.f32 %v2603_v49, %v15102_v57 }
  0x89   :  { %12876 = vmatmul.mubr.f32.gmra.mxu1 %v1905_v51  ;;  %12861 = vmatprep.mubr.f32.mxu0 %v14914_v31  ;;  %v15065_v0 = vand.u32 4294901760, %v2597_v44  ;;  %v15095_v31 = vand.u32 4294901760, %v2600_v1 }
  0x8a   :  { %12907 = vmatpush3.msra.mxu1 %v14748_v54  ;;  %12878 = vmatprep.mubr.f32.mxu1 %v1915_v59  ;;  %v2791_v54 = vsub.f32 %v14990_v32, %v15012_v28  ;;  %v2798_v51 = vsub.f32 %v15015_v26, %v15045_v40  ;;  %v15093_v59 = vsub.f32 %v2594_v35, %v15061_v45 }
  0x8b   :  { %12889 = vmatpush3.msra.mxu0 %v14836_v27  ;;  %12908 = vmatprep.subr.mxu1 %v14773_v62  ;;  %v15050_v27 = vsub.f32 %v11767_v58, %v15017_v24  ;;  %v15100_v46 = vsub.f32 %v2597_v44, %v15065_v0  ;;  %v15124_v6 = vsub.f32 %v2600_v1, %v15095_v31 }
  0x8c   :  { %12890 = vmatprep.subr.mxu0 %v14871_v41  ;;  %12862 = vmatmul.mubr.f32.gmra.mxu0 %v14926_v2  ;;  %v1762_v2 = vld [vmem:[%s16841_s1 + $0x38] sm:$0xff] }
  0x8d   :  { %12879 = vmatmul.mubr.f32.gmra.mxu1 %v1925_v60  ;;  %12891 = vmatpush3.msra.mxu0 %v14871_v41  ;;  %v2792_v41 = vand.u32 4294901760, %v2791_v54  ;;  %v15080_v48 = vand.u32 4294901760, %v15050_v27  ;;  %v2609_v60 = vsel %vm90_vm0, %v1761_v29, 0  ;;  %v2612_v16 = vsel %vm90_vm0, %v1762_v2, 0 }
  0x8e   :  { %12892 = vmatprep.mubr.f32.mxu0 %v14784_v63  ;;  %12909 = vmatpush3.msra.mxu1 %v14773_v62  ;;  %v15083_v62 = vsub.f32 %v11766_v22, %v15047_v56  ;;  %v2715_v5 = vand.u32 4294901760, %v15124_v6  ;;  %v15150_v18 = vand.u32 4294901760, %v2612_v16 }
  0x8f   :  { %12881 = vmatprep.mubr.f32.mxu1 %v1935_v11  ;;  %12910 = vmatprep.subr.mxu1 %v14803_v8  ;;  %v2805_v61 = vsub.f32 %v15050_v27, %v15080_v48  ;;  %v2695_v11 = vand.u32 4294901760, %v15093_v59 }
  0x90   :  { %12924 = vmatprep.subr.mxu0 %v14972_v53  ;;  %12893 = vmatmul.mubr.f32.vlgmr.msra.gmra.mxu0 %v14817_v13  ;;  %v15115_v9 = vand.u32 4294901760, %v15083_v62  ;;  %v2716_v15 = vsub.f32 %v15124_v6, %v2715_v5  ;;  %v15170_v35 = vsub.f32 %v2612_v16, %v15150_v18  ;;  %v11779_v16 = vld [vmem:[%s16842_s5 + $0x38] sm:$0xff] }
  0x91   :  { %12882 = vmatmul.mubr.f32.gmra.mxu1 %v1945_v10  ;;  %12895 = vmatprep.mubr.f32.mxu0 %v14821_v14  ;;  %v2705_v10 = vand.u32 4294901760, %v15100_v46  ;;  %v2806_v34 = vand.u32 4294901760, %v2805_v61  ;;  %v2696_v30 = vsub.f32 %v15093_v59, %v2695_v11 }
  0x92   :  { %12911 = vmatpush3.msra.mxu1 %v14803_v8  ;;  %12912 = vmatprep.mubr.f32.mxu1 %v14784_v63  ;;  %v2799_v8 = vand.u32 4294901760, %v2798_v51  ;;  %v2686_v63 = vsub.f32 %v15059_v4, %v2685_v52  ;;  %v2812_v20 = vsub.f32 %v15083_v62, %v15115_v9  ;;  %v2717_v55 = vand.u32 4294901760, %v2716_v15  ;;  %v3425_v51 = vld [vmem:[#allocation2] sm:$0xff] }
  0x93   :  { %12925 = vmatpush3.msra.mxu0 %v14972_v53  ;;  %12944 = vmatprep.subr.mxu1 %v2792_v41  ;;  %v2706_v33 = vsub.f32 %v15100_v46, %v2705_v10  ;;  %v2697_v21 = vand.u32 4294901760, %v2696_v30  ;;  %v2755_v36 = vand.u32 4294901760, %v15170_v35  ;;  %v3430_v29 = vsel %vm90_vm0, %v3425_v51, 0 }
  0x94   :  { %12926 = vmatprep.subr.mxu0 %v14992_v17  ;;  %12896 = vmatmul.mubr.f32.gmra.mxu0 %v14851_v37  ;;  %v2687_v7 = vand.u32 4294901760, %v2686_v63  ;;  %v2813_v12 = vand.u32 4294901760, %v2812_v20 }
  0x95   :  { %12913 = vmatmul.mubr.f32.vlgmr.msra.gmra.mxu1 %v14817_v13  ;;  %12898 = vmatprep.mubr.f32.mxu0 %v14858_v23  ;;  %v15133_v13 = vand.u32 4294901760, %v2609_v60  ;;  %v2756_v49 = vsub.f32 %v15170_v35, %v2755_v36 }
  0x96   :  { %12945 = vmatpush3.msra.mxu1 %v2792_v41  ;;  %12915 = vmatprep.mubr.f32.mxu1 %v14821_v14  ;;  %v15148_v14 = vsub.f32 %v2606_v43, %v15126_v39  ;;  %v3418_v41 = vld [vmem:[%s16842_s5 + $0x10] sm:$0xff] }
  0x97   :  { %12927 = vmatpush3.msra.mxu0 %v14992_v17  ;;  %12946 = vmatprep.subr.mxu1 %v2799_v8  ;;  %v15158_v58 = vsub.f32 %v2609_v60, %v15133_v13 }
  0x98   :  { %12928 = vmatprep.subr.mxu0 %v15017_v24  ;;  %12899 = vmatmul.mubr.f32.gmra.mxu0 %v14882_v42  ;;  %v2735_v22 = vand.u32 4294901760, %v15148_v14 }
  0x99   :  { %12916 = vmatmul.mubr.f32.gmra.mxu1 %v14851_v37  ;;  %12901 = vmatprep.mubr.f32.mxu0 %v14889_v47  ;;  %v2725_v37 = vand.u32 4294901760, %v15131_v19 }
  0x9a   :  { %12947 = vmatpush3.msra.mxu1 %v2799_v8  ;;  %12918 = vmatprep.mubr.f32.mxu1 %v14858_v23  ;;  %v2707_v23 = vand.u32 4294901760, %v2706_v33  ;;  %v2736_v54 = vsub.f32 %v15148_v14, %v2735_v22 }
  0x9b   :  { %12929 = vmatpush3.msra.mxu0 %v15017_v24  ;;  %12948 = vmatprep.subr.mxu1 %v2806_v34  ;;  %v2726_v44 = vsub.f32 %v15131_v19, %v2725_v37 }
  0x9c   :  { %12930 = vmatprep.subr.mxu0 %v15047_v56  ;;  %12902 = vmatmul.mubr.f32.gmra.mxu0 %v14906_v3 }
  0x9d   :  { %12919 = vmatmul.mubr.f32.gmra.mxu1 %v14882_v42  ;;  %12931 = vmatpush3.msra.mxu0 %v15047_v56  ;;  %v2745_v42 = vand.u32 4294901760, %v15158_v58  ;;  %v2727_v1 = vand.u32 4294901760, %v2726_v44 }
  0x9e   :  { %12932 = vmatprep.mubr.f32.mxu0 %v2687_v7  ;;  %12949 = vmatpush3.msra.mxu1 %v2806_v34  ;;  %v11778_v7 = vld [vmem:[%s16842_s5 + $0x30] sm:$0xff] }
  0x9f   :  { %12921 = vmatprep.mubr.f32.mxu1 %v14889_v47  ;;  %12950 = vmatprep.subr.mxu1 %v2813_v12  ;;  %v2746_v47 = vsub.f32 %v15158_v58, %v2745_v42  ;;  %v15397_v15 = vand.u32 4294901760, %v11778_v7 }
  0xa0   :  { %12964 = vmatprep.subr.mxu0 %v14990_v32  ;;  %12933 = vmatmul.mubr.f32.vlgmr.msra.gmra.mxu0 %v2697_v21 }
  0xa1   :  { %12922 = vmatmul.mubr.f32.gmra.mxu1 %v14906_v3  ;;  %12935 = vmatprep.mubr.f32.mxu0 %v2707_v23  ;;  %v2737_v3 = vand.u32 4294901760, %v2736_v54  ;;  %v2747_v38 = vand.u32 4294901760, %v2746_v47  ;;  %16922 = vst [vmem:[#allocation21_spill] sm:$0xff] %v15397_v15  ;;  %v11776_v23 = vld [vmem:[%s16842_s5 + $0x20] sm:$0xff] }
  0xa2   :  { %12951 = vmatpush3.msra.mxu1 %v2813_v12  ;;  %12952 = vmatprep.mubr.f32.mxu1 %v15028_v25  ;;  %v15423_v47 = vand.u32 4294901760, %v11776_v23 }
  0xa3   :  { %12965 = vmatpush3.msra.mxu0 %v14990_v32  ;;  %12984 = vmatprep.subr.mxu1 %v14972_v53  ;;  %v2757_v32 = vand.u32 4294901760, %v2756_v49 }
  0xa4   :  { %12966 = vmatprep.subr.mxu0 %v15015_v26  ;;  %12936 = vmatmul.mubr.f32.gmra.mxu0 %v2717_v55  ;;  %16927 = vst [vmem:[#allocation26_spill] sm:$0xff] %v15423_v47 }
  0xa5   :  { %12953 = vmatmul.mubr.f32.vlgmr.msra.gmra.mxu1 %v15061_v45  ;;  %12938 = vmatprep.mubr.f32.mxu0 %v2727_v1 }
  0xa6   :  { %12985 = vmatpush3.msra.mxu1 %v14972_v53  ;;  %12955 = vmatprep.mubr.f32.mxu1 %v15065_v0 }
  0xa7   :  { %12967 = vmatpush3.msra.mxu0 %v15015_v26  ;;  %12986 = vmatprep.subr.mxu1 %v14992_v17  ;;  %v3419_v26 = vld [vmem:[%s16842_s5 + $0x18] sm:$0xff] }
  0xa8   :  { %12968 = vmatprep.subr.mxu0 %v15050_v27  ;;  %12939 = vmatmul.mubr.f32.gmra.mxu0 %v2737_v3  ;;  %v15426_v3 = vsub.f32 %v11778_v7, %v15397_v15 }
  0xa9   :  { %12956 = vmatmul.mubr.f32.gmra.mxu1 %v15095_v31  ;;  %12941 = vmatprep.mubr.f32.mxu0 %v2747_v38 }
  0xaa   :  { %12987 = vmatpush3.msra.mxu1 %v14992_v17  ;;  %12958 = vmatprep.mubr.f32.mxu1 %v15102_v57  ;;  %16928 = vst [vmem:[#allocation27_spill] sm:$0xff] %v15426_v3 }
  0xab   :  { %12969 = vmatpush3.msra.mxu0 %v15050_v27  ;;  %12988 = vmatprep.subr.mxu1 %v15017_v24  ;;  %v15220_v27 = vand.u32 4294901760, %v3419_v26 }
  0xac   :  { %12970 = vmatprep.subr.mxu0 %v15083_v62  ;;  %12942 = vmatmul.mubr.f32.gmra.mxu0 %v2757_v32 }
  0xad   :  { %12959 = vmatmul.mubr.f32.gmra.mxu1 %v15126_v39  ;;  %12971 = vmatpush3.msra.mxu0 %v15083_v62  ;;  %v3417_v62 = vld [vmem:[%s16842_s5 + $0x8] sm:$0xff] }
  0xae   :  { %12972 = vmatprep.mubr.f32.mxu0 %v15059_v4  ;;  %12989 = vmatpush3.msra.mxu1 %v15017_v24  ;;  %v15236_v4 = vsub.f32 %v3419_v26, %v15220_v27 }
  0xaf   :  { %12961 = vmatprep.mubr.f32.mxu1 %v15133_v13  ;;  %12990 = vmatprep.subr.mxu1 %v15047_v56 }
  0xb0   :  { %13004 = vmatprep.subr.mxu0 %v15012_v28  ;;  %12973 = vmatmul.mubr.f32.vlgmr.msra.gmra.mxu0 %v15093_v59  ;;  %16907 = vst [vmem:[#allocation6_spill] sm:$0xff] %v15236_v4  ;;  %v3416_v59 = vld [vmem:[%s16842_s5] sm:$0xff] }
  0xb1   :  { %12962 = vmatmul.mubr.f32.gmra.mxu1 %v15150_v18  ;;  %12975 = vmatprep.mubr.f32.mxu0 %v15100_v46  ;;  %v15282_v43 = vand.u32 4294901760, %v3416_v59 }
  0xb2   :  { %12991 = vmatpush3.msra.mxu1 %v15047_v56  ;;  %12992 = vmatprep.mubr.f32.mxu1 %v2685_v52  ;;  %v15263_v52 = vand.u32 4294901760, %v3417_v62 }
  0xb3   :  { %13005 = vmatpush3.msra.mxu0 %v15012_v28  ;;  %13024 = vmatprep.subr.mxu1 %v14972_v53  ;;  %v15238_v28 = vand.u32 4294901760, %v3418_v41  ;;  %16911 = vst [vmem:[#allocation10_spill] sm:$0xff] %v15282_v43  ;;  %v15305_v61 = vsub.f32 %v3416_v59, %v15282_v43 }
  0xb4   :  { %13006 = vmatprep.subr.mxu0 %v15045_v40  ;;  %12976 = vmatmul.mubr.f32.gmra.mxu0 %v15124_v6  ;;  %v15288_v60 = vsub.f32 %v3417_v62, %v15263_v52 }
  0xb5   :  { %12993 = vmatmul.mubr.f32.vlgmr.msra.gmra.mxu1 %v2695_v11  ;;  %12978 = vmatprep.mubr.f32.mxu0 %v15131_v19  ;;  %16914 = vst [vmem:[#allocation13_spill] sm:$0xff] %v15305_v61  ;;  %v15322_v63 = vand.u32 4294901760, %v15305_v61  ;;  %v3427_v19 = vld [vmem:[#allocation4] sm:$0xff] }
  0xb6   :  { %13025 = vmatpush3.msra.mxu1 %v14972_v53  ;;  %12995 = vmatprep.mubr.f32.mxu1 %v2705_v10  ;;  %v15254_v53 = vand.u32 4294901760, %v15236_v4  ;;  %16912 = vst [vmem:[#allocation11_spill] sm:$0xff] %v15288_v60 }
  0xb7   :  { %13007 = vmatpush3.msra.mxu0 %v15045_v40  ;;  %13026 = vmatprep.subr.mxu1 %v14992_v17  ;;  %v15257_v40 = vsub.f32 %v3418_v41, %v15238_v28  ;;  %16917 = vst [vmem:[#allocation16_spill] sm:$0xff] %v15322_v63 }
  0xb8   :  { %13008 = vmatprep.subr.mxu0 %v15080_v48  ;;  %12979 = vmatmul.mubr.f32.gmra.mxu0 %v15148_v14  ;;  %16908 = vst [vmem:[#allocation7_spill] sm:$0xff] %v15254_v53 }
  0xb9   :  { %12996 = vmatmul.mubr.f32.gmra.mxu1 %v2715_v5  ;;  %12981 = vmatprep.mubr.f32.mxu0 %v15158_v58  ;;  %16909 = vst [vmem:[#allocation8_spill] sm:$0xff] %v15257_v40  ;;  %v15280_v46 = vand.u32 4294901760, %v15257_v40  ;;  %v3952_v5 = vsel %vm90_vm0, %v3427_v19, 0  ;;  %v11777_v58 = vld [vmem:[%s16842_s5 + $0x28] sm:$0xff]  ;;  %s14237_s5 = smov 32  }
  0xba   :  { %13027 = vmatpush3.msra.mxu1 %v14992_v17  ;;  %12998 = vmatprep.mubr.f32.mxu1 %v2725_v37  ;;  %v15273_v17 = vand.u32 4294901760, %v3430_v29  ;;  %v15393_v12 = vand.u32 4294901760, %v3952_v5 }
  0xbb   :  { %13009 = vmatpush3.msra.mxu0 %v15080_v48  ;;  %13028 = vmatprep.subr.mxu1 %v15017_v24  ;;  %v3539_v48 = vsub.f32 %v15236_v4, %v15254_v53  ;;  %16910 = vst [vmem:[#allocation9_spill] sm:$0xff] %v15280_v46  ;;  %v3546_v8 = vsub.f32 %v15257_v40, %v15280_v46 }
  0xbc   :  { %13010 = vmatprep.subr.mxu0 %v15115_v9  ;;  %12982 = vmatmul.mubr.f32.gmra.mxu0 %v15170_v35  ;;  %v15296_v2 = vsub.f32 %v3430_v29, %v15273_v17 }
  0xbd   :  { %12999 = vmatmul.mubr.f32.gmra.mxu1 %v2735_v22  ;;  %13011 = vmatpush3.msra.mxu0 %v15115_v9  ;;  %v15310_v9 = vand.u32 4294901760, %v15288_v60 }
  0xbe   :  { %13012 = vmatprep.mubr.f32.mxu0 %v15028_v25  ;;  %13029 = vmatpush3.msra.mxu1 %v15017_v24  ;;  %v15300_v24 = vand.u32 4294901760, %v3539_v48  ;;  %v15450_v48 = vand.u32 4294901760, %v15426_v3 }
  0xbf   :  { %13001 = vmatprep.mubr.f32.mxu1 %v2745_v42  ;;  %13030 = vmatprep.subr.mxu1 %v15047_v56  ;;  %16915 = vst [vmem:[#allocation14_spill] sm:$0xff] %v15310_v9  ;;  %v3553_v11 = vsub.f32 %v15288_v60, %v15310_v9  ;;  %v15413_v42 = vand.u32 4294901760, %v11777_v58 }
  0xc0   :  { %13044 = vmatprep.subr.mxu0 %v16847_v50  ;;  %13013 = vmatmul.mubr.f32.vlgmr.msra.gmra.mxu0 %v15061_v45  ;;  %16913 = vst [vmem:[#allocation12_spill] sm:$0xff] %v15300_v24  ;;  %16933 = vst [vmem:[#allocation32_spill] sm:$0xff] %v15450_v48 }
  0xc1   :  { %13002 = vmatmul.mubr.f32.gmra.mxu1 %v2755_v36  ;;  %13015 = vmatprep.mubr.f32.mxu0 %v15065_v0  ;;  %v15341_v6 = vand.u32 4294901760, %v3553_v11  ;;  %16926 = vst [vmem:[#allocation25_spill] sm:$0xff] %v15413_v42  ;;  %v15418_v36 = vsub.f32 %v3952_v5, %v15393_v12  ;;  %v15441_v26 = vsub.f32 %v11777_v58, %v15413_v42 }
  0xc2   :  { %13031 = vmatpush3.msra.mxu1 %v15047_v56  ;;  %13032 = vmatprep.mubr.f32.mxu1 %v15028_v25  ;;  %v3503_v56 = vand.u32 4294901760, %v15296_v2  ;;  %v15319_v25 = vand.u32 4294901760, %v3546_v8 }
  0xc3   :  { %13045 = vmatpush3.msra.mxu0 %v15220_v27  ;;  %13055 = vmatprep.subr.mxu1 %v16847_v50  ;;  %16918 = vst [vmem:[#allocation17_spill] sm:$0xff] %v15341_v6  ;;  %16932 = vst [vmem:[#allocation31_spill] sm:$0xff] %v15441_v26  ;;  %v16846_v62 = vand.u32 4294901760, %v15418_v36 }
  0xc4   :  { %13046 = vmatprep.subr.mxu0 %v16847_v50  ;;  %13016 = vmatmul.mubr.f32.gmra.mxu0 %v15095_v31  ;;  %16916 = vst [vmem:[#allocation15_spill] sm:$0xff] %v15319_v25 }
  0xc5   :  { %13033 = vmatmul.mubr.f32.vlgmr.msra.gmra.mxu1 %v15061_v45  ;;  %13018 = vmatprep.mubr.f32.mxu0 %v15102_v57  ;;  %v3504_v45 = vsub.f32 %v15296_v2, %v3503_v56 }
  0xc6   :  { %13056 = vmatpush3.msra.mxu1 %v15300_v24  ;;  %13035 = vmatprep.mubr.f32.mxu1 %v15065_v0  ;;  %v3560_v0 = vsub.f32 %v15305_v61, %v15322_v63 }
  0xc7   :  { %13047 = vmatpush3.msra.mxu0 %v15238_v28  ;;  %13057 = vmatprep.subr.mxu1 %v16847_v50 }
  0xc8   :  { %13048 = vmatprep.subr.mxu0 %v16847_v50  ;;  %13019 = vmatmul.mubr.f32.gmra.mxu0 %v15126_v39  ;;  %v15350_v10 = vand.u32 4294901760, %v3560_v0 }
  0xc9   :  { %13036 = vmatmul.mubr.f32.gmra.mxu1 %v15095_v31  ;;  %13021 = vmatprep.mubr.f32.mxu0 %v15133_v13  ;;  %v3505_v31 = vand.u32 4294901760, %v3504_v45  ;;  %v15466_v45 = vand.u32 4294901760, %v15441_v26 }
  0xca   :  { %13058 = vmatpush3.msra.mxu1 %v15319_v25  ;;  %13049 = vmatpush3.msra.mxu0 %v15263_v52  ;;  %16919 = vst [vmem:[#allocation18_spill] sm:$0xff] %v15350_v10 }
  0xcb   :  { %13038 = vmatprep.mubr.f32.mxu1 %v15102_v57  ;;  %13050 = vmatprep.subr.mxu0 %v16847_v50  ;;  %16936 = vst [vmem:[#allocation35_spill] sm:$0xff] %v15466_v45 }
  0xcc   :  { %13059 = vmatprep.subr.mxu1 %v16847_v50  ;;  %13022 = vmatmul.mubr.f32.gmra.mxu0 %v15150_v18 }
  0xcd   :  { %13039 = vmatmul.mubr.f32.gmra.mxu1 %v15126_v39  ;;  %13051 = vmatpush3.msra.mxu0 %v15282_v43 }
  0xce   :  { %13052 = vmatprep.mubr.msk.f32.mxu0 %vm14236_vm1, %v16847_v50  ;;  %13060 = vmatpush3.msra.mxu1 %v15341_v6 }
  0xcf   :  { %13066 = vmatprep.subr.mxu0 %v16847_v50  ;;  %13041 = vmatprep.mubr.f32.mxu1 %v15133_v13 }
  0xd0   :  { %v12574_v57 = vpop.f32.mrf.mxu0  ;;  %13061 = vmatprep.subr.mxu1 %v16847_v50  ;;  %13053 = vmatmul.mubr.f32.vlgmr.msra.gmra.mxu0 %v3505_v31 }
  0xd1   :  { %13042 = vmatmul.mubr.f32.gmra.mxu1 %v15150_v18  ;;  %13067 = vmatpush3.msra.mxu0 %v15236_v4  ;;  %v15381_v18 = vand.u32 4294901760, %v11779_v16 }
  0xd2   :  { %v15358_v39 = vpop.f32.mrf.mxu0  ;;  %13062 = vmatpush3.msra.mxu1 %v15350_v10  ;;  %13068 = vmatprep.subr.mxu0 %v16847_v50 }
  0xd3   :  { %13063 = vmatprep.mubr.msk.f32.mxu1 %vm14236_vm1, %v16847_v50  ;;  %13069 = vmatpush3.msra.mxu0 %v15257_v40  ;;  %16921 = vst [vmem:[#allocation20_spill] sm:$0xff] %v15381_v18  ;;  %v15409_v44 = vsub.f32 %v11779_v16, %v15381_v18  ;;  %v4068_v16 = vsub.f32 %v15426_v3, %v15450_v48 }
  0xd4   :  { %v12577_v13 = vpop.f32.mrf.mxu0  ;;  %13077 = vmatprep.subr.mxu1 %v16847_v50  ;;  %13070 = vmatprep.subr.mxu0 %v16847_v50 }
  0xd5   :  { %v12594_v34 = vpop.f32.mrf.mxu1  ;;  %13064 = vmatmul.mubr.f32.vlgmr.msra.gmra.mxu1 %v15273_v17  ;;  %13071 = vmatpush3.msra.mxu0 %v15288_v60  ;;  %16925 = vst [vmem:[#allocation24_spill] sm:$0xff] %v15409_v44  ;;  %v15436_v32 = vand.u32 4294901760, %v15409_v44 }
  0xd6   :  { %v15372_v20 = vpop.f32.mrf.mxu0  ;;  %v387_v30 = vadd.f32 %v12594_v34, %v12574_v57  ;;  %13078 = vmatpush3.msra.mxu1 %v15220_v27  ;;  %13072 = vmatprep.subr.mxu0 %v16847_v50  ;;  %v4026_v57 = vsub.f32 %v15418_v36, %v16846_v62 }
  0xd7   :  { %16920 = vst [vmem:[#allocation19_spill] sm:$0xff] %v15372_v20  ;;  %13074 = vmatprep.mubr.msk.f32.mxu0 %vm14236_vm1, %v16847_v50  ;;  %v15379_v14 = vpop.f32.mrf.mxu1  ;;  %13073 = vmatpush3.msra.mxu0 %v15305_v61  ;;  %16931 = vst [vmem:[#allocation30_spill] sm:$0xff] %v15436_v32  ;;  %v4061_v11 = vsub.f32 %v15409_v44, %v15436_v32 }
  0xd8   :  { %13079 = vmatprep.subr.mxu1 %v16847_v50  ;;  %13088 = vmatprep.subr.mxu0 %v16847_v50  ;;  %v12580_v33 = vpop.f32.mrf.mxu0  ;;  %v4027_v58 = vand.u32 4294901760, %v4026_v57 }
  0xd9   :  { %13075 = vmatmul.mubr.f32.vlgmr.msra.gmra.mxu0 %v15296_v2  ;;  %v12597_v37 = vpop.f32.mrf.mxu1  ;;  %13080 = vmatpush3.msra.mxu1 %v15238_v28  ;;  %v15453_v2 = vsub.f32 %v11776_v23, %v15423_v47  ;;  %v15484_v5 = vand.u32 4294901760, %v4061_v11 }
  0xda   :  { %13089 = vmatpush3.msra.mxu0 %v15254_v53  ;;  %v399_v21 = vadd.f32 %v12597_v37, %v12577_v13  ;;  %13081 = vmatprep.subr.mxu1 %v16847_v50  ;;  %v15401_v22 = vpop.f32.mrf.mxu0 }
  0xdb   :  { %13090 = vmatprep.subr.mxu0 %v16847_v50  ;;  %16923 = vst [vmem:[#allocation22_spill] sm:$0xff] %v15401_v22  ;;  %v15403_v35 = vpop.f32.mrf.mxu1  ;;  %13082 = vmatpush3.msra.mxu1 %v15263_v52  ;;  %16934 = vst [vmem:[#allocation33_spill] sm:$0xff] %v15453_v2  ;;  %v15478_v34 = vand.u32 4294901760, %v15453_v2 }
  0xdc   :  { %16924 = vst [vmem:[#allocation23_spill] sm:$0xff] %v15403_v35  ;;  %13091 = vmatpush3.msra.mxu0 %v15280_v46  ;;  %13083 = vmatprep.subr.mxu1 %v16847_v50  ;;  %v12583_v55 = vpop.f32.mrf.mxu0  ;;  %16939 = vst [vmem:[#allocation38_spill] sm:$0xff] %v15484_v5 }
  0xdd   :  { %13092 = vmatprep.subr.mxu0 %v16847_v50  ;;  %v12600_v54 = vpop.f32.mrf.mxu1  ;;  %13084 = vmatpush3.msra.mxu1 %v15282_v43  ;;  %16937 = vst [vmem:[#allocation36_spill] sm:$0xff] %v15478_v34 }
  0xde   :  { %13085 = vmatprep.mubr.msk.f32.mxu1 %vm14236_vm1, %v16847_v50  ;;  %v411_v1 = vadd.f32 %v12600_v54, %v12580_v33  ;;  %13093 = vmatpush3.msra.mxu0 %v15310_v9  ;;  %v15431_v49 = vpop.f32.mrf.mxu0  ;;  %v4075_v33 = vsub.f32 %v15441_v26, %v15466_v45 }
  0xdf   :  { %13086 = vmatmul.mubr.f32.vlgmr.msra.gmra.mxu1 %v3503_v56  ;;  %16929 = vst [vmem:[#allocation28_spill] sm:$0xff] %v15431_v49  ;;  %v15433_v38 = vpop.f32.mrf.mxu1  ;;  %13094 = vmatprep.subr.mxu0 %v16847_v50  ;;  %v3426_v49 = vld [vmem:[#allocation3] sm:$0xff] }
  0xe0   :  { %16930 = vst [vmem:[#allocation29_spill] sm:$0xff] %v15433_v38  ;;  %13099 = vmatprep.subr.mxu1 %v16847_v50  ;;  %13095 = vmatpush3.msra.mxu0 %v15322_v63  ;;  %v12614_v41 = vpop.f32.mrf.mxu0 }
  0xe1   :  { %13096 = vmatprep.mubr.msk.f32.mxu0 %vm14236_vm1, %v16847_v50  ;;  %v12603_v51 = vpop.f32.mrf.mxu1  ;;  %13100 = vmatpush3.msra.mxu1 %v15220_v27  ;;  %v510_v29 = vadd.f32 %v12614_v41, %v387_v30  ;;  %v4082_v41 = vsub.f32 %v15453_v2, %v15478_v34 }
  0xe2   :  { %13097 = vmatmul.mubr.f32.vlgmr.msra.gmra.mxu0 %v15273_v17  ;;  %v423_v59 = vadd.f32 %v12603_v51, %v12583_v55  ;;  %13101 = vmatprep.subr.mxu1 %v16847_v50  ;;  %v15457_v8 = vpop.f32.mrf.mxu0  ;;  %v15497_v55 = vand.u32 4294901760, %v4068_v16 }
  0xe3   :  { %13110 = vmatprep.subr.mxu0 %v16847_v50  ;;  %v15459_v56 = vpop.f32.mrf.mxu1  ;;  %13102 = vmatpush3.msra.mxu1 %v15238_v28 }
  0xe4   :  { %16935 = vst [vmem:[#allocation34_spill] sm:$0xff] %v15459_v56  ;;  %13111 = vmatpush3.msra.mxu0 %v15381_v18  ;;  %13103 = vmatprep.subr.mxu1 %v16847_v50  ;;  %v12617_v0 = vpop.f32.mrf.mxu0  ;;  %16940 = vst [vmem:[#allocation39_spill] sm:$0xff] %v15497_v55 }
  0xe5   :  { %13112 = vmatprep.subr.mxu0 %v16847_v50  ;;  %v12634_v31 = vpop.f32.mrf.mxu1  ;;  %13104 = vmatpush3.msra.mxu1 %v15263_v52  ;;  %v524_v19 = vadd.f32 %v12617_v0, %v399_v21 }
  0xe6   :  { %13113 = vmatpush3.msra.mxu0 %v15397_v15  ;;  %v637_v13 = vadd.f32 %v12634_v31, %v510_v29  ;;  %13105 = vmatprep.subr.mxu1 %v16847_v50  ;;  %v15482_v30 = vpop.f32.mrf.mxu0  ;;  %v15515_v31 = vand.u32 4294901760, %v4082_v41 }
  0xe7   :  { %13114 = vmatprep.subr.mxu0 %v16847_v50  ;;  %16938 = vst [vmem:[#allocation37_spill] sm:$0xff] %v15482_v30  ;;  %v15486_v7 = vpop.f32.mrf.mxu1  ;;  %13106 = vmatpush3.msra.mxu1 %v15282_v43 }
  0xe8   :  { %13107 = vmatprep.mubr.msk.f32.mxu1 %vm14236_vm1, %v16847_v50  ;;  %13115 = vmatpush3.msra.mxu0 %v15413_v42  ;;  %v12620_v37 = vpop.f32.mrf.mxu0  ;;  %16944 = vst [vmem:[#allocation43_spill] sm:$0xff] %v15515_v31 }
  0xe9   :  { %13108 = vmatmul.mubr.f32.vlgmr.msra.gmra.mxu1 %v15273_v17  ;;  %v12637_v21 = vpop.f32.mrf.mxu1  ;;  %13116 = vmatprep.subr.mxu0 %v16847_v50  ;;  %v538_v23 = vadd.f32 %v12620_v37, %v411_v1  ;;  %v15510_v1 = vand.u32 4294901760, %v4075_v33 }
  0xea   :  { %13121 = vmatprep.subr.mxu1 %v16847_v50  ;;  %v653_v54 = vadd.f32 %v12637_v21, %v524_v19  ;;  %13117 = vmatpush3.msra.mxu0 %v15423_v47  ;;  %v15503_v51 = vpop.f32.mrf.mxu0 }
  0xeb   :  { %13122 = vmatpush3.msra.mxu1 %v15484_v5  ;;  %16941 = vst [vmem:[#allocation40_spill] sm:$0xff] %v15503_v51  ;;  %v15505_v17 = vpop.f32.mrf.mxu1  ;;  %13118 = vmatprep.mubr.msk.f32.mxu0 %vm14236_vm1, %v16847_v50  ;;  %16943 = vst [vmem:[#allocation42_spill] sm:$0xff] %v15510_v1 }
  0xec   :  { %16942 = vst [vmem:[#allocation41_spill] sm:$0xff] %v15505_v17  ;;  %13123 = vmatprep.subr.mxu1 %v16847_v50  ;;  %13132 = vmatprep.subr.mxu0 %v16847_v50  ;;  %v12623_v29 = vpop.f32.mrf.mxu0 }
  0xed   :  { %13119 = vmatmul.mubr.f32.vlgmr.msra.gmra.mxu0 %v4027_v58  ;;  %v12640_v11 = vpop.f32.mrf.mxu1  ;;  %13124 = vmatpush3.msra.mxu1 %v15497_v55  ;;  %v552_v0 = vadd.f32 %v12623_v29, %v423_v59 }
  0xee   :  { %13133 = vmatpush3.msra.mxu0 %v15409_v44  ;;  %v669_v57 = vadd.f32 %v12640_v11, %v538_v23  ;;  %13125 = vmatprep.subr.mxu1 %v16847_v50  ;;  %v15519_v19 = vpop.f32.mrf.mxu0 }
  0xef   :  { %13134 = vmatprep.subr.mxu0 %v16847_v50  ;;  %16945 = vst [vmem:[#allocation44_spill] sm:$0xff] %v15519_v19  ;;  %v15521_v16 = vpop.f32.mrf.mxu1  ;;  %13126 = vmatpush3.msra.mxu1 %v15510_v1 }
  0xf0   :  { %16946 = vst [vmem:[#allocation45_spill] sm:$0xff] %v15521_v16  ;;  %13135 = vmatpush3.msra.mxu0 %v15426_v3  ;;  %13127 = vmatprep.subr.mxu1 %v16847_v50  ;;  %v12654_v59 = vpop.f32.mrf.mxu0 }
  0xf1   :  { %13136 = vmatprep.subr.mxu0 %v16847_v50  ;;  %v12643_v33 = vpop.f32.mrf.mxu1  ;;  %13128 = vmatpush3.msra.mxu1 %v15515_v31  ;;  %v774_v37 = vadd.f32 %v12654_v59, %v637_v13 }
  0xf2   :  { %13129 = vmatprep.mubr.msk.f32.mxu1 %vm14236_vm1, %v16847_v50  ;;  %v685_v58 = vadd.f32 %v12643_v33, %v552_v0  ;;  %13137 = vmatpush3.msra.mxu0 %v15441_v26  ;;  %v15532_v21 = vpop.f32.mrf.mxu0 }
  0xf3   :  { %13130 = vmatmul.mubr.f32.vlgmr.msra.gmra.mxu1 %v15393_v12  ;;  %v15534_v23 = vpop.f32.mrf.mxu1  ;;  %13138 = vmatprep.subr.mxu0 %v16847_v50 }
  0xf4   :  { %16947 = vst [vmem:[#allocation46_spill] sm:$0xff] %v15534_v23  ;;  %13143 = vmatprep.subr.mxu1 %v16847_v50  ;;  %13139 = vmatpush3.msra.mxu0 %v15453_v2  ;;  %v12657_v41 = vpop.f32.mrf.mxu0  ;;  %v16951_v23 = vand.u32 4294901760, %v15418_v36 }
  0xf5   :  { %13140 = vmatprep.mubr.msk.f32.mxu0 %vm14236_vm1, %v16847_v50  ;;  %v12674_v13 = vpop.f32.mrf.mxu1  ;;  %13144 = vmatpush3.msra.mxu1 %v15381_v18  ;;  %v786_v29 = vadd.f32 %v12657_v41, %v653_v54 }
  0xf6   :  { %13141 = vmatmul.mubr.f32.vlgmr.msra.gmra.mxu0 %v15418_v36  ;;  %v891_v11 = vadd.f32 %v12674_v13, %v774_v37  ;;  %13145 = vmatprep.subr.mxu1 %v16847_v50  ;;  %v15545_v0 = vpop.f32.mrf.mxu0 }
  0xf7   :  { %13154 = vmatprep.subr.mxu0 %v16847_v50  ;;  %16948 = vst [vmem:[#allocation47_spill] sm:$0xff] %v15545_v0  ;;  %v15547_v59 = vpop.f32.mrf.mxu1  ;;  %13146 = vmatpush3.msra.mxu1 %v15397_v15 }
  0xf8   :  { %13155 = vmatpush3.msra.mxu0 %v15436_v32  ;;  %13147 = vmatprep.subr.mxu1 %v16847_v50  ;;  %v12660_v33 = vpop.f32.mrf.mxu0 }
  0xf9   :  { %13156 = vmatprep.subr.mxu0 %v16847_v50  ;;  %v12677_v62 = vpop.f32.mrf.mxu1  ;;  %13148 = vmatpush3.msra.mxu1 %v15413_v42  ;;  %v798_v54 = vadd.f32 %v12660_v33, %v669_v57 }
  0xfa   :  { %13157 = vmatpush3.msra.mxu0 %v15450_v48  ;;  %v903_v37 = vadd.f32 %v12677_v62, %v786_v29  ;;  %13149 = vmatprep.subr.mxu1 %v16847_v50  ;;  %v15557_v41 = vpop.f32.mrf.mxu0 }
  0xfb   :  { %13158 = vmatprep.subr.mxu0 %v16847_v50  ;;  %16949 = vst [vmem:[#allocation48_spill] sm:$0xff] %v15557_v41  ;;  %v15559_v13 = vpop.f32.mrf.mxu1  ;;  %13150 = vmatpush3.msra.mxu1 %v15423_v47 }
  0xfc   :  { %16950 = vst [vmem:[#allocation49_spill] sm:$0xff] %v15559_v13  ;;  %13151 = vmatprep.mubr.msk.f32.mxu1 %vm14236_vm1, %v16847_v50  ;;  %13159 = vmatpush3.msra.mxu0 %v15466_v45  ;;  %v12663_v57 = vpop.f32.mrf.mxu0 }
  0xfd   :  { %13152 = vmatmul.mubr.f32.vlgmr.msra.gmra.mxu1 %v16951_v23  ;;  %v12680_v62 = vpop.f32.mrf.mxu1  ;;  %13160 = vmatprep.subr.mxu0 %v16847_v50  ;;  %v810_v29 = vadd.f32 %v12663_v57, %v685_v58 }
  0xfe   :  { %13165 = vmatprep.subr.mxu1 %v16847_v50  ;;  %v915_v33 = vadd.f32 %v12680_v62, %v798_v54  ;;  %13161 = vmatpush3.msra.mxu0 %v15478_v34  ;;  %v15572_v19 = vpop.f32.mrf.mxu0 }
  0xff   :  { %13162 = vmatprep.mubr.msk.f32.mxu0 %vm14236_vm1, %v16847_v50  ;;  %16952 = vst [vmem:[#allocation50_spill] sm:$0xff] %v15572_v19  ;;  %v15574_v56 = vpop.f32.mrf.mxu1  ;;  %13166 = vmatpush3.msra.mxu1 %v15381_v18 }
 0x100   :  { %16953 = vst [vmem:[#allocation51_spill] sm:$0xff] %v15574_v56  ;;  %13163 = vmatmul.mubr.f32.vlgmr.msra.gmra.mxu0 %v15393_v12  ;;  %13167 = vmatprep.subr.mxu1 %v16847_v50  ;;  %v12694_v36 = vpop.f32.mrf.mxu0 }
 0x101   :  { %13173 = vmatprep.mubr.msk.f32.mxu1 %vm14236_vm1, %v16847_v50  ;;  %v12683_v58 = vpop.f32.mrf.mxu1  ;;  %13168 = vmatpush3.msra.mxu1 %v15397_v15  ;;  %v1040_v23 = vadd.f32 %v12694_v36, %v891_v11 }
 0x102   :  { %v927_v54 = vadd.f32 %v12683_v58, %v810_v29  ;;  %3926 = vrot.lane.b32.xlu1 %v3426_v49, %s14237_s5  ;;  %13169 = vmatprep.subr.mxu1 %v16847_v50  ;;  %v15584_v57 = vpop.f32.mrf.mxu0 }
 0x103   :  { %v15586_v62 = vpop.f32.mrf.mxu1  ;;  %13176 = vmatprep.subr.mxu0 %v16847_v50  ;;  %13170 = vmatpush3.msra.mxu1 %v15413_v42 }
 0x104   :  { %16954 = vst [vmem:[#allocation52_spill] sm:$0xff] %v15586_v62  ;;  %13177 = vmatpush3.msra.mxu0 %v15220_v27  ;;  %13171 = vmatprep.subr.mxu1 %v16847_v50  ;;  %v12697_v19 = vpop.f32.mrf.mxu0 }
 0x105   :  { %v12714_v11 = vpop.f32.mrf.mxu1  ;;  %13178 = vmatprep.subr.mxu0 %v16847_v50  ;;  %13172 = vmatpush3.msra.mxu1 %v15423_v47  ;;  %v1060_v49 = vadd.f32 %v12697_v19, %v903_v37 }
 0x106   :  { %v1197_v29 = vadd.f32 %v12714_v11, %v1040_v23  ;;  %13179 = vmatpush3.msra.mxu0 %v15238_v28  ;;  %13174 = vmatmul.mubr.f32.vlgmr.msra.gmra.mxu1 %v15393_v12  ;;  %v15596_v36 = vpop.f32.mrf.mxu0 }
 0x107   :  { %16955 = vst [vmem:[#allocation53_spill] sm:$0xff] %v15596_v36  ;;  %v15598_v58 = vpop.f32.mrf.mxu1  ;;  %13187 = vmatprep.subr.mxu1 %v16847_v50  ;;  %13195 = vmatprep.mubr.msk.f32.mxu1 %vm14236_vm1, %v16847_v50 }
 0x108   :  { %13188 = vmatpush3.msra.mxu1 %v15300_v24  ;;  %v12700_v62 = vpop.f32.mrf.mxu0  ;;  %13180 = vmatprep.subr.mxu0 %v16847_v50 }
 0x109   :  { %v12717_v56 = vpop.f32.mrf.mxu1  ;;  %13189 = vmatprep.subr.mxu1 %v16847_v50  ;;  %v1080_v19 = vadd.f32 %v12700_v62, %v915_v33  ;;  %13181 = vmatpush3.msra.mxu0 %v15263_v52 }
 0x10a   :  { %v1209_v37 = vadd.f32 %v12717_v56, %v1060_v49  ;;  %13190 = vmatpush3.msra.mxu1 %v15319_v25  ;;  %v15608_v12 = vpop.f32.mrf.mxu0  ;;  %13182 = vmatprep.subr.mxu0 %v16847_v50 }
 0x10b   :  { %16956 = vst [vmem:[#allocation54_spill] sm:$0xff] %v15608_v12  ;;  %v15610_v23 = vpop.f32.mrf.mxu1  ;;  %13191 = vmatprep.subr.mxu1 %v16847_v50  ;;  %13183 = vmatpush3.msra.mxu0 %v15282_v43 }
 0x10c   :  { %16957 = vst [vmem:[#allocation55_spill] sm:$0xff] %v15610_v23  ;;  %13192 = vmatpush3.msra.mxu1 %v15341_v6  ;;  %v12703_v11 = vpop.f32.mrf.mxu0  ;;  %13184 = vmatprep.mubr.msk.f32.mxu0 %vm14236_vm1, %v16847_v50 }
 0x10d   :  { %v12720_v41 = vpop.f32.mrf.mxu1  ;;  %13193 = vmatprep.subr.mxu1 %v16847_v50  ;;  %v1100_v56 = vadd.f32 %v12703_v11, %v927_v54  ;;  %13198 = vmatprep.subr.mxu0 %v16847_v50 }
 0x10e   :  { %v1221_v33 = vadd.f32 %v12720_v41, %v1080_v19  ;;  %13194 = vmatpush3.msra.mxu1 %v15350_v10  ;;  %v15621_v62 = vpop.f32.mrf.mxu0 }
 0x10f   :  { %16958 = vst [vmem:[#allocation56_spill] sm:$0xff] %v15621_v62  ;;  %v15623_v49 = vpop.f32.mrf.mxu1  ;;  %13209 = vmatprep.subr.mxu1 %v16847_v50 }
 0x110   :  { %16959 = vst [vmem:[#allocation57_spill] sm:$0xff] %v15623_v49  ;;  %v12734_v12 = vpop.f32.mrf.mxu0 }
 0x111   :  { %v12723_v16 = vpop.f32.mrf.mxu1  ;;  %v1320_v51 = vadd.f32 %v12734_v12, %v1197_v29 }
 0x112   :  { %v1233_v38 = vadd.f32 %v12723_v16, %v1100_v56  ;;  %v15626_v22 = vpop.f32.mrf.mxu0 }
 0x113   :  { %v15628_v23 = vpop.f32.mrf.mxu1 }
 0x114   :  { %16960 = vst [vmem:[#allocation58_spill] sm:$0xff] %v15628_v23  ;;  %v12737_v54 = vpop.f32.mrf.mxu0 }
 0x115   :  { %v12754_v41 = vpop.f32.mrf.mxu1  ;;  %v1334_v19 = vadd.f32 %v12737_v54, %v1209_v37 }
 0x116   :  { %v1447_v11 = vadd.f32 %v12754_v41, %v1320_v51  ;;  %v15630_v36 = vpop.f32.mrf.mxu0 }
 0x117   :  { %16961 = vst [vmem:[#allocation59_spill] sm:$0xff] %v15630_v36  ;;  %v15632_v13 = vpop.f32.mrf.mxu1 }
 0x118   :  { %v12740_v62 = vpop.f32.mrf.mxu0 }
 0x119   :  { %v12757_v49 = vpop.f32.mrf.mxu1  ;;  %v1348_v0 = vadd.f32 %v12740_v62, %v1221_v33 }
 0x11a   :  { %v1463_v50 = vadd.f32 %v12757_v49, %v1334_v19  ;;  %v15634_v17 = vpop.f32.mrf.mxu0  ;;  %v15649_v19 = vld [vmem:[%s16843_s6] ss:$0 sm:$0xff] }
 0x11b   :  { %16962 = vst [vmem:[#allocation60_spill] sm:$0xff] %v15634_v17  ;;  %v15636_v29 = vpop.f32.mrf.mxu1 }
 0x11c   :  { %16963 = vst [vmem:[#allocation61_spill] sm:$0xff] %v15636_v29  ;;  %v12743_v16 = vpop.f32.mrf.mxu0 }
 0x11d   :  { %v12760_v12 = vpop.f32.mrf.mxu1  ;;  %v1362_v56 = vadd.f32 %v12743_v16, %v1233_v38 }
 0x11e   :  { %v1479_v23 = vadd.f32 %v12760_v12, %v1348_v0  ;;  %v15638_v30 = vpop.f32.mrf.mxu0 }
 0x11f   :  { %16964 = vst [vmem:[#allocation62_spill] sm:$0xff] %v15638_v30  ;;  %v15640_v37 = vpop.f32.mrf.mxu1 }
 0x120   :  { %16965 = vst [vmem:[#allocation63_spill] sm:$0xff] %v15640_v37  ;;  %v12774_v51 = vpop.f32.mrf.mxu0 }
 0x121   :  { %v12763_v54 = vpop.f32.mrf.mxu1  ;;  %v1584_v41 = vadd.f32 %v12774_v51, %v1447_v11 }
 0x122   :  { %v1495_v36 = vadd.f32 %v12763_v54, %v1362_v56  ;;  %v15642_v35 = vpop.f32.mrf.mxu0 }
 0x123   :  { %v15644_v33 = vpop.f32.mrf.mxu1 }
 0x124   :  { %16966 = vst [vmem:[#allocation64_spill] sm:$0xff] %v15644_v33  ;;  %v12777_v62 = vpop.f32.mrf.mxu0 }
 0x125   :  { %v12794_v49 = vpop.f32.mrf.mxu1  ;;  %v1596_v38 = vadd.f32 %v12777_v62, %v1463_v50 }
 0x126   :  { %v1701_v0 = vadd.f32 %v12794_v49, %v1584_v41  ;;  %v15651_v16 = vpop.f32.mrf.mxu0 }
 0x127   :  { %16967 = vst [vmem:[#allocation65_spill] sm:$0xff] %v15651_v16  ;;  %v15653_v12 = vpop.f32.mrf.mxu1 }
 0x128   :  { %v15656_v11 = vadd.f32 %v15649_v19, %v1701_v0  ;;  %v12780_v56 = vpop.f32.mrf.mxu0 }
 0x129   :  { %v12797_v51 = vpop.f32.mrf.mxu1  ;;  %v1608_v54 = vadd.f32 %v12780_v56, %v1479_v23 }
 0x12a   :  { %16968 = vst [vmem:[#allocation66_spill] sm:$0xff] %v15656_v11  ;;  %v1713_v33 = vadd.f32 %v12797_v51, %v1596_v38  ;;  %v15658_v30 = vpop.f32.mrf.mxu0 }
 0x12b   :  { %16969 = vst [vmem:[#allocation67_spill] sm:$0xff] %v15658_v30  ;;  %v15660_v37 = vpop.f32.mrf.mxu1 }
 0x12c   :  { %16970 = vst [vmem:[#allocation68_spill] sm:$0xff] %v15660_v37  ;;  %v15663_v17 = vadd.f32 %v15649_v19, %v1713_v33  ;;  %v12783_v50 = vpop.f32.mrf.mxu0 }
 0x12d   :  { %v12800_v41 = vpop.f32.mrf.mxu1  ;;  %v1620_v62 = vadd.f32 %v12783_v50, %v1495_v36 }
 0x12e   :  { %16971 = vst [vmem:[#allocation69_spill] sm:$0xff] %v15663_v17  ;;  %v1725_v49 = vadd.f32 %v12800_v41, %v1608_v54  ;;  %v15665_v16 = vpop.f32.mrf.mxu0 }
 0x12f   :  { %16972 = vst [vmem:[#allocation70_spill] sm:$0xff] %v15665_v16  ;;  %v15667_v29 = vpop.f32.mrf.mxu1 }
 0x130   :  { %16973 = vst [vmem:[#allocation71_spill] sm:$0xff] %v15667_v29  ;;  %v15670_v0 = vadd.f32 %v15649_v19, %v1725_v49  ;;  %v12814_v23 = vpop.f32.mrf.mxu0 }
 0x131   :  { %v12803_v38 = vpop.f32.mrf.mxu1 }
 0x132   :  { %16974 = vst [vmem:[#allocation72_spill] sm:$0xff] %v15670_v0  ;;  %v1737_v56 = vadd.f32 %v12803_v38, %v1620_v62  ;;  %v15672_v51 = vpop.f32.mrf.mxu0 }
 0x133   :  { %v15674_v30 = vpop.f32.mrf.mxu1 }
 0x134   :  { %16975 = vst [vmem:[#allocation73_spill] sm:$0xff] %v15674_v30  ;;  %v15677_v33 = vadd.f32 %v15649_v19, %v1737_v56  ;;  %v12817_v17 = vpop.f32.mrf.mxu0 }
 0x135   :  { %v12834_v36 = vpop.f32.mrf.mxu1 }
 0x136   :  { %16976 = vst [vmem:[#allocation74_spill] sm:$0xff] %v15677_v33  ;;  %v2047_v54 = vadd.f32 %v12834_v36, %v12814_v23  ;;  %v15679_v50 = vpop.f32.mrf.mxu0 }
 0x137   :  { %v15681_v41 = vpop.f32.mrf.mxu1 }
 0x138   :  { %v12820_v16 = vpop.f32.mrf.mxu0 }
 0x139   :  { %v12837_v49 = vpop.f32.mrf.mxu1 }
 0x13a   :  { %v2059_v0 = vadd.f32 %v12837_v49, %v12817_v17  ;;  %v15683_v29 = vpop.f32.mrf.mxu0 }
 0x13b   :  { %v15685_v62 = vpop.f32.mrf.mxu1 }
 0x13c   :  { %v12823_v38 = vpop.f32.mrf.mxu0 }
 0x13d   :  { %v12840_v37 = vpop.f32.mrf.mxu1 }
 0x13e   :  { %v2071_v30 = vadd.f32 %v12840_v37, %v12820_v16  ;;  %v15687_v20 = vpop.f32.mrf.mxu0 }
 0x13f   :  { %v15689_v56 = vpop.f32.mrf.mxu1 }
 0x140   :  { %v12854_v33 = vpop.f32.mrf.mxu0 }
 0x141   :  { %v12843_v23 = vpop.f32.mrf.mxu1  ;;  %v2170_v36 = vadd.f32 %v12854_v33, %v2047_v54 }
 0x142   :  { %v2083_v11 = vadd.f32 %v12843_v23, %v12823_v38  ;;  %v2162_v10 = vpop.f32.mrf.mxu0 }
 0x143   :  { %v15691_v6 = vpop.f32.mrf.mxu1 }
 0x144   :  { %v12857_v34 = vpop.f32.mrf.mxu0 }
 0x145   :  { %v12874_v17 = vpop.f32.mrf.mxu1  ;;  %v2184_v49 = vadd.f32 %v12857_v34, %v2059_v0 }
 0x146   :  { %v2297_v25 = vadd.f32 %v12874_v17, %v2170_v36  ;;  %v2176_v45 = vpop.f32.mrf.mxu0 }
 0x147   :  { %v2288_v24 = vpop.f32.mrf.mxu1 }
 0x148   :  { %v12860_v48 = vpop.f32.mrf.mxu0 }
 0x149   :  { %v12877_v32 = vpop.f32.mrf.mxu1  ;;  %v2198_v37 = vadd.f32 %v12860_v48, %v2071_v30 }
 0x14a   :  { %v2313_v16 = vadd.f32 %v12877_v32, %v2184_v49  ;;  %v15693_v2 = vpop.f32.mrf.mxu0 }
 0x14b   :  { %v2304_v26 = vpop.f32.mrf.mxu1 }
 0x14c   :  { %v12863_v3 = vpop.f32.mrf.mxu0 }
 0x14d   :  { %v12880_v44 = vpop.f32.mrf.mxu1  ;;  %v2212_v33 = vadd.f32 %v12863_v3, %v2083_v11 }
 0x14e   :  { %v2329_v54 = vadd.f32 %v12880_v44, %v2198_v37  ;;  %v15695_v38 = vpop.f32.mrf.mxu0 }
 0x14f   :  { %v15697_v23 = vpop.f32.mrf.mxu1 }
 0x150   :  { %v12894_v47 = vpop.f32.mrf.mxu0 }
 0x151   :  { %v12883_v34 = vpop.f32.mrf.mxu1  ;;  %v2434_v0 = vadd.f32 %v12894_v47, %v2297_v25 }
 0x152   :  { %v2345_v36 = vadd.f32 %v12883_v34, %v2212_v33  ;;  %v2427_v17 = vpop.f32.mrf.mxu0 }
 0x153   :  { %v15699_v42 = vpop.f32.mrf.mxu1 }
 0x154   :  { %v12897_v48 = vpop.f32.mrf.mxu0 }
 0x155   :  { %v12914_v32 = vpop.f32.mrf.mxu1  ;;  %v2446_v30 = vadd.f32 %v12897_v48, %v2313_v16 }
 0x156   :  { %v2551_v49 = vadd.f32 %v12914_v32, %v2434_v0  ;;  %v2439_v15 = vpop.f32.mrf.mxu0 }
 0x157   :  { %v2544_v18 = vpop.f32.mrf.mxu1 }
 0x158   :  { %v12900_v31 = vpop.f32.mrf.mxu0 }
 0x159   :  { %v12917_v3 = vpop.f32.mrf.mxu1  ;;  %v2458_v44 = vadd.f32 %v12900_v31, %v2329_v54 }
 0x15a   :  { %v2563_v11 = vadd.f32 %v12917_v3, %v2446_v30  ;;  %v2451_v37 = vpop.f32.mrf.mxu0  ;;  %v2041_v3 = vadd.f32 %v15681_v41, %v15672_v51  ;;  %v2065_v51 = vadd.f32 %v15689_v56, %v15683_v29 }
 0x15b   :  { %v2556_v63 = vpop.f32.mrf.mxu1 }
 0x15c   :  { %v12903_v1 = vpop.f32.mrf.mxu0 }
 0x15d   :  { %v12920_v9 = vpop.f32.mrf.mxu1  ;;  %v2470_v55 = vadd.f32 %v12903_v1, %v2345_v36  ;;  %v2163_v36 = vadd.f32 %v2162_v10, %v2041_v3 }
 0x15e   :  { %v2575_v25 = vadd.f32 %v12920_v9, %v2458_v44  ;;  %v2463_v47 = vpop.f32.mrf.mxu0 }
 0x15f   :  { %v2568_v33 = vpop.f32.mrf.mxu1 }
 0x160   :  { %v12934_v34 = vpop.f32.mrf.mxu0 }
 0x161   :  { %v12923_v46 = vpop.f32.mrf.mxu1  ;;  %v2700_v5 = vadd.f32 %v12934_v34, %v2551_v49 }
 0x162   :  { %v2587_v53 = vadd.f32 %v12923_v46, %v2470_v55  ;;  %v2689_v16 = vpop.f32.mrf.mxu0  ;;  %v2053_v46 = vadd.f32 %v15685_v62, %v15679_v50  ;;  %v2289_v55 = vadd.f32 %v2288_v24, %v2163_v36 }
 0x163   :  { %v15701_v0 = vpop.f32.mrf.mxu1 }
 0x164   :  { %v12937_v48 = vpop.f32.mrf.mxu0 }
 0x165   :  { %v12954_v32 = vpop.f32.mrf.mxu1  ;;  %v2720_v61 = vadd.f32 %v12937_v48, %v2563_v11  ;;  %v2177_v11 = vadd.f32 %v2176_v45, %v2053_v46  ;;  %v2077_v45 = vadd.f32 %v15691_v6, %v15687_v20 }
 0x166   :  { %v2857_v31 = vadd.f32 %v12954_v32, %v2700_v5  ;;  %v2709_v54 = vpop.f32.mrf.mxu0  ;;  %v2428_v5 = vadd.f32 %v2427_v17, %v2289_v55 }
 0x167   :  { %v2850_v30 = vpop.f32.mrf.mxu1  ;;  %v2305_v10 = vadd.f32 %v2304_v26, %v2177_v11  ;;  %v2205_v26 = vadd.f32 %v15695_v38, %v2077_v45 }
 0x168   :  { %v12940_v1 = vpop.f32.mrf.mxu0 }
 0x169   :  { %v12957_v9 = vpop.f32.mrf.mxu1  ;;  %v2740_v44 = vadd.f32 %v12940_v1, %v2575_v25  ;;  %v2545_v25 = vadd.f32 %v2544_v18, %v2428_v5 }
 0x16a   :  { %v2869_v60 = vadd.f32 %v12957_v9, %v2720_v61  ;;  %v2729_v40 = vpop.f32.mrf.mxu0  ;;  %v2191_v61 = vadd.f32 %v15693_v2, %v2065_v51  ;;  %v2440_v9 = vadd.f32 %v2439_v15, %v2305_v10 }
 0x16b   :  { %v2862_v49 = vpop.f32.mrf.mxu1  ;;  %v2690_v50 = vadd.f32 %v2689_v16, %v2545_v25 }
 0x16c   :  { %v12943_v34 = vpop.f32.mrf.mxu0  ;;  %v2557_v29 = vadd.f32 %v2556_v63, %v2440_v9 }
 0x16d   :  { %v12960_v4 = vpop.f32.mrf.mxu1  ;;  %v2760_v48 = vadd.f32 %v12943_v34, %v2587_v53  ;;  %v2851_v56 = vadd.f32 %v2850_v30, %v2690_v50 }
 0x16e   :  { %v2881_v32 = vadd.f32 %v12960_v4, %v2740_v44  ;;  %v2749_v41 = vpop.f32.mrf.mxu0  ;;  %v2321_v4 = vadd.f32 %v15697_v23, %v2191_v61  ;;  %v2710_v44 = vadd.f32 %v2709_v54, %v2557_v29 }
 0x16f   :  { %v2874_v43 = vpop.f32.mrf.mxu1 }
 0x170   :  { %v12974_v3 = vpop.f32.mrf.mxu0  ;;  %v2452_v18 = vadd.f32 %v2451_v37, %v2321_v4  ;;  %v2863_v20 = vadd.f32 %v2862_v49, %v2710_v44 }
 0x171   :  { %v12963_v1 = vpop.f32.mrf.mxu1  ;;  %v2980_v24 = vadd.f32 %v12974_v3, %v2857_v31  ;;  %v2337_v31 = vadd.f32 %v15699_v42, %v2205_v26 }
 0x172   :  { %v2893_v62 = vadd.f32 %v12963_v1, %v2760_v48  ;;  %v2972_v53 = vpop.f32.mrf.mxu0  ;;  %v2569_v6 = vadd.f32 %v2568_v33, %v2452_v18 }
 0x173   :  { %v2886_v17 = vpop.f32.mrf.mxu1  ;;  %v2973_v46 = vadd.f32 %v2972_v53, %v2851_v56  ;;  %v2464_v11 = vadd.f32 %v2463_v47, %v2337_v31 }
 0x174   :  { %v12977_v36 = vpop.f32.mrf.mxu0  ;;  %v2730_v30 = vadd.f32 %v2729_v40, %v2569_v6 }
 0x175   :  { %v12994_v2 = vpop.f32.mrf.mxu1  ;;  %v2994_v15 = vadd.f32 %v12977_v36, %v2869_v60  ;;  %v2581_v54 = vadd.f32 %v15701_v0, %v2464_v11 }
 0x176   :  { %v3107_v16 = vadd.f32 %v12994_v2, %v2980_v24  ;;  %v2986_v55 = vpop.f32.mrf.mxu0  ;;  %v2875_v60 = vadd.f32 %v2874_v43, %v2730_v30 }
 0x177   :  { %v3098_v34 = vpop.f32.mrf.mxu1  ;;  %v2987_v48 = vadd.f32 %v2986_v55, %v2863_v20  ;;  %v2750_v3 = vadd.f32 %v2749_v41, %v2581_v54  ;;  %v15721_v41 = vld [vmem:[%s16843_s6 + $0x1] ss:$0 sm:$0xff] }
 0x178   :  { %v3099_v23 = vadd.f32 %v3098_v34, %v2973_v46  ;;  %v12980_v5 = vpop.f32.mrf.mxu0 }
 0x179   :  { %v12997_v63 = vpop.f32.mrf.mxu1  ;;  %v3008_v38 = vadd.f32 %v12980_v5, %v2881_v32  ;;  %v2887_v50 = vadd.f32 %v2886_v17, %v2750_v3  ;;  %v381_v3 = vadd.f32 %v15379_v14, %v15358_v39 }
 0x17a   :  { %v3123_v37 = vadd.f32 %v12997_v63, %v2994_v15  ;;  %v3000_v51 = vpop.f32.mrf.mxu0 }
 0x17b   :  { %v3114_v10 = vpop.f32.mrf.mxu1  ;;  %v3001_v1 = vadd.f32 %v3000_v51, %v2875_v60 }
 0x17c   :  { %v3115_v25 = vadd.f32 %v3114_v10, %v2987_v48  ;;  %v12983_v61 = vpop.f32.mrf.mxu0 }
 0x17d   :  { %v13000_v42 = vpop.f32.mrf.mxu1  ;;  %v3022_v33 = vadd.f32 %v12983_v61, %v2893_v62 }
 0x17e   :  { %v3139_v49 = vadd.f32 %v13000_v42, %v3008_v38  ;;  %v3014_v9 = vpop.f32.mrf.mxu0 }
 0x17f   :  { %v3130_v47 = vpop.f32.mrf.mxu1  ;;  %v3015_v32 = vadd.f32 %v3014_v9, %v2887_v50  ;;  %v503_v9 = vadd.f32 %v15457_v8, %v381_v3 }
 0x180   :  { %v3131_v24 = vadd.f32 %v3130_v47, %v3001_v1  ;;  %v13014_v40 = vpop.f32.mrf.mxu0 }
 0x181   :  { %v13003_v45 = vpop.f32.mrf.mxu1  ;;  %v3244_v4 = vadd.f32 %v13014_v40, %v3107_v16 }
 0x182   :  { %v15716_v53 = vadd.f32 %v13003_v45, %v3022_v33  ;;  %v3237_v29 = vpop.f32.mrf.mxu0 }
 0x183   :  { %v3146_v0 = vpop.f32.mrf.mxu1  ;;  %v3238_v43 = vadd.f32 %v3237_v29, %v3099_v23 }
 0x184   :  { %v3147_v56 = vadd.f32 %v3146_v0, %v3015_v32  ;;  %v13017_v26 = vpop.f32.mrf.mxu0 }
 0x185   :  { %v13034_v18 = vpop.f32.mrf.mxu1  ;;  %v3256_v62 = vadd.f32 %v13017_v26, %v3123_v37 }
 0x186   :  { %v3361_v17 = vadd.f32 %v13034_v18, %v3244_v4  ;;  %v3249_v36 = vpop.f32.mrf.mxu0 }
 0x187   :  { %v3354_v2 = vpop.f32.mrf.mxu1  ;;  %v3250_v44 = vadd.f32 %v3249_v36, %v3115_v25 }
 0x188   :  { %v15724_v46 = vadd.f32 %v15721_v41, %v3361_v17  ;;  %v3355_v15 = vadd.f32 %v3354_v2, %v3238_v43  ;;  %v13020_v16 = vpop.f32.mrf.mxu0 }
 0x189   :  { %v13037_v31 = vpop.f32.mrf.mxu1  ;;  %v3268_v55 = vadd.f32 %v13020_v16, %v3139_v49 }
 0x18a   :  { %16977 = vst [vmem:[#allocation75_spill] sm:$0xff] %v15724_v46  ;;  %v15727_v34 = vadd.f32 %v15721_v41, %v3355_v15  ;;  %v3373_v6 = vadd.f32 %v13037_v31, %v3256_v62  ;;  %v3261_v20 = vpop.f32.mrf.mxu0 }
 0x18b   :  { %v3366_v23 = vpop.f32.mrf.mxu1  ;;  %v3262_v11 = vadd.f32 %v3261_v20, %v3131_v24  ;;  %v629_v24 = vadd.f32 %v15486_v7, %v503_v9 }
 0x18c   :  { %16978 = vst [vmem:[#allocation76_spill] sm:$0xff] %v15727_v34  ;;  %v15730_v5 = vadd.f32 %v15721_v41, %v3373_v6  ;;  %v3367_v63 = vadd.f32 %v3366_v23, %v3250_v44  ;;  %v13023_v30 = vpop.f32.mrf.mxu0 }
 0x18d   :  { %v13040_v48 = vpop.f32.mrf.mxu1  ;;  %v768_v32 = vadd.f32 %v15532_v21, %v629_v24 }
 0x18e   :  { %v15733_v38 = vadd.f32 %v15721_v41, %v3367_v63  ;;  %v3385_v37 = vadd.f32 %v13040_v48, %v3268_v55  ;;  %v3273_v51 = vpop.f32.mrf.mxu0 }
 0x18f   :  { %v3378_v10 = vpop.f32.mrf.mxu1  ;;  %v3274_v54 = vadd.f32 %v3273_v51, %v3147_v56  ;;  %v885_v39 = vadd.f32 %v15547_v59, %v768_v32 }
 0x190   :  { %v15736_v60 = vadd.f32 %v15721_v41, %v3385_v37  ;;  %v3379_v25 = vadd.f32 %v3378_v10, %v3262_v11  ;;  %v3507_v42 = vpop.f32.mrf.mxu0 }
 0x191   :  { %v13043_v61 = vpop.f32.mrf.mxu1  ;;  %v1030_v29 = vadd.f32 %v15584_v57, %v885_v39 }
 0x192   :  { %v15741_v1 = vadd.f32 %v15721_v41, %v3379_v25  ;;  %v13054_v49 = vpop.f32.mrf.mxu0 }
 0x193   :  { %v3390_v33 = vpop.f32.mrf.mxu1  ;;  %v1191_v0 = vadd.f32 %v15598_v58, %v1030_v29 }
 0x194   :  { %v3391_v47 = vadd.f32 %v3390_v33, %v3274_v54 }
 0x195   :  { %v3598_v50 = vpop.f32.mrf.mxu1  ;;  %v1313_v56 = vadd.f32 %v15626_v22, %v1191_v0  ;;  %v3927_v0 = vpop.permute.xlu1 %3926 }
 0x196   :  { %v15746_v40 = vadd.f32 %v15721_v41, %v3391_v47  ;;  %v3599_v43 = vadd.f32 %v3598_v50, %v3507_v42  ;;  %v3428_v47 = vld [vmem:[#allocation5] sm:$0xff] }
 0x197   :  { %v13065_v45 = vpop.f32.mrf.mxu1  ;;  %v1439_v7 = vadd.f32 %v15632_v13, %v1313_v56 }
 0x199   :  { %v3678_v4 = vpop.f32.mrf.mxu0  ;;  %v1578_v17 = vadd.f32 %v15642_v35, %v1439_v7 }
 0x19a   :  { %v3679_v18 = vadd.f32 %v3678_v4, %v3599_v43 }
 0x19b   :  { %v13076_v14 = vpop.f32.mrf.mxu0  ;;  %v1695_v59 = vadd.f32 %v15653_v12, %v1578_v17 }
 0x19d   :  { %v1747_v57 = vadd.f32 %v15649_v19, %v1695_v59  ;;  %v3280_v19 = vadd.f32 %v13023_v30, %v15716_v53 }
 0x19f   :  { %v3755_v8 = vpop.f32.mrf.mxu1  ;;  %v3397_v10 = vadd.f32 %v13043_v61, %v3280_v19  ;;  %v16988_v19 = vld [vmem:[#allocation39_spill] sm:$0xff] }
 0x1a0   :  { %v3756_v21 = vadd.f32 %v3755_v8, %v3679_v18 }
 0x1a1   :  { %v13087_v26 = vpop.f32.mrf.mxu1  ;;  %v3415_v42 = vadd.f32 %v15721_v41, %v3397_v10  ;;  %v16991_v10 = vld [vmem:[#allocation16_spill] sm:$0xff] }
 0x1a2   :  { %v3838_v62 = vpop.f32.mrf.mxu0 }
 0x1a3   :  { %v3839_v2 = vadd.f32 %v3838_v62, %v3756_v21 }
 0x1a4   :  { %v13098_v36 = vpop.f32.mrf.mxu0 }
 0x1a9   :  { %v3913_v44 = vpop.f32.mrf.mxu1 }
 0x1aa   :  { %v3914_v58 = vadd.f32 %v3913_v44, %v3839_v2 }
 0x1ab   :  { %v13109_v15 = vpop.f32.mrf.mxu1 }
 0x1ac   :  { %v3917_v16 = vadd.f32 %v3914_v58, %v1747_v57 }
 0x1ad   :  { %v4029_v31 = vpop.f32.mrf.mxu0 }
 0x1ae   :  { %14105 = vtanh.f32 %v3917_v16  ;;  %v11780_v50 = vmul.f32 -1.442695, %v3917_v16 }
 0x1af   :  { %v13120_v22 = vpop.f32.mrf.mxu0 }
 0x1b3   :  { %v4120_v55 = vpop.f32.mrf.mxu1 }
 0x1b4   :  { %v4121_v35 = vadd.f32 %v4120_v55, %v4029_v31  ;;  %v16979_v31 = vmov 0.0  }
 0x1b5   :  { %v13131_v13 = vpop.f32.mrf.mxu1 }
 0x1b6   :  { %v4200_v6 = vpop.f32.mrf.mxu0 }
 0x1b7   :  { %v4201_v63 = vadd.f32 %v4200_v6, %v4121_v35  ;;  %v16980_v6 = vld [vmem:[#allocation10_spill] sm:$0xff]  ;;  %v16983_v35 = vld [vmem:[#allocation11_spill] sm:$0xff] }
 0x1b8   :  { %v13142_v20 = vpop.f32.mrf.mxu0 }
 0x1b9   :  { %v16981_v20 = vld [vmem:[#allocation6_spill] sm:$0xff] }
 0x1bb   :  { %v14106_v23 = vpop.eup %14105 }
 0x1bc   :  { %3931 = vrot.lane.b32.xlu0 %v14106_v23, %s14237_s5  ;;  %v16982_v23 = vld [vmem:[#allocation8_spill] sm:$0xff] }
 0x1bd   :  { %v4277_v11 = vpop.f32.mrf.mxu1 }
 0x1be   :  { %v4278_v37 = vadd.f32 %v4277_v11, %v4201_v63  ;;  %v16984_v11 = vld [vmem:[#allocation13_spill] sm:$0xff]  ;;  %v16986_v63 = vld [vmem:[#allocation38_spill] sm:$0xff] }
 0x1bf   :  { %v13153_v12 = vpop.f32.mrf.mxu1 }
 0x1c0   :  { %v4360_v48 = vpop.f32.mrf.mxu0  ;;  %v16985_v12 = vld [vmem:[#allocation7_spill] sm:$0xff] }
 0x1c1   :  { %v4361_v54 = vadd.f32 %v4360_v48, %v4278_v37  ;;  %v16987_v48 = vld [vmem:[#allocation9_spill] sm:$0xff]  ;;  %v16989_v37 = vld [vmem:[#allocation14_spill] sm:$0xff] }
 0x1c2   :  { %v13164_v51 = vpop.f32.mrf.mxu0 }
 0x1c3   :  { %v16990_v51 = vld [vmem:[#allocation42_spill] sm:$0xff] }
 0x1c6   :  { %v4435_v25 = vpop.f32.mrf.mxu1 }
 0x1c7   :  { %v4436_v3 = vadd.f32 %v4435_v25, %v4361_v54  ;;  %v16992_v25 = vld [vmem:[#allocation43_spill] sm:$0xff] }
 0x1c8   :  { %v13175_v33 = vpop.f32.mrf.mxu1 }
 0x1c9   :  { %v4439_v49 = vadd.f32 %v4436_v3, %v3415_v42  ;;  %v16993_v33 = vld [vmem:[#allocation20_spill] sm:$0xff] }
 0x1cb   :  { %14107 = vtanh.f32 %v4439_v49  ;;  %v11781_v61 = vmul.f32 -1.442695, %v4439_v49 }
 0x1cc   :  { %14109 = vpow2.f32 %v11780_v50  ;;  %v16995_v50 = vld [vmem:[#allocation25_spill] sm:$0xff] }
 0x1d8   :  { %v14108_v9 = vpop.eup %14107 }
 0x1d9   :  { %4453 = vrot.lane.b32.xlu0 %v14108_v9, %s14237_s5  ;;  %v14110_v53 = vpop.eup %14109  ;;  %v16994_v9 = vld [vmem:[#allocation21_spill] sm:$0xff] }
 0x1da   :  { %v3921_v30 = vadd.f32 1.0, %v14110_v53 }
 0x1dc   :  { %14111 = vrcp.f32 %v3921_v30  ;;  %v16996_v30 = vld [vmem:[#allocation26_spill] sm:$0xff] }
 0x1dd   :  { %4448 = vrot.lane.b32.xlu0 %v3428_v47, %s14237_s5  ;;  %14113 = vpow2.f32 %v11781_v61 }
 0x1e9   :  { %v14112_v24 = vpop.eup %14111 }
 0x1ea   :  { %v14114_v32 = vpop.eup %14113  ;;  %v3929_v43 = vmul.f32 %v14112_v24, %v3927_v0  ;;  %v17005_v0 = vld [vmem:[#allocation15_spill] sm:$0xff] }
 0x1eb   :  { %v4443_v4 = vadd.f32 1.0, %v14114_v32  ;;  %v17000_v32 = vld [vmem:[#allocation33_spill] sm:$0xff] }
 0x1ed   :  { %14115 = vrcp.f32 %v4443_v4  ;;  %v17001_v4 = vld [vmem:[#allocation30_spill] sm:$0xff] }
 0x1fa   :  { %v14116_v39 = vpop.eup %14115 }
 0x22e   :  { %v3932_v45 = vpop.permute.xlu0 %3931 }
 0x22f   :  { %v3934_v41 = vmul.f32 %v14112_v24, %v3932_v45  ;;  %v16998_v45 = vld [vmem:[#allocation27_spill] sm:$0xff] }
 0x231   :  { %3936 = vrot.lane.b32.xlu1 %v3934_v41, %s14237_s5  ;;  %v16999_v41 = vld [vmem:[#allocation31_spill] sm:$0xff] }
 0x24b   :  { %v4454_v14 = vpop.permute.xlu0 %4453 }
 0x24c   :  { %v4456_v29 = vmul.f32 %v14116_v39, %v4454_v14  ;;  %v17003_v14 = vld [vmem:[#allocation12_spill] sm:$0xff] }
 0x24e   :  { %4458 = vrot.lane.b32.xlu1 %v4456_v29, %s14237_s5  ;;  %v17004_v29 = vld [vmem:[#allocation35_spill] sm:$0xff] }
 0x24f   :  { %v4449_v7 = vpop.permute.xlu0 %4448 }
 0x250   :  { %v4451_v18 = vmul.f32 %v14116_v39, %v4449_v7 }
 0x2a3   :  { %v3937_v8 = vpop.permute.xlu1 %3936 }
 0x2a4   :  { %v15764_v56 = vadd.f32 %v3937_v8, %v3929_v43  ;;  %v17006_v43 = vld [vmem:[#allocation36_spill] sm:$0xff]  ;;  %v17007_v8 = vld [vmem:[#allocation17_spill] sm:$0xff] }
 0x2a6   :  { %14117 = vtanh.f32 %v15764_v56 }
 0x2b3   :  { %v14118_v26 = vpop.eup %14117 }
 0x2b4   :  { %3942 = vrot.lane.b32.xlu0 %v14118_v26, %s14237_s5  ;;  %v17008_v26 = vld [vmem:[#allocation18_spill] sm:$0xff] }
 0x2c0   :  { %v4459_v62 = vpop.permute.xlu1 %4458 }
 0x2c1   :  { %v15768_v17 = vadd.f32 %v4459_v62, %v4451_v18 }
 0x2c3   :  { %14119 = vtanh.f32 %v15768_v17 }
 0x2d0   :  { %v14120_v21 = vpop.eup %14119 }
 0x2d1   :  { %4464 = vrot.lane.b32.xlu1 %v14120_v21, %s14237_s5 }
 0x326   :  { %v3943_v36 = vpop.permute.xlu0 %3942 }
 0x327   :  { %v3945_v59 = vmul.f32 %v14112_v24, %v3943_v36  ;;  %v16997_v24 = vld [vmem:[#allocation24_spill] sm:$0xff] }
 0x329   :  { %3947 = vrot.lane.b32.xlu0 %v3945_v59, %s14238_s21 }
 0x343   :  { %v4465_v2 = vpop.permute.xlu1 %4464 }
 0x344   :  { %v4467_v44 = vmul.f32 %v14116_v39, %v4465_v2  ;;  %v17002_v39 = vld [vmem:[#allocation32_spill] sm:$0xff] }
 0x346   :  { %4469 = vrot.lane.b32.xlu1 %v4467_v44, %s14238_s21 }
 0x39b   :  { %v3948_v57 = vpop.permute.xlu0 %3947 }
 0x39c   :  { %3950 = vst.msk [vmem:[%s16844_s7] sm:$0xff] %vm90_vm0, %v3948_v57  ;;  %v4473_v58 = vsel %vm90_vm0, %v3948_v57, 0 }
 0x39d   :  { %v4544_v15 = vand.u32 4294901760, %v4473_v58 }
 0x39f   :  { %v4545_v16 = vsub.f32 %v4473_v58, %v4544_v15  ;;  %13196 = vmatmul.mubr.f32.vlgmr.msra.gmra.mxu1 %v4544_v15 }
 0x3a0   :  { %13210 = vmatpush3.msra.mxu1 %v15220_v27  ;;  %13217 = vmatprep.mubr.msk.f32.mxu1 %vm14236_vm1, %v16979_v31 }
 0x3a1   :  { %v4546_v22 = vand.u32 4294901760, %v4545_v16  ;;  %13211 = vmatprep.subr.mxu1 %v16979_v31 }
 0x3a2   :  { %13212 = vmatpush3.msra.mxu1 %v15238_v28 }
 0x3a3   :  { %v4547_v55 = vsub.f32 %v4545_v16, %v4546_v22  ;;  %13213 = vmatprep.subr.mxu1 %v16979_v31 }
 0x3a4   :  { %13214 = vmatpush3.msra.mxu1 %v15263_v52 }
 0x3a5   :  { %13215 = vmatprep.subr.mxu1 %v16979_v31  ;;  %v4548_v13 = vand.u32 4294901760, %v4547_v55 }
 0x3a6   :  { %13216 = vmatpush3.msra.mxu1 %v16980_v6 }
 0x3a7   :  { %13218 = vmatmul.mubr.f32.vlgmr.msra.gmra.mxu1 %v4546_v22  ;;  %13231 = vmatprep.subr.mxu1 %v16979_v31 }
 0x3a8   :  { %13185 = vmatmul.mubr.f32.vlgmr.msra.gmra.mxu0 %v4548_v13  ;;  %13232 = vmatpush3.msra.mxu1 %v15220_v27 }
 0x3a9   :  { %13199 = vmatpush3.msra.mxu0 %v16981_v20  ;;  %13233 = vmatprep.subr.mxu1 %v16979_v31 }
 0x3aa   :  { %13200 = vmatprep.subr.mxu0 %v16979_v31  ;;  %13234 = vmatpush3.msra.mxu1 %v15238_v28 }
 0x3ab   :  { %13201 = vmatpush3.msra.mxu0 %v16982_v23  ;;  %13235 = vmatprep.subr.mxu1 %v16979_v31 }
 0x3ac   :  { %13202 = vmatprep.subr.mxu0 %v16979_v31  ;;  %13236 = vmatpush3.msra.mxu1 %v15263_v52 }
 0x3ad   :  { %13203 = vmatpush3.msra.mxu0 %v16983_v35  ;;  %13237 = vmatprep.subr.mxu1 %v16979_v31 }
 0x3ae   :  { %13204 = vmatprep.subr.mxu0 %v16979_v31  ;;  %13206 = vmatprep.mubr.msk.f32.mxu0 %vm14236_vm1, %v16979_v31 }
 0x3af   :  { %13205 = vmatpush3.msra.mxu0 %v16984_v11  ;;  %13238 = vmatpush3.msra.mxu1 %v16980_v6 }
 0x3b0   :  { %13239 = vmatprep.mubr.msk.f32.mxu1 %vm14236_vm1, %v16979_v31  ;;  %13207 = vmatmul.mubr.f32.vlgmr.msra.gmra.mxu0 %v4545_v16 }
 0x3b1   :  { %13220 = vmatprep.subr.mxu0 %v16979_v31  ;;  %13240 = vmatmul.mubr.f32.vlgmr.msra.gmra.mxu1 %v4544_v15 }
 0x3b2   :  { %13253 = vmatprep.subr.mxu1 %v16979_v31  ;;  %13221 = vmatpush3.msra.mxu0 %v16985_v12 }
 0x3b3   :  { %13254 = vmatpush3.msra.mxu1 %v16986_v63  ;;  %13222 = vmatprep.subr.mxu0 %v16979_v31 }
 0x3b4   :  { %13255 = vmatprep.subr.mxu1 %v16979_v31  ;;  %13223 = vmatpush3.msra.mxu0 %v16987_v48 }
 0x3b5   :  { %13256 = vmatpush3.msra.mxu1 %v16988_v19  ;;  %13224 = vmatprep.subr.mxu0 %v16979_v31 }
 0x3b6   :  { %13257 = vmatprep.subr.mxu1 %v16979_v31  ;;  %13225 = vmatpush3.msra.mxu0 %v16989_v37 }
 0x3b7   :  { %13258 = vmatpush3.msra.mxu1 %v16990_v51  ;;  %13226 = vmatprep.subr.mxu0 %v16979_v31 }
 0x3b8   :  { %13259 = vmatprep.subr.mxu1 %v16979_v31  ;;  %13227 = vmatpush3.msra.mxu0 %v16991_v10  ;;  %v4470_v54 = vpop.permute.xlu1 %4469 }
 0x3b9   :  { %13228 = vmatprep.mubr.msk.f32.mxu0 %vm14236_vm1, %v16979_v31  ;;  %13260 = vmatpush3.msra.mxu1 %v16992_v25  ;;  %4472 = vst.msk [vmem:[%s16845_s8 + $0x38] sm:$0xff] %vm90_vm0, %v4470_v54  ;;  %v4990_v42 = vsel %vm90_vm0, %v4470_v54, 0 }
 0x3ba   :  { %13229 = vmatmul.mubr.f32.vlgmr.msra.gmra.mxu0 %v4544_v15  ;;  %13242 = vmatprep.subr.mxu0 %v16979_v31  ;;  %v5061_v3 = vand.u32 4294901760, %v4990_v42 }
 0x3bb   :  { %13261 = vmatprep.mubr.msk.f32.mxu1 %vm14236_vm1, %v16979_v31  ;;  %13275 = vmatprep.subr.mxu1 %v16979_v31 }
 0x3bc   :  { %13243 = vmatpush3.msra.mxu0 %v16993_v33  ;;  %13250 = vmatprep.mubr.msk.f32.mxu0 %vm14236_vm1, %v16979_v31  ;;  %v5062_v49 = vsub.f32 %v4990_v42, %v5061_v3 }
 0x3bd   :  { %13262 = vmatmul.mubr.f32.vlgmr.msra.gmra.mxu1 %v5061_v3  ;;  %13244 = vmatprep.subr.mxu0 %v16979_v31 }
 0x3be   :  { %13276 = vmatpush3.msra.mxu1 %v16993_v33  ;;  %13245 = vmatpush3.msra.mxu0 %v16994_v9  ;;  %v5063_v47 = vand.u32 4294901760, %v5062_v49 }
 0x3bf   :  { %13277 = vmatprep.subr.mxu1 %v16979_v31  ;;  %13246 = vmatprep.subr.mxu0 %v16979_v31 }
 0x3c0   :  { %13278 = vmatpush3.msra.mxu1 %v16994_v9  ;;  %13247 = vmatpush3.msra.mxu0 %v16995_v50  ;;  %v5064_v53 = vsub.f32 %v5062_v49, %v5063_v47 }
 0x3c1   :  { %13279 = vmatprep.subr.mxu1 %v16979_v31  ;;  %13248 = vmatprep.subr.mxu0 %v16979_v31 }
 0x3c2   :  { %13280 = vmatpush3.msra.mxu1 %v16995_v50  ;;  %13249 = vmatpush3.msra.mxu0 %v16996_v30  ;;  %v5065_v61 = vand.u32 4294901760, %v5064_v53 }
 0x3c3   :  { %13281 = vmatprep.subr.mxu1 %v16979_v31  ;;  %13283 = vmatprep.mubr.msk.f32.mxu1 %vm14236_vm1, %v16979_v31 }
 0x3c4   :  { %13282 = vmatpush3.msra.mxu1 %v16996_v30  ;;  %13264 = vmatprep.subr.mxu0 %v16979_v31 }
 0x3c5   :  { %13284 = vmatmul.mubr.f32.vlgmr.msra.gmra.mxu1 %v5063_v47  ;;  %13297 = vmatprep.subr.mxu1 %v16979_v31 }
 0x3c6   :  { %13251 = vmatmul.mubr.f32.vlgmr.msra.gmra.mxu0 %v5065_v61  ;;  %13298 = vmatpush3.msra.mxu1 %v16993_v33 }
 0x3c7   :  { %13265 = vmatpush3.msra.mxu0 %v16997_v24  ;;  %13299 = vmatprep.subr.mxu1 %v16979_v31 }
 0x3c8   :  { %13266 = vmatprep.subr.mxu0 %v16979_v31  ;;  %13300 = vmatpush3.msra.mxu1 %v16994_v9 }
 0x3c9   :  { %13267 = vmatpush3.msra.mxu0 %v16998_v45  ;;  %13301 = vmatprep.subr.mxu1 %v16979_v31 }
 0x3ca   :  { %13268 = vmatprep.subr.mxu0 %v16979_v31  ;;  %13302 = vmatpush3.msra.mxu1 %v16995_v50 }
 0x3cb   :  { %13269 = vmatpush3.msra.mxu0 %v16999_v41  ;;  %13303 = vmatprep.subr.mxu1 %v16979_v31 }
 0x3cc   :  { %13270 = vmatprep.subr.mxu0 %v16979_v31  ;;  %13272 = vmatprep.mubr.msk.f32.mxu0 %vm14236_vm1, %v16979_v31 }
 0x3cd   :  { %13271 = vmatpush3.msra.mxu0 %v17000_v32  ;;  %13304 = vmatpush3.msra.mxu1 %v16996_v30 }
 0x3ce   :  { %13305 = vmatprep.mubr.msk.f32.mxu1 %vm14236_vm1, %v16979_v31  ;;  %13273 = vmatmul.mubr.f32.vlgmr.msra.gmra.mxu0 %v5062_v49  ;;  %v17009_v49 = vld [vmem:[#allocation66_spill] sm:$0xff] }
 0x3cf   :  { %13286 = vmatprep.subr.mxu0 %v16979_v31  ;;  %13306 = vmatmul.mubr.f32.vlgmr.msra.gmra.mxu1 %v5061_v3 }
 0x3d0   :  { %13287 = vmatpush3.msra.mxu0 %v17001_v4  ;;  %13294 = vmatprep.mubr.msk.f32.mxu0 %vm14236_vm1, %v16979_v31 }
 0x3d1   :  { %13288 = vmatprep.subr.mxu0 %v16979_v31  ;;  %13319 = vmatprep.subr.mxu1 %v16979_v31 }
 0x3d2   :  { %13289 = vmatpush3.msra.mxu0 %v17002_v39  ;;  %13320 = vmatpush3.msra.mxu1 %v17003_v14 }
 0x3d3   :  { %13290 = vmatprep.subr.mxu0 %v16979_v31  ;;  %13321 = vmatprep.subr.mxu1 %v16979_v31 }
 0x3d4   :  { %13291 = vmatpush3.msra.mxu0 %v17004_v29  ;;  %13322 = vmatpush3.msra.mxu1 %v17005_v0 }
 0x3d5   :  { %13292 = vmatprep.subr.mxu0 %v16979_v31  ;;  %13323 = vmatprep.subr.mxu1 %v16979_v31 }
 0x3d6   :  { %13293 = vmatpush3.msra.mxu0 %v17006_v43  ;;  %13324 = vmatpush3.msra.mxu1 %v17007_v8 }
 0x3d7   :  { %13295 = vmatmul.mubr.f32.vlgmr.msra.gmra.mxu0 %v5061_v3  ;;  %13325 = vmatprep.subr.mxu1 %v16979_v31 }
 0x3d8   :  { %13326 = vmatpush3.msra.mxu1 %v17008_v26  ;;  %13308 = vmatprep.subr.mxu0 %v16979_v31 }
 0x3d9   :  { %13327 = vmatprep.mubr.msk.f32.mxu1 %vm14236_vm1, %v16979_v31  ;;  %13341 = vmatprep.subr.mxu1 %v16979_v31 }
 0x3da   :  { %13309 = vmatpush3.msra.mxu0 %v15220_v27  ;;  %13316 = vmatprep.mubr.msk.f32.mxu0 %vm14236_vm1, %v16979_v31 }
 0x3db   :  { %13310 = vmatprep.subr.mxu0 %v16979_v31 }
 0x3dc   :  { %13311 = vmatpush3.msra.mxu0 %v15238_v28 }
 0x3dd   :  { %13312 = vmatprep.subr.mxu0 %v16979_v31 }
 0x3de   :  { %13313 = vmatpush3.msra.mxu0 %v15263_v52 }
 0x3df   :  { %13314 = vmatprep.subr.mxu0 %v16979_v31 }
 0x3e0   :  { %13315 = vmatpush3.msra.mxu0 %v16980_v6 }
 0x3e1   :  { %13330 = vmatprep.subr.mxu0 %v16979_v31 }
 0x45f   :  { %v4641_v7 = vpop.f32.mrf.mxu1 }
 0x461   :  { %v13197_v18 = vpop.f32.mrf.mxu1 }
 0x467   :  { %v4798_v62 = vpop.f32.mrf.mxu1 }
 0x468   :  { %v4550_v21 = vpop.f32.mrf.mxu0 }
 0x469   :  { %v13219_v36 = vpop.f32.mrf.mxu1  ;;  %v4642_v58 = vadd.f32 %v4641_v7, %v4550_v21 }
 0x46a   :  { %v13186_v59 = vpop.f32.mrf.mxu0 }
 0x470   :  { %v4721_v2 = vpop.f32.mrf.mxu0 }
 0x471   :  { %v4956_v44 = vpop.f32.mrf.mxu1  ;;  %v4722_v16 = vadd.f32 %v4721_v2, %v4642_v58 }
 0x472   :  { %v13208_v57 = vpop.f32.mrf.mxu0 }
 0x473   :  { %v13241_v15 = vpop.f32.mrf.mxu1  ;;  %v4799_v22 = vadd.f32 %v4798_v62, %v4722_v16 }
 0x47a   :  { %v4881_v55 = vpop.f32.mrf.mxu0 }
 0x47b   :  { %v4882_v13 = vadd.f32 %v4881_v55, %v4799_v22 }
 0x47c   :  { %v13230_v54 = vpop.f32.mrf.mxu0 }
 0x47d   :  { %v4957_v42 = vadd.f32 %v4956_v44, %v4882_v13  ;;  %v5158_v3 = vpop.f32.mrf.mxu1 }
 0x47f   :  { %v4960_v47 = vadd.f32 %v4957_v42, %v17009_v49  ;;  %v13263_v53 = vpop.f32.mrf.mxu1 }
 0x481   :  { %14121 = vtanh.f32 %v4960_v47  ;;  %v11782_v54 = vmul.f32 -1.442695, %v4960_v47 }
 0x485   :  { %v5315_v61 = vpop.f32.mrf.mxu1 }
 0x486   :  { %v5067_v18 = vpop.f32.mrf.mxu0 }
 0x487   :  { %v13285_v36 = vpop.f32.mrf.mxu1  ;;  %v5159_v7 = vadd.f32 %v5158_v3, %v5067_v18 }
 0x488   :  { %v13252_v59 = vpop.f32.mrf.mxu0 }
 0x48e   :  { %v14122_v34 = vpop.eup %14121  ;;  %v5238_v46 = vpop.f32.mrf.mxu0 }
 0x48f   :  { %v5473_v57 = vpop.f32.mrf.mxu1  ;;  %4970 = vrot.lane.b32.xlu0 %v14122_v34, %s14237_s5  ;;  %v5239_v2 = vadd.f32 %v5238_v46, %v5159_v7 }
 0x490   :  { %v13274_v62 = vpop.f32.mrf.mxu0 }
 0x491   :  { %v13307_v21 = vpop.f32.mrf.mxu1  ;;  %v5316_v58 = vadd.f32 %v5315_v61, %v5239_v2 }
 0x497   :  { %v5398_v44 = vpop.f32.mrf.mxu0 }
 0x498   :  { %v5399_v15 = vadd.f32 %v5398_v44, %v5316_v58 }
 0x499   :  { %v13296_v16 = vpop.f32.mrf.mxu0 }
 0x49a   :  { %v5474_v22 = vadd.f32 %v5473_v57, %v5399_v15 }
 0x49c   :  { %v5477_v55 = vadd.f32 %v5474_v22, %v15746_v40 }
 0x49e   :  { %14123 = vtanh.f32 %v5477_v55  ;;  %v11783_v34 = vmul.f32 -1.442695, %v5477_v55 }
 0x49f   :  { %14125 = vpow2.f32 %v11782_v54 }
 0x4ab   :  { %v14124_v13 = vpop.eup %14123 }
 0x4ac   :  { %5487 = vrot.lane.b32.xlu1 %v14124_v13, %s14237_s5  ;;  %v14126_v42 = vpop.eup %14125 }
 0x4ad   :  { %v4964_v49 = vadd.f32 1.0, %v14126_v42 }
 0x4af   :  { %14127 = vrcp.f32 %v4964_v49 }
 0x4b0   :  { %14129 = vpow2.f32 %v11783_v34 }
 0x4bc   :  { %v14128_v3 = vpop.eup %14127 }
 0x4bd   :  { %v14130_v61 = vpop.eup %14129  ;;  %v4968_v47 = vmul.f32 %v14128_v3, %v15764_v56 }
 0x4be   :  { %v5481_v18 = vadd.f32 1.0, %v14130_v61 }
 0x4c0   :  { %14131 = vrcp.f32 %v5481_v18 }
 0x4cd   :  { %v14132_v40 = vpop.eup %14131 }
 0x4ce   :  { %v5485_v21 = vmul.f32 %v14132_v40, %v15768_v17 }
 0x501   :  { %v4971_v46 = vpop.permute.xlu0 %4970 }
 0x502   :  { %v4973_v53 = vmul.f32 %v14128_v3, %v4971_v46 }
 0x504   :  { %4975 = vrot.lane.b32.xlu0 %v4973_v53, %s14237_s5 }
 0x51e   :  { %v5488_v36 = vpop.permute.xlu1 %5487 }
 0x51f   :  { %v5490_v59 = vmul.f32 %v14132_v40, %v5488_v36 }
 0x521   :  { %5492 = vrot.lane.b32.xlu1 %v5490_v59, %s14237_s5 }
 0x576   :  { %v4976_v57 = vpop.permute.xlu0 %4975 }
 0x577   :  { %v15911_v7 = vadd.f32 %v4976_v57, %v4968_v47  ;;  %v17010_v57 = vld [vmem:[#allocation19_spill] sm:$0xff] }
 0x579   :  { %14133 = vtanh.f32 %v15911_v7 }
 0x586   :  { %v14134_v62 = vpop.eup %14133 }
 0x587   :  { %4981 = vrot.lane.b32.xlu0 %v14134_v62, %s14237_s5  ;;  %v17011_v62 = vld [vmem:[#allocation23_spill] sm:$0xff] }
 0x593   :  { %v5493_v2 = vpop.permute.xlu1 %5492 }
 0x594   :  { %v15916_v58 = vadd.f32 %v5493_v2, %v5485_v21  ;;  %v393_v21 = vadd.f32 %v17011_v62, %v17010_v57  ;;  %v17012_v2 = vld [vmem:[#allocation37_spill] sm:$0xff] }
 0x596   :  { %14135 = vtanh.f32 %v15916_v58 }
 0x5a3   :  { %v14136_v44 = vpop.eup %14135 }
 0x5a4   :  { %5498 = vrot.lane.b32.xlu1 %v14136_v44, %s14237_s5  ;;  %v517_v44 = vadd.f32 %v17012_v2, %v393_v21  ;;  %v17019_v21 = vld [vmem:[#allocation61_spill] sm:$0xff] }
 0x5f9   :  { %v4982_v15 = vpop.permute.xlu0 %4981 }
 0x5fa   :  { %v4984_v56 = vmul.f32 %v14128_v3, %v4982_v15 }
 0x5fc   :  { %4986 = vrot.lane.b32.xlu0 %v4984_v56, %s14238_s21 }
 0x616   :  { %v5499_v16 = vpop.permute.xlu1 %5498 }
 0x617   :  { %v5501_v22 = vmul.f32 %v14132_v40, %v5499_v16  ;;  %v17013_v16 = vld [vmem:[#allocation41_spill] sm:$0xff] }
 0x619   :  { %5503 = vrot.lane.b32.xlu1 %v5501_v22, %s14238_s21  ;;  %v645_v22 = vadd.f32 %v17013_v16, %v517_v44  ;;  %v17020_v16 = vld [vmem:[#allocation65_spill] sm:$0xff] }
 0x66e   :  { %v4987_v55 = vpop.permute.xlu0 %4986 }
 0x66f   :  { %4989 = vst.msk [vmem:[%s16844_s7 + $0x8] sm:$0xff] %vm90_vm0, %v4987_v55  ;;  %v5507_v17 = vsel %vm90_vm0, %v4987_v55, 0 }
 0x670   :  { %v5578_v13 = vand.u32 4294901760, %v5507_v17 }
 0x672   :  { %v5579_v54 = vsub.f32 %v5507_v17, %v5578_v13  ;;  %13328 = vmatmul.mubr.f32.vlgmr.msra.gmra.mxu1 %v5578_v13 }
 0x673   :  { %13342 = vmatpush3.msra.mxu1 %v15220_v27  ;;  %13349 = vmatprep.mubr.msk.f32.mxu1 %vm14236_vm1, %v16979_v31 }
 0x674   :  { %v5580_v42 = vand.u32 4294901760, %v5579_v54  ;;  %13343 = vmatprep.subr.mxu1 %v16979_v31 }
 0x675   :  { %13344 = vmatpush3.msra.mxu1 %v15238_v28 }
 0x676   :  { %v5581_v49 = vsub.f32 %v5579_v54, %v5580_v42  ;;  %13345 = vmatprep.subr.mxu1 %v16979_v31 }
 0x677   :  { %13346 = vmatpush3.msra.mxu1 %v15263_v52 }
 0x678   :  { %v5582_v34 = vand.u32 4294901760, %v5581_v49  ;;  %13347 = vmatprep.subr.mxu1 %v16979_v31 }
 0x679   :  { %13348 = vmatpush3.msra.mxu1 %v16980_v6 }
 0x67a   :  { %13350 = vmatmul.mubr.f32.vlgmr.msra.gmra.mxu1 %v5580_v42  ;;  %13363 = vmatprep.subr.mxu1 %v16979_v31  ;;  %v17015_v42 = vld [vmem:[#allocation49_spill] sm:$0xff] }
 0x67b   :  { %13317 = vmatmul.mubr.f32.vlgmr.msra.gmra.mxu0 %v5582_v34  ;;  %13364 = vmatpush3.msra.mxu1 %v15220_v27  ;;  %v17016_v34 = vld [vmem:[#allocation53_spill] sm:$0xff] }
 0x67c   :  { %13331 = vmatpush3.msra.mxu0 %v16981_v20  ;;  %13365 = vmatprep.subr.mxu1 %v16979_v31 }
 0x67d   :  { %13332 = vmatprep.subr.mxu0 %v16979_v31  ;;  %13366 = vmatpush3.msra.mxu1 %v15238_v28 }
 0x67e   :  { %13333 = vmatpush3.msra.mxu0 %v16982_v23  ;;  %13367 = vmatprep.subr.mxu1 %v16979_v31 }
 0x67f   :  { %13334 = vmatprep.subr.mxu0 %v16979_v31  ;;  %13368 = vmatpush3.msra.mxu1 %v15263_v52 }
 0x680   :  { %13335 = vmatpush3.msra.mxu0 %v16983_v35  ;;  %13369 = vmatprep.subr.mxu1 %v16979_v31 }
 0x681   :  { %13336 = vmatprep.subr.mxu0 %v16979_v31  ;;  %13338 = vmatprep.mubr.msk.f32.mxu0 %vm14236_vm1, %v16979_v31 }
 0x682   :  { %13337 = vmatpush3.msra.mxu0 %v16984_v11  ;;  %13370 = vmatpush3.msra.mxu1 %v16980_v6 }
 0x683   :  { %13371 = vmatprep.mubr.msk.f32.mxu1 %vm14236_vm1, %v16979_v31  ;;  %13339 = vmatmul.mubr.f32.vlgmr.msra.gmra.mxu0 %v5579_v54 }
 0x684   :  { %13352 = vmatprep.subr.mxu0 %v16979_v31  ;;  %13372 = vmatmul.mubr.f32.vlgmr.msra.gmra.mxu1 %v5578_v13 }
 0x685   :  { %13385 = vmatprep.subr.mxu1 %v16979_v31  ;;  %13353 = vmatpush3.msra.mxu0 %v16985_v12 }
 0x686   :  { %13386 = vmatpush3.msra.mxu1 %v16986_v63  ;;  %13354 = vmatprep.subr.mxu0 %v16979_v31 }
 0x687   :  { %13387 = vmatprep.subr.mxu1 %v16979_v31  ;;  %13355 = vmatpush3.msra.mxu0 %v16987_v48 }
 0x688   :  { %13388 = vmatpush3.msra.mxu1 %v16988_v19  ;;  %13356 = vmatprep.subr.mxu0 %v16979_v31 }
 0x689   :  { %13389 = vmatprep.subr.mxu1 %v16979_v31  ;;  %13357 = vmatpush3.msra.mxu0 %v16989_v37 }
 0x68a   :  { %13390 = vmatpush3.msra.mxu1 %v16990_v51  ;;  %13358 = vmatprep.subr.mxu0 %v16979_v31 }
 0x68b   :  { %v5504_v3 = vpop.permute.xlu1 %5503  ;;  %13391 = vmatprep.subr.mxu1 %v16979_v31  ;;  %13359 = vmatpush3.msra.mxu0 %v16991_v10 }
 0x68c   :  { %5506 = vst.msk [vmem:[%s16845_s8 + $0x30] sm:$0xff] %vm90_vm0, %v5504_v3  ;;  %v6024_v46 = vsel %vm90_vm0, %v5504_v3, 0  ;;  %13360 = vmatprep.mubr.msk.f32.mxu0 %vm14236_vm1, %v16979_v31  ;;  %13392 = vmatpush3.msra.mxu1 %v16992_v25 }
 0x68d   :  { %v6095_v53 = vand.u32 4294901760, %v6024_v46  ;;  %13361 = vmatmul.mubr.f32.vlgmr.msra.gmra.mxu0 %v5578_v13  ;;  %13374 = vmatprep.subr.mxu0 %v16979_v31  ;;  %v17014_v13 = vld [vmem:[#allocation47_spill] sm:$0xff] }
 0x68e   :  { %13393 = vmatprep.mubr.msk.f32.mxu1 %vm14236_vm1, %v16979_v31  ;;  %13407 = vmatprep.subr.mxu1 %v16979_v31  ;;  %v780_v54 = vadd.f32 %v17014_v13, %v645_v22 }
 0x68f   :  { %v6096_v61 = vsub.f32 %v6024_v46, %v6095_v53  ;;  %13375 = vmatpush3.msra.mxu0 %v16993_v33  ;;  %13394 = vmatmul.mubr.f32.vlgmr.msra.gmra.mxu1 %v6095_v53 }
 0x690   :  { %13408 = vmatpush3.msra.mxu1 %v16993_v33  ;;  %13376 = vmatprep.subr.mxu0 %v16979_v31  ;;  %v897_v49 = vadd.f32 %v17015_v42, %v780_v54 }
 0x691   :  { %v6097_v18 = vand.u32 4294901760, %v6096_v61  ;;  %13409 = vmatprep.subr.mxu1 %v16979_v31  ;;  %13377 = vmatpush3.msra.mxu0 %v16994_v9 }
 0x692   :  { %13410 = vmatpush3.msra.mxu1 %v16994_v9  ;;  %13378 = vmatprep.subr.mxu0 %v16979_v31  ;;  %v1050_v3 = vadd.f32 %v17016_v34, %v897_v49 }
 0x693   :  { %v6098_v40 = vsub.f32 %v6096_v61, %v6097_v18  ;;  %13411 = vmatprep.subr.mxu1 %v16979_v31  ;;  %13379 = vmatpush3.msra.mxu0 %v16995_v50 }
 0x694   :  { %13412 = vmatpush3.msra.mxu1 %v16995_v50  ;;  %13380 = vmatprep.subr.mxu0 %v16979_v31 }
 0x695   :  { %v6099_v36 = vand.u32 4294901760, %v6098_v40  ;;  %13413 = vmatprep.subr.mxu1 %v16979_v31  ;;  %13381 = vmatpush3.msra.mxu0 %v16996_v30 }
 0x696   :  { %13414 = vmatpush3.msra.mxu1 %v16996_v30  ;;  %13415 = vmatprep.mubr.msk.f32.mxu1 %vm14236_vm1, %v16979_v31 }
 0x697   :  { %13382 = vmatprep.mubr.msk.f32.mxu0 %vm14236_vm1, %v16979_v31  ;;  %13396 = vmatprep.subr.mxu0 %v16979_v31 }
 0x698   :  { %13416 = vmatmul.mubr.f32.vlgmr.msra.gmra.mxu1 %v6097_v18  ;;  %13429 = vmatprep.subr.mxu1 %v16979_v31 }
 0x699   :  { %13383 = vmatmul.mubr.f32.vlgmr.msra.gmra.mxu0 %v6099_v36  ;;  %13430 = vmatpush3.msra.mxu1 %v16993_v33  ;;  %v17018_v36 = vld [vmem:[#allocation59_spill] sm:$0xff] }
 0x69a   :  { %13397 = vmatpush3.msra.mxu0 %v16997_v24  ;;  %13431 = vmatprep.subr.mxu1 %v16979_v31 }
 0x69b   :  { %13398 = vmatprep.subr.mxu0 %v16979_v31  ;;  %13432 = vmatpush3.msra.mxu1 %v16994_v9 }
 0x69c   :  { %13399 = vmatpush3.msra.mxu0 %v16998_v45  ;;  %13433 = vmatprep.subr.mxu1 %v16979_v31 }
 0x69d   :  { %13400 = vmatprep.subr.mxu0 %v16979_v31  ;;  %13434 = vmatpush3.msra.mxu1 %v16995_v50 }
 0x69e   :  { %13401 = vmatpush3.msra.mxu0 %v16999_v41  ;;  %13435 = vmatprep.subr.mxu1 %v16979_v31 }
 0x69f   :  { %13402 = vmatprep.subr.mxu0 %v16979_v31  ;;  %13404 = vmatprep.mubr.msk.f32.mxu0 %vm14236_vm1, %v16979_v31 }
 0x6a0   :  { %13403 = vmatpush3.msra.mxu0 %v17000_v32  ;;  %13436 = vmatpush3.msra.mxu1 %v16996_v30 }
 0x6a1   :  { %13437 = vmatprep.mubr.msk.f32.mxu1 %vm14236_vm1, %v16979_v31  ;;  %13405 = vmatmul.mubr.f32.vlgmr.msra.gmra.mxu0 %v6096_v61 }
 0x6a2   :  { %13418 = vmatprep.subr.mxu0 %v16979_v31  ;;  %13438 = vmatmul.mubr.f32.vlgmr.msra.gmra.mxu1 %v6095_v53 }
 0x6a3   :  { %13419 = vmatpush3.msra.mxu0 %v17001_v4  ;;  %13426 = vmatprep.mubr.msk.f32.mxu0 %vm14236_vm1, %v16979_v31 }
 0x6a4   :  { %13420 = vmatprep.subr.mxu0 %v16979_v31  ;;  %13451 = vmatprep.subr.mxu1 %v16979_v31 }
 0x6a5   :  { %13421 = vmatpush3.msra.mxu0 %v17002_v39  ;;  %13452 = vmatpush3.msra.mxu1 %v17003_v14 }
 0x6a6   :  { %13422 = vmatprep.subr.mxu0 %v16979_v31  ;;  %13453 = vmatprep.subr.mxu1 %v16979_v31 }
 0x6a7   :  { %13423 = vmatpush3.msra.mxu0 %v17004_v29  ;;  %13454 = vmatpush3.msra.mxu1 %v17005_v0 }
 0x6a8   :  { %13424 = vmatprep.subr.mxu0 %v16979_v31  ;;  %13455 = vmatprep.subr.mxu1 %v16979_v31 }
 0x6a9   :  { %13425 = vmatpush3.msra.mxu0 %v17006_v43  ;;  %13456 = vmatpush3.msra.mxu1 %v17007_v8 }
 0x6aa   :  { %13427 = vmatmul.mubr.f32.vlgmr.msra.gmra.mxu0 %v6095_v53  ;;  %13457 = vmatprep.subr.mxu1 %v16979_v31  ;;  %v17017_v53 = vld [vmem:[#allocation55_spill] sm:$0xff] }
 0x6ab   :  { %13458 = vmatpush3.msra.mxu1 %v17008_v26  ;;  %13440 = vmatprep.subr.mxu0 %v16979_v31  ;;  %v1203_v61 = vadd.f32 %v17017_v53, %v1050_v3  ;;  %v16067_v3 = vld [vmem:[%s16843_s6] ss:$0 sm:$0xff] }
 0x6ac   :  { %13459 = vmatprep.mubr.msk.f32.mxu1 %vm14236_vm1, %v16979_v31  ;;  %13473 = vmatprep.subr.mxu1 %v16979_v31 }
 0x6ad   :  { %13441 = vmatpush3.msra.mxu0 %v15220_v27  ;;  %13448 = vmatprep.mubr.msk.f32.mxu0 %vm14236_vm1, %v16979_v31 }
 0x6ae   :  { %13442 = vmatprep.subr.mxu0 %v16979_v31 }
 0x6af   :  { %13443 = vmatpush3.msra.mxu0 %v15238_v28 }
 0x6b0   :  { %13444 = vmatprep.subr.mxu0 %v16979_v31 }
 0x6b1   :  { %13445 = vmatpush3.msra.mxu0 %v15263_v52 }
 0x6b2   :  { %13446 = vmatprep.subr.mxu0 %v16979_v31 }
 0x6b3   :  { %13447 = vmatpush3.msra.mxu0 %v16980_v6 }
 0x6b4   :  { %13462 = vmatprep.subr.mxu0 %v16979_v31 }
 0x732   :  { %v5675_v59 = vpop.f32.mrf.mxu1 }
 0x734   :  { %v13329_v47 = vpop.f32.mrf.mxu1 }
 0x735   :  { %v1327_v47 = vadd.f32 %v17018_v36, %v1203_v61 }
 0x737   :  { %v1455_v2 = vadd.f32 %v17019_v21, %v1327_v47 }
 0x73a   :  { %v5832_v15 = vpop.f32.mrf.mxu1 }
 0x73b   :  { %v5584_v56 = vpop.f32.mrf.mxu0 }
 0x73c   :  { %v13351_v55 = vpop.f32.mrf.mxu1  ;;  %v5676_v57 = vadd.f32 %v5675_v59, %v5584_v56 }
 0x73d   :  { %v13318_v17 = vpop.f32.mrf.mxu0  ;;  %v1590_v55 = vadd.f32 %v17020_v16, %v1455_v2 }
 0x73e   :  { %v17021_v17 = vld [vmem:[#allocation68_spill] sm:$0xff] }
 0x73f   :  { %v1707_v22 = vadd.f32 %v17021_v17, %v1590_v55 }
 0x741   :  { %v1749_v59 = vadd.f32 %v16067_v3, %v1707_v22 }
 0x743   :  { %v5755_v46 = vpop.f32.mrf.mxu0 }
 0x744   :  { %v5990_v18 = vpop.f32.mrf.mxu1  ;;  %v5756_v44 = vadd.f32 %v5755_v46, %v5676_v57 }
 0x745   :  { %v13340_v40 = vpop.f32.mrf.mxu0 }
 0x746   :  { %v13373_v62 = vpop.f32.mrf.mxu1  ;;  %v5833_v13 = vadd.f32 %v5832_v15, %v5756_v44 }
 0x74d   :  { %v5915_v54 = vpop.f32.mrf.mxu0 }
 0x74e   :  { %v5916_v42 = vadd.f32 %v5915_v54, %v5833_v13 }
 0x74f   :  { %v6192_v49 = vpop.f32.mrf.mxu1  ;;  %v13362_v34 = vpop.f32.mrf.mxu0 }
 0x750   :  { %v5991_v56 = vadd.f32 %v5990_v18, %v5916_v42 }
 0x751   :  { %v13395_v53 = vpop.f32.mrf.mxu1 }
 0x752   :  { %v5994_v61 = vadd.f32 %v5991_v56, %v1749_v59 }
 0x754   :  { %14137 = vtanh.f32 %v5994_v61  ;;  %v11784_v34 = vmul.f32 -1.442695, %v5994_v61 }
 0x758   :  { %v6349_v46 = vpop.f32.mrf.mxu1 }
 0x759   :  { %v6101_v40 = vpop.f32.mrf.mxu0 }
 0x75a   :  { %v13417_v36 = vpop.f32.mrf.mxu1  ;;  %v6193_v21 = vadd.f32 %v6192_v49, %v6101_v40 }
 0x75b   :  { %v13384_v47 = vpop.f32.mrf.mxu0 }
 0x761   :  { %v14138_v15 = vpop.eup %14137  ;;  %v6272_v57 = vpop.f32.mrf.mxu0 }
 0x762   :  { %v6507_v62 = vpop.f32.mrf.mxu1  ;;  %6004 = vrot.lane.b32.xlu0 %v14138_v15, %s14237_s5  ;;  %v6273_v16 = vadd.f32 %v6272_v57, %v6193_v21 }
 0x763   :  { %v13406_v2 = vpop.f32.mrf.mxu0 }
 0x764   :  { %v13439_v44 = vpop.f32.mrf.mxu1  ;;  %v6350_v55 = vadd.f32 %v6349_v46, %v6273_v16 }
 0x76a   :  { %v6432_v17 = vpop.f32.mrf.mxu0 }
 0x76b   :  { %v6433_v22 = vadd.f32 %v6432_v17, %v6350_v55 }
 0x76c   :  { %v13428_v18 = vpop.f32.mrf.mxu0 }
 0x76d   :  { %v6508_v13 = vadd.f32 %v6507_v62, %v6433_v22 }
 0x76f   :  { %v6511_v54 = vadd.f32 %v6508_v13, %v15736_v60 }
 0x771   :  { %14139 = vtanh.f32 %v6511_v54  ;;  %v11785_v49 = vmul.f32 -1.442695, %v6511_v54 }
 0x772   :  { %14141 = vpow2.f32 %v11784_v34 }
 0x77e   :  { %v14140_v42 = vpop.eup %14139 }
 0x77f   :  { %6521 = vrot.lane.b32.xlu1 %v14140_v42, %s14237_s5  ;;  %v14142_v59 = vpop.eup %14141 }
 0x780   :  { %v5998_v56 = vadd.f32 1.0, %v14142_v59 }
 0x782   :  { %14143 = vrcp.f32 %v5998_v56 }
 0x783   :  { %14145 = vpow2.f32 %v11785_v49 }
 0x78f   :  { %v14144_v53 = vpop.eup %14143 }
 0x790   :  { %v14146_v36 = vpop.eup %14145  ;;  %v6002_v61 = vmul.f32 %v14144_v53, %v15911_v7 }
 0x791   :  { %v6515_v47 = vadd.f32 1.0, %v14146_v36 }
 0x793   :  { %14147 = vrcp.f32 %v6515_v47 }
 0x7a0   :  { %v14148_v60 = vpop.eup %14147 }
 0x7a1   :  { %v6519_v44 = vmul.f32 %v14148_v60, %v15916_v58 }
 0x7d4   :  { %v6005_v40 = vpop.permute.xlu0 %6004 }
 0x7d5   :  { %v6007_v46 = vmul.f32 %v14144_v53, %v6005_v40 }
 0x7d7   :  { %6009 = vrot.lane.b32.xlu0 %v6007_v46, %s14237_s5 }
 0x7f1   :  { %v6522_v15 = vpop.permute.xlu1 %6521 }
 0x7f2   :  { %v6524_v57 = vmul.f32 %v14148_v60, %v6522_v15 }
 0x7f4   :  { %6526 = vrot.lane.b32.xlu1 %v6524_v57, %s14237_s5 }
 0x849   :  { %v6010_v62 = vpop.permute.xlu0 %6009 }
 0x84a   :  { %v16076_v21 = vadd.f32 %v6010_v62, %v6002_v61 }
 0x84c   :  { %14149 = vtanh.f32 %v16076_v21 }
 0x859   :  { %v14150_v2 = vpop.eup %14149 }
 0x85a   :  { %6015 = vrot.lane.b32.xlu0 %v14150_v2, %s14237_s5 }
 0x866   :  { %v6527_v16 = vpop.permute.xlu1 %6526 }
 0x867   :  { %v16081_v55 = vadd.f32 %v6527_v16, %v6519_v44 }
 0x869   :  { %14151 = vtanh.f32 %v16081_v55 }
 0x876   :  { %v14152_v17 = vpop.eup %14151 }
 0x877   :  { %6532 = vrot.lane.b32.xlu1 %v14152_v17, %s14237_s5 }
 0x8cc   :  { %v6016_v22 = vpop.permute.xlu0 %6015 }
 0x8cd   :  { %v6018_v7 = vmul.f32 %v14144_v53, %v6016_v22 }
 0x8cf   :  { %6020 = vrot.lane.b32.xlu0 %v6018_v7, %s14238_s21 }
 0x8e9   :  { %v6533_v18 = vpop.permute.xlu1 %6532 }
 0x8ea   :  { %v6535_v13 = vmul.f32 %v14148_v60, %v6533_v18 }
 0x8ec   :  { %6537 = vrot.lane.b32.xlu1 %v6535_v13, %s14238_s21 }
 0x941   :  { %v6021_v54 = vpop.permute.xlu0 %6020 }
 0x942   :  { %6023 = vst.msk [vmem:[%s16844_s7 + $0x10] sm:$0xff] %vm90_vm0, %v6021_v54  ;;  %v6541_v58 = vsel %vm90_vm0, %v6021_v54, 0 }
 0x943   :  { %v6612_v42 = vand.u32 4294901760, %v6541_v58 }
 0x945   :  { %v6613_v34 = vsub.f32 %v6541_v58, %v6612_v42  ;;  %13460 = vmatmul.mubr.f32.vlgmr.msra.gmra.mxu1 %v6612_v42 }
 0x946   :  { %13474 = vmatpush3.msra.mxu1 %v15220_v27  ;;  %13481 = vmatprep.mubr.msk.f32.mxu1 %vm14236_vm1, %v16979_v31 }
 0x947   :  { %v6614_v59 = vand.u32 4294901760, %v6613_v34  ;;  %13475 = vmatprep.subr.mxu1 %v16979_v31 }
 0x948   :  { %13476 = vmatpush3.msra.mxu1 %v15238_v28 }
 0x949   :  { %v6615_v56 = vsub.f32 %v6613_v34, %v6614_v59  ;;  %13477 = vmatprep.subr.mxu1 %v16979_v31 }
 0x94a   :  { %13478 = vmatpush3.msra.mxu1 %v15263_v52 }
 0x94b   :  { %v6616_v49 = vand.u32 4294901760, %v6615_v56  ;;  %13479 = vmatprep.subr.mxu1 %v16979_v31 }
 0x94c   :  { %13480 = vmatpush3.msra.mxu1 %v16980_v6 }
 0x94d   :  { %13482 = vmatmul.mubr.f32.vlgmr.msra.gmra.mxu1 %v6614_v59  ;;  %13495 = vmatprep.subr.mxu1 %v16979_v31 }
 0x94e   :  { %13449 = vmatmul.mubr.f32.vlgmr.msra.gmra.mxu0 %v6616_v49  ;;  %13496 = vmatpush3.msra.mxu1 %v15220_v27 }
 0x94f   :  { %13463 = vmatpush3.msra.mxu0 %v16981_v20  ;;  %13497 = vmatprep.subr.mxu1 %v16979_v31 }
 0x950   :  { %13464 = vmatprep.subr.mxu0 %v16979_v31  ;;  %13498 = vmatpush3.msra.mxu1 %v15238_v28 }
 0x951   :  { %13465 = vmatpush3.msra.mxu0 %v16982_v23  ;;  %13499 = vmatprep.subr.mxu1 %v16979_v31 }
 0x952   :  { %13466 = vmatprep.subr.mxu0 %v16979_v31  ;;  %13500 = vmatpush3.msra.mxu1 %v15263_v52 }
 0x953   :  { %13467 = vmatpush3.msra.mxu0 %v16983_v35  ;;  %13501 = vmatprep.subr.mxu1 %v16979_v31 }
 0x954   :  { %13468 = vmatprep.subr.mxu0 %v16979_v31  ;;  %13470 = vmatprep.mubr.msk.f32.mxu0 %vm14236_vm1, %v16979_v31 }
 0x955   :  { %13469 = vmatpush3.msra.mxu0 %v16984_v11  ;;  %13502 = vmatpush3.msra.mxu1 %v16980_v6 }
 0x956   :  { %13503 = vmatprep.mubr.msk.f32.mxu1 %vm14236_vm1, %v16979_v31  ;;  %13471 = vmatmul.mubr.f32.vlgmr.msra.gmra.mxu0 %v6613_v34 }
 0x957   :  { %13484 = vmatprep.subr.mxu0 %v16979_v31  ;;  %13504 = vmatmul.mubr.f32.vlgmr.msra.gmra.mxu1 %v6612_v42 }
 0x958   :  { %13517 = vmatprep.subr.mxu1 %v16979_v31  ;;  %13485 = vmatpush3.msra.mxu0 %v16985_v12 }
 0x959   :  { %13518 = vmatpush3.msra.mxu1 %v16986_v63  ;;  %13486 = vmatprep.subr.mxu0 %v16979_v31 }
 0x95a   :  { %13519 = vmatprep.subr.mxu1 %v16979_v31  ;;  %13487 = vmatpush3.msra.mxu0 %v16987_v48 }
 0x95b   :  { %13520 = vmatpush3.msra.mxu1 %v16988_v19  ;;  %13488 = vmatprep.subr.mxu0 %v16979_v31 }
 0x95c   :  { %13521 = vmatprep.subr.mxu1 %v16979_v31  ;;  %13489 = vmatpush3.msra.mxu0 %v16989_v37 }
 0x95d   :  { %13522 = vmatpush3.msra.mxu1 %v16990_v51  ;;  %13490 = vmatprep.subr.mxu0 %v16979_v31 }
 0x95e   :  { %v6538_v53 = vpop.permute.xlu1 %6537  ;;  %13523 = vmatprep.subr.mxu1 %v16979_v31  ;;  %13491 = vmatpush3.msra.mxu0 %v16991_v10 }
 0x95f   :  { %6540 = vst.msk [vmem:[%s16845_s8 + $0x28] sm:$0xff] %vm90_vm0, %v6538_v53  ;;  %v7058_v40 = vsel %vm90_vm0, %v6538_v53, 0  ;;  %13492 = vmatprep.mubr.msk.f32.mxu0 %vm14236_vm1, %v16979_v31  ;;  %13524 = vmatpush3.msra.mxu1 %v16992_v25 }
 0x960   :  { %v7129_v46 = vand.u32 4294901760, %v7058_v40  ;;  %13493 = vmatmul.mubr.f32.vlgmr.msra.gmra.mxu0 %v6612_v42  ;;  %13506 = vmatprep.subr.mxu0 %v16979_v31 }
 0x961   :  { %13525 = vmatprep.mubr.msk.f32.mxu1 %vm14236_vm1, %v16979_v31  ;;  %13539 = vmatprep.subr.mxu1 %v16979_v31 }
 0x962   :  { %v7130_v36 = vsub.f32 %v7058_v40, %v7129_v46  ;;  %13507 = vmatpush3.msra.mxu0 %v16993_v33  ;;  %13526 = vmatmul.mubr.f32.vlgmr.msra.gmra.mxu1 %v7129_v46  ;;  %v17022_v40 = vld [vmem:[#allocation69_spill] sm:$0xff] }
 0x963   :  { %13540 = vmatpush3.msra.mxu1 %v16993_v33  ;;  %13508 = vmatprep.subr.mxu0 %v16979_v31 }
 0x964   :  { %v7131_v47 = vand.u32 4294901760, %v7130_v36  ;;  %13541 = vmatprep.subr.mxu1 %v16979_v31  ;;  %13509 = vmatpush3.msra.mxu0 %v16994_v9 }
 0x965   :  { %13542 = vmatpush3.msra.mxu1 %v16994_v9  ;;  %13510 = vmatprep.subr.mxu0 %v16979_v31 }
 0x966   :  { %v7132_v60 = vsub.f32 %v7130_v36, %v7131_v47  ;;  %13543 = vmatprep.subr.mxu1 %v16979_v31  ;;  %13511 = vmatpush3.msra.mxu0 %v16995_v50 }
 0x967   :  { %13544 = vmatpush3.msra.mxu1 %v16995_v50  ;;  %13512 = vmatprep.subr.mxu0 %v16979_v31 }
 0x968   :  { %v7133_v15 = vand.u32 4294901760, %v7132_v60  ;;  %13545 = vmatprep.subr.mxu1 %v16979_v31  ;;  %13513 = vmatpush3.msra.mxu0 %v16996_v30 }
 0x969   :  { %13546 = vmatpush3.msra.mxu1 %v16996_v30  ;;  %13547 = vmatprep.mubr.msk.f32.mxu1 %vm14236_vm1, %v16979_v31 }
 0x96a   :  { %13514 = vmatprep.mubr.msk.f32.mxu0 %vm14236_vm1, %v16979_v31  ;;  %13528 = vmatprep.subr.mxu0 %v16979_v31 }
 0x96b   :  { %13548 = vmatmul.mubr.f32.vlgmr.msra.gmra.mxu1 %v7131_v47  ;;  %13561 = vmatprep.subr.mxu1 %v16979_v31 }
 0x96c   :  { %13515 = vmatmul.mubr.f32.vlgmr.msra.gmra.mxu0 %v7133_v15  ;;  %13562 = vmatpush3.msra.mxu1 %v16993_v33 }
 0x96d   :  { %13529 = vmatpush3.msra.mxu0 %v16997_v24  ;;  %13563 = vmatprep.subr.mxu1 %v16979_v31 }
 0x96e   :  { %13530 = vmatprep.subr.mxu0 %v16979_v31  ;;  %13564 = vmatpush3.msra.mxu1 %v16994_v9 }
 0x96f   :  { %13531 = vmatpush3.msra.mxu0 %v16998_v45  ;;  %13565 = vmatprep.subr.mxu1 %v16979_v31 }
 0x970   :  { %13532 = vmatprep.subr.mxu0 %v16979_v31  ;;  %13566 = vmatpush3.msra.mxu1 %v16995_v50 }
 0x971   :  { %13533 = vmatpush3.msra.mxu0 %v16999_v41  ;;  %13567 = vmatprep.subr.mxu1 %v16979_v31 }
 0x972   :  { %13534 = vmatprep.subr.mxu0 %v16979_v31  ;;  %13536 = vmatprep.mubr.msk.f32.mxu0 %vm14236_vm1, %v16979_v31 }
 0x973   :  { %13535 = vmatpush3.msra.mxu0 %v17000_v32  ;;  %13568 = vmatpush3.msra.mxu1 %v16996_v30 }
 0x974   :  { %13569 = vmatprep.mubr.msk.f32.mxu1 %vm14236_vm1, %v16979_v31  ;;  %13537 = vmatmul.mubr.f32.vlgmr.msra.gmra.mxu0 %v7130_v36 }
 0x975   :  { %13550 = vmatprep.subr.mxu0 %v16979_v31  ;;  %13570 = vmatmul.mubr.f32.vlgmr.msra.gmra.mxu1 %v7129_v46 }
 0x976   :  { %13551 = vmatpush3.msra.mxu0 %v17001_v4  ;;  %13558 = vmatprep.mubr.msk.f32.mxu0 %vm14236_vm1, %v16979_v31 }
 0x977   :  { %13552 = vmatprep.subr.mxu0 %v16979_v31  ;;  %13583 = vmatprep.subr.mxu1 %v16979_v31 }
 0x978   :  { %13553 = vmatpush3.msra.mxu0 %v17002_v39  ;;  %13584 = vmatpush3.msra.mxu1 %v17003_v14 }
 0x979   :  { %13554 = vmatprep.subr.mxu0 %v16979_v31  ;;  %13585 = vmatprep.subr.mxu1 %v16979_v31 }
 0x97a   :  { %13555 = vmatpush3.msra.mxu0 %v17004_v29  ;;  %13586 = vmatpush3.msra.mxu1 %v17005_v0 }
 0x97b   :  { %13556 = vmatprep.subr.mxu0 %v16979_v31  ;;  %13587 = vmatprep.subr.mxu1 %v16979_v31 }
 0x97c   :  { %13557 = vmatpush3.msra.mxu0 %v17006_v43  ;;  %13588 = vmatpush3.msra.mxu1 %v17007_v8 }
 0x97d   :  { %13559 = vmatmul.mubr.f32.vlgmr.msra.gmra.mxu0 %v7129_v46  ;;  %13589 = vmatprep.subr.mxu1 %v16979_v31 }
 0x97e   :  { %13590 = vmatpush3.msra.mxu1 %v17008_v26  ;;  %13572 = vmatprep.subr.mxu0 %v16979_v31 }
 0x97f   :  { %13591 = vmatprep.mubr.msk.f32.mxu1 %vm14236_vm1, %v16979_v31  ;;  %13605 = vmatprep.subr.mxu1 %v16979_v31 }
 0x980   :  { %13573 = vmatpush3.msra.mxu0 %v15220_v27  ;;  %13580 = vmatprep.mubr.msk.f32.mxu0 %vm14236_vm1, %v16979_v31 }
 0x981   :  { %13574 = vmatprep.subr.mxu0 %v16979_v31 }
 0x982   :  { %13575 = vmatpush3.msra.mxu0 %v15238_v28 }
 0x983   :  { %13576 = vmatprep.subr.mxu0 %v16979_v31 }
 0x984   :  { %13577 = vmatpush3.msra.mxu0 %v15263_v52 }
 0x985   :  { %13578 = vmatprep.subr.mxu0 %v16979_v31 }
 0x986   :  { %13579 = vmatpush3.msra.mxu0 %v16980_v6 }
 0x987   :  { %13594 = vmatprep.subr.mxu0 %v16979_v31 }
 0xa05   :  { %v6709_v57 = vpop.f32.mrf.mxu1 }
 0xa07   :  { %v13461_v61 = vpop.f32.mrf.mxu1 }
 0xa0d   :  { %v6866_v62 = vpop.f32.mrf.mxu1 }
 0xa0e   :  { %v6618_v2 = vpop.f32.mrf.mxu0 }
 0xa0f   :  { %v13483_v44 = vpop.f32.mrf.mxu1  ;;  %v6710_v18 = vadd.f32 %v6709_v57, %v6618_v2 }
 0xa10   :  { %v13450_v16 = vpop.f32.mrf.mxu0 }
 0xa16   :  { %v6789_v17 = vpop.f32.mrf.mxu0 }
 0xa17   :  { %v7024_v22 = vpop.f32.mrf.mxu1  ;;  %v6790_v54 = vadd.f32 %v6789_v17, %v6710_v18 }
 0xa18   :  { %v13472_v7 = vpop.f32.mrf.mxu0 }
 0xa19   :  { %v13505_v13 = vpop.f32.mrf.mxu1  ;;  %v6867_v58 = vadd.f32 %v6866_v62, %v6790_v54 }
 0xa20   :  { %v6949_v42 = vpop.f32.mrf.mxu0 }
 0xa21   :  { %v6950_v34 = vadd.f32 %v6949_v42, %v6867_v58 }
 0xa22   :  { %v7226_v59 = vpop.f32.mrf.mxu1  ;;  %v13494_v56 = vpop.f32.mrf.mxu0 }
 0xa23   :  { %v7025_v49 = vadd.f32 %v7024_v22, %v6950_v34 }
 0xa24   :  { %v13527_v53 = vpop.f32.mrf.mxu1 }
 0xa25   :  { %v7028_v46 = vadd.f32 %v7025_v49, %v17022_v40 }
 0xa27   :  { %14153 = vtanh.f32 %v7028_v46  ;;  %v11786_v34 = vmul.f32 -1.442695, %v7028_v46 }
 0xa2b   :  { %v7383_v36 = vpop.f32.mrf.mxu1 }
 0xa2c   :  { %v7135_v47 = vpop.f32.mrf.mxu0 }
 0xa2d   :  { %v13549_v60 = vpop.f32.mrf.mxu1  ;;  %v7227_v57 = vadd.f32 %v7226_v59, %v7135_v47 }
 0xa2e   :  { %v13516_v15 = vpop.f32.mrf.mxu0 }
 0xa34   :  { %v14154_v61 = vpop.eup %14153  ;;  %v7306_v44 = vpop.f32.mrf.mxu0 }
 0xa35   :  { %v7541_v16 = vpop.f32.mrf.mxu1  ;;  %7038 = vrot.lane.b32.xlu0 %v14154_v61, %s14237_s5  ;;  %v7307_v17 = vadd.f32 %v7306_v44, %v7227_v57 }
 0xa36   :  { %v13538_v62 = vpop.f32.mrf.mxu0 }
 0xa37   :  { %v13571_v2 = vpop.f32.mrf.mxu1  ;;  %v7384_v7 = vadd.f32 %v7383_v36, %v7307_v17 }
 0xa3d   :  { %v7466_v18 = vpop.f32.mrf.mxu0 }
 0xa3e   :  { %v7467_v22 = vadd.f32 %v7466_v18, %v7384_v7 }
 0xa3f   :  { %v13560_v13 = vpop.f32.mrf.mxu0 }
 0xa40   :  { %v7542_v54 = vadd.f32 %v7541_v16, %v7467_v22 }
 0xa42   :  { %v7545_v58 = vadd.f32 %v7542_v54, %v15741_v1 }
 0xa44   :  { %14155 = vtanh.f32 %v7545_v58  ;;  %v11787_v59 = vmul.f32 -1.442695, %v7545_v58 }
 0xa45   :  { %14157 = vpow2.f32 %v11786_v34 }
 0xa51   :  { %v14156_v42 = vpop.eup %14155 }
 0xa52   :  { %7555 = vrot.lane.b32.xlu1 %v14156_v42, %s14237_s5  ;;  %v14158_v56 = vpop.eup %14157 }
 0xa53   :  { %v7032_v49 = vadd.f32 1.0, %v14158_v56 }
 0xa55   :  { %14159 = vrcp.f32 %v7032_v49 }
 0xa56   :  { %14161 = vpow2.f32 %v11787_v59 }
 0xa62   :  { %v14160_v53 = vpop.eup %14159 }
 0xa63   :  { %v14162_v47 = vpop.eup %14161  ;;  %v7036_v46 = vmul.f32 %v14160_v53, %v16076_v21 }
 0xa64   :  { %v7549_v60 = vadd.f32 1.0, %v14162_v47 }
 0xa66   :  { %14163 = vrcp.f32 %v7549_v60 }
 0xa73   :  { %v14164_v1 = vpop.eup %14163 }
 0xa74   :  { %v7553_v62 = vmul.f32 %v14164_v1, %v16081_v55 }
 0xaa7   :  { %v7039_v40 = vpop.permute.xlu0 %7038 }
 0xaa8   :  { %v7041_v36 = vmul.f32 %v14160_v53, %v7039_v40 }
 0xaaa   :  { %7043 = vrot.lane.b32.xlu0 %v7041_v36, %s14237_s5 }
 0xac4   :  { %v7556_v15 = vpop.permute.xlu1 %7555 }
 0xac5   :  { %v7558_v61 = vmul.f32 %v14164_v1, %v7556_v15 }
 0xac7   :  { %7560 = vrot.lane.b32.xlu1 %v7558_v61, %s14237_s5 }
 0xb1c   :  { %v7044_v44 = vpop.permute.xlu0 %7043 }
 0xb1d   :  { %v16224_v16 = vadd.f32 %v7044_v44, %v7036_v46  ;;  %v17023_v46 = vld [vmem:[#allocation22_spill] sm:$0xff]  ;;  %v17024_v44 = vld [vmem:[#allocation29_spill] sm:$0xff] }
 0xb1f   :  { %14165 = vtanh.f32 %v16224_v16 }
 0xb2c   :  { %v14166_v57 = vpop.eup %14165 }
 0xb2d   :  { %7049 = vrot.lane.b32.xlu0 %v14166_v57, %s14237_s5  ;;  %v405_v57 = vadd.f32 %v17024_v44, %v17023_v46  ;;  %v17032_v44 = vld [vmem:[#allocation63_spill] sm:$0xff] }
 0xb39   :  { %v7561_v2 = vpop.permute.xlu1 %7560 }
 0xb3a   :  { %v16229_v17 = vadd.f32 %v7561_v2, %v7553_v62  ;;  %v17025_v62 = vld [vmem:[#allocation40_spill] sm:$0xff] }
 0xb3b   :  { %v531_v2 = vadd.f32 %v17025_v62, %v405_v57 }
 0xb3c   :  { %14167 = vtanh.f32 %v16229_v17 }
 0xb49   :  { %v14168_v7 = vpop.eup %14167 }
 0xb4a   :  { %7566 = vrot.lane.b32.xlu1 %v14168_v7, %s14237_s5 }
 0xb9f   :  { %v7050_v18 = vpop.permute.xlu0 %7049 }
 0xba0   :  { %v7052_v21 = vmul.f32 %v14160_v53, %v7050_v18 }
 0xba2   :  { %7054 = vrot.lane.b32.xlu0 %v7052_v21, %s14238_s21  ;;  %v17026_v21 = vld [vmem:[#allocation45_spill] sm:$0xff] }
 0xbbc   :  { %v7567_v22 = vpop.permute.xlu1 %7566 }
 0xbbd   :  { %v7569_v13 = vmul.f32 %v14164_v1, %v7567_v22  ;;  %v661_v22 = vadd.f32 %v17026_v21, %v531_v2  ;;  %v17033_v2 = vld [vmem:[#allocation67_spill] sm:$0xff] }
 0xbbf   :  { %7571 = vrot.lane.b32.xlu1 %v7569_v13, %s14238_s21 }
 0xc14   :  { %v7055_v54 = vpop.permute.xlu0 %7054 }
 0xc15   :  { %7057 = vst.msk [vmem:[%s16844_s7 + $0x18] sm:$0xff] %vm90_vm0, %v7055_v54  ;;  %v7575_v55 = vsel %vm90_vm0, %v7055_v54, 0 }
 0xc16   :  { %v7646_v58 = vand.u32 4294901760, %v7575_v55 }
 0xc18   :  { %v7647_v42 = vsub.f32 %v7575_v55, %v7646_v58  ;;  %13592 = vmatmul.mubr.f32.vlgmr.msra.gmra.mxu1 %v7646_v58  ;;  %v17027_v55 = vld [vmem:[#allocation48_spill] sm:$0xff] }
 0xc19   :  { %13606 = vmatpush3.msra.mxu1 %v15220_v27  ;;  %13613 = vmatprep.mubr.msk.f32.mxu1 %vm14236_vm1, %v16979_v31 }
 0xc1a   :  { %v7648_v34 = vand.u32 4294901760, %v7647_v42  ;;  %13607 = vmatprep.subr.mxu1 %v16979_v31 }
 0xc1b   :  { %13608 = vmatpush3.msra.mxu1 %v15238_v28 }
 0xc1c   :  { %v7649_v56 = vsub.f32 %v7647_v42, %v7648_v34  ;;  %13609 = vmatprep.subr.mxu1 %v16979_v31 }
 0xc1d   :  { %13610 = vmatpush3.msra.mxu1 %v15263_v52 }
 0xc1e   :  { %v7650_v49 = vand.u32 4294901760, %v7649_v56  ;;  %13611 = vmatprep.subr.mxu1 %v16979_v31  ;;  %v17029_v56 = vld [vmem:[#allocation54_spill] sm:$0xff] }
 0xc1f   :  { %13612 = vmatpush3.msra.mxu1 %v16980_v6 }
 0xc20   :  { %13614 = vmatmul.mubr.f32.vlgmr.msra.gmra.mxu1 %v7648_v34  ;;  %13627 = vmatprep.subr.mxu1 %v16979_v31 }
 0xc21   :  { %13581 = vmatmul.mubr.f32.vlgmr.msra.gmra.mxu0 %v7650_v49  ;;  %13628 = vmatpush3.msra.mxu1 %v15220_v27 }
 0xc22   :  { %13595 = vmatpush3.msra.mxu0 %v16981_v20  ;;  %13629 = vmatprep.subr.mxu1 %v16979_v31 }
 0xc23   :  { %13596 = vmatprep.subr.mxu0 %v16979_v31  ;;  %13630 = vmatpush3.msra.mxu1 %v15238_v28 }
 0xc24   :  { %13597 = vmatpush3.msra.mxu0 %v16982_v23  ;;  %13631 = vmatprep.subr.mxu1 %v16979_v31 }
 0xc25   :  { %13598 = vmatprep.subr.mxu0 %v16979_v31  ;;  %13632 = vmatpush3.msra.mxu1 %v15263_v52 }
 0xc26   :  { %13599 = vmatpush3.msra.mxu0 %v16983_v35  ;;  %13633 = vmatprep.subr.mxu1 %v16979_v31 }
 0xc27   :  { %13600 = vmatprep.subr.mxu0 %v16979_v31  ;;  %13602 = vmatprep.mubr.msk.f32.mxu0 %vm14236_vm1, %v16979_v31 }
 0xc28   :  { %13601 = vmatpush3.msra.mxu0 %v16984_v11  ;;  %13634 = vmatpush3.msra.mxu1 %v16980_v6 }
 0xc29   :  { %13635 = vmatprep.mubr.msk.f32.mxu1 %vm14236_vm1, %v16979_v31  ;;  %13603 = vmatmul.mubr.f32.vlgmr.msra.gmra.mxu0 %v7647_v42  ;;  %v17028_v42 = vld [vmem:[#allocation51_spill] sm:$0xff] }
 0xc2a   :  { %13616 = vmatprep.subr.mxu0 %v16979_v31  ;;  %13636 = vmatmul.mubr.f32.vlgmr.msra.gmra.mxu1 %v7646_v58 }
 0xc2b   :  { %13649 = vmatprep.subr.mxu1 %v16979_v31  ;;  %13617 = vmatpush3.msra.mxu0 %v16985_v12 }
 0xc2c   :  { %13650 = vmatpush3.msra.mxu1 %v16986_v63  ;;  %13618 = vmatprep.subr.mxu0 %v16979_v31 }
 0xc2d   :  { %13651 = vmatprep.subr.mxu1 %v16979_v31  ;;  %13619 = vmatpush3.msra.mxu0 %v16987_v48 }
 0xc2e   :  { %13652 = vmatpush3.msra.mxu1 %v16988_v19  ;;  %13620 = vmatprep.subr.mxu0 %v16979_v31 }
 0xc2f   :  { %13653 = vmatprep.subr.mxu1 %v16979_v31  ;;  %13621 = vmatpush3.msra.mxu0 %v16989_v37 }
 0xc30   :  { %13654 = vmatpush3.msra.mxu1 %v16990_v51  ;;  %13622 = vmatprep.subr.mxu0 %v16979_v31 }
 0xc31   :  { %v7572_v59 = vpop.permute.xlu1 %7571  ;;  %13655 = vmatprep.subr.mxu1 %v16979_v31  ;;  %13623 = vmatpush3.msra.mxu0 %v16991_v10 }
 0xc32   :  { %7574 = vst.msk [vmem:[%s16845_s8 + $0x20] sm:$0xff] %vm90_vm0, %v7572_v59  ;;  %v8092_v53 = vsel %vm90_vm0, %v7572_v59, 0  ;;  %13624 = vmatprep.mubr.msk.f32.mxu0 %vm14236_vm1, %v16979_v31  ;;  %13656 = vmatpush3.msra.mxu1 %v16992_v25 }
 0xc33   :  { %v8163_v40 = vand.u32 4294901760, %v8092_v53  ;;  %13625 = vmatmul.mubr.f32.vlgmr.msra.gmra.mxu0 %v7646_v58  ;;  %13638 = vmatprep.subr.mxu0 %v16979_v31  ;;  %v792_v58 = vadd.f32 %v17027_v55, %v661_v22 }
 0xc34   :  { %13657 = vmatprep.mubr.msk.f32.mxu1 %vm14236_vm1, %v16979_v31  ;;  %13671 = vmatprep.subr.mxu1 %v16979_v31 }
 0xc35   :  { %v8164_v36 = vsub.f32 %v8092_v53, %v8163_v40  ;;  %13639 = vmatpush3.msra.mxu0 %v16993_v33  ;;  %13658 = vmatmul.mubr.f32.vlgmr.msra.gmra.mxu1 %v8163_v40  ;;  %v909_v34 = vadd.f32 %v17028_v42, %v792_v58  ;;  %v17030_v53 = vld [vmem:[#allocation57_spill] sm:$0xff] }
 0xc36   :  { %13672 = vmatpush3.msra.mxu1 %v16993_v33  ;;  %13640 = vmatprep.subr.mxu0 %v16979_v31 }
 0xc37   :  { %v8165_v47 = vand.u32 4294901760, %v8164_v36  ;;  %13673 = vmatprep.subr.mxu1 %v16979_v31  ;;  %13641 = vmatpush3.msra.mxu0 %v16994_v9  ;;  %v1070_v49 = vadd.f32 %v17029_v56, %v909_v34 }
 0xc38   :  { %13674 = vmatpush3.msra.mxu1 %v16994_v9  ;;  %13642 = vmatprep.subr.mxu0 %v16979_v31 }
 0xc39   :  { %v8166_v60 = vsub.f32 %v8164_v36, %v8165_v47  ;;  %13675 = vmatprep.subr.mxu1 %v16979_v31  ;;  %13643 = vmatpush3.msra.mxu0 %v16995_v50 }
 0xc3a   :  { %13676 = vmatpush3.msra.mxu1 %v16995_v50  ;;  %13644 = vmatprep.subr.mxu0 %v16979_v31 }
 0xc3b   :  { %v8167_v1 = vand.u32 4294901760, %v8166_v60  ;;  %13677 = vmatprep.subr.mxu1 %v16979_v31  ;;  %13645 = vmatpush3.msra.mxu0 %v16996_v30  ;;  %v17031_v60 = vld [vmem:[#allocation60_spill] sm:$0xff] }
 0xc3c   :  { %13678 = vmatpush3.msra.mxu1 %v16996_v30  ;;  %13679 = vmatprep.mubr.msk.f32.mxu1 %vm14236_vm1, %v16979_v31 }
 0xc3d   :  { %13646 = vmatprep.mubr.msk.f32.mxu0 %vm14236_vm1, %v16979_v31  ;;  %13660 = vmatprep.subr.mxu0 %v16979_v31 }
 0xc3e   :  { %13680 = vmatmul.mubr.f32.vlgmr.msra.gmra.mxu1 %v8165_v47  ;;  %13693 = vmatprep.subr.mxu1 %v16979_v31 }
 0xc3f   :  { %13647 = vmatmul.mubr.f32.vlgmr.msra.gmra.mxu0 %v8167_v1  ;;  %13694 = vmatpush3.msra.mxu1 %v16993_v33 }
 0xc40   :  { %13661 = vmatpush3.msra.mxu0 %v16997_v24  ;;  %13695 = vmatprep.subr.mxu1 %v16979_v31 }
 0xc41   :  { %13662 = vmatprep.subr.mxu0 %v16979_v31  ;;  %13696 = vmatpush3.msra.mxu1 %v16994_v9 }
 0xc42   :  { %13663 = vmatpush3.msra.mxu0 %v16998_v45  ;;  %13697 = vmatprep.subr.mxu1 %v16979_v31 }
 0xc43   :  { %13664 = vmatprep.subr.mxu0 %v16979_v31  ;;  %13698 = vmatpush3.msra.mxu1 %v16995_v50 }
 0xc44   :  { %13665 = vmatpush3.msra.mxu0 %v16999_v41  ;;  %13699 = vmatprep.subr.mxu1 %v16979_v31 }
 0xc45   :  { %13666 = vmatprep.subr.mxu0 %v16979_v31  ;;  %13668 = vmatprep.mubr.msk.f32.mxu0 %vm14236_vm1, %v16979_v31 }
 0xc46   :  { %13667 = vmatpush3.msra.mxu0 %v17000_v32  ;;  %13700 = vmatpush3.msra.mxu1 %v16996_v30 }
 0xc47   :  { %13701 = vmatprep.mubr.msk.f32.mxu1 %vm14236_vm1, %v16979_v31  ;;  %13669 = vmatmul.mubr.f32.vlgmr.msra.gmra.mxu0 %v8164_v36 }
 0xc48   :  { %13682 = vmatprep.subr.mxu0 %v16979_v31  ;;  %13702 = vmatmul.mubr.f32.vlgmr.msra.gmra.mxu1 %v8163_v40 }
 0xc49   :  { %13683 = vmatpush3.msra.mxu0 %v17001_v4  ;;  %13690 = vmatprep.mubr.msk.f32.mxu0 %vm14236_vm1, %v16979_v31 }
 0xc4a   :  { %13684 = vmatprep.subr.mxu0 %v16979_v31  ;;  %13715 = vmatprep.subr.mxu1 %v16979_v31 }
 0xc4b   :  { %13685 = vmatpush3.msra.mxu0 %v17002_v39  ;;  %13716 = vmatpush3.msra.mxu1 %v17003_v14 }
 0xc4c   :  { %13686 = vmatprep.subr.mxu0 %v16979_v31  ;;  %13717 = vmatprep.subr.mxu1 %v16979_v31 }
 0xc4d   :  { %13687 = vmatpush3.msra.mxu0 %v17004_v29  ;;  %13718 = vmatpush3.msra.mxu1 %v17005_v0 }
 0xc4e   :  { %13688 = vmatprep.subr.mxu0 %v16979_v31  ;;  %13719 = vmatprep.subr.mxu1 %v16979_v31 }
 0xc4f   :  { %13689 = vmatpush3.msra.mxu0 %v17006_v43  ;;  %13720 = vmatpush3.msra.mxu1 %v17007_v8 }
 0xc50   :  { %13691 = vmatmul.mubr.f32.vlgmr.msra.gmra.mxu0 %v8163_v40  ;;  %13721 = vmatprep.subr.mxu1 %v16979_v31  ;;  %v1215_v40 = vadd.f32 %v17030_v53, %v1070_v49 }
 0xc51   :  { %13722 = vmatpush3.msra.mxu1 %v17008_v26  ;;  %13704 = vmatprep.subr.mxu0 %v16979_v31 }
 0xc52   :  { %13723 = vmatprep.mubr.msk.f32.mxu1 %vm14236_vm1, %v16979_v31  ;;  %13737 = vmatprep.subr.mxu1 %v16979_v31  ;;  %v1341_v1 = vadd.f32 %v17031_v60, %v1215_v40 }
 0xc53   :  { %13705 = vmatpush3.msra.mxu0 %v15220_v27  ;;  %13712 = vmatprep.mubr.msk.f32.mxu0 %vm14236_vm1, %v16979_v31 }
 0xc54   :  { %13706 = vmatprep.subr.mxu0 %v16979_v31  ;;  %v1471_v57 = vadd.f32 %v17032_v44, %v1341_v1 }
 0xc55   :  { %13707 = vmatpush3.msra.mxu0 %v15238_v28 }
 0xc56   :  { %13708 = vmatprep.subr.mxu0 %v16979_v31  ;;  %v1602_v21 = vadd.f32 %v17033_v2, %v1471_v57 }
 0xc57   :  { %13709 = vmatpush3.msra.mxu0 %v15263_v52 }
 0xc58   :  { %13710 = vmatprep.subr.mxu0 %v16979_v31 }
 0xc59   :  { %13711 = vmatpush3.msra.mxu0 %v16980_v6 }
 0xc5a   :  { %13726 = vmatprep.subr.mxu0 %v16979_v31 }
 0xcd8   :  { %v7743_v15 = vpop.f32.mrf.mxu1 }
 0xcda   :  { %v13593_v61 = vpop.f32.mrf.mxu1 }
 0xce0   :  { %v7900_v7 = vpop.f32.mrf.mxu1 }
 0xce1   :  { %v7652_v18 = vpop.f32.mrf.mxu0 }
 0xce2   :  { %v13615_v13 = vpop.f32.mrf.mxu1  ;;  %v7744_v61 = vadd.f32 %v7743_v15, %v7652_v18 }
 0xce3   :  { %v13582_v54 = vpop.f32.mrf.mxu0  ;;  %v17034_v13 = vld [vmem:[#allocation71_spill] sm:$0xff] }
 0xce4   :  { %v1719_v22 = vadd.f32 %v17034_v13, %v1602_v21 }
 0xce6   :  { %v1751_v56 = vadd.f32 %v16067_v3, %v1719_v22 }
 0xce9   :  { %v7823_v59 = vpop.f32.mrf.mxu0 }
 0xcea   :  { %v8058_v36 = vpop.f32.mrf.mxu1  ;;  %v7824_v62 = vadd.f32 %v7823_v59, %v7744_v61 }
 0xceb   :  { %v13604_v47 = vpop.f32.mrf.mxu0 }
 0xcec   :  { %v13637_v46 = vpop.f32.mrf.mxu1  ;;  %v7901_v54 = vadd.f32 %v7900_v7, %v7824_v62 }
 0xcf3   :  { %v7983_v55 = vpop.f32.mrf.mxu0 }
 0xcf4   :  { %v7984_v58 = vadd.f32 %v7983_v55, %v7901_v54 }
 0xcf5   :  { %v8260_v42 = vpop.f32.mrf.mxu1  ;;  %v13626_v34 = vpop.f32.mrf.mxu0 }
 0xcf6   :  { %v8059_v49 = vadd.f32 %v8058_v36, %v7984_v58 }
 0xcf7   :  { %v13659_v53 = vpop.f32.mrf.mxu1 }
 0xcf8   :  { %v8062_v47 = vadd.f32 %v8059_v49, %v1751_v56 }
 0xcfa   :  { %14169 = vtanh.f32 %v8062_v47  ;;  %v11788_v54 = vmul.f32 -1.442695, %v8062_v47 }
 0xcfe   :  { %v8417_v15 = vpop.f32.mrf.mxu1 }
 0xcff   :  { %v8169_v18 = vpop.f32.mrf.mxu0 }
 0xd00   :  { %v13681_v40 = vpop.f32.mrf.mxu1  ;;  %v8261_v7 = vadd.f32 %v8260_v42, %v8169_v18 }
 0xd01   :  { %v13648_v60 = vpop.f32.mrf.mxu0 }
 0xd07   :  { %v14170_v59 = vpop.eup %14169  ;;  %v8340_v1 = vpop.f32.mrf.mxu0 }
 0xd08   :  { %v8575_v61 = vpop.f32.mrf.mxu1  ;;  %8072 = vrot.lane.b32.xlu0 %v14170_v59, %s14237_s5  ;;  %v8341_v57 = vadd.f32 %v8340_v1, %v8261_v7 }
 0xd09   :  { %v13670_v46 = vpop.f32.mrf.mxu0 }
 0xd0a   :  { %v13703_v44 = vpop.f32.mrf.mxu1  ;;  %v8418_v62 = vadd.f32 %v8417_v15, %v8341_v57 }
 0xd10   :  { %v8500_v2 = vpop.f32.mrf.mxu0 }
 0xd11   :  { %v8501_v3 = vadd.f32 %v8500_v2, %v8418_v62 }
 0xd12   :  { %v13692_v36 = vpop.f32.mrf.mxu0 }
 0xd13   :  { %v8576_v21 = vadd.f32 %v8575_v61, %v8501_v3 }
 0xd15   :  { %v8579_v13 = vadd.f32 %v8576_v21, %v15730_v5 }
 0xd17   :  { %14171 = vtanh.f32 %v8579_v13  ;;  %v11789_v42 = vmul.f32 -1.442695, %v8579_v13 }
 0xd18   :  { %14173 = vpow2.f32 %v11788_v54 }
 0xd24   :  { %v14172_v22 = vpop.eup %14171 }
 0xd25   :  { %8589 = vrot.lane.b32.xlu1 %v14172_v22, %s14237_s5  ;;  %v14174_v55 = vpop.eup %14173 }
 0xd26   :  { %v8066_v58 = vadd.f32 1.0, %v14174_v55 }
 0xd28   :  { %14175 = vrcp.f32 %v8066_v58 }
 0xd29   :  { %14177 = vpow2.f32 %v11789_v42 }
 0xd35   :  { %v14176_v34 = vpop.eup %14175 }
 0xd36   :  { %v14178_v53 = vpop.eup %14177  ;;  %v8070_v47 = vmul.f32 %v14176_v34, %v16224_v16 }
 0xd37   :  { %v8583_v15 = vadd.f32 1.0, %v14178_v53 }
 0xd39   :  { %14179 = vrcp.f32 %v8583_v15 }
 0xd46   :  { %v14180_v5 = vpop.eup %14179 }
 0xd47   :  { %v8587_v61 = vmul.f32 %v14180_v5, %v16229_v17 }
 0xd7a   :  { %v8073_v56 = vpop.permute.xlu0 %8072 }
 0xd7b   :  { %v8075_v49 = vmul.f32 %v14176_v34, %v8073_v56 }
 0xd7d   :  { %8077 = vrot.lane.b32.xlu0 %v8075_v49, %s14237_s5 }
 0xd97   :  { %v8590_v18 = vpop.permute.xlu1 %8589 }
 0xd98   :  { %v8592_v40 = vmul.f32 %v14180_v5, %v8590_v18 }
 0xd9a   :  { %8594 = vrot.lane.b32.xlu1 %v8592_v40, %s14237_s5 }
 0xdef   :  { %v8078_v60 = vpop.permute.xlu0 %8077 }
 0xdf0   :  { %v16384_v59 = vadd.f32 %v8078_v60, %v8070_v47 }
 0xdf2   :  { %14181 = vtanh.f32 %v16384_v59 }
 0xdff   :  { %v14182_v1 = vpop.eup %14181 }
 0xe00   :  { %8083 = vrot.lane.b32.xlu0 %v14182_v1, %s14237_s5 }
 0xe0c   :  { %v8595_v7 = vpop.permute.xlu1 %8594 }
 0xe0d   :  { %v16389_v46 = vadd.f32 %v8595_v7, %v8587_v61 }
 0xe0f   :  { %14183 = vtanh.f32 %v16389_v46 }
 0xe1c   :  { %v14184_v44 = vpop.eup %14183 }
 0xe1d   :  { %8600 = vrot.lane.b32.xlu1 %v14184_v44, %s14237_s5 }
 0xe72   :  { %v8084_v57 = vpop.permute.xlu0 %8083 }
 0xe73   :  { %v8086_v16 = vmul.f32 %v14176_v34, %v8084_v57 }
 0xe75   :  { %8088 = vrot.lane.b32.xlu0 %v8086_v16, %s14238_s21 }
 0xe8f   :  { %v8601_v62 = vpop.permute.xlu1 %8600 }
 0xe90   :  { %v8603_v2 = vmul.f32 %v14180_v5, %v8601_v62 }
 0xe92   :  { %8605 = vrot.lane.b32.xlu1 %v8603_v2, %s14238_s21 }
 0xee7   :  { %v8089_v3 = vpop.permute.xlu0 %8088 }
 0xee8   :  { %8091 = vst.msk [vmem:[%s16844_s7 + $0x20] sm:$0xff] %vm90_vm0, %v8089_v3  ;;  %v8609_v17 = vsel %vm90_vm0, %v8089_v3, 0 }
 0xee9   :  { %v8680_v36 = vand.u32 4294901760, %v8609_v17 }
 0xeeb   :  { %v8681_v21 = vsub.f32 %v8609_v17, %v8680_v36  ;;  %13724 = vmatmul.mubr.f32.vlgmr.msra.gmra.mxu1 %v8680_v36 }
 0xeec   :  { %13738 = vmatpush3.msra.mxu1 %v15220_v27  ;;  %13745 = vmatprep.mubr.msk.f32.mxu1 %vm14236_vm1, %v16979_v31 }
 0xeed   :  { %v8682_v13 = vand.u32 4294901760, %v8681_v21  ;;  %13739 = vmatprep.subr.mxu1 %v16979_v31 }
 0xeee   :  { %13740 = vmatpush3.msra.mxu1 %v15238_v28 }
 0xeef   :  { %v8683_v22 = vsub.f32 %v8681_v21, %v8682_v13  ;;  %13741 = vmatprep.subr.mxu1 %v16979_v31 }
 0xef0   :  { %13742 = vmatpush3.msra.mxu1 %v15263_v52 }
 0xef1   :  { %v8684_v54 = vand.u32 4294901760, %v8683_v22  ;;  %13743 = vmatprep.subr.mxu1 %v16979_v31  ;;  %v17035_v22 = vld [vmem:[#allocation72_spill] sm:$0xff] }
 0xef2   :  { %13744 = vmatpush3.msra.mxu1 %v16980_v6 }
 0xef3   :  { %13746 = vmatmul.mubr.f32.vlgmr.msra.gmra.mxu1 %v8682_v13  ;;  %13759 = vmatprep.subr.mxu1 %v16979_v31 }
 0xef4   :  { %13713 = vmatmul.mubr.f32.vlgmr.msra.gmra.mxu0 %v8684_v54  ;;  %13760 = vmatpush3.msra.mxu1 %v15220_v27 }
 0xef5   :  { %13727 = vmatpush3.msra.mxu0 %v16981_v20  ;;  %13761 = vmatprep.subr.mxu1 %v16979_v31 }
 0xef6   :  { %13728 = vmatprep.subr.mxu0 %v16979_v31  ;;  %13762 = vmatpush3.msra.mxu1 %v15238_v28 }
 0xef7   :  { %13729 = vmatpush3.msra.mxu0 %v16982_v23  ;;  %13763 = vmatprep.subr.mxu1 %v16979_v31 }
 0xef8   :  { %13730 = vmatprep.subr.mxu0 %v16979_v31  ;;  %13764 = vmatpush3.msra.mxu1 %v15263_v52 }
 0xef9   :  { %13731 = vmatpush3.msra.mxu0 %v16983_v35  ;;  %13765 = vmatprep.subr.mxu1 %v16979_v31 }
 0xefa   :  { %13732 = vmatprep.subr.mxu0 %v16979_v31  ;;  %13734 = vmatprep.mubr.msk.f32.mxu0 %vm14236_vm1, %v16979_v31 }
 0xefb   :  { %13733 = vmatpush3.msra.mxu0 %v16984_v11  ;;  %13766 = vmatpush3.msra.mxu1 %v16980_v6 }
 0xefc   :  { %13767 = vmatprep.mubr.msk.f32.mxu1 %vm14236_vm1, %v16979_v31  ;;  %13735 = vmatmul.mubr.f32.vlgmr.msra.gmra.mxu0 %v8681_v21 }
 0xefd   :  { %13748 = vmatprep.subr.mxu0 %v16979_v31  ;;  %13768 = vmatmul.mubr.f32.vlgmr.msra.gmra.mxu1 %v8680_v36 }
 0xefe   :  { %13781 = vmatprep.subr.mxu1 %v16979_v31  ;;  %13749 = vmatpush3.msra.mxu0 %v16985_v12 }
 0xeff   :  { %13782 = vmatpush3.msra.mxu1 %v16986_v63  ;;  %13750 = vmatprep.subr.mxu0 %v16979_v31 }
 0xf00   :  { %13783 = vmatprep.subr.mxu1 %v16979_v31  ;;  %13751 = vmatpush3.msra.mxu0 %v16987_v48 }
 0xf01   :  { %13784 = vmatpush3.msra.mxu1 %v16988_v19  ;;  %13752 = vmatprep.subr.mxu0 %v16979_v31 }
 0xf02   :  { %13785 = vmatprep.subr.mxu1 %v16979_v31  ;;  %13753 = vmatpush3.msra.mxu0 %v16989_v37 }
 0xf03   :  { %13786 = vmatpush3.msra.mxu1 %v16990_v51  ;;  %13754 = vmatprep.subr.mxu0 %v16979_v31 }
 0xf04   :  { %v8606_v55 = vpop.permute.xlu1 %8605  ;;  %13787 = vmatprep.subr.mxu1 %v16979_v31  ;;  %13755 = vmatpush3.msra.mxu0 %v16991_v10 }
 0xf05   :  { %8608 = vst.msk [vmem:[%s16845_s8 + $0x18] sm:$0xff] %vm90_vm0, %v8606_v55  ;;  %v9126_v58 = vsel %vm90_vm0, %v8606_v55, 0  ;;  %13756 = vmatprep.mubr.msk.f32.mxu0 %vm14236_vm1, %v16979_v31  ;;  %13788 = vmatpush3.msra.mxu1 %v16992_v25 }
 0xf06   :  { %v9197_v42 = vand.u32 4294901760, %v9126_v58  ;;  %13757 = vmatmul.mubr.f32.vlgmr.msra.gmra.mxu0 %v8680_v36  ;;  %13770 = vmatprep.subr.mxu0 %v16979_v31 }
 0xf07   :  { %13789 = vmatprep.mubr.msk.f32.mxu1 %vm14236_vm1, %v16979_v31  ;;  %13803 = vmatprep.subr.mxu1 %v16979_v31 }
 0xf08   :  { %v9198_v34 = vsub.f32 %v9126_v58, %v9197_v42  ;;  %13771 = vmatpush3.msra.mxu0 %v16993_v33  ;;  %13790 = vmatmul.mubr.f32.vlgmr.msra.gmra.mxu1 %v9197_v42 }
 0xf09   :  { %13804 = vmatpush3.msra.mxu1 %v16993_v33  ;;  %13772 = vmatprep.subr.mxu0 %v16979_v31 }
 0xf0a   :  { %v9199_v56 = vand.u32 4294901760, %v9198_v34  ;;  %13805 = vmatprep.subr.mxu1 %v16979_v31  ;;  %13773 = vmatpush3.msra.mxu0 %v16994_v9 }
 0xf0b   :  { %13806 = vmatpush3.msra.mxu1 %v16994_v9  ;;  %13774 = vmatprep.subr.mxu0 %v16979_v31 }
 0xf0c   :  { %v9200_v49 = vsub.f32 %v9198_v34, %v9199_v56  ;;  %13807 = vmatprep.subr.mxu1 %v16979_v31  ;;  %13775 = vmatpush3.msra.mxu0 %v16995_v50 }
 0xf0d   :  { %13808 = vmatpush3.msra.mxu1 %v16995_v50  ;;  %13776 = vmatprep.subr.mxu0 %v16979_v31 }
 0xf0e   :  { %v9201_v53 = vand.u32 4294901760, %v9200_v49  ;;  %13809 = vmatprep.subr.mxu1 %v16979_v31  ;;  %13777 = vmatpush3.msra.mxu0 %v16996_v30 }
 0xf0f   :  { %13810 = vmatpush3.msra.mxu1 %v16996_v30  ;;  %13811 = vmatprep.mubr.msk.f32.mxu1 %vm14236_vm1, %v16979_v31 }
 0xf10   :  { %13778 = vmatprep.mubr.msk.f32.mxu0 %vm14236_vm1, %v16979_v31  ;;  %13792 = vmatprep.subr.mxu0 %v16979_v31 }
 0xf11   :  { %13812 = vmatmul.mubr.f32.vlgmr.msra.gmra.mxu1 %v9199_v56  ;;  %13825 = vmatprep.subr.mxu1 %v16979_v31 }
 0xf12   :  { %13779 = vmatmul.mubr.f32.vlgmr.msra.gmra.mxu0 %v9201_v53  ;;  %13826 = vmatpush3.msra.mxu1 %v16993_v33 }
 0xf13   :  { %13793 = vmatpush3.msra.mxu0 %v16997_v24  ;;  %13827 = vmatprep.subr.mxu1 %v16979_v31 }
 0xf14   :  { %13794 = vmatprep.subr.mxu0 %v16979_v31  ;;  %13828 = vmatpush3.msra.mxu1 %v16994_v9 }
 0xf15   :  { %13795 = vmatpush3.msra.mxu0 %v16998_v45  ;;  %13829 = vmatprep.subr.mxu1 %v16979_v31 }
 0xf16   :  { %13796 = vmatprep.subr.mxu0 %v16979_v31  ;;  %13830 = vmatpush3.msra.mxu1 %v16995_v50 }
 0xf17   :  { %13797 = vmatpush3.msra.mxu0 %v16999_v41  ;;  %13831 = vmatprep.subr.mxu1 %v16979_v31 }
 0xf18   :  { %13798 = vmatprep.subr.mxu0 %v16979_v31  ;;  %13800 = vmatprep.mubr.msk.f32.mxu0 %vm14236_vm1, %v16979_v31 }
 0xf19   :  { %13799 = vmatpush3.msra.mxu0 %v17000_v32  ;;  %13832 = vmatpush3.msra.mxu1 %v16996_v30 }
 0xf1a   :  { %13833 = vmatprep.mubr.msk.f32.mxu1 %vm14236_vm1, %v16979_v31  ;;  %13801 = vmatmul.mubr.f32.vlgmr.msra.gmra.mxu0 %v9198_v34 }
 0xf1b   :  { %13814 = vmatprep.subr.mxu0 %v16979_v31  ;;  %13834 = vmatmul.mubr.f32.vlgmr.msra.gmra.mxu1 %v9197_v42 }
 0xf1c   :  { %13815 = vmatpush3.msra.mxu0 %v17001_v4  ;;  %13822 = vmatprep.mubr.msk.f32.mxu0 %vm14236_vm1, %v16979_v31 }
 0xf1d   :  { %13816 = vmatprep.subr.mxu0 %v16979_v31  ;;  %13847 = vmatprep.subr.mxu1 %v16979_v31 }
 0xf1e   :  { %13817 = vmatpush3.msra.mxu0 %v17002_v39  ;;  %13848 = vmatpush3.msra.mxu1 %v17003_v14 }
 0xf1f   :  { %13818 = vmatprep.subr.mxu0 %v16979_v31  ;;  %13849 = vmatprep.subr.mxu1 %v16979_v31 }
 0xf20   :  { %13819 = vmatpush3.msra.mxu0 %v17004_v29  ;;  %13850 = vmatpush3.msra.mxu1 %v17005_v0 }
 0xf21   :  { %13820 = vmatprep.subr.mxu0 %v16979_v31  ;;  %13851 = vmatprep.subr.mxu1 %v16979_v31 }
 0xf22   :  { %13821 = vmatpush3.msra.mxu0 %v17006_v43  ;;  %13852 = vmatpush3.msra.mxu1 %v17007_v8 }
 0xf23   :  { %13823 = vmatmul.mubr.f32.vlgmr.msra.gmra.mxu0 %v9197_v42  ;;  %13853 = vmatprep.subr.mxu1 %v16979_v31 }
 0xf24   :  { %13854 = vmatpush3.msra.mxu1 %v17008_v26  ;;  %13836 = vmatprep.subr.mxu0 %v16979_v31 }
 0xf25   :  { %13855 = vmatprep.mubr.msk.f32.mxu1 %vm14236_vm1, %v16979_v31  ;;  %13869 = vmatprep.subr.mxu1 %v16979_v31 }
 0xf26   :  { %13837 = vmatpush3.msra.mxu0 %v15220_v27  ;;  %13844 = vmatprep.mubr.msk.f32.mxu0 %vm14236_vm1, %v16979_v31 }
 0xf27   :  { %13838 = vmatprep.subr.mxu0 %v16979_v31 }
 0xf28   :  { %13839 = vmatpush3.msra.mxu0 %v15238_v28 }
 0xf29   :  { %13840 = vmatprep.subr.mxu0 %v16979_v31 }
 0xf2a   :  { %13841 = vmatpush3.msra.mxu0 %v15263_v52 }
 0xf2b   :  { %13842 = vmatprep.subr.mxu0 %v16979_v31 }
 0xf2c   :  { %13843 = vmatpush3.msra.mxu0 %v16980_v6 }
 0xf2d   :  { %13858 = vmatprep.subr.mxu0 %v16979_v31 }
 0xfab   :  { %v8777_v15 = vpop.f32.mrf.mxu1 }
 0xfad   :  { %v13725_v5 = vpop.f32.mrf.mxu1 }
 0xfb3   :  { %v8934_v18 = vpop.f32.mrf.mxu1 }
 0xfb4   :  { %v8686_v40 = vpop.f32.mrf.mxu0 }
 0xfb5   :  { %v13747_v47 = vpop.f32.mrf.mxu1  ;;  %v8778_v44 = vadd.f32 %v8777_v15, %v8686_v40 }
 0xfb6   :  { %v13714_v60 = vpop.f32.mrf.mxu0 }
 0xfbc   :  { %v8857_v1 = vpop.f32.mrf.mxu0 }
 0xfbd   :  { %v9092_v61 = vpop.f32.mrf.mxu1  ;;  %v8858_v16 = vadd.f32 %v8857_v1, %v8778_v44 }
 0xfbe   :  { %v13736_v7 = vpop.f32.mrf.mxu0 }
 0xfbf   :  { %v13769_v57 = vpop.f32.mrf.mxu1  ;;  %v8935_v62 = vadd.f32 %v8934_v18, %v8858_v16 }
 0xfc6   :  { %v9017_v2 = vpop.f32.mrf.mxu0 }
 0xfc7   :  { %v9018_v3 = vadd.f32 %v9017_v2, %v8935_v62 }
 0xfc8   :  { %v9294_v17 = vpop.f32.mrf.mxu1  ;;  %v13758_v36 = vpop.f32.mrf.mxu0 }
 0xfc9   :  { %v9093_v21 = vadd.f32 %v9092_v61, %v9018_v3 }
 0xfca   :  { %v13791_v13 = vpop.f32.mrf.mxu1 }
 0xfcb   :  { %v9096_v54 = vadd.f32 %v9093_v21, %v17035_v22 }
 0xfcd   :  { %14185 = vtanh.f32 %v9096_v54  ;;  %v11790_v16 = vmul.f32 -1.442695, %v9096_v54 }
 0xfd1   :  { %v9451_v55 = vpop.f32.mrf.mxu1 }
 0xfd2   :  { %v9203_v58 = vpop.f32.mrf.mxu0 }
 0xfd3   :  { %v13813_v42 = vpop.f32.mrf.mxu1  ;;  %v9295_v15 = vadd.f32 %v9294_v17, %v9203_v58 }
 0xfd4   :  { %v13780_v34 = vpop.f32.mrf.mxu0 }
 0xfda   :  { %v14186_v56 = vpop.eup %14185  ;;  %v9374_v49 = vpop.f32.mrf.mxu0 }
 0xfdb   :  { %v9609_v53 = vpop.f32.mrf.mxu1  ;;  %9106 = vrot.lane.b32.xlu0 %v14186_v56, %s14237_s5  ;;  %v9375_v40 = vadd.f32 %v9374_v49, %v9295_v15 }
 0xfdc   :  { %v13802_v5 = vpop.f32.mrf.mxu0 }
 0xfdd   :  { %v13835_v18 = vpop.f32.mrf.mxu1  ;;  %v9452_v47 = vadd.f32 %v9451_v55, %v9375_v40 }
 0xfe3   :  { %v9534_v60 = vpop.f32.mrf.mxu0 }
 0xfe4   :  { %v9535_v1 = vadd.f32 %v9534_v60, %v9452_v47 }
 0xfe5   :  { %v13824_v61 = vpop.f32.mrf.mxu0 }
 0xfe6   :  { %v9610_v7 = vadd.f32 %v9609_v53, %v9535_v1 }
 0xfe8   :  { %v9613_v44 = vadd.f32 %v9610_v7, %v15733_v38 }
 0xfea   :  { %14187 = vtanh.f32 %v9613_v44  ;;  %v11791_v3 = vmul.f32 -1.442695, %v9613_v44 }
 0xfeb   :  { %14189 = vpow2.f32 %v11790_v16 }
 0xff7   :  { %v14188_v57 = vpop.eup %14187 }
 0xff8   :  { %9623 = vrot.lane.b32.xlu1 %v14188_v57, %s14237_s5  ;;  %v14190_v62 = vpop.eup %14189 }
 0xff9   :  { %v9100_v2 = vadd.f32 1.0, %v14190_v62 }
 0xffb   :  { %14191 = vrcp.f32 %v9100_v2 }
 0xffc   :  { %14193 = vpow2.f32 %v11791_v3 }
0x1008   :  { %v14192_v17 = vpop.eup %14191 }
0x1009   :  { %v14194_v13 = vpop.eup %14193  ;;  %v9104_v54 = vmul.f32 %v14192_v17, %v16384_v59 }
0x100a   :  { %v9617_v22 = vadd.f32 1.0, %v14194_v13 }
0x100c   :  { %14195 = vrcp.f32 %v9617_v22  ;;  %v17038_v22 = vld [vmem:[#allocation44_spill] sm:$0xff] }
0x1019   :  { %v14196_v38 = vpop.eup %14195 }
0x101a   :  { %v9621_v49 = vmul.f32 %v14196_v38, %v16389_v46 }
0x104d   :  { %v9107_v36 = vpop.permute.xlu0 %9106 }
0x104e   :  { %v9109_v21 = vmul.f32 %v14192_v17, %v9107_v36 }
0x1050   :  { %9111 = vrot.lane.b32.xlu0 %v9109_v21, %s14237_s5 }
0x106a   :  { %v9624_v55 = vpop.permute.xlu1 %9623 }
0x106b   :  { %v9626_v58 = vmul.f32 %v14196_v38, %v9624_v55 }
0x106d   :  { %9628 = vrot.lane.b32.xlu1 %v9626_v58, %s14237_s5 }
0x10c2   :  { %v9112_v42 = vpop.permute.xlu0 %9111 }
0x10c3   :  { %v16532_v34 = vadd.f32 %v9112_v42, %v9104_v54  ;;  %v17039_v54 = vld [vmem:[#allocation46_spill] sm:$0xff] }
0x10c5   :  { %14197 = vtanh.f32 %v16532_v34 }
0x10d2   :  { %v14198_v56 = vpop.eup %14197 }
0x10d3   :  { %9117 = vrot.lane.b32.xlu0 %v14198_v56, %s14237_s5 }
0x10df   :  { %v9629_v53 = vpop.permute.xlu1 %9628 }
0x10e0   :  { %v16537_v15 = vadd.f32 %v9629_v53, %v9621_v49  ;;  %v17040_v53 = vld [vmem:[#allocation50_spill] sm:$0xff] }
0x10e2   :  { %14199 = vtanh.f32 %v16537_v15 }
0x10ef   :  { %v14200_v5 = vpop.eup %14199 }
0x10f0   :  { %9634 = vrot.lane.b32.xlu1 %v14200_v5, %s14237_s5 }
0x1145   :  { %v9118_v18 = vpop.permute.xlu0 %9117 }
0x1146   :  { %v9120_v59 = vmul.f32 %v14192_v17, %v9118_v18  ;;  %v17041_v18 = vld [vmem:[#allocation52_spill] sm:$0xff] }
0x1148   :  { %9122 = vrot.lane.b32.xlu0 %v9120_v59, %s14238_s21 }
0x1162   :  { %v9635_v40 = vpop.permute.xlu1 %9634 }
0x1163   :  { %v9637_v47 = vmul.f32 %v14196_v38, %v9635_v40  ;;  %v17042_v40 = vld [vmem:[#allocation56_spill] sm:$0xff] }
0x1165   :  { %9639 = vrot.lane.b32.xlu1 %v9637_v47, %s14238_s21 }
0x11ba   :  { %v9123_v60 = vpop.permute.xlu0 %9122 }
0x11bb   :  { %9125 = vst.msk [vmem:[%s16844_s7 + $0x28] sm:$0xff] %vm90_vm0, %v9123_v60  ;;  %v9643_v46 = vsel %vm90_vm0, %v9123_v60, 0 }
0x11bc   :  { %v9714_v1 = vand.u32 4294901760, %v9643_v46 }
0x11be   :  { %v9715_v61 = vsub.f32 %v9643_v46, %v9714_v1  ;;  %13856 = vmatmul.mubr.f32.vlgmr.msra.gmra.mxu1 %v9714_v1  ;;  %v17043_v46 = vld [vmem:[#allocation58_spill] sm:$0xff] }
0x11bf   :  { %13870 = vmatpush3.msra.mxu1 %v15220_v27  ;;  %13877 = vmatprep.mubr.msk.f32.mxu1 %vm14236_vm1, %v16979_v31 }
0x11c0   :  { %v9716_v7 = vand.u32 4294901760, %v9715_v61  ;;  %13871 = vmatprep.subr.mxu1 %v16979_v31 }
0x11c1   :  { %13872 = vmatpush3.msra.mxu1 %v15238_v28 }
0x11c2   :  { %v9717_v44 = vsub.f32 %v9715_v61, %v9716_v7  ;;  %13873 = vmatprep.subr.mxu1 %v16979_v31 }
0x11c3   :  { %13874 = vmatpush3.msra.mxu1 %v15263_v52 }
0x11c4   :  { %v9718_v57 = vand.u32 4294901760, %v9717_v44  ;;  %13875 = vmatprep.subr.mxu1 %v16979_v31  ;;  %v17044_v44 = vld [vmem:[#allocation62_spill] sm:$0xff] }
0x11c5   :  { %13876 = vmatpush3.msra.mxu1 %v16980_v6 }
0x11c6   :  { %13878 = vmatmul.mubr.f32.vlgmr.msra.gmra.mxu1 %v9716_v7  ;;  %13891 = vmatprep.subr.mxu1 %v16979_v31 }
0x11c7   :  { %13845 = vmatmul.mubr.f32.vlgmr.msra.gmra.mxu0 %v9718_v57  ;;  %13892 = vmatpush3.msra.mxu1 %v15220_v27 }
0x11c8   :  { %13859 = vmatpush3.msra.mxu0 %v16981_v20  ;;  %13893 = vmatprep.subr.mxu1 %v16979_v31 }
0x11c9   :  { %13860 = vmatprep.subr.mxu0 %v16979_v31  ;;  %13894 = vmatpush3.msra.mxu1 %v15238_v28 }
0x11ca   :  { %13861 = vmatpush3.msra.mxu0 %v16982_v23  ;;  %13895 = vmatprep.subr.mxu1 %v16979_v31 }
0x11cb   :  { %13862 = vmatprep.subr.mxu0 %v16979_v31  ;;  %13896 = vmatpush3.msra.mxu1 %v15263_v52 }
0x11cc   :  { %13863 = vmatpush3.msra.mxu0 %v16983_v35  ;;  %13897 = vmatprep.subr.mxu1 %v16979_v31 }
0x11cd   :  { %13864 = vmatprep.subr.mxu0 %v16979_v31  ;;  %13866 = vmatprep.mubr.msk.f32.mxu0 %vm14236_vm1, %v16979_v31 }
0x11ce   :  { %13865 = vmatpush3.msra.mxu0 %v16984_v11  ;;  %13898 = vmatpush3.msra.mxu1 %v16980_v6 }
0x11cf   :  { %13899 = vmatprep.mubr.msk.f32.mxu1 %vm14236_vm1, %v16979_v31  ;;  %13867 = vmatmul.mubr.f32.vlgmr.msra.gmra.mxu0 %v9715_v61 }
0x11d0   :  { %13880 = vmatprep.subr.mxu0 %v16979_v31  ;;  %13900 = vmatmul.mubr.f32.vlgmr.msra.gmra.mxu1 %v9714_v1 }
0x11d1   :  { %13913 = vmatprep.subr.mxu1 %v16979_v31  ;;  %13881 = vmatpush3.msra.mxu0 %v16985_v12 }
0x11d2   :  { %13914 = vmatpush3.msra.mxu1 %v16986_v63  ;;  %13882 = vmatprep.subr.mxu0 %v16979_v31 }
0x11d3   :  { %13915 = vmatprep.subr.mxu1 %v16979_v31  ;;  %13883 = vmatpush3.msra.mxu0 %v16987_v48 }
0x11d4   :  { %13916 = vmatpush3.msra.mxu1 %v16988_v19  ;;  %13884 = vmatprep.subr.mxu0 %v16979_v31 }
0x11d5   :  { %13917 = vmatprep.subr.mxu1 %v16979_v31  ;;  %13885 = vmatpush3.msra.mxu0 %v16989_v37 }
0x11d6   :  { %13918 = vmatpush3.msra.mxu1 %v16990_v51  ;;  %13886 = vmatprep.subr.mxu0 %v16979_v31 }
0x11d7   :  { %v9640_v16 = vpop.permute.xlu1 %9639  ;;  %13919 = vmatprep.subr.mxu1 %v16979_v31  ;;  %13887 = vmatpush3.msra.mxu0 %v16991_v10 }
0x11d8   :  { %9642 = vst.msk [vmem:[%s16845_s8 + $0x10] sm:$0xff] %vm90_vm0, %v9640_v16  ;;  %v10160_v62 = vsel %vm90_vm0, %v9640_v16, 0  ;;  %13888 = vmatprep.mubr.msk.f32.mxu0 %vm14236_vm1, %v16979_v31  ;;  %13920 = vmatpush3.msra.mxu1 %v16992_v25 }
0x11d9   :  { %v10231_v2 = vand.u32 4294901760, %v10160_v62  ;;  %13889 = vmatmul.mubr.f32.vlgmr.msra.gmra.mxu0 %v9714_v1  ;;  %13902 = vmatprep.subr.mxu0 %v16979_v31 }
0x11da   :  { %13921 = vmatprep.mubr.msk.f32.mxu1 %vm14236_vm1, %v16979_v31  ;;  %13935 = vmatprep.subr.mxu1 %v16979_v31 }
0x11db   :  { %v10232_v3 = vsub.f32 %v10160_v62, %v10231_v2  ;;  %13903 = vmatpush3.msra.mxu0 %v16993_v33  ;;  %13922 = vmatmul.mubr.f32.vlgmr.msra.gmra.mxu1 %v10231_v2 }
0x11dc   :  { %13936 = vmatpush3.msra.mxu1 %v16993_v33  ;;  %13904 = vmatprep.subr.mxu0 %v16979_v31 }
0x11dd   :  { %v10233_v17 = vand.u32 4294901760, %v10232_v3  ;;  %13937 = vmatprep.subr.mxu1 %v16979_v31  ;;  %13905 = vmatpush3.msra.mxu0 %v16994_v9 }
0x11de   :  { %13938 = vmatpush3.msra.mxu1 %v16994_v9  ;;  %13906 = vmatprep.subr.mxu0 %v16979_v31 }
0x11df   :  { %v10234_v36 = vsub.f32 %v10232_v3, %v10233_v17  ;;  %13939 = vmatprep.subr.mxu1 %v16979_v31  ;;  %13907 = vmatpush3.msra.mxu0 %v16995_v50 }
0x11e0   :  { %13940 = vmatpush3.msra.mxu1 %v16995_v50  ;;  %13908 = vmatprep.subr.mxu0 %v16979_v31 }
0x11e1   :  { %v10235_v21 = vand.u32 4294901760, %v10234_v36  ;;  %13941 = vmatprep.subr.mxu1 %v16979_v31  ;;  %13909 = vmatpush3.msra.mxu0 %v16996_v30  ;;  %v17046_v36 = vld [vmem:[#allocation70_spill] sm:$0xff] }
0x11e2   :  { %13942 = vmatpush3.msra.mxu1 %v16996_v30  ;;  %13943 = vmatprep.mubr.msk.f32.mxu1 %vm14236_vm1, %v16979_v31 }
0x11e3   :  { %13910 = vmatprep.mubr.msk.f32.mxu0 %vm14236_vm1, %v16979_v31  ;;  %13924 = vmatprep.subr.mxu0 %v16979_v31 }
0x11e4   :  { %13944 = vmatmul.mubr.f32.vlgmr.msra.gmra.mxu1 %v10233_v17  ;;  %13957 = vmatprep.subr.mxu1 %v16979_v31 }
0x11e5   :  { %13911 = vmatmul.mubr.f32.vlgmr.msra.gmra.mxu0 %v10235_v21  ;;  %13958 = vmatpush3.msra.mxu1 %v16993_v33 }
0x11e6   :  { %13925 = vmatpush3.msra.mxu0 %v16997_v24  ;;  %13959 = vmatprep.subr.mxu1 %v16979_v31 }
0x11e7   :  { %13926 = vmatprep.subr.mxu0 %v16979_v31  ;;  %13960 = vmatpush3.msra.mxu1 %v16994_v9 }
0x11e8   :  { %13927 = vmatpush3.msra.mxu0 %v16998_v45  ;;  %13961 = vmatprep.subr.mxu1 %v16979_v31 }
0x11e9   :  { %13928 = vmatprep.subr.mxu0 %v16979_v31  ;;  %13962 = vmatpush3.msra.mxu1 %v16995_v50 }
0x11ea   :  { %13929 = vmatpush3.msra.mxu0 %v16999_v41  ;;  %13963 = vmatprep.subr.mxu1 %v16979_v31 }
0x11eb   :  { %13930 = vmatprep.subr.mxu0 %v16979_v31  ;;  %13932 = vmatprep.mubr.msk.f32.mxu0 %vm14236_vm1, %v16979_v31 }
0x11ec   :  { %13931 = vmatpush3.msra.mxu0 %v17000_v32  ;;  %13964 = vmatpush3.msra.mxu1 %v16996_v30 }
0x11ed   :  { %13965 = vmatprep.mubr.msk.f32.mxu1 %vm14236_vm1, %v16979_v31  ;;  %13933 = vmatmul.mubr.f32.vlgmr.msra.gmra.mxu0 %v10232_v3 }
0x11ee   :  { %13946 = vmatprep.subr.mxu0 %v16979_v31  ;;  %13966 = vmatmul.mubr.f32.vlgmr.msra.gmra.mxu1 %v10231_v2 }
0x11ef   :  { %13947 = vmatpush3.msra.mxu0 %v17001_v4  ;;  %13954 = vmatprep.mubr.msk.f32.mxu0 %vm14236_vm1, %v16979_v31 }
0x11f0   :  { %13948 = vmatprep.subr.mxu0 %v16979_v31  ;;  %13979 = vmatprep.subr.mxu1 %v16979_v31 }
0x11f1   :  { %13949 = vmatpush3.msra.mxu0 %v17002_v39  ;;  %13980 = vmatpush3.msra.mxu1 %v17003_v14 }
0x11f2   :  { %13950 = vmatprep.subr.mxu0 %v16979_v31  ;;  %13981 = vmatprep.subr.mxu1 %v16979_v31 }
0x11f3   :  { %13951 = vmatpush3.msra.mxu0 %v17004_v29  ;;  %13982 = vmatpush3.msra.mxu1 %v17005_v0 }
0x11f4   :  { %13952 = vmatprep.subr.mxu0 %v16979_v31  ;;  %13983 = vmatprep.subr.mxu1 %v16979_v31 }
0x11f5   :  { %13953 = vmatpush3.msra.mxu0 %v17006_v43  ;;  %13984 = vmatpush3.msra.mxu1 %v17007_v8  ;;  %v17036_v8 = vld [vmem:[#allocation28_spill] sm:$0xff] }
0x11f6   :  { %13955 = vmatmul.mubr.f32.vlgmr.msra.gmra.mxu0 %v10231_v2  ;;  %13985 = vmatprep.subr.mxu1 %v16979_v31  ;;  %v17045_v2 = vld [vmem:[#allocation64_spill] sm:$0xff] }
0x11f7   :  { %13986 = vmatpush3.msra.mxu1 %v17008_v26  ;;  %13968 = vmatprep.subr.mxu0 %v16979_v31  ;;  %v17037_v26 = vld [vmem:[#allocation34_spill] sm:$0xff] }
0x11f8   :  { %13987 = vmatprep.mubr.msk.f32.mxu1 %vm14236_vm1, %v16979_v31  ;;  %14001 = vmatprep.subr.mxu1 %v16979_v31  ;;  %v417_v13 = vadd.f32 %v17037_v26, %v17036_v8 }
0x11f9   :  { %13969 = vmatpush3.msra.mxu0 %v15220_v27  ;;  %13976 = vmatprep.mubr.msk.f32.mxu0 %vm14236_vm1, %v16979_v31 }
0x11fa   :  { %13970 = vmatprep.subr.mxu0 %v16979_v31  ;;  %v545_v38 = vadd.f32 %v17038_v22, %v417_v13 }
0x11fb   :  { %13971 = vmatpush3.msra.mxu0 %v15238_v28 }
0x11fc   :  { %13972 = vmatprep.subr.mxu0 %v16979_v31  ;;  %v677_v42 = vadd.f32 %v17039_v54, %v545_v38 }
0x11fd   :  { %13973 = vmatpush3.msra.mxu0 %v15263_v52 }
0x11fe   :  { %13974 = vmatprep.subr.mxu0 %v16979_v31  ;;  %v804_v5 = vadd.f32 %v17040_v53, %v677_v42  ;;  %v14234_v42 = vld [vmem:[%s16843_s6] ss:$0 sm:$0xff] }
0x11ff   :  { %13975 = vmatpush3.msra.mxu0 %v16980_v6 }
0x1200   :  { %13990 = vmatprep.subr.mxu0 %v16979_v31  ;;  %v921_v59 = vadd.f32 %v17041_v18, %v804_v5 }
0x1202   :  { %v1090_v47 = vadd.f32 %v17042_v40, %v921_v59 }
0x1204   :  { %v1227_v1 = vadd.f32 %v17043_v46, %v1090_v47 }
0x1206   :  { %v1355_v57 = vadd.f32 %v17044_v44, %v1227_v1 }
0x1208   :  { %v1487_v3 = vadd.f32 %v17045_v2, %v1355_v57  ;;  %v17048_v2 = vld [vmem:[#allocation75_spill] sm:$0xff] }
0x120a   :  { %v1614_v21 = vadd.f32 %v17046_v36, %v1487_v3 }
0x127e   :  { %v9811_v14 = vpop.f32.mrf.mxu1 }
0x1280   :  { %v13857_v0 = vpop.f32.mrf.mxu1 }
0x1281   :  { %v17047_v0 = vld [vmem:[#allocation73_spill] sm:$0xff] }
0x1282   :  { %v1731_v8 = vadd.f32 %v17047_v0, %v1614_v21 }
0x1286   :  { %v9968_v55 = vpop.f32.mrf.mxu1 }
0x1287   :  { %v9720_v58 = vpop.f32.mrf.mxu0 }
0x1288   :  { %v13879_v56 = vpop.f32.mrf.mxu1  ;;  %v9812_v16 = vadd.f32 %v9811_v14, %v9720_v58 }
0x1289   :  { %v13846_v49 = vpop.f32.mrf.mxu0  ;;  %v1753_v56 = vadd.f32 %v14234_v42, %v1731_v8 }
0x128f   :  { %v9891_v60 = vpop.f32.mrf.mxu0 }
0x1290   :  { %v10126_v61 = vpop.f32.mrf.mxu1  ;;  %v9892_v17 = vadd.f32 %v9891_v60, %v9812_v16 }
0x1291   :  { %v13868_v7 = vpop.f32.mrf.mxu0 }
0x1292   :  { %v13901_v62 = vpop.f32.mrf.mxu1  ;;  %v9969_v26 = vadd.f32 %v9968_v55, %v9892_v17 }
0x1299   :  { %v10051_v13 = vpop.f32.mrf.mxu0 }
0x129a   :  { %v10052_v22 = vadd.f32 %v10051_v13, %v9969_v26 }
0x129b   :  { %v10328_v38 = vpop.f32.mrf.mxu1  ;;  %v13890_v54 = vpop.f32.mrf.mxu0 }
0x129c   :  { %v10127_v49 = vadd.f32 %v10126_v61, %v10052_v22 }
0x129d   :  { %v13923_v14 = vpop.f32.mrf.mxu1 }
0x129e   :  { %v10130_v58 = vadd.f32 %v10127_v49, %v1753_v56 }
0x12a0   :  { %14201 = vtanh.f32 %v10130_v58  ;;  %v11792_v36 = vmul.f32 -1.442695, %v10130_v58 }
0x12a4   :  { %v10485_v53 = vpop.f32.mrf.mxu1 }
0x12a5   :  { %v10237_v5 = vpop.f32.mrf.mxu0 }
0x12a6   :  { %v13945_v18 = vpop.f32.mrf.mxu1  ;;  %v10329_v60 = vadd.f32 %v10328_v38, %v10237_v5 }
0x12a7   :  { %v13912_v59 = vpop.f32.mrf.mxu0 }
0x12ad   :  { %v14202_v40 = vpop.eup %14201  ;;  %v10408_v47 = vpop.f32.mrf.mxu0 }
0x12ae   :  { %v10643_v55 = vpop.f32.mrf.mxu1  ;;  %10140 = vrot.lane.b32.xlu0 %v14202_v40, %s14237_s5  ;;  %v10409_v7 = vadd.f32 %v10408_v47, %v10329_v60 }
0x12af   :  { %v13934_v46 = vpop.f32.mrf.mxu0 }
0x12b0   :  { %v13967_v1 = vpop.f32.mrf.mxu1  ;;  %v10486_v44 = vadd.f32 %v10485_v53, %v10409_v7 }
0x12b6   :  { %v10568_v57 = vpop.f32.mrf.mxu0 }
0x12b7   :  { %v10569_v16 = vadd.f32 %v10568_v57, %v10486_v44 }
0x12b8   :  { %v13956_v61 = vpop.f32.mrf.mxu0 }
0x12b9   :  { %v10644_v62 = vadd.f32 %v10643_v55, %v10569_v16 }
0x12bb   :  { %v10647_v3 = vadd.f32 %v10644_v62, %v17048_v2 }
0x12bd   :  { %14203 = vtanh.f32 %v10647_v3  ;;  %v11793_v8 = vmul.f32 -1.442695, %v10647_v3 }
0x12be   :  { %14205 = vpow2.f32 %v11792_v36 }
0x12ca   :  { %v14204_v17 = vpop.eup %14203 }
0x12cb   :  { %10657 = vrot.lane.b32.xlu1 %v14204_v17, %s14237_s5  ;;  %v14206_v21 = vpop.eup %14205 }
0x12cc   :  { %v10134_v0 = vadd.f32 1.0, %v14206_v21 }
0x12ce   :  { %14207 = vrcp.f32 %v10134_v0 }
0x12cf   :  { %14209 = vpow2.f32 %v11793_v8 }
0x12db   :  { %v14208_v26 = vpop.eup %14207 }
0x12dc   :  { %v14210_v38 = vpop.eup %14209  ;;  %v10138_v14 = vmul.f32 %v14208_v26, %v16532_v34 }
0x12dd   :  { %v10651_v54 = vadd.f32 1.0, %v14210_v38 }
0x12df   :  { %14211 = vrcp.f32 %v10651_v54 }
0x12ec   :  { %v14212_v42 = vpop.eup %14211 }
0x12ed   :  { %v10655_v18 = vmul.f32 %v14212_v42, %v16537_v15 }
0x1320   :  { %v10141_v13 = vpop.permute.xlu0 %10140 }
0x1321   :  { %v10143_v22 = vmul.f32 %v14208_v26, %v10141_v13 }
0x1323   :  { %10145 = vrot.lane.b32.xlu0 %v10143_v22, %s14237_s5 }
0x133d   :  { %v10658_v56 = vpop.permute.xlu1 %10657 }
0x133e   :  { %v10660_v49 = vmul.f32 %v14212_v42, %v10658_v56 }
0x1340   :  { %10662 = vrot.lane.b32.xlu1 %v10660_v49, %s14237_s5  ;;  %v17050_v49 = vld [vmem:[#allocation76_spill] sm:$0xff] }
0x1395   :  { %v10146_v58 = vpop.permute.xlu0 %10145 }
0x1396   :  { %v16694_v53 = vadd.f32 %v10146_v58, %v10138_v14 }
0x1398   :  { %14213 = vtanh.f32 %v16694_v53 }
0x13a5   :  { %v14214_v5 = vpop.eup %14213 }
0x13a6   :  { %10151 = vrot.lane.b32.xlu0 %v14214_v5, %s14237_s5 }
0x13b2   :  { %v10663_v59 = vpop.permute.xlu1 %10662 }
0x13b3   :  { %v16699_v40 = vadd.f32 %v10663_v59, %v10655_v18 }
0x13b5   :  { %14215 = vtanh.f32 %v16699_v40 }
0x13c2   :  { %v14216_v47 = vpop.eup %14215 }
0x13c3   :  { %10668 = vrot.lane.b32.xlu1 %v14216_v47, %s14237_s5 }
0x1418   :  { %v10152_v55 = vpop.permute.xlu0 %10151 }
0x1419   :  { %v10154_v34 = vmul.f32 %v14208_v26, %v10152_v55 }
0x141b   :  { %10156 = vrot.lane.b32.xlu0 %v10154_v34, %s14238_s21 }
0x1435   :  { %v10669_v60 = vpop.permute.xlu1 %10668 }
0x1436   :  { %v10671_v46 = vmul.f32 %v14212_v42, %v10669_v60 }
0x1438   :  { %10673 = vrot.lane.b32.xlu1 %v10671_v46, %s14238_s21 }
0x148d   :  { %v10157_v1 = vpop.permute.xlu0 %10156 }
0x148e   :  { %10159 = vst.msk [vmem:[%s16844_s7 + $0x30] sm:$0xff] %vm90_vm0, %v10157_v1  ;;  %v10677_v15 = vsel %vm90_vm0, %v10157_v1, 0 }
0x148f   :  { %v10748_v7 = vand.u32 4294901760, %v10677_v15 }
0x1491   :  { %v10749_v44 = vsub.f32 %v10677_v15, %v10748_v7  ;;  %13988 = vmatmul.mubr.f32.vlgmr.msra.gmra.mxu1 %v10748_v7 }
0x1492   :  { %14002 = vmatpush3.msra.mxu1 %v15220_v27  ;;  %14009 = vmatprep.mubr.msk.f32.mxu1 %vm14236_vm1, %v16979_v31 }
0x1493   :  { %v10750_v57 = vand.u32 4294901760, %v10749_v44  ;;  %14003 = vmatprep.subr.mxu1 %v16979_v31 }
0x1494   :  { %14004 = vmatpush3.msra.mxu1 %v15238_v28 }
0x1495   :  { %v10751_v16 = vsub.f32 %v10749_v44, %v10750_v57  ;;  %14005 = vmatprep.subr.mxu1 %v16979_v31 }
0x1496   :  { %14006 = vmatpush3.msra.mxu1 %v15263_v52 }
0x1497   :  { %v10752_v61 = vand.u32 4294901760, %v10751_v16  ;;  %14007 = vmatprep.subr.mxu1 %v16979_v31 }
0x1498   :  { %14008 = vmatpush3.msra.mxu1 %v16980_v6 }
0x1499   :  { %14010 = vmatmul.mubr.f32.vlgmr.msra.gmra.mxu1 %v10750_v57  ;;  %14023 = vmatprep.subr.mxu1 %v16979_v31 }
0x149a   :  { %13977 = vmatmul.mubr.f32.vlgmr.msra.gmra.mxu0 %v10752_v61  ;;  %14024 = vmatpush3.msra.mxu1 %v15220_v27 }
0x149b   :  { %13991 = vmatpush3.msra.mxu0 %v16981_v20  ;;  %14025 = vmatprep.subr.mxu1 %v16979_v31 }
0x149c   :  { %13992 = vmatprep.subr.mxu0 %v16979_v31  ;;  %14026 = vmatpush3.msra.mxu1 %v15238_v28 }
0x149d   :  { %13993 = vmatpush3.msra.mxu0 %v16982_v23  ;;  %14027 = vmatprep.subr.mxu1 %v16979_v31 }
0x149e   :  { %13994 = vmatprep.subr.mxu0 %v16979_v31  ;;  %14028 = vmatpush3.msra.mxu1 %v15263_v52 }
0x149f   :  { %13995 = vmatpush3.msra.mxu0 %v16983_v35  ;;  %14029 = vmatprep.subr.mxu1 %v16979_v31 }
0x14a0   :  { %13996 = vmatprep.subr.mxu0 %v16979_v31  ;;  %13998 = vmatprep.mubr.msk.f32.mxu0 %vm14236_vm1, %v16979_v31 }
0x14a1   :  { %13997 = vmatpush3.msra.mxu0 %v16984_v11  ;;  %14030 = vmatpush3.msra.mxu1 %v16980_v6 }
0x14a2   :  { %14031 = vmatprep.mubr.msk.f32.mxu1 %vm14236_vm1, %v16979_v31  ;;  %13999 = vmatmul.mubr.f32.vlgmr.msra.gmra.mxu0 %v10749_v44 }
0x14a3   :  { %14012 = vmatprep.subr.mxu0 %v16979_v31  ;;  %14032 = vmatmul.mubr.f32.vlgmr.msra.gmra.mxu1 %v10748_v7 }
0x14a4   :  { %14045 = vmatprep.subr.mxu1 %v16979_v31  ;;  %14013 = vmatpush3.msra.mxu0 %v16985_v12 }
0x14a5   :  { %14046 = vmatpush3.msra.mxu1 %v16986_v63  ;;  %14014 = vmatprep.subr.mxu0 %v16979_v31 }
0x14a6   :  { %14047 = vmatprep.subr.mxu1 %v16979_v31  ;;  %14015 = vmatpush3.msra.mxu0 %v16987_v48 }
0x14a7   :  { %14048 = vmatpush3.msra.mxu1 %v16988_v19  ;;  %14016 = vmatprep.subr.mxu0 %v16979_v31 }
0x14a8   :  { %14049 = vmatprep.subr.mxu1 %v16979_v31  ;;  %14017 = vmatpush3.msra.mxu0 %v16989_v37 }
0x14a9   :  { %14050 = vmatpush3.msra.mxu1 %v16990_v51  ;;  %14018 = vmatprep.subr.mxu0 %v16979_v31 }
0x14aa   :  { %v10674_v27 = vpop.permute.xlu1 %10673  ;;  %14051 = vmatprep.subr.mxu1 %v16979_v31  ;;  %14019 = vmatpush3.msra.mxu0 %v16991_v10 }
0x14ab   :  { %10676 = vst.msk [vmem:[%s16845_s8 + $0x8] sm:$0xff] %vm90_vm0, %v10674_v27  ;;  %v11194_v28 = vsel %vm90_vm0, %v10674_v27, 0  ;;  %14020 = vmatprep.mubr.msk.f32.mxu0 %vm14236_vm1, %v16979_v31  ;;  %14052 = vmatpush3.msra.mxu1 %v16992_v25 }
0x14ac   :  { %v11265_v52 = vand.u32 4294901760, %v11194_v28  ;;  %14021 = vmatmul.mubr.f32.vlgmr.msra.gmra.mxu0 %v10748_v7  ;;  %14034 = vmatprep.subr.mxu0 %v16979_v31 }
0x14ad   :  { %14053 = vmatprep.mubr.msk.f32.mxu1 %vm14236_vm1, %v16979_v31  ;;  %14067 = vmatprep.subr.mxu1 %v16979_v31 }
0x14ae   :  { %v11266_v6 = vsub.f32 %v11194_v28, %v11265_v52  ;;  %14035 = vmatpush3.msra.mxu0 %v16993_v33  ;;  %14054 = vmatmul.mubr.f32.vlgmr.msra.gmra.mxu1 %v11265_v52 }
0x14af   :  { %14068 = vmatpush3.msra.mxu1 %v16993_v33  ;;  %14036 = vmatprep.subr.mxu0 %v16979_v31 }
0x14b0   :  { %v11267_v20 = vand.u32 4294901760, %v11266_v6  ;;  %14069 = vmatprep.subr.mxu1 %v16979_v31  ;;  %14037 = vmatpush3.msra.mxu0 %v16994_v9 }
0x14b1   :  { %14070 = vmatpush3.msra.mxu1 %v16994_v9  ;;  %14038 = vmatprep.subr.mxu0 %v16979_v31 }
0x14b2   :  { %v11268_v23 = vsub.f32 %v11266_v6, %v11267_v20  ;;  %14071 = vmatprep.subr.mxu1 %v16979_v31  ;;  %14039 = vmatpush3.msra.mxu0 %v16995_v50 }
0x14b3   :  { %14072 = vmatpush3.msra.mxu1 %v16995_v50  ;;  %14040 = vmatprep.subr.mxu0 %v16979_v31 }
0x14b4   :  { %v11269_v35 = vand.u32 4294901760, %v11268_v23  ;;  %14073 = vmatprep.subr.mxu1 %v16979_v31  ;;  %14041 = vmatpush3.msra.mxu0 %v16996_v30 }
0x14b5   :  { %14074 = vmatpush3.msra.mxu1 %v16996_v30  ;;  %14075 = vmatprep.mubr.msk.f32.mxu1 %vm14236_vm1, %v16979_v31 }
0x14b6   :  { %14042 = vmatprep.mubr.msk.f32.mxu0 %vm14236_vm1, %v16979_v31  ;;  %14056 = vmatprep.subr.mxu0 %v16979_v31 }
0x14b7   :  { %14076 = vmatmul.mubr.f32.vlgmr.msra.gmra.mxu1 %v11267_v20  ;;  %14089 = vmatprep.subr.mxu1 %v16979_v31 }
0x14b8   :  { %14043 = vmatmul.mubr.f32.vlgmr.msra.gmra.mxu0 %v11269_v35  ;;  %14090 = vmatpush3.msra.mxu1 %v16993_v33 }
0x14b9   :  { %14057 = vmatpush3.msra.mxu0 %v16997_v24  ;;  %14091 = vmatprep.subr.mxu1 %v16979_v31 }
0x14ba   :  { %14058 = vmatprep.subr.mxu0 %v16979_v31  ;;  %14092 = vmatpush3.msra.mxu1 %v16994_v9 }
0x14bb   :  { %14059 = vmatpush3.msra.mxu0 %v16998_v45  ;;  %14093 = vmatprep.subr.mxu1 %v16979_v31 }
0x14bc   :  { %14060 = vmatprep.subr.mxu0 %v16979_v31  ;;  %14094 = vmatpush3.msra.mxu1 %v16995_v50 }
0x14bd   :  { %14061 = vmatpush3.msra.mxu0 %v16999_v41  ;;  %14095 = vmatprep.subr.mxu1 %v16979_v31 }
0x14be   :  { %14062 = vmatprep.subr.mxu0 %v16979_v31  ;;  %14064 = vmatprep.mubr.msk.f32.mxu0 %vm14236_vm1, %v16979_v31 }
0x14bf   :  { %14063 = vmatpush3.msra.mxu0 %v17000_v32  ;;  %14096 = vmatpush3.msra.mxu1 %v16996_v30 }
0x14c0   :  { %14097 = vmatprep.mubr.msk.f32.mxu1 %vm14236_vm1, %v16979_v31  ;;  %14065 = vmatmul.mubr.f32.vlgmr.msra.gmra.mxu0 %v11266_v6 }
0x14c1   :  { %14078 = vmatprep.subr.mxu0 %v16979_v31  ;;  %14098 = vmatmul.mubr.f32.vlgmr.msra.gmra.mxu1 %v11265_v52 }
0x14c2   :  { %14079 = vmatpush3.msra.mxu0 %v17001_v4  ;;  %14086 = vmatprep.mubr.msk.f32.mxu0 %vm14236_vm1, %v16979_v31 }
0x14c3   :  { %14080 = vmatprep.subr.mxu0 %v16979_v31 }
0x14c4   :  { %14081 = vmatpush3.msra.mxu0 %v17002_v39  ;;  %v17049_v39 = vld [vmem:[#allocation74_spill] sm:$0xff] }
0x14c5   :  { %14082 = vmatprep.subr.mxu0 %v16979_v31 }
0x14c6   :  { %14083 = vmatpush3.msra.mxu0 %v17004_v29 }
0x14c7   :  { %14084 = vmatprep.subr.mxu0 %v16979_v31 }
0x14c8   :  { %14085 = vmatpush3.msra.mxu0 %v17006_v43 }
0x14c9   :  { %14087 = vmatmul.mubr.f32.vlgmr.msra.gmra.mxu0 %v11265_v52 }
0x1551   :  { %v10845_v11 = vpop.f32.mrf.mxu1 }
0x1553   :  { %v13989_v12 = vpop.f32.mrf.mxu1 }
0x1559   :  { %v11002_v63 = vpop.f32.mrf.mxu1 }
0x155a   :  { %v10754_v48 = vpop.f32.mrf.mxu0 }
0x155b   :  { %v14011_v19 = vpop.f32.mrf.mxu1  ;;  %v10846_v33 = vadd.f32 %v10845_v11, %v10754_v48 }
0x155c   :  { %v13978_v37 = vpop.f32.mrf.mxu0 }
0x1562   :  { %v10925_v51 = vpop.f32.mrf.mxu0 }
0x1563   :  { %v11160_v10 = vpop.f32.mrf.mxu1  ;;  %v10926_v50 = vadd.f32 %v10925_v51, %v10846_v33 }
0x1564   :  { %v14000_v25 = vpop.f32.mrf.mxu0 }
0x1565   :  { %v14033_v9 = vpop.f32.mrf.mxu1  ;;  %v11003_v30 = vadd.f32 %v11002_v63, %v10926_v50 }
0x156c   :  { %v11085_v24 = vpop.f32.mrf.mxu0 }
0x156d   :  { %v11086_v45 = vadd.f32 %v11085_v24, %v11003_v30 }
0x156e   :  { %v11362_v41 = vpop.f32.mrf.mxu1  ;;  %v14022_v31 = vpop.f32.mrf.mxu0 }
0x156f   :  { %v11161_v32 = vadd.f32 %v11160_v10, %v11086_v45 }
0x1570   :  { %v14055_v4 = vpop.f32.mrf.mxu1 }
0x1571   :  { %v11164_v29 = vadd.f32 %v11161_v32, %v17049_v39 }
0x1573   :  { %14217 = vtanh.f32 %v11164_v29  ;;  %v11794_v5 = vmul.f32 -1.442695, %v11164_v29 }
0x1577   :  { %v11519_v43 = vpop.f32.mrf.mxu1 }
0x1578   :  { %v11271_v62 = vpop.f32.mrf.mxu0 }
0x1579   :  { %v14077_v2 = vpop.f32.mrf.mxu1  ;;  %v11363_v0 = vadd.f32 %v11362_v41, %v11271_v62 }
0x157a   :  { %v14044_v3 = vpop.f32.mrf.mxu0 }
0x1580   :  { %v14218_v17 = vpop.eup %14217  ;;  %v11442_v36 = vpop.f32.mrf.mxu0 }
0x1581   :  { %v11677_v21 = vpop.f32.mrf.mxu1  ;;  %11174 = vrot.lane.b32.xlu0 %v14218_v17, %s14237_s5  ;;  %v11443_v13 = vadd.f32 %v11442_v36, %v11363_v0 }
0x1582   :  { %v14066_v8 = vpop.f32.mrf.mxu0 }
0x1583   :  { %v14099_v26 = vpop.f32.mrf.mxu1  ;;  %v11520_v22 = vadd.f32 %v11519_v43, %v11443_v13 }
0x1589   :  { %v11602_v38 = vpop.f32.mrf.mxu0 }
0x158a   :  { %v11603_v54 = vadd.f32 %v11602_v38, %v11520_v22 }
0x158b   :  { %v14088_v42 = vpop.f32.mrf.mxu0 }
0x158c   :  { %v11678_v56 = vadd.f32 %v11677_v21, %v11603_v54 }
0x158e   :  { %v11681_v14 = vadd.f32 %v11678_v56, %v17050_v49 }
0x1590   :  { %14219 = vtanh.f32 %v11681_v14  ;;  %v11795_v47 = vmul.f32 -1.442695, %v11681_v14 }
0x1591   :  { %14221 = vpow2.f32 %v11794_v5 }
0x159d   :  { %v14220_v58 = vpop.eup %14219 }
0x159e   :  { %11691 = vrot.lane.b32.xlu1 %v14220_v58, %s14237_s5  ;;  %v14222_v18 = vpop.eup %14221 }
0x159f   :  { %v11168_v59 = vadd.f32 1.0, %v14222_v18 }
0x15a1   :  { %14223 = vrcp.f32 %v11168_v59 }
0x15a2   :  { %14225 = vpow2.f32 %v11795_v47 }
0x15ae   :  { %v14224_v55 = vpop.eup %14223 }
0x15af   :  { %v14226_v46 = vpop.eup %14225  ;;  %v11172_v57 = vmul.f32 %v14224_v55, %v16694_v53 }
0x15b0   :  { %v11685_v1 = vadd.f32 1.0, %v14226_v46 }
0x15b2   :  { %14227 = vrcp.f32 %v11685_v1 }
0x15bf   :  { %v14228_v15 = vpop.eup %14227 }
0x15c0   :  { %v11689_v28 = vmul.f32 %v14228_v15, %v16699_v40 }
0x15f3   :  { %v11175_v34 = vpop.permute.xlu0 %11174 }
0x15f4   :  { %v11177_v60 = vmul.f32 %v14224_v55, %v11175_v34 }
0x15f6   :  { %11179 = vrot.lane.b32.xlu0 %v11177_v60, %s14237_s5 }
0x1610   :  { %v11692_v7 = vpop.permute.xlu1 %11691 }
0x1611   :  { %v11694_v44 = vmul.f32 %v14228_v15, %v11692_v7 }
0x1613   :  { %11696 = vrot.lane.b32.xlu1 %v11694_v44, %s14237_s5 }
0x1668   :  { %v11180_v16 = vpop.permute.xlu0 %11179 }
0x1669   :  { %v11182_v61 = vadd.f32 %v11180_v16, %v11172_v57 }
0x166b   :  { %14229 = vtanh.f32 %v11182_v61 }
0x1678   :  { %v14230_v27 = vpop.eup %14229 }
0x1679   :  { %11185 = vrot.lane.b32.xlu0 %v14230_v27, %s14237_s5 }
0x1685   :  { %v11697_v52 = vpop.permute.xlu1 %11696 }
0x1686   :  { %v11699_v6 = vadd.f32 %v11697_v52, %v11689_v28 }
0x1688   :  { %14231 = vtanh.f32 %v11699_v6 }
0x1695   :  { %v14232_v20 = vpop.eup %14231 }
0x1696   :  { %11702 = vrot.lane.b32.xlu1 %v14232_v20, %s14237_s5 }
0x16eb   :  { %v11186_v23 = vpop.permute.xlu0 %11185 }
0x16ec   :  { %v11188_v35 = vmul.f32 %v14224_v55, %v11186_v23 }
0x16ee   :  { %11190 = vrot.lane.b32.xlu0 %v11188_v35, %s14238_s21 }
0x16f2   :  { %11713 = vrot.lane.b32.xlu0 %v11182_v61, %s14239_s27 }
0x1708   :  { %v11703_v53 = vpop.permute.xlu1 %11702 }
0x1709   :  { %v11705_v11 = vmul.f32 %v14228_v15, %v11703_v53 }
0x170b   :  { %11707 = vrot.lane.b32.xlu1 %v11705_v11, %s14238_s21 }
0x170f   :  { %11719 = vrot.lane.b32.xlu1 %v11699_v6, %s14239_s27 }
0x1760   :  { %v11191_v12 = vpop.permute.xlu0 %11190 }
0x1761   :  { %11193 = vst.msk [vmem:[%s16844_s7 + $0x38] sm:$0xff] %vm90_vm0, %v11191_v12  ;;  %11711 = vst.msk [vmem:[#allocation2] sm:$0xff] %vm90_vm0, %v11191_v12 }
0x1764   :  { %v11714_v40 = vpop.permute.xlu0 %11713 }
0x1765   :  { %11716 = vst.msk [vmem:[#allocation3] sm:$0xff] %vm90_vm0, %v11714_v40 }
0x177d   :  { %v11708_v63 = vpop.permute.xlu1 %11707 }
0x177e   :  { %11710 = vst.msk [vmem:[%s16845_s8] sm:$0xff] %vm90_vm0, %v11708_v63  ;;  %11717 = vst.msk [vmem:[#allocation4] sm:$0xff] %vm90_vm0, %v11708_v63 }
0x1781   :  { %v11720_v48 = vpop.permute.xlu1 %11719 }
0x1782   :  { %11722 = vst.msk [vmem:[#allocation5] sm:$0xff] %vm90_vm0, %v11720_v48 }

// kernel: sequence_encoder_forward.2
= control target key start
LH: loop header
LB: loop body
LE: loop exit
PB: predicated region body
PF: predicated region fallthrough
CT: control target
= control target key end

     0   :  { %vm84_vm0 = vcmask 130048   ;;  %vm62_vm1 = vcmask 261120   ;;  %v13908_v3 = vmov 0.0   ;;  %vm12025_vm2 = vmmov 0   ;;  %s12027_s28 = smov 64   ;;  %s12028_s10 = smov 96   ;;  %s13901_s2 = inlined_call_operand.vmem [shape: f32[2,16,128], index: 2, kind: input, shape index: {}]   ;;  %s13902_s0 = inlined_call_operand.vmem [shape: f32[64,16], index: 0, kind: input, shape index: {}, may-alias: {0,1}]   ;;  %s13903_s1 = inlined_call_operand.vmem [shape: f32[64,16], index: 1, kind: input, shape index: {}, may-alias: {0,1}]   ;;  %s13904_s3 = inlined_call_operand.vmem [shape: f32[2,32,128], index: 3, kind: input, shape index: {}]   ;;  %s13905_s4 = inlined_call_operand.vmem [shape: f32[2,1,128], index: 4, kind: input, shape index: {}]   ;;  %s13906_s5 = inlined_call_operand.vmem [shape: f32[64,32], index: 5, kind: output, shape index: {0}]   ;;  %s13907_s6 = inlined_call_operand.vmem [shape: f32[64,32], index: 6, kind: output, shape index: {1}]  }
   0x1   :  { %v76_v0 = vld [vmem:[%s13901_s2 + $0x8] sm:$0xff]  ;;  %v75_v1 = vld [vmem:[%s13901_s2] sm:$0xff]  ;;  %63 = vst.msk [vmem:[#allocation2] sm:$0xff] %vm62_vm1, %v13908_v3  ;;  %64 = vst.msk [vmem:[#allocation3] sm:$0xff] %vm62_vm1, %v13908_v3 }
   0x2   :  { %v67_v2 = vld [vmem:[%s13902_s0] sm:$0xff]  ;;  %65 = vst.msk [vmem:[#allocation4] sm:$0xff] %vm62_vm1, %v13908_v3  ;;  %66 = vst.msk [vmem:[#allocation5] sm:$0xff] %vm62_vm1, %v13908_v3  ;;  %v12081_v4 = vand.u32 4294901760, %v76_v0  ;;  %v12083_v5 = vand.u32 4294901760, %v75_v1  ;;  %v68_v7 = vld [vmem:[%s13902_s0 + $0x8] sm:$0xff] }
   0x3   :  { %v86_v6 = vsel %vm84_vm0, %v67_v2, 0  ;;  %v69_v8 = vld [vmem:[%s13902_s0 + $0x10] sm:$0xff]  ;;  %v70_v9 = vld [vmem:[%s13902_s0 + $0x18] sm:$0xff]  ;;  %v89_v11 = vsel %vm84_vm0, %v68_v7, 0  ;;  %v71_v14 = vld [vmem:[%s13902_s0 + $0x20] sm:$0xff] }
   0x4   :  { %v12095_v10 = vand.u32 4294901760, %v86_v6  ;;  %v92_v12 = vsel %vm84_vm0, %v69_v8, 0  ;;  %v95_v13 = vsel %vm84_vm0, %v70_v9, 0  ;;  %v72_v15 = vld [vmem:[%s13902_s0 + $0x28] sm:$0xff]  ;;  %10641 = vmatprep.subr.mxu0 %v12081_v4  ;;  %v286_v16 = vsub.f32 %v76_v0, %v12081_v4  ;;  %v73_v40 = vld [vmem:[%s13902_s0 + $0x30] sm:$0xff]  ;;  %v74_v41 = vld [vmem:[%s13902_s0 + $0x38] sm:$0xff] }
   0x5   :  { %v12108_v17 = vand.u32 4294901760, %v89_v11  ;;  %v12111_v18 = vsub.f32 %v75_v1, %v12083_v5  ;;  %v12113_v19 = vand.u32 4294901760, %v92_v12  ;;  %10642 = vmatpush3.msra.mxu0 %v12081_v4  ;;  %v12120_v21 = vand.u32 4294901760, %v95_v13  ;;  %v10018_v61 = vld [vmem:[%s13901_s2 + $0x18] sm:$0xff] }
   0x6   :  { %v12117_v20 = vsub.f32 %v86_v6, %v12095_v10  ;;  %10661 = vmatprep.mubr.f32.mxu1 %v12095_v10  ;;  %v98_v22 = vsel %vm84_vm0, %v71_v14, 0  ;;  %v101_v23 = vsel %vm84_vm0, %v72_v15, 0  ;;  %10643 = vmatprep.subr.mxu0 %v12083_v5  ;;  %v12125_v24 = vand.u32 4294901760, %v286_v16 }
   0x7   :  { %v12128_v25 = vsub.f32 %v89_v11, %v12108_v17  ;;  %v12131_v26 = vand.u32 4294901760, %v12111_v18  ;;  %v12134_v27 = vsub.f32 %v92_v12, %v12113_v19  ;;  %10644 = vmatpush3.msra.mxu0 %v12083_v5  ;;  %v12139_v29 = vsub.f32 %v95_v13, %v12120_v21  ;;  %v10017_v13 = vld [vmem:[%s13901_s2 + $0x10] sm:$0xff] }
   0x8   :  { %v178_v28 = vand.u32 4294901760, %v12117_v20  ;;  %v12141_v30 = vand.u32 4294901760, %v98_v22  ;;  %v12143_v31 = vand.u32 4294901760, %v101_v23  ;;  %v288_v32 = vsub.f32 %v286_v16, %v12125_v24  ;;  %10673 = vmatprep.subr.mxu0 %v286_v16 }
   0x9   :  { %v188_v33 = vand.u32 4294901760, %v12128_v25  ;;  %v295_v34 = vsub.f32 %v12111_v18, %v12131_v26  ;;  %v198_v35 = vand.u32 4294901760, %v12134_v27  ;;  %v208_v37 = vand.u32 4294901760, %v12139_v29 }
   0xa   :  { %v179_v36 = vsub.f32 %v12117_v20, %v178_v28  ;;  %v12155_v38 = vsub.f32 %v98_v22, %v12141_v30  ;;  %v12158_v39 = vsub.f32 %v101_v23, %v12143_v31  ;;  %v289_v42 = vand.u32 4294901760, %v288_v32  ;;  %v871_v23 = vld [vmem:[%s13903_s1 + $0x10] sm:$0xff] }
   0xb   :  { %v189_v43 = vsub.f32 %v12128_v25, %v188_v33  ;;  %v296_v44 = vand.u32 4294901760, %v295_v34  ;;  %v199_v45 = vsub.f32 %v12134_v27, %v198_v35  ;;  %v209_v47 = vsub.f32 %v12139_v29, %v208_v37 }
   0xc   :  { %v180_v46 = vand.u32 4294901760, %v179_v36  ;;  %v218_v48 = vand.u32 4294901760, %v12155_v38  ;;  %v228_v49 = vand.u32 4294901760, %v12158_v39  ;;  %10657 = vmatprep.subr.mxu1 %v289_v42  ;;  %v104_v51 = vsel %vm84_vm0, %v73_v40, 0 }
   0xd   :  { %v190_v50 = vand.u32 4294901760, %v189_v43  ;;  %v107_v52 = vsel %vm84_vm0, %v74_v41, 0  ;;  %10658 = vmatpush3.msra.mxu1 %v289_v42  ;;  %v200_v53 = vand.u32 4294901760, %v199_v45  ;;  %v12182_v55 = vand.u32 4294901760, %v104_v51 }
   0xe   :  { %10645 = vmatprep.mubr.f32.mxu0 %v180_v46  ;;  %v219_v54 = vsub.f32 %v12155_v38, %v218_v48  ;;  %10659 = vmatprep.subr.mxu1 %v296_v44  ;;  %v210_v56 = vand.u32 4294901760, %v209_v47  ;;  %v229_v57 = vsub.f32 %v12158_v39, %v228_v49  ;;  %v12187_v58 = vand.u32 4294901760, %v107_v52  ;;  %v876_v46 = vld [vmem:[%s13903_s1 + $0x38] sm:$0xff] }
   0xf   :  { %10646 = vmatmul.mubr.f32.vlgmr.msra.gmra.mxu0 %v190_v50  ;;  %10660 = vmatpush3.msra.mxu1 %v296_v44  ;;  %v12190_v60 = vsub.f32 %v104_v51, %v12182_v55  ;;  %v12204_v2 = vand.u32 4294901760, %v10018_v61  ;;  %v12236_v15 = vand.u32 4294901760, %v10017_v13 }
  0x10   :  { %10674 = vmatpush3.msra.mxu0 %v286_v16  ;;  %v220_v59 = vand.u32 4294901760, %v219_v54  ;;  %10662 = vmatmul.mubr.f32.vlgmr.msra.gmra.mxu1 %v12108_v17  ;;  %v12198_v62 = vsub.f32 %v107_v52, %v12187_v58  ;;  %v230_v0 = vand.u32 4294901760, %v229_v57  ;;  %v869_v16 = vld [vmem:[%s13903_s1] sm:$0xff]  ;;  %v910_v52 = vsel %vm84_vm0, %v876_v46, 0 }
  0x11   :  { %10689 = vmatprep.subr.mxu1 %v12081_v4  ;;  %10648 = vmatprep.mubr.f32.mxu0 %v200_v53  ;;  %v238_v63 = vand.u32 4294901760, %v12190_v60  ;;  %v12217_v11 = vsub.f32 %v10018_v61, %v12204_v2  ;;  %v889_v22 = vsel %vm84_vm0, %v869_v16, 0  ;;  %v12361_v57 = vand.u32 4294901760, %v910_v52 }
  0x12   :  { %10690 = vmatpush3.msra.mxu1 %v12081_v4  ;;  %10664 = vmatprep.mubr.f32.mxu1 %v12113_v19  ;;  %v248_v1 = vand.u32 4294901760, %v12198_v62 }
  0x13   :  { %10649 = vmatmul.mubr.f32.gmra.mxu0 %v210_v56  ;;  %10675 = vmatprep.subr.mxu0 %v12111_v18  ;;  %v239_v6 = vsub.f32 %v12190_v60, %v238_v63  ;;  %v12224_v12 = vand.u32 4294901760, %v12217_v11 }
  0x14   :  { %10651 = vmatprep.mubr.f32.mxu0 %v220_v59  ;;  %10665 = vmatmul.mubr.f32.gmra.mxu1 %v12120_v21  ;;  %v249_v7 = vsub.f32 %v12198_v62, %v248_v1 }
  0x15   :  { %10676 = vmatpush3.msra.mxu0 %v12111_v18  ;;  %10667 = vmatprep.mubr.f32.mxu1 %v12141_v30  ;;  %v240_v8 = vand.u32 4294901760, %v239_v6  ;;  %v1091_v14 = vsub.f32 %v12217_v11, %v12224_v12 }
  0x16   :  { %10691 = vmatprep.subr.mxu1 %v12083_v5  ;;  %v250_v9 = vand.u32 4294901760, %v249_v7  ;;  %10705 = vmatprep.subr.mxu0 %v12125_v24 }
  0x17   :  { %10652 = vmatmul.mubr.f32.gmra.mxu0 %v230_v0  ;;  %10692 = vmatpush3.msra.mxu1 %v12083_v5  ;;  %v1092_v18 = vand.u32 4294901760, %v1091_v14  ;;  %v12379_v0 = vsub.f32 %v910_v52, %v12361_v57  ;;  %v10021_v52 = vld [vmem:[%s13904_s3 + $0x20] sm:$0xff] }
  0x18   :  { %10654 = vmatprep.mubr.f32.mxu0 %v240_v8  ;;  %10668 = vmatmul.mubr.f32.gmra.mxu1 %v12143_v31 }
  0x19   :  { %10721 = vmatprep.subr.mxu1 %v12081_v4  ;;  %10670 = vmatprep.mubr.f32.mxu1 %v12182_v55  ;;  %v1051_v8 = vand.u32 4294901760, %v12379_v0 }
  0x1b   :  { %10655 = vmatmul.mubr.f32.gmra.mxu0 %v250_v9 }
  0x1c   :  { %10677 = vmatprep.mubr.f32.mxu0 %v12117_v20  ;;  %10671 = vmatmul.mubr.f32.gmra.mxu1 %v12187_v58  ;;  %v12252_v20 = vsub.f32 %v10017_v13, %v12236_v15 }
  0x1d   :  { %10693 = vmatprep.mubr.f32.mxu1 %v178_v28  ;;  %v873_v28 = vld [vmem:[%s13903_s1 + $0x20] sm:$0xff] }
  0x1e   :  { %v901_v36 = vsel %vm84_vm0, %v873_v28, 0 }
  0x1f   :  { %10678 = vmatmul.mubr.f32.vlgmr.msra.gmra.mxu0 %v12128_v25  ;;  %v12273_v25 = vand.u32 4294901760, %v889_v22  ;;  %v12320_v43 = vand.u32 4294901760, %v901_v36 }
  0x20   :  { %10706 = vmatpush3.msra.mxu0 %v12125_v24  ;;  %10680 = vmatprep.mubr.f32.mxu0 %v12134_v27  ;;  %v12271_v24 = vand.u32 4294901760, %v12252_v20  ;;  %v872_v27 = vld [vmem:[%s13903_s1 + $0x18] sm:$0xff] }
  0x21   :  { %10694 = vmatmul.mubr.f32.vlgmr.msra.gmra.mxu1 %v188_v33  ;;  %10707 = vmatprep.subr.mxu0 %v12131_v26  ;;  %v12290_v32 = vsub.f32 %v889_v22, %v12273_v25  ;;  %v12344_v50 = vsub.f32 %v901_v36, %v12320_v43  ;;  %v1674_v22 = vld [vmem:[%s13904_s3 + $0x10] sm:$0xff] }
  0x22   :  { %10722 = vmatpush3.msra.mxu1 %v12081_v4  ;;  %10696 = vmatprep.mubr.f32.mxu1 %v198_v35  ;;  %v870_v4 = vld [vmem:[%s13903_s1 + $0x8] sm:$0xff]  ;;  %v898_v35 = vsel %vm84_vm0, %v872_v27, 0 }
  0x23   :  { %10681 = vmatmul.mubr.f32.gmra.mxu0 %v12139_v29  ;;  %10723 = vmatprep.subr.mxu1 %v12083_v5  ;;  %v1098_v29 = vsub.f32 %v12252_v20, %v12271_v24  ;;  %v981_v40 = vand.u32 4294901760, %v12290_v32  ;;  %v12313_v42 = vand.u32 4294901760, %v898_v35  ;;  %v1021_v59 = vand.u32 4294901760, %v12344_v50 }
  0x24   :  { %10683 = vmatprep.mubr.f32.mxu0 %v12155_v38  ;;  %10708 = vmatpush3.msra.mxu0 %v12131_v26  ;;  %v892_v26 = vsel %vm84_vm0, %v870_v4, 0  ;;  %v875_v38 = vld [vmem:[%s13903_s1 + $0x30] sm:$0xff] }
  0x25   :  { %10697 = vmatmul.mubr.f32.gmra.mxu1 %v208_v37  ;;  %10737 = vmatprep.subr.mxu0 %v12204_v2  ;;  %v12292_v33 = vand.u32 4294901760, %v892_v26  ;;  %v874_v37 = vld [vmem:[%s13903_s1 + $0x28] sm:$0xff]  ;;  %v907_v45 = vsel %vm84_vm0, %v875_v38, 0  ;;  %v982_v47 = vsub.f32 %v12290_v32, %v981_v40 }
  0x26   :  { %10699 = vmatprep.mubr.f32.mxu1 %v218_v48  ;;  %10724 = vmatpush3.msra.mxu1 %v12083_v5  ;;  %v895_v5 = vsel %vm84_vm0, %v871_v23, 0  ;;  %v904_v44 = vsel %vm84_vm0, %v874_v37, 0  ;;  %v12336_v48 = vsub.f32 %v898_v35, %v12313_v42  ;;  %v12346_v51 = vand.u32 4294901760, %v907_v45 }
  0x27   :  { %10684 = vmatmul.mubr.f32.gmra.mxu0 %v12158_v39  ;;  %10753 = vmatprep.subr.mxu1 %v1092_v18  ;;  %v12295_v34 = vand.u32 4294901760, %v895_v5  ;;  %v1099_v39 = vand.u32 4294901760, %v1098_v29  ;;  %v12311_v41 = vsub.f32 %v892_v26, %v12292_v33  ;;  %v12435_v23 = vand.u32 4294901760, %v1674_v22 }
  0x28   :  { %10686 = vmatprep.mubr.f32.mxu0 %v12190_v60  ;;  %v1011_v54 = vand.u32 4294901760, %v12336_v48  ;;  %v12369_v60 = vsub.f32 %v907_v45, %v12346_v51 }
  0x29   :  { %10700 = vmatmul.mubr.f32.gmra.mxu1 %v228_v49  ;;  %v12338_v49 = vand.u32 4294901760, %v904_v44 }
  0x2a   :  { %10702 = vmatprep.mubr.f32.mxu1 %v238_v63 }
  0x2b   :  { %10687 = vmatmul.mubr.f32.gmra.mxu0 %v12198_v62  ;;  %v12359_v56 = vsub.f32 %v904_v44, %v12338_v49  ;;  %v1012_v62 = vsub.f32 %v12336_v48, %v1011_v54 }
  0x2c   :  { %10709 = vmatprep.mubr.f32.mxu0 %v12095_v10 }
  0x2d   :  { %10703 = vmatmul.mubr.f32.gmra.mxu1 %v248_v1  ;;  %v1031_v63 = vand.u32 4294901760, %v12359_v56  ;;  %v1013_v6 = vand.u32 4294901760, %v1012_v62 }
  0x2e   :  { %10725 = vmatprep.mubr.f32.mxu1 %v12095_v10  ;;  %v12318_v10 = vsub.f32 %v895_v5, %v12295_v34  ;;  %v12454_v5 = vsub.f32 %v1674_v22, %v12435_v23 }
  0x2f   :  { %10710 = vmatmul.mubr.f32.vlgmr.msra.gmra.mxu0 %v12108_v17  ;;  %v1032_v7 = vsub.f32 %v12359_v56, %v1031_v63 }
  0x30   :  { %10738 = vmatpush3.msra.mxu0 %v12204_v2  ;;  %10712 = vmatprep.mubr.f32.mxu0 %v12113_v19  ;;  %v12472_v29 = vand.u32 4294901760, %v12454_v5 }
  0x31   :  { %10726 = vmatmul.mubr.f32.vlgmr.msra.gmra.mxu1 %v12108_v17  ;;  %10739 = vmatprep.subr.mxu0 %v12236_v15  ;;  %v991_v17 = vand.u32 4294901760, %v12311_v41 }
  0x32   :  { %10754 = vmatpush3.msra.mxu1 %v1092_v18  ;;  %10728 = vmatprep.mubr.f32.mxu1 %v12113_v19  ;;  %v1001_v19 = vand.u32 4294901760, %v12318_v10  ;;  %v1675_v18 = vld [vmem:[%s13904_s3 + $0x18] sm:$0xff]  ;;  %v1803_v38 = vsub.f32 %v12454_v5, %v12472_v29 }
  0x33   :  { %10713 = vmatmul.mubr.f32.gmra.mxu0 %v12120_v21  ;;  %10755 = vmatprep.subr.mxu1 %v1099_v39  ;;  %v992_v53 = vsub.f32 %v12311_v41, %v991_v17 }
  0x34   :  { %10715 = vmatprep.mubr.f32.mxu0 %v12141_v30  ;;  %10740 = vmatpush3.msra.mxu0 %v12236_v15 }
  0x35   :  { %10729 = vmatmul.mubr.f32.gmra.mxu1 %v12120_v21  ;;  %10769 = vmatprep.subr.mxu0 %v12217_v11  ;;  %v983_v21 = vand.u32 4294901760, %v982_v47  ;;  %v993_v61 = vand.u32 4294901760, %v992_v53  ;;  %v10024_v47 = vld [vmem:[%s13904_s3 + $0x38] sm:$0xff] }
  0x36   :  { %10731 = vmatprep.mubr.f32.mxu1 %v12141_v30  ;;  %10756 = vmatpush3.msra.mxu1 %v1099_v39  ;;  %v1002_v30 = vsub.f32 %v12318_v10, %v1001_v19 }
  0x37   :  { %10716 = vmatmul.mubr.f32.gmra.mxu0 %v12143_v31  ;;  %10785 = vmatprep.subr.mxu1 %v12204_v2 }
  0x38   :  { %10718 = vmatprep.mubr.f32.mxu0 %v12182_v55  ;;  %v1003_v1 = vand.u32 4294901760, %v1002_v30 }
  0x39   :  { %10732 = vmatmul.mubr.f32.gmra.mxu1 %v12143_v31  ;;  %v1022_v31 = vsub.f32 %v12344_v50, %v1021_v59 }
  0x3a   :  { %10734 = vmatprep.mubr.f32.mxu1 %v12182_v55  ;;  %v1041_v55 = vand.u32 4294901760, %v12369_v60 }
  0x3b   :  { %10719 = vmatmul.mubr.f32.gmra.mxu0 %v12187_v58  ;;  %v1023_v9 = vand.u32 4294901760, %v1022_v31 }
  0x3c   :  { %10741 = vmatprep.mubr.f32.mxu0 %v983_v21  ;;  %v1042_v13 = vsub.f32 %v12369_v60, %v1041_v55  ;;  %v12596_v21 = vand.u32 4294901760, %v10021_v52 }
  0x3d   :  { %10735 = vmatmul.mubr.f32.gmra.mxu1 %v12187_v58  ;;  %v1033_v58 = vand.u32 4294901760, %v1032_v7 }
  0x3e   :  { %10757 = vmatprep.mubr.f32.mxu1 %v12273_v25  ;;  %v1043_v14 = vand.u32 4294901760, %v1042_v13  ;;  %v12621_v62 = vsub.f32 %v10021_v52, %v12596_v21 }
  0x3f   :  { %10742 = vmatmul.mubr.f32.vlgmr.msra.gmra.mxu0 %v993_v61 }
  0x40   :  { %10770 = vmatpush3.msra.mxu0 %v12217_v11  ;;  %10744 = vmatprep.mubr.f32.mxu0 %v1003_v1  ;;  %v1052_v11 = vsub.f32 %v12379_v0, %v1051_v8  ;;  %13934 = vst [vmem:[#allocation12_spill] sm:$0xff] %v12621_v62 }
  0x41   :  { %10758 = vmatmul.mubr.f32.vlgmr.msra.gmra.mxu1 %v12292_v33  ;;  %10771 = vmatprep.subr.mxu0 %v12252_v20 }
  0x42   :  { %10786 = vmatpush3.msra.mxu1 %v12204_v2  ;;  %10760 = vmatprep.mubr.f32.mxu1 %v12295_v34  ;;  %v1053_v16 = vand.u32 4294901760, %v1052_v11 }
  0x43   :  { %10745 = vmatmul.mubr.f32.gmra.mxu0 %v1013_v6  ;;  %10787 = vmatprep.subr.mxu1 %v12236_v15 }
  0x44   :  { %10747 = vmatprep.mubr.f32.mxu0 %v1023_v9  ;;  %10772 = vmatpush3.msra.mxu0 %v12252_v20  ;;  %v12418_v20 = vand.u32 4294901760, %v1675_v18 }
  0x45   :  { %10761 = vmatmul.mubr.f32.gmra.mxu1 %v12313_v42  ;;  %10801 = vmatprep.subr.mxu0 %v12224_v12 }
  0x46   :  { %10763 = vmatprep.mubr.f32.mxu1 %v12320_v43  ;;  %10788 = vmatpush3.msra.mxu1 %v12236_v15  ;;  %v12433_v4 = vsub.f32 %v1675_v18, %v12418_v20  ;;  %v12752_v18 = vld [vmem:[%s13905_s4] ss:$0 sm:$0xff] }
  0x47   :  { %10748 = vmatmul.mubr.f32.gmra.mxu0 %v1033_v58  ;;  %10817 = vmatprep.subr.mxu1 %v12204_v2 }
  0x48   :  { %10750 = vmatprep.mubr.f32.mxu0 %v1043_v14  ;;  %v12451_v26 = vand.u32 4294901760, %v12433_v4 }
  0x49   :  { %10764 = vmatmul.mubr.f32.gmra.mxu1 %v12338_v49 }
  0x4a   :  { %10766 = vmatprep.mubr.f32.mxu1 %v12346_v51  ;;  %v1796_v28 = vsub.f32 %v12433_v4, %v12451_v26 }
  0x4b   :  { %10751 = vmatmul.mubr.f32.gmra.mxu0 %v1053_v16  ;;  %v1682_v16 = vld [vmem:[#allocation3] sm:$0xff] }
  0x4c   :  { %10773 = vmatprep.mubr.f32.mxu0 %v12290_v32  ;;  %v12486_v37 = vand.u32 4294901760, %v1796_v28 }
  0x4d   :  { %10767 = vmatmul.mubr.f32.gmra.mxu1 %v12361_v57 }
  0x4e   :  { %10789 = vmatprep.mubr.f32.mxu1 %v981_v40  ;;  %13928 = vst [vmem:[#allocation6_spill] sm:$0xff] %v12486_v37 }
  0x4f   :  { %10774 = vmatmul.mubr.f32.vlgmr.msra.gmra.mxu0 %v12311_v41 }
  0x50   :  { %10802 = vmatpush3.msra.mxu0 %v12224_v12  ;;  %10776 = vmatprep.mubr.f32.mxu0 %v12318_v10  ;;  %v1673_v12 = vld [vmem:[%s13904_s3 + $0x8] sm:$0xff] }
  0x51   :  { %10790 = vmatmul.mubr.f32.vlgmr.msra.gmra.mxu1 %v991_v17  ;;  %10803 = vmatprep.subr.mxu0 %v12271_v24  ;;  %v12456_v27 = vand.u32 4294901760, %v1673_v12  ;;  %v10023_v17 = vld [vmem:[%s13904_s3 + $0x30] sm:$0xff] }
  0x52   :  { %10818 = vmatpush3.msra.mxu1 %v12204_v2  ;;  %10792 = vmatprep.mubr.f32.mxu1 %v1001_v19  ;;  %v1681_v2 = vld [vmem:[#allocation2] sm:$0xff]  ;;  %v10022_v19 = vld [vmem:[%s13904_s3 + $0x28] sm:$0xff] }
  0x53   :  { %10777 = vmatmul.mubr.f32.gmra.mxu0 %v12336_v48  ;;  %10819 = vmatprep.subr.mxu1 %v12236_v15  ;;  %v12475_v32 = vsub.f32 %v1673_v12, %v12456_v27  ;;  %v1683_v48 = vld [vmem:[#allocation4] sm:$0xff] }
  0x54   :  { %10779 = vmatprep.mubr.f32.mxu0 %v12344_v50  ;;  %10804 = vmatpush3.msra.mxu0 %v12271_v24  ;;  %v1672_v24 = vld [vmem:[%s13904_s3] sm:$0xff]  ;;  %v12572_v50 = vand.u32 4294901760, %v10023_v17  ;;  %s12026_s3 = smov 32  }
  0x55   :  { %10793 = vmatmul.mubr.f32.gmra.mxu1 %v1011_v54  ;;  %10833 = vmatprep.subr.mxu0 %v13908_v3  ;;  %v12477_v35 = vand.u32 4294901760, %v1672_v24  ;;  %v12491_v39 = vand.u32 4294901760, %v12475_v32  ;;  %v12585_v54 = vand.u32 4294901760, %v10022_v19 }
  0x56   :  { %10795 = vmatprep.mubr.f32.mxu1 %v1021_v59  ;;  %10820 = vmatpush3.msra.mxu1 %v12236_v15  ;;  %v1687_v15 = vsel %vm62_vm1, %v1681_v2, 0 }
  0x57   :  { %10780 = vmatmul.mubr.f32.gmra.mxu0 %v12359_v56  ;;  %10844 = vmatprep.subr.mxu1 %v13908_v3  ;;  %v12480_v36 = vand.u32 4294901760, %v1687_v15  ;;  %v12494_v40 = vsub.f32 %v1672_v24, %v12477_v35  ;;  %v1810_v10 = vsub.f32 %v12475_v32, %v12491_v39  ;;  %v12608_v59 = vsub.f32 %v10022_v19, %v12585_v54 }
  0x58   :  { %10782 = vmatprep.mubr.f32.mxu0 %v12369_v60  ;;  %2183 = vrot.lane.b32.xlu1 %v1682_v16, %s12026_s3 }
  0x59   :  { %10796 = vmatmul.mubr.f32.gmra.mxu1 %v1031_v63  ;;  %v12498_v41 = vsub.f32 %v1687_v15, %v12480_v36  ;;  %v12511_v44 = vand.u32 4294901760, %v12494_v40 }
  0x5a   :  { %10798 = vmatprep.mubr.f32.mxu1 %v1041_v55  ;;  %v12641_v55 = vand.u32 4294901760, %v12621_v62 }
  0x5b   :  { %10783 = vmatmul.mubr.f32.gmra.mxu0 %v12379_v0  ;;  %v1817_v45 = vsub.f32 %v12494_v40, %v12511_v44  ;;  %v12630_v0 = vand.u32 4294901760, %v12608_v59 }
  0x5c   :  { %10805 = vmatprep.mubr.f32.mxu0 %v12273_v25  ;;  %13936 = vst [vmem:[#allocation14_spill] sm:$0xff] %v12641_v55  ;;  %v2339_v13 = vsub.f32 %v12621_v62, %v12641_v55 }
  0x5d   :  { %10799 = vmatmul.mubr.f32.gmra.mxu1 %v1051_v8  ;;  %13935 = vst [vmem:[#allocation13_spill] sm:$0xff] %v12630_v0  ;;  %v2332_v7 = vsub.f32 %v12608_v59, %v12630_v0 }
  0x5e   :  { %10821 = vmatprep.mubr.f32.mxu1 %v12273_v25  ;;  %v12506_v25 = vand.u32 4294901760, %v1803_v38  ;;  %v12671_v14 = vand.u32 4294901760, %v2339_v13 }
  0x5f   :  { %10806 = vmatmul.mubr.f32.vlgmr.msra.gmra.mxu0 %v12292_v33  ;;  %v12665_v58 = vand.u32 4294901760, %v2332_v7 }
  0x60   :  { %10834 = vmatpush3.msra.mxu0 %v12418_v20  ;;  %10808 = vmatprep.mubr.f32.mxu0 %v12295_v34  ;;  %13929 = vst [vmem:[#allocation7_spill] sm:$0xff] %v12506_v25 }
  0x61   :  { %10822 = vmatmul.mubr.f32.vlgmr.msra.gmra.mxu1 %v12292_v33  ;;  %10835 = vmatprep.subr.mxu0 %v13908_v3  ;;  %v1760_v33 = vand.u32 4294901760, %v12498_v41 }
  0x62   :  { %10845 = vmatpush3.msra.mxu1 %v12486_v37  ;;  %10824 = vmatprep.mubr.f32.mxu1 %v12295_v34  ;;  %v12522_v34 = vand.u32 4294901760, %v1810_v10 }
  0x63   :  { %10809 = vmatmul.mubr.f32.gmra.mxu0 %v12313_v42  ;;  %10846 = vmatprep.subr.mxu1 %v13908_v3  ;;  %v1761_v46 = vsub.f32 %v12498_v41, %v1760_v33 }
  0x64   :  { %10836 = vmatpush3.msra.mxu0 %v12435_v23  ;;  %10811 = vmatprep.mubr.f32.mxu0 %v12320_v43  ;;  %13930 = vst [vmem:[#allocation8_spill] sm:$0xff] %v12522_v34 }
  0x65   :  { %10825 = vmatmul.mubr.f32.gmra.mxu1 %v12313_v42  ;;  %10837 = vmatprep.subr.mxu0 %v13908_v3  ;;  %v12537_v42 = vand.u32 4294901760, %v1817_v45 }
  0x66   :  { %10847 = vmatpush3.msra.mxu1 %v12506_v25  ;;  %10827 = vmatprep.mubr.f32.mxu1 %v12320_v43  ;;  %v1762_v43 = vand.u32 4294901760, %v1761_v46 }
  0x67   :  { %10812 = vmatmul.mubr.f32.gmra.mxu0 %v12338_v49  ;;  %10848 = vmatprep.subr.mxu1 %v13908_v3  ;;  %13931 = vst [vmem:[#allocation9_spill] sm:$0xff] %v12537_v42 }
  0x68   :  { %10838 = vmatpush3.msra.mxu0 %v12456_v27  ;;  %10814 = vmatprep.mubr.f32.mxu0 %v12346_v51 }
  0x69   :  { %10828 = vmatmul.mubr.f32.gmra.mxu1 %v12338_v49  ;;  %10839 = vmatprep.subr.mxu0 %v13908_v3  ;;  %v12563_v49 = vand.u32 4294901760, %v10024_v47 }
  0x6a   :  { %10849 = vmatpush3.msra.mxu1 %v12522_v34  ;;  %10830 = vmatprep.mubr.f32.mxu1 %v12346_v51  ;;  %v2209_v51 = vsel %vm62_vm1, %v1683_v48, 0 }
  0x6b   :  { %10815 = vmatmul.mubr.f32.gmra.mxu0 %v12361_v57  ;;  %10850 = vmatprep.subr.mxu1 %v13908_v3  ;;  %v12583_v53 = vsub.f32 %v10024_v47, %v12563_v49  ;;  %v12589_v56 = vand.u32 4294901760, %v2209_v51 }
  0x6c   :  { %10840 = vmatpush3.msra.mxu0 %v12477_v35  ;;  %10841 = vmatprep.mubr.msk.f32.mxu0 %vm12025_vm2, %v13908_v3 }
  0x6d   :  { %10831 = vmatmul.mubr.f32.gmra.mxu1 %v12361_v57  ;;  %10855 = vmatprep.subr.mxu0 %v13908_v3  ;;  %v12594_v57 = vsub.f32 %v10023_v17, %v12572_v50  ;;  %v12605_v30 = vand.u32 4294901760, %v12583_v53  ;;  %v12613_v60 = vsub.f32 %v2209_v51, %v12589_v56 }
  0x6e   :  { %10851 = vmatpush3.msra.mxu1 %v12537_v42  ;;  %10852 = vmatprep.mubr.msk.f32.mxu1 %vm12025_vm2, %v13908_v3 }
  0x6f   :  { %10842 = vmatmul.mubr.f32.vlgmr.msra.gmra.mxu0 %v1762_v43  ;;  %10866 = vmatprep.subr.mxu1 %v13908_v3  ;;  %13932 = vst [vmem:[#allocation10_spill] sm:$0xff] %v12605_v30  ;;  %v12618_v61 = vand.u32 4294901760, %v12594_v57  ;;  %v2318_v63 = vsub.f32 %v12583_v53, %v12605_v30  ;;  %v2282_v1 = vand.u32 4294901760, %v12613_v60 }
  0x70   :  { %10856 = vmatpush3.msra.mxu0 %v12433_v4  ;;  %10863 = vmatprep.mubr.msk.f32.mxu0 %vm12025_vm2, %v13908_v3 }
  0x71   :  { %10857 = vmatprep.subr.mxu0 %v13908_v3  ;;  %10853 = vmatmul.mubr.f32.vlgmr.msra.gmra.mxu1 %v12480_v36  ;;  %13933 = vst [vmem:[#allocation11_spill] sm:$0xff] %v12618_v61  ;;  %v2325_v31 = vsub.f32 %v12594_v57, %v12618_v61  ;;  %v12647_v6 = vand.u32 4294901760, %v2318_v63  ;;  %v2283_v8 = vsub.f32 %v12613_v60, %v2282_v1 }
  0x72   :  { %10858 = vmatpush3.msra.mxu0 %v12454_v5  ;;  %10867 = vmatpush3.msra.mxu1 %v12418_v20 }
  0x73   :  { %10859 = vmatprep.subr.mxu0 %v13908_v3  ;;  %10868 = vmatprep.subr.mxu1 %v13908_v3  ;;  %v12657_v9 = vand.u32 4294901760, %v2325_v31  ;;  %v2284_v11 = vand.u32 4294901760, %v2283_v8 }
  0x74   :  { %10860 = vmatpush3.msra.mxu0 %v12475_v32  ;;  %10869 = vmatpush3.msra.mxu1 %v12435_v23 }
  0x75   :  { %10861 = vmatprep.subr.mxu0 %v13908_v3  ;;  %10870 = vmatprep.subr.mxu1 %v13908_v3 }
  0x76   :  { %10862 = vmatpush3.msra.mxu0 %v12494_v40  ;;  %10871 = vmatpush3.msra.mxu1 %v12456_v27 }
  0x77   :  { %10864 = vmatmul.mubr.f32.vlgmr.msra.gmra.mxu0 %v12498_v41  ;;  %10872 = vmatprep.subr.mxu1 %v13908_v3 }
  0x78   :  { %10877 = vmatprep.subr.mxu0 %v13908_v3  ;;  %10873 = vmatpush3.msra.mxu1 %v12477_v35 }
  0x79   :  { %10874 = vmatprep.mubr.msk.f32.mxu1 %vm12025_vm2, %v13908_v3  ;;  %10878 = vmatpush3.msra.mxu0 %v12451_v26 }
  0x7a   :  { %10875 = vmatmul.mubr.f32.vlgmr.msra.gmra.mxu1 %v1760_v33  ;;  %10879 = vmatprep.subr.mxu0 %v13908_v3 }
  0x7b   :  { %10888 = vmatprep.subr.mxu1 %v13908_v3  ;;  %10880 = vmatpush3.msra.mxu0 %v12472_v29 }
  0x7c   :  { %10889 = vmatpush3.msra.mxu1 %v12418_v20  ;;  %10881 = vmatprep.subr.mxu0 %v13908_v3 }
  0x7d   :  { %10890 = vmatprep.subr.mxu1 %v13908_v3  ;;  %10882 = vmatpush3.msra.mxu0 %v12491_v39 }
  0x7e   :  { %10891 = vmatpush3.msra.mxu1 %v12435_v23  ;;  %10883 = vmatprep.subr.mxu0 %v13908_v3 }
  0x7f   :  { %10892 = vmatprep.subr.mxu1 %v13908_v3  ;;  %10884 = vmatpush3.msra.mxu0 %v12511_v44 }
  0x80   :  { %10885 = vmatprep.mubr.msk.f32.mxu0 %vm12025_vm2, %v13908_v3  ;;  %10893 = vmatpush3.msra.mxu1 %v12456_v27 }
  0x81   :  { %10886 = vmatmul.mubr.f32.vlgmr.msra.gmra.mxu0 %v12480_v36  ;;  %10894 = vmatprep.subr.mxu1 %v13908_v3 }
  0x82   :  { %10899 = vmatprep.subr.mxu0 %v13908_v3  ;;  %10895 = vmatpush3.msra.mxu1 %v12477_v35 }
  0x83   :  { %10896 = vmatprep.mubr.msk.f32.mxu1 %vm12025_vm2, %v13908_v3  ;;  %10900 = vmatpush3.msra.mxu0 %v12563_v49 }
  0x84   :  { %10897 = vmatmul.mubr.f32.vlgmr.msra.gmra.mxu1 %v12480_v36  ;;  %10901 = vmatprep.subr.mxu0 %v13908_v3 }
  0x85   :  { %10910 = vmatprep.subr.mxu1 %v13908_v3  ;;  %10902 = vmatpush3.msra.mxu0 %v12572_v50 }
  0x86   :  { %10911 = vmatpush3.msra.mxu1 %v12647_v6  ;;  %10903 = vmatprep.subr.mxu0 %v13908_v3 }
  0x87   :  { %10912 = vmatprep.subr.mxu1 %v13908_v3  ;;  %10904 = vmatpush3.msra.mxu0 %v12585_v54 }
  0x88   :  { %10913 = vmatpush3.msra.mxu1 %v12657_v9  ;;  %10905 = vmatprep.subr.mxu0 %v13908_v3 }
  0x89   :  { %10914 = vmatprep.subr.mxu1 %v13908_v3  ;;  %10906 = vmatpush3.msra.mxu0 %v12596_v21 }
  0x8a   :  { %10907 = vmatprep.mubr.msk.f32.mxu0 %vm12025_vm2, %v13908_v3  ;;  %10915 = vmatpush3.msra.mxu1 %v12665_v58 }
  0x8b   :  { %10908 = vmatmul.mubr.f32.vlgmr.msra.gmra.mxu0 %v2284_v11  ;;  %10916 = vmatprep.subr.mxu1 %v13908_v3 }
  0x8c   :  { %10921 = vmatprep.subr.mxu0 %v13908_v3  ;;  %10917 = vmatpush3.msra.mxu1 %v12671_v14 }
  0x8d   :  { %10918 = vmatprep.mubr.msk.f32.mxu1 %vm12025_vm2, %v13908_v3  ;;  %10922 = vmatpush3.msra.mxu0 %v12583_v53 }
  0x8e   :  { %10919 = vmatmul.mubr.f32.vlgmr.msra.gmra.mxu1 %v12589_v56  ;;  %10923 = vmatprep.subr.mxu0 %v13908_v3 }
  0x8f   :  { %10932 = vmatprep.subr.mxu1 %v13908_v3  ;;  %10924 = vmatpush3.msra.mxu0 %v12594_v57 }
  0x90   :  { %10933 = vmatpush3.msra.mxu1 %v12563_v49  ;;  %10925 = vmatprep.subr.mxu0 %v13908_v3 }
  0x91   :  { %10934 = vmatprep.subr.mxu1 %v13908_v3  ;;  %10926 = vmatpush3.msra.mxu0 %v12608_v59 }
  0x92   :  { %10935 = vmatpush3.msra.mxu1 %v12572_v50  ;;  %10927 = vmatprep.subr.mxu0 %v13908_v3 }
  0x93   :  { %10936 = vmatprep.subr.mxu1 %v13908_v3  ;;  %10928 = vmatpush3.msra.mxu0 %v12621_v62 }
  0x94   :  { %10929 = vmatprep.mubr.msk.f32.mxu0 %vm12025_vm2, %v13908_v3  ;;  %10937 = vmatpush3.msra.mxu1 %v12585_v54 }
  0x95   :  { %10930 = vmatmul.mubr.f32.vlgmr.msra.gmra.mxu0 %v12613_v60  ;;  %10938 = vmatprep.subr.mxu1 %v13908_v3 }
  0x96   :  { %10943 = vmatprep.subr.mxu0 %v13908_v3  ;;  %10939 = vmatpush3.msra.mxu1 %v12596_v21 }
  0x97   :  { %10940 = vmatprep.mubr.msk.f32.mxu1 %vm12025_vm2, %v13908_v3  ;;  %10944 = vmatpush3.msra.mxu0 %v12605_v30 }
  0x98   :  { %10941 = vmatmul.mubr.f32.vlgmr.msra.gmra.mxu1 %v2282_v1  ;;  %10945 = vmatprep.subr.mxu0 %v13908_v3 }
  0x99   :  { %10954 = vmatprep.subr.mxu1 %v13908_v3  ;;  %10946 = vmatpush3.msra.mxu0 %v12618_v61 }
  0x9a   :  { %10955 = vmatpush3.msra.mxu1 %v12563_v49  ;;  %10947 = vmatprep.subr.mxu0 %v13908_v3 }
  0x9b   :  { %10956 = vmatprep.subr.mxu1 %v13908_v3  ;;  %10948 = vmatpush3.msra.mxu0 %v12630_v0 }
  0x9c   :  { %10957 = vmatpush3.msra.mxu1 %v12572_v50  ;;  %10949 = vmatprep.subr.mxu0 %v13908_v3 }
  0x9d   :  { %10958 = vmatprep.subr.mxu1 %v13908_v3  ;;  %10950 = vmatpush3.msra.mxu0 %v12641_v55 }
  0x9e   :  { %10951 = vmatprep.mubr.msk.f32.mxu0 %vm12025_vm2, %v13908_v3  ;;  %10959 = vmatpush3.msra.mxu1 %v12585_v54 }
  0x9f   :  { %10952 = vmatmul.mubr.f32.vlgmr.msra.gmra.mxu0 %v12589_v56  ;;  %10960 = vmatprep.subr.mxu1 %v13908_v3 }
  0xa0   :  { %10961 = vmatpush3.msra.mxu1 %v12596_v21  ;;  %10962 = vmatprep.mubr.msk.f32.mxu1 %vm12025_vm2, %v13908_v3 }
  0xa1   :  { %10963 = vmatmul.mubr.f32.vlgmr.msra.gmra.mxu1 %v12589_v56  ;;  %10976 = vmatprep.subr.mxu1 %v13908_v3 }
  0xa2   :  { %10965 = vmatprep.subr.mxu0 %v13908_v3  ;;  %10977 = vmatpush3.msra.mxu1 %v12486_v37 }
  0xa3   :  { %10984 = vmatprep.mubr.msk.f32.mxu1 %vm12025_vm2, %v13908_v3  ;;  %10978 = vmatprep.subr.mxu1 %v13908_v3 }
  0xa4   :  { %10966 = vmatpush3.msra.mxu0 %v12418_v20  ;;  %10979 = vmatpush3.msra.mxu1 %v12506_v25 }
  0xa5   :  { %10967 = vmatprep.subr.mxu0 %v13908_v3  ;;  %10980 = vmatprep.subr.mxu1 %v13908_v3 }
  0xa6   :  { %10968 = vmatpush3.msra.mxu0 %v12435_v23  ;;  %10981 = vmatpush3.msra.mxu1 %v12522_v34 }
  0xa7   :  { %10969 = vmatprep.subr.mxu0 %v13908_v3  ;;  %10982 = vmatprep.subr.mxu1 %v13908_v3 }
  0xa8   :  { %10970 = vmatpush3.msra.mxu0 %v12456_v27  ;;  %10983 = vmatpush3.msra.mxu1 %v12537_v42 }
  0xa9   :  { %10971 = vmatprep.subr.mxu0 %v13908_v3  ;;  %10998 = vmatprep.subr.mxu1 %v13908_v3 }
  0xaa   :  { %10972 = vmatpush3.msra.mxu0 %v12477_v35  ;;  %10973 = vmatprep.mubr.msk.f32.mxu0 %vm12025_vm2, %v13908_v3 }
  0xab   :  { %10987 = vmatprep.subr.mxu0 %v13908_v3 }
  0xcf   :  { %v10647_v22 = vpop.f32.mrf.mxu0 }
  0xd0   :  { %v193_v12 = vadd.f32 %v10647_v22, %v12752_v18  ;;  %v10663_v24 = vpop.f32.mrf.mxu1 }
  0xd1   :  { %v12755_v2 = vpop.f32.mrf.mxu0 }
  0xd2   :  { %v340_v15 = vadd.f32 %v10663_v24, %v193_v12  ;;  %v12757_v36 = vpop.f32.mrf.mxu1 }
  0xd3   :  { %v10650_v28 = vpop.f32.mrf.mxu0 }
  0xd4   :  { %v213_v38 = vadd.f32 %v10650_v28, %v12752_v18  ;;  %v10666_v10 = vpop.f32.mrf.mxu1 }
  0xd5   :  { %v12760_v41 = vpop.f32.mrf.mxu0 }
  0xd6   :  { %13937 = vst [vmem:[#allocation15_spill] sm:$0xff] %v12760_v41  ;;  %v352_v33 = vadd.f32 %v10666_v10, %v213_v38  ;;  %v12762_v46 = vpop.f32.mrf.mxu1 }
  0xd7   :  { %v10653_v45 = vpop.f32.mrf.mxu0  ;;  %13938 = vst [vmem:[#allocation16_spill] sm:$0xff] %v12762_v46 }
  0xd8   :  { %v233_v43 = vadd.f32 %v10653_v45, %v12752_v18  ;;  %v10669_v17 = vpop.f32.mrf.mxu1 }
  0xd9   :  { %v12765_v47 = vpop.f32.mrf.mxu0 }
  0xda   :  { %13939 = vst [vmem:[#allocation17_spill] sm:$0xff] %v12765_v47  ;;  %v364_v48 = vadd.f32 %v10669_v17, %v233_v43  ;;  %v12767_v51 = vpop.f32.mrf.mxu1 }
  0xdb   :  { %v10656_v19 = vpop.f32.mrf.mxu0  ;;  %13940 = vst [vmem:[#allocation18_spill] sm:$0xff] %v12767_v51 }
  0xdc   :  { %v253_v52 = vadd.f32 %v10656_v19, %v12752_v18  ;;  %v10672_v60 = vpop.f32.mrf.mxu1 }
  0xdd   :  { %v12770_v56 = vpop.f32.mrf.mxu0 }
  0xde   :  { %13941 = vst [vmem:[#allocation19_spill] sm:$0xff] %v12770_v56  ;;  %v376_v63 = vadd.f32 %v10672_v60, %v253_v52  ;;  %v12772_v1 = vpop.f32.mrf.mxu1 }
  0xdf   :  { %13942 = vst [vmem:[#allocation20_spill] sm:$0xff] %v12772_v1  ;;  %v10679_v31 = vpop.f32.mrf.mxu0 }
  0xe0   :  { %v459_v7 = vadd.f32 %v10679_v31, %v340_v15 }
  0xe1   :  { %v12774_v8 = vpop.f32.mrf.mxu0  ;;  %v10695_v13 = vpop.f32.mrf.mxu1 }
  0xe2   :  { %v584_v11 = vadd.f32 %v10695_v13, %v459_v7 }
  0xe3   :  { %v10682_v16 = vpop.f32.mrf.mxu0  ;;  %v12776_v22 = vpop.f32.mrf.mxu1 }
  0xe4   :  { %v473_v12 = vadd.f32 %v10682_v16, %v352_v33 }
  0xe5   :  { %v12778_v24 = vpop.f32.mrf.mxu0  ;;  %v10698_v28 = vpop.f32.mrf.mxu1 }
  0xe6   :  { %13943 = vst [vmem:[#allocation21_spill] sm:$0xff] %v12778_v24  ;;  %v600_v38 = vadd.f32 %v10698_v28, %v473_v12 }
  0xe7   :  { %v10685_v10 = vpop.f32.mrf.mxu0  ;;  %v12780_v45 = vpop.f32.mrf.mxu1 }
  0xe8   :  { %13944 = vst [vmem:[#allocation22_spill] sm:$0xff] %v12780_v45  ;;  %v487_v43 = vadd.f32 %v10685_v10, %v364_v48 }
  0xe9   :  { %v12782_v17 = vpop.f32.mrf.mxu0  ;;  %v10701_v19 = vpop.f32.mrf.mxu1 }
  0xea   :  { %13945 = vst [vmem:[#allocation23_spill] sm:$0xff] %v12782_v17  ;;  %v616_v15 = vadd.f32 %v10701_v19, %v487_v43 }
  0xeb   :  { %v10688_v52 = vpop.f32.mrf.mxu0  ;;  %v12784_v60 = vpop.f32.mrf.mxu1 }
  0xec   :  { %13946 = vst [vmem:[#allocation24_spill] sm:$0xff] %v12784_v60  ;;  %v501_v31 = vadd.f32 %v10688_v52, %v376_v63 }
  0xed   :  { %v12786_v7 = vpop.f32.mrf.mxu0  ;;  %v10704_v13 = vpop.f32.mrf.mxu1 }
  0xee   :  { %13947 = vst [vmem:[#allocation25_spill] sm:$0xff] %v12786_v7  ;;  %v632_v33 = vadd.f32 %v10704_v13, %v501_v31 }
  0xef   :  { %v12788_v16 = vpop.f32.mrf.mxu1  ;;  %v10711_v3 = vpop.f32.mrf.mxu0 }
  0xf0   :  { %13948 = vst [vmem:[#allocation26_spill] sm:$0xff] %v12788_v16  ;;  %v715_v12 = vadd.f32 %v10711_v3, %v584_v11 }
  0xf1   :  { %v12790_v28 = vpop.f32.mrf.mxu0  ;;  %v10727_v1 = vpop.f32.mrf.mxu1 }
  0xf2   :  { %v12792_v48 = vadd.f32 %v10727_v1, %v715_v12 }
  0xf3   :  { %v10714_v10 = vpop.f32.mrf.mxu0  ;;  %v12794_v56 = vpop.f32.mrf.mxu1 }
  0xf4   :  { %13949 = vst [vmem:[#allocation27_spill] sm:$0xff] %v12792_v48  ;;  %v727_v43 = vadd.f32 %v10714_v10, %v600_v38  ;;  %v10020_v10 = vld [vmem:[%s13905_s4 + $0x1] ss:$0 sm:$0xff] }
  0xf5   :  { %v12796_v19 = vpop.f32.mrf.mxu0  ;;  %v10730_v63 = vpop.f32.mrf.mxu1 }
  0xf6   :  { %13950 = vst [vmem:[#allocation28_spill] sm:$0xff] %v12796_v19  ;;  %v12798_v52 = vadd.f32 %v10730_v63, %v727_v43 }
  0xf7   :  { %v10717_v7 = vpop.f32.mrf.mxu0  ;;  %v12800_v31 = vpop.f32.mrf.mxu1 }
  0xf8   :  { %13951 = vst [vmem:[#allocation29_spill] sm:$0xff] %v12798_v52  ;;  %13952 = vst [vmem:[#allocation30_spill] sm:$0xff] %v12800_v31  ;;  %v739_v13 = vadd.f32 %v10717_v7, %v616_v15 }
  0xf9   :  { %v12802_v16 = vpop.f32.mrf.mxu0  ;;  %v10733_v3 = vpop.f32.mrf.mxu1 }
  0xfa   :  { %13953 = vst [vmem:[#allocation31_spill] sm:$0xff] %v12802_v16  ;;  %v12804_v11 = vadd.f32 %v10733_v3, %v739_v13 }
  0xfb   :  { %v10720_v1 = vpop.f32.mrf.mxu0  ;;  %v12806_v12 = vpop.f32.mrf.mxu1 }
  0xfc   :  { %13954 = vst [vmem:[#allocation32_spill] sm:$0xff] %v12804_v11  ;;  %13955 = vst [vmem:[#allocation33_spill] sm:$0xff] %v12806_v12  ;;  %v751_v60 = vadd.f32 %v10720_v1, %v632_v33 }
  0xfd   :  { %v12808_v17 = vpop.f32.mrf.mxu0  ;;  %v10736_v38 = vpop.f32.mrf.mxu1 }
  0xfe   :  { %13956 = vst [vmem:[#allocation34_spill] sm:$0xff] %v12808_v17  ;;  %v12813_v43 = vadd.f32 %v10736_v38, %v751_v60 }
  0xff   :  { %v12815_v63 = vpop.f32.mrf.mxu1  ;;  %v10743_v15 = vpop.f32.mrf.mxu0 }
 0x100   :  { %13957 = vst [vmem:[#allocation35_spill] sm:$0xff] %v12813_v43  ;;  %13958 = vst [vmem:[#allocation36_spill] sm:$0xff] %v12815_v63  ;;  %v996_v7 = vadd.f32 %v10743_v15, %v10020_v10 }
 0x101   :  { %v985_v16 = vpop.f32.mrf.mxu0  ;;  %v10759_v13 = vpop.f32.mrf.mxu1 }
 0x102   :  { %v1143_v3 = vadd.f32 %v10759_v13, %v996_v7  ;;  %v986_v63 = vadd.f32 %v10020_v10, %v985_v16 }
 0x103   :  { %v10746_v11 = vpop.f32.mrf.mxu0  ;;  %v1136_v51 = vpop.f32.mrf.mxu1 }
 0x104   :  { %v1016_v12 = vadd.f32 %v10746_v11, %v10020_v10  ;;  %v1137_v48 = vadd.f32 %v1136_v51, %v986_v63 }
 0x105   :  { %v1005_v33 = vpop.f32.mrf.mxu0  ;;  %v10762_v1 = vpop.f32.mrf.mxu1 }
 0x106   :  { %v1155_v17 = vadd.f32 %v10762_v1, %v1016_v12  ;;  %v1006_v11 = vadd.f32 %v10020_v10, %v1005_v33 }
 0x107   :  { %v10749_v47 = vpop.f32.mrf.mxu0  ;;  %v1148_v52 = vpop.f32.mrf.mxu1 }
 0x108   :  { %v1036_v31 = vadd.f32 %v10749_v47, %v10020_v10  ;;  %v1149_v0 = vadd.f32 %v1148_v52, %v1006_v11 }
 0x109   :  { %v1025_v19 = vpop.f32.mrf.mxu0  ;;  %v10765_v45 = vpop.f32.mrf.mxu1 }
 0x10a   :  { %v1167_v60 = vadd.f32 %v10765_v45, %v1036_v31  ;;  %v1026_v45 = vadd.f32 %v10020_v10, %v1025_v19 }
 0x10b   :  { %v10752_v38 = vpop.f32.mrf.mxu0  ;;  %v1160_v43 = vpop.f32.mrf.mxu1 }
 0x10c   :  { %v1056_v24 = vadd.f32 %v10752_v38, %v10020_v10  ;;  %v1161_v62 = vadd.f32 %v1160_v43, %v1026_v45 }
 0x10d   :  { %v1045_v15 = vpop.f32.mrf.mxu0  ;;  %v10768_v46 = vpop.f32.mrf.mxu1 }
 0x10e   :  { %v1179_v41 = vadd.f32 %v10768_v46, %v1056_v24  ;;  %v1046_v51 = vadd.f32 %v10020_v10, %v1045_v15 }
 0x10f   :  { %v1172_v7 = vpop.f32.mrf.mxu1  ;;  %v10775_v13 = vpop.f32.mrf.mxu0 }
 0x110   :  { %v1262_v42 = vadd.f32 %v10775_v13, %v1143_v3  ;;  %v1173_v52 = vadd.f32 %v1172_v7, %v1046_v51 }
 0x111   :  { %v1254_v34 = vpop.f32.mrf.mxu0  ;;  %v10791_v12 = vpop.f32.mrf.mxu1 }
 0x112   :  { %v1255_v1 = vadd.f32 %v1254_v34, %v1137_v48  ;;  %v1387_v55 = vadd.f32 %v10791_v12, %v1262_v42 }
 0x113   :  { %v10778_v47 = vpop.f32.mrf.mxu0  ;;  %v1378_v25 = vpop.f32.mrf.mxu1 }
 0x114   :  { %v1276_v31 = vadd.f32 %v10778_v47, %v1155_v17  ;;  %v1379_v37 = vadd.f32 %v1378_v25, %v1255_v1 }
 0x115   :  { %v1268_v16 = vpop.f32.mrf.mxu0  ;;  %v10794_v38 = vpop.f32.mrf.mxu1 }
 0x116   :  { %v1269_v61 = vadd.f32 %v1268_v16, %v1149_v0  ;;  %v1403_v30 = vadd.f32 %v10794_v38, %v1276_v31 }
 0x117   :  { %v10781_v46 = vpop.f32.mrf.mxu0  ;;  %v1394_v24 = vpop.f32.mrf.mxu1 }
 0x118   :  { %v1290_v63 = vadd.f32 %v10781_v46, %v1167_v60  ;;  %v1395_v3 = vadd.f32 %v1394_v24, %v1269_v61 }
 0x119   :  { %v1282_v33 = vpop.f32.mrf.mxu0  ;;  %v10797_v13 = vpop.f32.mrf.mxu1 }
 0x11a   :  { %v1283_v34 = vadd.f32 %v1282_v33, %v1161_v62  ;;  %v1419_v42 = vadd.f32 %v10797_v13, %v1290_v63 }
 0x11b   :  { %v10784_v48 = vpop.f32.mrf.mxu0  ;;  %v1410_v12 = vpop.f32.mrf.mxu1 }
 0x11c   :  { %v1304_v19 = vadd.f32 %v10784_v48, %v1179_v41  ;;  %v1411_v17 = vadd.f32 %v1410_v12, %v1283_v34 }
 0x11d   :  { %v1296_v25 = vpop.f32.mrf.mxu0  ;;  %v10800_v11 = vpop.f32.mrf.mxu1 }
 0x11e   :  { %v1297_v1 = vadd.f32 %v1296_v25, %v1173_v52  ;;  %v12817_v0 = vadd.f32 %v10800_v11, %v1304_v19 }
 0x11f   :  { %v1426_v47 = vpop.f32.mrf.mxu1  ;;  %v10807_v31 = vpop.f32.mrf.mxu0 }
 0x120   :  { %v1427_v43 = vadd.f32 %v1426_v47, %v1297_v1  ;;  %v1518_v10 = vadd.f32 %v10807_v31, %v1387_v55 }
 0x121   :  { %v1511_v60 = vpop.f32.mrf.mxu0  ;;  %v10823_v61 = vpop.f32.mrf.mxu1 }
 0x122   :  { %v1512_v15 = vadd.f32 %v1511_v60, %v1379_v37  ;;  %v12819_v45 = vadd.f32 %v10823_v61, %v1518_v10  ;;  %v183_v61 = vadd.f32 %v12752_v18, %v12755_v2 }
 0x123   :  { %v10810_v62 = vpop.f32.mrf.mxu0  ;;  %v1626_v16 = vpop.f32.mrf.mxu1 }
 0x124   :  { %13959 = vst [vmem:[#allocation37_spill] sm:$0xff] %v12819_v45  ;;  %v1530_v38 = vadd.f32 %v10810_v62, %v1403_v30  ;;  %v12821_v7 = vadd.f32 %v1626_v16, %v1512_v15  ;;  %v334_v15 = vadd.f32 %v12757_v36, %v183_v61 }
 0x125   :  { %v1523_v41 = vpop.f32.mrf.mxu0  ;;  %v10826_v46 = vpop.f32.mrf.mxu1 }
 0x126   :  { %13960 = vst [vmem:[#allocation38_spill] sm:$0xff] %v12821_v7  ;;  %v1524_v24 = vadd.f32 %v1523_v41, %v1395_v3  ;;  %v12823_v51 = vadd.f32 %v10826_v46, %v1530_v38  ;;  %v452_v41 = vadd.f32 %v12774_v8, %v334_v15 }
 0x127   :  { %v10813_v63 = vpop.f32.mrf.mxu0  ;;  %v1638_v33 = vpop.f32.mrf.mxu1 }
 0x128   :  { %13961 = vst [vmem:[#allocation39_spill] sm:$0xff] %v12823_v51  ;;  %v1542_v13 = vadd.f32 %v10813_v63, %v1419_v42  ;;  %v12825_v34 = vadd.f32 %v1638_v33, %v1524_v24  ;;  %v576_v24 = vadd.f32 %v12776_v22, %v452_v41 }
 0x129   :  { %v1535_v55 = vpop.f32.mrf.mxu0  ;;  %v10829_v48 = vpop.f32.mrf.mxu1 }
 0x12a   :  { %13962 = vst [vmem:[#allocation40_spill] sm:$0xff] %v12825_v34  ;;  %v1536_v37 = vadd.f32 %v1535_v55, %v1411_v17  ;;  %v12827_v12 = vadd.f32 %v10829_v48, %v1542_v13  ;;  %v709_v33 = vadd.f32 %v12790_v28, %v576_v24 }
 0x12b   :  { %v10816_v52 = vpop.f32.mrf.mxu0  ;;  %v1650_v19 = vpop.f32.mrf.mxu1 }
 0x12c   :  { %v12829_v30 = vadd.f32 %v1650_v19, %v1536_v37  ;;  %v824_v18 = vadd.f32 %v12794_v56, %v709_v33  ;;  %v1684_v33 = vld [vmem:[#allocation5] sm:$0xff] }
 0x12d   :  { %v1547_v25 = vpop.f32.mrf.mxu0  ;;  %v10832_v11 = vpop.f32.mrf.mxu1 }
 0x12e   :  { %v1548_v1 = vadd.f32 %v1547_v25, %v1427_v43 }
 0x12f   :  { %v1662_v3 = vpop.f32.mrf.mxu1  ;;  %v1764_v47 = vpop.f32.mrf.mxu0 }
 0x130   :  { %v12831_v31 = vadd.f32 %v1662_v3, %v1548_v1 }
 0x131   :  { %v10843_v10 = vpop.f32.mrf.mxu0  ;;  %v1855_v42 = vpop.f32.mrf.mxu1 }
 0x132   :  { %v1856_v16 = vadd.f32 %v1855_v42, %v1764_v47 }
 0x133   :  { %v10854_v60 = vpop.f32.mrf.mxu1 }
 0x137   :  { %v1935_v17 = vpop.f32.mrf.mxu0 }
 0x138   :  { %v1936_v46 = vadd.f32 %v1935_v17, %v1856_v16  ;;  %v1554_v17 = vadd.f32 %v10816_v52, %v12817_v0 }
 0x139   :  { %v10865_v62 = vpop.f32.mrf.mxu0 }
 0x13a   :  { %v2012_v38 = vpop.f32.mrf.mxu1  ;;  %v1669_v41 = vadd.f32 %v10832_v11, %v1554_v17 }
 0x13b   :  { %v2013_v63 = vadd.f32 %v2012_v38, %v1936_v46 }
 0x13c   :  { %v10876_v43 = vpop.f32.mrf.mxu1 }
 0x141   :  { %v2095_v13 = vpop.f32.mrf.mxu0 }
 0x142   :  { %v2096_v55 = vadd.f32 %v2095_v13, %v2013_v63 }
 0x143   :  { %v10887_v48 = vpop.f32.mrf.mxu0 }
 0x144   :  { %v2170_v37 = vpop.f32.mrf.mxu1 }
 0x145   :  { %v2171_v2 = vadd.f32 %v2170_v37, %v2096_v55 }
 0x146   :  { %v10898_v36 = vpop.f32.mrf.mxu1 }
 0x147   :  { %v2174_v19 = vadd.f32 %v2171_v2, %v824_v18 }
 0x149   :  { %11894 = vtanh.f32 %v2174_v19  ;;  %v10025_v13 = vmul.f32 -1.442695, %v2174_v19  ;;  %v2184_v19 = vpop.permute.xlu1 %2183 }
 0x14b   :  { %v2286_v25 = vpop.f32.mrf.mxu0 }
 0x14d   :  { %v10909_v1 = vpop.f32.mrf.mxu0 }
 0x14e   :  { %v2377_v8 = vpop.f32.mrf.mxu1 }
 0x14f   :  { %v2378_v28 = vadd.f32 %v2377_v8, %v2286_v25 }
 0x150   :  { %v10920_v3 = vpop.f32.mrf.mxu1 }
 0x155   :  { %v2457_v47 = vpop.f32.mrf.mxu0 }
 0x156   :  { %v11895_v10 = vpop.eup %11894  ;;  %v2458_v60 = vadd.f32 %v2457_v47, %v2378_v28 }
 0x157   :  { %v10931_v22 = vpop.f32.mrf.mxu0  ;;  %2188 = vrot.lane.b32.xlu0 %v11895_v10, %s12026_s3 }
 0x158   :  { %v2534_v42 = vpop.f32.mrf.mxu1 }
 0x159   :  { %v2535_v56 = vadd.f32 %v2534_v42, %v2458_v60 }
 0x15a   :  { %v10942_v61 = vpop.f32.mrf.mxu1 }
 0x15f   :  { %v2617_v15 = vpop.f32.mrf.mxu0 }
 0x160   :  { %v2618_v62 = vadd.f32 %v2617_v15, %v2535_v56 }
 0x161   :  { %v10953_v16 = vpop.f32.mrf.mxu0  ;;  %v2692_v38 = vpop.f32.mrf.mxu1 }
 0x162   :  { %v2693_v46 = vadd.f32 %v2692_v38, %v2618_v62 }
 0x163   :  { %v10964_v43 = vpop.f32.mrf.mxu1 }
 0x164   :  { %v2696_v24 = vadd.f32 %v2693_v46, %v1669_v41  ;;  %v13963_v43 = vmov 0.0  }
 0x166   :  { %11896 = vtanh.f32 %v2696_v24  ;;  %v10026_v52 = vmul.f32 -1.442695, %v2696_v24 }
 0x167   :  { %11898 = vpow2.f32 %v10025_v13 }
 0x173   :  { %v11897_v63 = vpop.eup %11896 }
 0x174   :  { %2710 = vrot.lane.b32.xlu0 %v11897_v63, %s12026_s3  ;;  %v11899_v55 = vpop.eup %11898 }
 0x175   :  { %v2178_v0 = vadd.f32 1.0, %v11899_v55 }
 0x177   :  { %11900 = vrcp.f32 %v2178_v0 }
 0x178   :  { %2705 = vrot.lane.b32.xlu0 %v1684_v33, %s12026_s3  ;;  %11902 = vpow2.f32 %v10026_v52 }
 0x184   :  { %v11901_v48 = vpop.eup %11900 }
 0x185   :  { %v11903_v18 = vpop.eup %11902  ;;  %v2186_v8 = vmul.f32 %v11901_v48, %v2184_v19  ;;  %v13969_v19 = vld [vmem:[#allocation7_spill] sm:$0xff] }
 0x186   :  { %v2700_v2 = vadd.f32 1.0, %v11903_v18  ;;  %v13964_v18 = vld [vmem:[#allocation12_spill] sm:$0xff] }
 0x188   :  { %11904 = vrcp.f32 %v2700_v2  ;;  %v13965_v2 = vld [vmem:[#allocation10_spill] sm:$0xff] }
 0x195   :  { %v11905_v36 = vpop.eup %11904 }
 0x1c9   :  { %v2189_v37 = vpop.permute.xlu0 %2188 }
 0x1ca   :  { %v2191_v11 = vmul.f32 %v11901_v48, %v2189_v37 }
 0x1cc   :  { %2193 = vrot.lane.b32.xlu1 %v2191_v11, %s12026_s3 }
 0x1e6   :  { %v2711_v25 = vpop.permute.xlu0 %2710 }
 0x1e7   :  { %v2713_v1 = vmul.f32 %v11905_v36, %v2711_v25  ;;  %v13967_v25 = vld [vmem:[#allocation6_spill] sm:$0xff] }
 0x1e9   :  { %2715 = vrot.lane.b32.xlu1 %v2713_v1, %s12026_s3  ;;  %v13968_v1 = vld [vmem:[#allocation13_spill] sm:$0xff] }
 0x1ea   :  { %v2706_v22 = vpop.permute.xlu0 %2705 }
 0x1eb   :  { %v2708_v28 = vmul.f32 %v11905_v36, %v2706_v22 }
 0x23e   :  { %v2194_v3 = vpop.permute.xlu1 %2193 }
 0x23f   :  { %v12846_v47 = vadd.f32 %v2194_v3, %v2186_v8  ;;  %v13970_v8 = vld [vmem:[#allocation14_spill] sm:$0xff]  ;;  %v13971_v3 = vld [vmem:[#allocation8_spill] sm:$0xff] }
 0x241   :  { %11906 = vtanh.f32 %v12846_v47 }
 0x24e   :  { %v11907_v10 = vpop.eup %11906 }
 0x24f   :  { %2199 = vrot.lane.b32.xlu0 %v11907_v10, %s12026_s3  ;;  %v13972_v10 = vld [vmem:[#allocation9_spill] sm:$0xff] }
 0x25b   :  { %v2716_v42 = vpop.permute.xlu1 %2715 }
 0x25c   :  { %v12850_v60 = vadd.f32 %v2716_v42, %v2708_v28 }
 0x25e   :  { %11908 = vtanh.f32 %v12850_v60 }
 0x26b   :  { %v11909_v61 = vpop.eup %11908 }
 0x26c   :  { %2721 = vrot.lane.b32.xlu1 %v11909_v61, %s12026_s3 }
 0x2c1   :  { %v2200_v17 = vpop.permute.xlu0 %2199 }
 0x2c2   :  { %v2202_v56 = vmul.f32 %v11901_v48, %v2200_v17 }
 0x2c4   :  { %2204 = vrot.lane.b32.xlu0 %v2202_v56, %s12027_s28 }
 0x2de   :  { %v2722_v15 = vpop.permute.xlu1 %2721 }
 0x2df   :  { %v2724_v62 = vmul.f32 %v11905_v36, %v2722_v15  ;;  %v13966_v36 = vld [vmem:[#allocation11_spill] sm:$0xff] }
 0x2e1   :  { %2726 = vrot.lane.b32.xlu1 %v2724_v62, %s12027_s28 }
 0x336   :  { %v2205_v16 = vpop.permute.xlu0 %2204 }
 0x337   :  { %2207 = vst.msk [vmem:[%s13906_s5] sm:$0xff] %vm62_vm1, %v2205_v16  ;;  %v2730_v38 = vsel %vm62_vm1, %v2205_v16, 0 }
 0x338   :  { %v2801_v41 = vand.u32 4294901760, %v2730_v38 }
 0x33a   :  { %v2802_v46 = vsub.f32 %v2730_v38, %v2801_v41  ;;  %10985 = vmatmul.mubr.f32.vlgmr.msra.gmra.mxu1 %v2801_v41 }
 0x33b   :  { %10999 = vmatpush3.msra.mxu1 %v12418_v20  ;;  %11006 = vmatprep.mubr.msk.f32.mxu1 %vm12025_vm2, %v13963_v43 }
 0x33c   :  { %v2803_v24 = vand.u32 4294901760, %v2802_v46  ;;  %11000 = vmatprep.subr.mxu1 %v13963_v43 }
 0x33d   :  { %11001 = vmatpush3.msra.mxu1 %v12435_v23 }
 0x33e   :  { %v2804_v63 = vsub.f32 %v2802_v46, %v2803_v24  ;;  %11002 = vmatprep.subr.mxu1 %v13963_v43 }
 0x33f   :  { %11003 = vmatpush3.msra.mxu1 %v12456_v27 }
 0x340   :  { %11004 = vmatprep.subr.mxu1 %v13963_v43  ;;  %v2805_v33 = vand.u32 4294901760, %v2804_v63 }
 0x341   :  { %11005 = vmatpush3.msra.mxu1 %v12477_v35 }
 0x342   :  { %11007 = vmatmul.mubr.f32.vlgmr.msra.gmra.mxu1 %v2803_v24  ;;  %11020 = vmatprep.subr.mxu1 %v13963_v43 }
 0x343   :  { %10974 = vmatmul.mubr.f32.vlgmr.msra.gmra.mxu0 %v2805_v33  ;;  %11021 = vmatpush3.msra.mxu1 %v12418_v20 }
 0x344   :  { %10988 = vmatpush3.msra.mxu0 %v12433_v4  ;;  %11022 = vmatprep.subr.mxu1 %v13963_v43 }
 0x345   :  { %10989 = vmatprep.subr.mxu0 %v13963_v43  ;;  %11023 = vmatpush3.msra.mxu1 %v12435_v23 }
 0x346   :  { %10990 = vmatpush3.msra.mxu0 %v12454_v5  ;;  %11024 = vmatprep.subr.mxu1 %v13963_v43 }
 0x347   :  { %10991 = vmatprep.subr.mxu0 %v13963_v43  ;;  %11025 = vmatpush3.msra.mxu1 %v12456_v27 }
 0x348   :  { %10992 = vmatpush3.msra.mxu0 %v12475_v32  ;;  %11026 = vmatprep.subr.mxu1 %v13963_v43 }
 0x349   :  { %10993 = vmatprep.subr.mxu0 %v13963_v43  ;;  %10995 = vmatprep.mubr.msk.f32.mxu0 %vm12025_vm2, %v13963_v43 }
 0x34a   :  { %10994 = vmatpush3.msra.mxu0 %v12494_v40  ;;  %11027 = vmatpush3.msra.mxu1 %v12477_v35 }
 0x34b   :  { %11028 = vmatprep.mubr.msk.f32.mxu1 %vm12025_vm2, %v13963_v43  ;;  %10996 = vmatmul.mubr.f32.vlgmr.msra.gmra.mxu0 %v2802_v46 }
 0x34c   :  { %11009 = vmatprep.subr.mxu0 %v13963_v43  ;;  %11029 = vmatmul.mubr.f32.vlgmr.msra.gmra.mxu1 %v2801_v41 }
 0x34d   :  { %11042 = vmatprep.subr.mxu1 %v13963_v43  ;;  %11010 = vmatpush3.msra.mxu0 %v12451_v26 }
 0x34e   :  { %11043 = vmatpush3.msra.mxu1 %v12647_v6  ;;  %11011 = vmatprep.subr.mxu0 %v13963_v43 }
 0x34f   :  { %11044 = vmatprep.subr.mxu1 %v13963_v43  ;;  %11012 = vmatpush3.msra.mxu0 %v12472_v29 }
 0x350   :  { %11045 = vmatpush3.msra.mxu1 %v12657_v9  ;;  %11013 = vmatprep.subr.mxu0 %v13963_v43 }
 0x351   :  { %11046 = vmatprep.subr.mxu1 %v13963_v43  ;;  %11014 = vmatpush3.msra.mxu0 %v12491_v39 }
 0x352   :  { %11047 = vmatpush3.msra.mxu1 %v12665_v58  ;;  %11015 = vmatprep.subr.mxu0 %v13963_v43 }
 0x353   :  { %v2727_v13 = vpop.permute.xlu1 %2726  ;;  %11048 = vmatprep.subr.mxu1 %v13963_v43  ;;  %11016 = vmatpush3.msra.mxu0 %v12511_v44 }
 0x354   :  { %2729 = vst.msk [vmem:[%s13907_s6 + $0x38] sm:$0xff] %vm62_vm1, %v2727_v13  ;;  %v3247_v55 = vsel %vm62_vm1, %v2727_v13, 0  ;;  %11017 = vmatprep.mubr.msk.f32.mxu0 %vm12025_vm2, %v13963_v43  ;;  %11049 = vmatpush3.msra.mxu1 %v12671_v14 }
 0x355   :  { %v3318_v0 = vand.u32 4294901760, %v3247_v55  ;;  %11018 = vmatmul.mubr.f32.vlgmr.msra.gmra.mxu0 %v2801_v41  ;;  %11031 = vmatprep.subr.mxu0 %v13963_v43 }
 0x356   :  { %11050 = vmatprep.mubr.msk.f32.mxu1 %vm12025_vm2, %v13963_v43  ;;  %11064 = vmatprep.subr.mxu1 %v13963_v43 }
 0x357   :  { %v3319_v52 = vsub.f32 %v3247_v55, %v3318_v0  ;;  %11032 = vmatpush3.msra.mxu0 %v12563_v49  ;;  %11051 = vmatmul.mubr.f32.vlgmr.msra.gmra.mxu1 %v3318_v0 }
 0x358   :  { %11065 = vmatpush3.msra.mxu1 %v12563_v49  ;;  %11033 = vmatprep.subr.mxu0 %v13963_v43 }
 0x359   :  { %v3320_v48 = vand.u32 4294901760, %v3319_v52  ;;  %11066 = vmatprep.subr.mxu1 %v13963_v43  ;;  %11034 = vmatpush3.msra.mxu0 %v12572_v50 }
 0x35a   :  { %11067 = vmatpush3.msra.mxu1 %v12572_v50  ;;  %11035 = vmatprep.subr.mxu0 %v13963_v43 }
 0x35b   :  { %v3321_v37 = vsub.f32 %v3319_v52, %v3320_v48  ;;  %11068 = vmatprep.subr.mxu1 %v13963_v43  ;;  %11036 = vmatpush3.msra.mxu0 %v12585_v54 }
 0x35c   :  { %11069 = vmatpush3.msra.mxu1 %v12585_v54  ;;  %11037 = vmatprep.subr.mxu0 %v13963_v43 }
 0x35d   :  { %11070 = vmatprep.subr.mxu1 %v13963_v43  ;;  %11038 = vmatpush3.msra.mxu0 %v12596_v21  ;;  %v3322_v11 = vand.u32 4294901760, %v3321_v37 }
 0x35e   :  { %11071 = vmatpush3.msra.mxu1 %v12596_v21  ;;  %11072 = vmatprep.mubr.msk.f32.mxu1 %vm12025_vm2, %v13963_v43 }
 0x35f   :  { %11039 = vmatprep.mubr.msk.f32.mxu0 %vm12025_vm2, %v13963_v43  ;;  %11053 = vmatprep.subr.mxu0 %v13963_v43 }
 0x360   :  { %11073 = vmatmul.mubr.f32.vlgmr.msra.gmra.mxu1 %v3320_v48  ;;  %11086 = vmatprep.subr.mxu1 %v13963_v43  ;;  %v13973_v48 = vld [vmem:[#allocation27_spill] sm:$0xff] }
 0x361   :  { %11040 = vmatmul.mubr.f32.vlgmr.msra.gmra.mxu0 %v3322_v11  ;;  %11087 = vmatpush3.msra.mxu1 %v12563_v49 }
 0x362   :  { %11054 = vmatpush3.msra.mxu0 %v12583_v53  ;;  %11088 = vmatprep.subr.mxu1 %v13963_v43 }
 0x363   :  { %11055 = vmatprep.subr.mxu0 %v13963_v43  ;;  %11089 = vmatpush3.msra.mxu1 %v12572_v50 }
 0x364   :  { %11056 = vmatpush3.msra.mxu0 %v12594_v57  ;;  %11090 = vmatprep.subr.mxu1 %v13963_v43 }
 0x365   :  { %11057 = vmatprep.subr.mxu0 %v13963_v43  ;;  %11091 = vmatpush3.msra.mxu1 %v12585_v54 }
 0x366   :  { %11058 = vmatpush3.msra.mxu0 %v12608_v59  ;;  %11092 = vmatprep.subr.mxu1 %v13963_v43 }
 0x367   :  { %11059 = vmatprep.subr.mxu0 %v13963_v43  ;;  %11061 = vmatprep.mubr.msk.f32.mxu0 %vm12025_vm2, %v13963_v43 }
 0x368   :  { %11060 = vmatpush3.msra.mxu0 %v13964_v18  ;;  %11093 = vmatpush3.msra.mxu1 %v12596_v21 }
 0x369   :  { %11094 = vmatprep.mubr.msk.f32.mxu1 %vm12025_vm2, %v13963_v43  ;;  %11062 = vmatmul.mubr.f32.vlgmr.msra.gmra.mxu0 %v3319_v52 }
 0x36a   :  { %11075 = vmatprep.subr.mxu0 %v13963_v43  ;;  %11095 = vmatmul.mubr.f32.vlgmr.msra.gmra.mxu1 %v3318_v0 }
 0x36b   :  { %11076 = vmatpush3.msra.mxu0 %v13965_v2  ;;  %11083 = vmatprep.mubr.msk.f32.mxu0 %vm12025_vm2, %v13963_v43 }
 0x36c   :  { %11077 = vmatprep.subr.mxu0 %v13963_v43  ;;  %11108 = vmatprep.subr.mxu1 %v13963_v43 }
 0x36d   :  { %11078 = vmatpush3.msra.mxu0 %v13966_v36  ;;  %11109 = vmatpush3.msra.mxu1 %v13967_v25 }
 0x36e   :  { %11079 = vmatprep.subr.mxu0 %v13963_v43  ;;  %11110 = vmatprep.subr.mxu1 %v13963_v43 }
 0x36f   :  { %11080 = vmatpush3.msra.mxu0 %v13968_v1  ;;  %11111 = vmatpush3.msra.mxu1 %v13969_v19 }
 0x370   :  { %11081 = vmatprep.subr.mxu0 %v13963_v43  ;;  %11112 = vmatprep.subr.mxu1 %v13963_v43 }
 0x371   :  { %11082 = vmatpush3.msra.mxu0 %v13970_v8  ;;  %11113 = vmatpush3.msra.mxu1 %v13971_v3 }
 0x372   :  { %11084 = vmatmul.mubr.f32.vlgmr.msra.gmra.mxu0 %v3318_v0  ;;  %11114 = vmatprep.subr.mxu1 %v13963_v43 }
 0x373   :  { %11115 = vmatpush3.msra.mxu1 %v13972_v10  ;;  %11097 = vmatprep.subr.mxu0 %v13963_v43 }
 0x374   :  { %11116 = vmatprep.mubr.msk.f32.mxu1 %vm12025_vm2, %v13963_v43  ;;  %11130 = vmatprep.subr.mxu1 %v13963_v43 }
 0x375   :  { %11098 = vmatpush3.msra.mxu0 %v12418_v20  ;;  %11105 = vmatprep.mubr.msk.f32.mxu0 %vm12025_vm2, %v13963_v43 }
 0x376   :  { %11099 = vmatprep.subr.mxu0 %v13963_v43 }
 0x377   :  { %11100 = vmatpush3.msra.mxu0 %v12435_v23 }
 0x378   :  { %11101 = vmatprep.subr.mxu0 %v13963_v43 }
 0x379   :  { %11102 = vmatpush3.msra.mxu0 %v12456_v27 }
 0x37a   :  { %11103 = vmatprep.subr.mxu0 %v13963_v43 }
 0x37b   :  { %11104 = vmatpush3.msra.mxu0 %v12477_v35 }
 0x37c   :  { %11119 = vmatprep.subr.mxu0 %v13963_v43 }
 0x3fa   :  { %v2898_v22 = vpop.f32.mrf.mxu1 }
 0x3fc   :  { %v10986_v28 = vpop.f32.mrf.mxu1 }
 0x402   :  { %v3055_v42 = vpop.f32.mrf.mxu1 }
 0x403   :  { %v2807_v61 = vpop.f32.mrf.mxu0 }
 0x404   :  { %v11008_v17 = vpop.f32.mrf.mxu1  ;;  %v2899_v38 = vadd.f32 %v2898_v22, %v2807_v61 }
 0x405   :  { %v10975_v56 = vpop.f32.mrf.mxu0 }
 0x40b   :  { %v2978_v15 = vpop.f32.mrf.mxu0 }
 0x40c   :  { %v3213_v62 = vpop.f32.mrf.mxu1  ;;  %v2979_v46 = vadd.f32 %v2978_v15, %v2899_v38 }
 0x40d   :  { %v10997_v16 = vpop.f32.mrf.mxu0 }
 0x40e   :  { %v11030_v41 = vpop.f32.mrf.mxu1  ;;  %v3056_v24 = vadd.f32 %v3055_v42, %v2979_v46 }
 0x415   :  { %v3138_v63 = vpop.f32.mrf.mxu0 }
 0x416   :  { %v3139_v33 = vadd.f32 %v3138_v63, %v3056_v24 }
 0x417   :  { %v3415_v13 = vpop.f32.mrf.mxu1  ;;  %v11019_v55 = vpop.f32.mrf.mxu0 }
 0x418   :  { %v3214_v0 = vadd.f32 %v3213_v62, %v3139_v33 }
 0x419   :  { %v11052_v52 = vpop.f32.mrf.mxu1 }
 0x41a   :  { %v3217_v37 = vadd.f32 %v3214_v0, %v13973_v48 }
 0x41c   :  { %11910 = vtanh.f32 %v3217_v37  ;;  %v10027_v55 = vmul.f32 -1.442695, %v3217_v37 }
 0x420   :  { %v3572_v11 = vpop.f32.mrf.mxu1 }
 0x421   :  { %v3324_v28 = vpop.f32.mrf.mxu0 }
 0x422   :  { %v11074_v17 = vpop.f32.mrf.mxu1  ;;  %v3416_v22 = vadd.f32 %v3415_v13, %v3324_v28 }
 0x423   :  { %v11041_v56 = vpop.f32.mrf.mxu0 }
 0x429   :  { %v11911_v7 = vpop.eup %11910  ;;  %v3495_v45 = vpop.f32.mrf.mxu0 }
 0x42a   :  { %v3730_v16 = vpop.f32.mrf.mxu1  ;;  %3227 = vrot.lane.b32.xlu0 %v11911_v7, %s12026_s3  ;;  %v3496_v15 = vadd.f32 %v3495_v45, %v3416_v22 }
 0x42b   :  { %v11063_v42 = vpop.f32.mrf.mxu0 }
 0x42c   :  { %v11096_v61 = vpop.f32.mrf.mxu1  ;;  %v3573_v38 = vadd.f32 %v3572_v11, %v3496_v15 }
 0x432   :  { %v3655_v41 = vpop.f32.mrf.mxu0 }
 0x433   :  { %v3656_v62 = vadd.f32 %v3655_v41, %v3573_v38 }
 0x434   :  { %v11085_v46 = vpop.f32.mrf.mxu0 }
 0x435   :  { %v3731_v24 = vadd.f32 %v3730_v16, %v3656_v62 }
 0x437   :  { %v3734_v63 = vadd.f32 %v3731_v24, %v12831_v31 }
 0x439   :  { %11912 = vtanh.f32 %v3734_v63  ;;  %v10028_v7 = vmul.f32 -1.442695, %v3734_v63 }
 0x43a   :  { %11914 = vpow2.f32 %v10027_v55 }
 0x446   :  { %v11913_v33 = vpop.eup %11912 }
 0x447   :  { %3744 = vrot.lane.b32.xlu1 %v11913_v33, %s12026_s3  ;;  %v11915_v0 = vpop.eup %11914 }
 0x448   :  { %v3221_v52 = vadd.f32 1.0, %v11915_v0 }
 0x44a   :  { %11916 = vrcp.f32 %v3221_v52 }
 0x44b   :  { %11918 = vpow2.f32 %v10028_v7 }
 0x457   :  { %v11917_v13 = vpop.eup %11916 }
 0x458   :  { %v11919_v11 = vpop.eup %11918  ;;  %v3225_v37 = vmul.f32 %v11917_v13, %v12846_v47 }
 0x459   :  { %v3738_v28 = vadd.f32 1.0, %v11919_v11 }
 0x45b   :  { %11920 = vrcp.f32 %v3738_v28 }
 0x468   :  { %v11921_v31 = vpop.eup %11920 }
 0x469   :  { %v3742_v61 = vmul.f32 %v11921_v31, %v12850_v60 }
 0x49c   :  { %v3228_v45 = vpop.permute.xlu0 %3227 }
 0x49d   :  { %v3230_v48 = vmul.f32 %v11917_v13, %v3228_v45 }
 0x49f   :  { %3232 = vrot.lane.b32.xlu0 %v3230_v48, %s12026_s3 }
 0x4b9   :  { %v3745_v17 = vpop.permute.xlu1 %3744 }
 0x4ba   :  { %v3747_v56 = vmul.f32 %v11921_v31, %v3745_v17 }
 0x4bc   :  { %3749 = vrot.lane.b32.xlu1 %v3747_v56, %s12026_s3 }
 0x511   :  { %v3233_v16 = vpop.permute.xlu0 %3232 }
 0x512   :  { %v12993_v22 = vadd.f32 %v3233_v16, %v3225_v37 }
 0x514   :  { %11922 = vtanh.f32 %v12993_v22 }
 0x521   :  { %v11923_v42 = vpop.eup %11922 }
 0x522   :  { %3238 = vrot.lane.b32.xlu0 %v11923_v42, %s12026_s3 }
 0x52e   :  { %v3750_v15 = vpop.permute.xlu1 %3749 }
 0x52f   :  { %v12998_v38 = vadd.f32 %v3750_v15, %v3742_v61 }
 0x531   :  { %11924 = vtanh.f32 %v12998_v38 }
 0x53e   :  { %v11925_v41 = vpop.eup %11924 }
 0x53f   :  { %3755 = vrot.lane.b32.xlu1 %v11925_v41, %s12026_s3  ;;  %v13137_v41 = vld [vmem:[%s13905_s4] ss:$0 sm:$0xff] }
 0x594   :  { %v3239_v62 = vpop.permute.xlu0 %3238 }
 0x595   :  { %v3241_v47 = vmul.f32 %v11917_v13, %v3239_v62  ;;  %v13974_v62 = vld [vmem:[#allocation15_spill] sm:$0xff] }
 0x597   :  { %3243 = vrot.lane.b32.xlu0 %v3241_v47, %s12027_s28  ;;  %v203_v47 = vadd.f32 %v13137_v41, %v13974_v62  ;;  %v13979_v62 = vld [vmem:[#allocation30_spill] sm:$0xff] }
 0x5b1   :  { %v3756_v46 = vpop.permute.xlu1 %3755 }
 0x5b2   :  { %v3758_v24 = vmul.f32 %v11921_v31, %v3756_v46 }
 0x5b4   :  { %3760 = vrot.lane.b32.xlu1 %v3758_v24, %s12027_s28  ;;  %v13975_v24 = vld [vmem:[#allocation16_spill] sm:$0xff] }
 0x609   :  { %v3244_v63 = vpop.permute.xlu0 %3243 }
 0x60a   :  { %3246 = vst.msk [vmem:[%s13906_s5 + $0x8] sm:$0xff] %vm62_vm1, %v3244_v63  ;;  %v3764_v60 = vsel %vm62_vm1, %v3244_v63, 0  ;;  %v346_v63 = vadd.f32 %v13975_v24, %v203_v47 }
 0x60b   :  { %v3835_v33 = vand.u32 4294901760, %v3764_v60 }
 0x60d   :  { %v3836_v55 = vsub.f32 %v3764_v60, %v3835_v33  ;;  %11117 = vmatmul.mubr.f32.vlgmr.msra.gmra.mxu1 %v3835_v33 }
 0x60e   :  { %11131 = vmatpush3.msra.mxu1 %v12418_v20  ;;  %11138 = vmatprep.mubr.msk.f32.mxu1 %vm12025_vm2, %v13963_v43 }
 0x60f   :  { %v3837_v0 = vand.u32 4294901760, %v3836_v55  ;;  %11132 = vmatprep.subr.mxu1 %v13963_v43 }
 0x610   :  { %11133 = vmatpush3.msra.mxu1 %v12435_v23 }
 0x611   :  { %v3838_v52 = vsub.f32 %v3836_v55, %v3837_v0  ;;  %11134 = vmatprep.subr.mxu1 %v13963_v43 }
 0x612   :  { %11135 = vmatpush3.msra.mxu1 %v12456_v27 }
 0x613   :  { %11136 = vmatprep.subr.mxu1 %v13963_v43  ;;  %v3839_v7 = vand.u32 4294901760, %v3838_v52 }
 0x614   :  { %11137 = vmatpush3.msra.mxu1 %v12477_v35 }
 0x615   :  { %11139 = vmatmul.mubr.f32.vlgmr.msra.gmra.mxu1 %v3837_v0  ;;  %11152 = vmatprep.subr.mxu1 %v13963_v43 }
 0x616   :  { %11106 = vmatmul.mubr.f32.vlgmr.msra.gmra.mxu0 %v3839_v7  ;;  %11153 = vmatpush3.msra.mxu1 %v12418_v20 }
 0x617   :  { %11120 = vmatpush3.msra.mxu0 %v12433_v4  ;;  %11154 = vmatprep.subr.mxu1 %v13963_v43 }
 0x618   :  { %11121 = vmatprep.subr.mxu0 %v13963_v43  ;;  %11155 = vmatpush3.msra.mxu1 %v12435_v23 }
 0x619   :  { %11122 = vmatpush3.msra.mxu0 %v12454_v5  ;;  %11156 = vmatprep.subr.mxu1 %v13963_v43 }
 0x61a   :  { %11123 = vmatprep.subr.mxu0 %v13963_v43  ;;  %11157 = vmatpush3.msra.mxu1 %v12456_v27 }
 0x61b   :  { %11124 = vmatpush3.msra.mxu0 %v12475_v32  ;;  %11158 = vmatprep.subr.mxu1 %v13963_v43 }
 0x61c   :  { %11125 = vmatprep.subr.mxu0 %v13963_v43  ;;  %11127 = vmatprep.mubr.msk.f32.mxu0 %vm12025_vm2, %v13963_v43 }
 0x61d   :  { %11126 = vmatpush3.msra.mxu0 %v12494_v40  ;;  %11159 = vmatpush3.msra.mxu1 %v12477_v35 }
 0x61e   :  { %11160 = vmatprep.mubr.msk.f32.mxu1 %vm12025_vm2, %v13963_v43  ;;  %11128 = vmatmul.mubr.f32.vlgmr.msra.gmra.mxu0 %v3836_v55  ;;  %v13976_v55 = vld [vmem:[#allocation21_spill] sm:$0xff] }
 0x61f   :  { %11141 = vmatprep.subr.mxu0 %v13963_v43  ;;  %11161 = vmatmul.mubr.f32.vlgmr.msra.gmra.mxu1 %v3835_v33  ;;  %v466_v0 = vadd.f32 %v13976_v55, %v346_v63 }
 0x620   :  { %11174 = vmatprep.subr.mxu1 %v13963_v43  ;;  %11142 = vmatpush3.msra.mxu0 %v12451_v26 }
 0x621   :  { %11175 = vmatpush3.msra.mxu1 %v12647_v6  ;;  %11143 = vmatprep.subr.mxu0 %v13963_v43 }
 0x622   :  { %11176 = vmatprep.subr.mxu1 %v13963_v43  ;;  %11144 = vmatpush3.msra.mxu0 %v12472_v29 }
 0x623   :  { %11177 = vmatpush3.msra.mxu1 %v12657_v9  ;;  %11145 = vmatprep.subr.mxu0 %v13963_v43 }
 0x624   :  { %11178 = vmatprep.subr.mxu1 %v13963_v43  ;;  %11146 = vmatpush3.msra.mxu0 %v12491_v39 }
 0x625   :  { %11179 = vmatpush3.msra.mxu1 %v12665_v58  ;;  %11147 = vmatprep.subr.mxu0 %v13963_v43 }
 0x626   :  { %v3761_v13 = vpop.permute.xlu1 %3760  ;;  %11180 = vmatprep.subr.mxu1 %v13963_v43  ;;  %11148 = vmatpush3.msra.mxu0 %v12511_v44 }
 0x627   :  { %3763 = vst.msk [vmem:[%s13907_s6 + $0x30] sm:$0xff] %vm62_vm1, %v3761_v13  ;;  %v4281_v45 = vsel %vm62_vm1, %v3761_v13, 0  ;;  %11149 = vmatprep.mubr.msk.f32.mxu0 %vm12025_vm2, %v13963_v43  ;;  %11181 = vmatpush3.msra.mxu1 %v12671_v14 }
 0x628   :  { %v4352_v48 = vand.u32 4294901760, %v4281_v45  ;;  %11150 = vmatmul.mubr.f32.vlgmr.msra.gmra.mxu0 %v3835_v33  ;;  %11163 = vmatprep.subr.mxu0 %v13963_v43 }
 0x629   :  { %11182 = vmatprep.mubr.msk.f32.mxu1 %vm12025_vm2, %v13963_v43  ;;  %11196 = vmatprep.subr.mxu1 %v13963_v43 }
 0x62a   :  { %v4353_v11 = vsub.f32 %v4281_v45, %v4352_v48  ;;  %11164 = vmatpush3.msra.mxu0 %v12563_v49  ;;  %11183 = vmatmul.mubr.f32.vlgmr.msra.gmra.mxu1 %v4352_v48  ;;  %v13977_v45 = vld [vmem:[#allocation22_spill] sm:$0xff] }
 0x62b   :  { %11197 = vmatpush3.msra.mxu1 %v12563_v49  ;;  %11165 = vmatprep.subr.mxu0 %v13963_v43 }
 0x62c   :  { %v4354_v28 = vand.u32 4294901760, %v4353_v11  ;;  %11198 = vmatprep.subr.mxu1 %v13963_v43  ;;  %11166 = vmatpush3.msra.mxu0 %v12572_v50 }
 0x62d   :  { %11199 = vmatpush3.msra.mxu1 %v12572_v50  ;;  %11167 = vmatprep.subr.mxu0 %v13963_v43 }
 0x62e   :  { %v4355_v31 = vsub.f32 %v4353_v11, %v4354_v28  ;;  %11200 = vmatprep.subr.mxu1 %v13963_v43  ;;  %11168 = vmatpush3.msra.mxu0 %v12585_v54 }
 0x62f   :  { %11201 = vmatpush3.msra.mxu1 %v12585_v54  ;;  %11169 = vmatprep.subr.mxu0 %v13963_v43 }
 0x630   :  { %11202 = vmatprep.subr.mxu1 %v13963_v43  ;;  %11170 = vmatpush3.msra.mxu0 %v12596_v21  ;;  %v4356_v17 = vand.u32 4294901760, %v4355_v31 }
 0x631   :  { %11203 = vmatpush3.msra.mxu1 %v12596_v21  ;;  %11204 = vmatprep.mubr.msk.f32.mxu1 %vm12025_vm2, %v13963_v43 }
 0x632   :  { %11171 = vmatprep.mubr.msk.f32.mxu0 %vm12025_vm2, %v13963_v43  ;;  %11185 = vmatprep.subr.mxu0 %v13963_v43 }
 0x633   :  { %11205 = vmatmul.mubr.f32.vlgmr.msra.gmra.mxu1 %v4354_v28  ;;  %11218 = vmatprep.subr.mxu1 %v13963_v43 }
 0x634   :  { %11172 = vmatmul.mubr.f32.vlgmr.msra.gmra.mxu0 %v4356_v17  ;;  %11219 = vmatpush3.msra.mxu1 %v12563_v49 }
 0x635   :  { %11186 = vmatpush3.msra.mxu0 %v12583_v53  ;;  %11220 = vmatprep.subr.mxu1 %v13963_v43 }
 0x636   :  { %11187 = vmatprep.subr.mxu0 %v13963_v43  ;;  %11221 = vmatpush3.msra.mxu1 %v12572_v50 }
 0x637   :  { %11188 = vmatpush3.msra.mxu0 %v12594_v57  ;;  %11222 = vmatprep.subr.mxu1 %v13963_v43 }
 0x638   :  { %11189 = vmatprep.subr.mxu0 %v13963_v43  ;;  %11223 = vmatpush3.msra.mxu1 %v12585_v54 }
 0x639   :  { %11190 = vmatpush3.msra.mxu0 %v12608_v59  ;;  %11224 = vmatprep.subr.mxu1 %v13963_v43 }
 0x63a   :  { %11191 = vmatprep.subr.mxu0 %v13963_v43  ;;  %11193 = vmatprep.mubr.msk.f32.mxu0 %vm12025_vm2, %v13963_v43 }
 0x63b   :  { %11192 = vmatpush3.msra.mxu0 %v13964_v18  ;;  %11225 = vmatpush3.msra.mxu1 %v12596_v21 }
 0x63c   :  { %11226 = vmatprep.mubr.msk.f32.mxu1 %vm12025_vm2, %v13963_v43  ;;  %11194 = vmatmul.mubr.f32.vlgmr.msra.gmra.mxu0 %v4353_v11  ;;  %v13978_v11 = vld [vmem:[#allocation28_spill] sm:$0xff] }
 0x63d   :  { %11207 = vmatprep.subr.mxu0 %v13963_v43  ;;  %11227 = vmatmul.mubr.f32.vlgmr.msra.gmra.mxu1 %v4352_v48 }
 0x63e   :  { %11208 = vmatpush3.msra.mxu0 %v13965_v2  ;;  %11215 = vmatprep.mubr.msk.f32.mxu0 %vm12025_vm2, %v13963_v43 }
 0x63f   :  { %11209 = vmatprep.subr.mxu0 %v13963_v43  ;;  %11240 = vmatprep.subr.mxu1 %v13963_v43 }
 0x640   :  { %11210 = vmatpush3.msra.mxu0 %v13966_v36  ;;  %11241 = vmatpush3.msra.mxu1 %v13967_v25 }
 0x641   :  { %11211 = vmatprep.subr.mxu0 %v13963_v43  ;;  %11242 = vmatprep.subr.mxu1 %v13963_v43 }
 0x642   :  { %11212 = vmatpush3.msra.mxu0 %v13968_v1  ;;  %11243 = vmatpush3.msra.mxu1 %v13969_v19 }
 0x643   :  { %11213 = vmatprep.subr.mxu0 %v13963_v43  ;;  %11244 = vmatprep.subr.mxu1 %v13963_v43 }
 0x644   :  { %11214 = vmatpush3.msra.mxu0 %v13970_v8  ;;  %11245 = vmatpush3.msra.mxu1 %v13971_v3 }
 0x645   :  { %11216 = vmatmul.mubr.f32.vlgmr.msra.gmra.mxu0 %v4352_v48  ;;  %11246 = vmatprep.subr.mxu1 %v13963_v43  ;;  %v592_v48 = vadd.f32 %v13977_v45, %v466_v0 }
 0x646   :  { %11247 = vmatpush3.msra.mxu1 %v13972_v10  ;;  %11229 = vmatprep.subr.mxu0 %v13963_v43 }
 0x647   :  { %11248 = vmatprep.mubr.msk.f32.mxu1 %vm12025_vm2, %v13963_v43  ;;  %11262 = vmatprep.subr.mxu1 %v13963_v43  ;;  %v721_v28 = vadd.f32 %v13978_v11, %v592_v48 }
 0x648   :  { %11230 = vmatpush3.msra.mxu0 %v12418_v20  ;;  %11237 = vmatprep.mubr.msk.f32.mxu0 %vm12025_vm2, %v13963_v43 }
 0x649   :  { %11231 = vmatprep.subr.mxu0 %v13963_v43  ;;  %v836_v34 = vadd.f32 %v13979_v62, %v721_v28 }
 0x64a   :  { %11232 = vmatpush3.msra.mxu0 %v12435_v23 }
 0x64b   :  { %11233 = vmatprep.subr.mxu0 %v13963_v43 }
 0x64c   :  { %11234 = vmatpush3.msra.mxu0 %v12456_v27 }
 0x64d   :  { %11235 = vmatprep.subr.mxu0 %v13963_v43 }
 0x64e   :  { %11236 = vmatpush3.msra.mxu0 %v12477_v35 }
 0x64f   :  { %11251 = vmatprep.subr.mxu0 %v13963_v43 }
 0x6cd   :  { %v3932_v56 = vpop.f32.mrf.mxu1 }
 0x6cf   :  { %v11118_v37 = vpop.f32.mrf.mxu1 }
 0x6d5   :  { %v4089_v16 = vpop.f32.mrf.mxu1 }
 0x6d6   :  { %v3841_v42 = vpop.f32.mrf.mxu0 }
 0x6d7   :  { %v11140_v61 = vpop.f32.mrf.mxu1  ;;  %v3933_v52 = vadd.f32 %v3932_v56, %v3841_v42 }
 0x6d8   :  { %v11107_v15 = vpop.f32.mrf.mxu0 }
 0x6de   :  { %v4012_v46 = vpop.f32.mrf.mxu0 }
 0x6df   :  { %v4247_v60 = vpop.f32.mrf.mxu1  ;;  %v4013_v13 = vadd.f32 %v4012_v46, %v3933_v52 }
 0x6e0   :  { %v11129_v33 = vpop.f32.mrf.mxu0 }
 0x6e1   :  { %v11162_v7 = vpop.f32.mrf.mxu1  ;;  %v4090_v31 = vadd.f32 %v4089_v16, %v4013_v13 }
 0x6e8   :  { %v4172_v17 = vpop.f32.mrf.mxu0 }
 0x6e9   :  { %v4173_v37 = vadd.f32 %v4172_v17, %v4090_v31 }
 0x6ea   :  { %v4449_v61 = vpop.f32.mrf.mxu1  ;;  %v11151_v15 = vpop.f32.mrf.mxu0 }
 0x6eb   :  { %v4248_v51 = vadd.f32 %v4247_v60, %v4173_v37 }
 0x6ec   :  { %v11184_v47 = vpop.f32.mrf.mxu1 }
 0x6ed   :  { %v4251_v24 = vadd.f32 %v4248_v51, %v836_v34 }
 0x6ef   :  { %11926 = vtanh.f32 %v4251_v24  ;;  %v10029_v31 = vmul.f32 -1.442695, %v4251_v24 }
 0x6f3   :  { %v4606_v33 = vpop.f32.mrf.mxu1 }
 0x6f4   :  { %v4358_v63 = vpop.f32.mrf.mxu0 }
 0x6f5   :  { %v11206_v56 = vpop.f32.mrf.mxu1  ;;  %v4450_v16 = vadd.f32 %v4449_v61, %v4358_v63 }
 0x6f6   :  { %v11173_v42 = vpop.f32.mrf.mxu0 }
 0x6fc   :  { %v11927_v46 = vpop.eup %11926  ;;  %v4529_v55 = vpop.f32.mrf.mxu0 }
 0x6fd   :  { %v4764_v0 = vpop.f32.mrf.mxu1  ;;  %4261 = vrot.lane.b32.xlu0 %v11927_v46, %s12026_s3  ;;  %v4530_v13 = vadd.f32 %v4529_v55, %v4450_v16 }
 0x6fe   :  { %v11195_v52 = vpop.f32.mrf.mxu0 }
 0x6ff   :  { %v11228_v7 = vpop.f32.mrf.mxu1  ;;  %v4607_v45 = vadd.f32 %v4606_v33, %v4530_v13 }
 0x705   :  { %v4689_v48 = vpop.f32.mrf.mxu0 }
 0x706   :  { %v4690_v11 = vadd.f32 %v4689_v48, %v4607_v45 }
 0x707   :  { %v11217_v60 = vpop.f32.mrf.mxu0 }
 0x708   :  { %v4765_v28 = vadd.f32 %v4764_v0, %v4690_v11 }
 0x70a   :  { %v4768_v51 = vadd.f32 %v4765_v28, %v12827_v12 }
 0x70c   :  { %11928 = vtanh.f32 %v4768_v51  ;;  %v10030_v61 = vmul.f32 -1.442695, %v4768_v51 }
 0x70d   :  { %11930 = vpow2.f32 %v10029_v31 }
 0x719   :  { %v11929_v34 = vpop.eup %11928 }
 0x71a   :  { %4778 = vrot.lane.b32.xlu1 %v11929_v34, %s12026_s3  ;;  %v11931_v17 = vpop.eup %11930 }
 0x71b   :  { %v4255_v37 = vadd.f32 1.0, %v11931_v17 }
 0x71d   :  { %11932 = vrcp.f32 %v4255_v37 }
 0x71e   :  { %11934 = vpow2.f32 %v10030_v61 }
 0x72a   :  { %v11933_v15 = vpop.eup %11932 }
 0x72b   :  { %v11935_v33 = vpop.eup %11934  ;;  %v4259_v24 = vmul.f32 %v11933_v15, %v12993_v22 }
 0x72c   :  { %v4772_v63 = vadd.f32 1.0, %v11935_v33 }
 0x72e   :  { %11936 = vrcp.f32 %v4772_v63 }
 0x73b   :  { %v11937_v12 = vpop.eup %11936 }
 0x73c   :  { %v4776_v16 = vmul.f32 %v11937_v12, %v12998_v38 }
 0x76f   :  { %v4262_v62 = vpop.permute.xlu0 %4261 }
 0x770   :  { %v4264_v47 = vmul.f32 %v11933_v15, %v4262_v62 }
 0x772   :  { %4266 = vrot.lane.b32.xlu0 %v4264_v47, %s12026_s3 }
 0x78c   :  { %v4779_v56 = vpop.permute.xlu1 %4778 }
 0x78d   :  { %v4781_v42 = vmul.f32 %v11937_v12, %v4779_v56 }
 0x78f   :  { %4783 = vrot.lane.b32.xlu1 %v4781_v42, %s12026_s3 }
 0x7e4   :  { %v4267_v46 = vpop.permute.xlu0 %4266 }
 0x7e5   :  { %v13152_v55 = vadd.f32 %v4267_v46, %v4259_v24 }
 0x7e7   :  { %11938 = vtanh.f32 %v13152_v55 }
 0x7f4   :  { %v11939_v0 = vpop.eup %11938 }
 0x7f5   :  { %4272 = vrot.lane.b32.xlu0 %v11939_v0, %s12026_s3 }
 0x801   :  { %v4784_v52 = vpop.permute.xlu1 %4783 }
 0x802   :  { %v13157_v7 = vadd.f32 %v4784_v52, %v4776_v16 }
 0x804   :  { %11940 = vtanh.f32 %v13157_v7 }
 0x811   :  { %v11941_v13 = vpop.eup %11940 }
 0x812   :  { %4789 = vrot.lane.b32.xlu1 %v11941_v13, %s12026_s3 }
 0x867   :  { %v4273_v45 = vpop.permute.xlu0 %4272 }
 0x868   :  { %v4275_v22 = vmul.f32 %v11933_v15, %v4273_v45 }
 0x86a   :  { %4277 = vrot.lane.b32.xlu0 %v4275_v22, %s12027_s28 }
 0x884   :  { %v4790_v48 = vpop.permute.xlu1 %4789 }
 0x885   :  { %v4792_v11 = vmul.f32 %v11937_v12, %v4790_v48 }
 0x887   :  { %4794 = vrot.lane.b32.xlu1 %v4792_v11, %s12027_s28 }
 0x8dc   :  { %v4278_v60 = vpop.permute.xlu0 %4277 }
 0x8dd   :  { %4280 = vst.msk [vmem:[%s13906_s5 + $0x10] sm:$0xff] %vm62_vm1, %v4278_v60  ;;  %v4798_v38 = vsel %vm62_vm1, %v4278_v60, 0 }
 0x8de   :  { %v4869_v28 = vand.u32 4294901760, %v4798_v38 }
 0x8e0   :  { %v4870_v51 = vsub.f32 %v4798_v38, %v4869_v28  ;;  %11249 = vmatmul.mubr.f32.vlgmr.msra.gmra.mxu1 %v4869_v28 }
 0x8e1   :  { %11263 = vmatpush3.msra.mxu1 %v12418_v20  ;;  %11270 = vmatprep.mubr.msk.f32.mxu1 %vm12025_vm2, %v13963_v43 }
 0x8e2   :  { %v4871_v34 = vand.u32 4294901760, %v4870_v51  ;;  %11264 = vmatprep.subr.mxu1 %v13963_v43 }
 0x8e3   :  { %11265 = vmatpush3.msra.mxu1 %v12435_v23 }
 0x8e4   :  { %v4872_v31 = vsub.f32 %v4870_v51, %v4871_v34  ;;  %11266 = vmatprep.subr.mxu1 %v13963_v43 }
 0x8e5   :  { %11267 = vmatpush3.msra.mxu1 %v12456_v27 }
 0x8e6   :  { %11268 = vmatprep.subr.mxu1 %v13963_v43  ;;  %v4873_v17 = vand.u32 4294901760, %v4872_v31 }
 0x8e7   :  { %11269 = vmatpush3.msra.mxu1 %v12477_v35 }
 0x8e8   :  { %11271 = vmatmul.mubr.f32.vlgmr.msra.gmra.mxu1 %v4871_v34  ;;  %11284 = vmatprep.subr.mxu1 %v13963_v43 }
 0x8e9   :  { %11238 = vmatmul.mubr.f32.vlgmr.msra.gmra.mxu0 %v4873_v17  ;;  %11285 = vmatpush3.msra.mxu1 %v12418_v20  ;;  %v13980_v17 = vld [vmem:[#allocation29_spill] sm:$0xff] }
 0x8ea   :  { %11252 = vmatpush3.msra.mxu0 %v12433_v4  ;;  %11286 = vmatprep.subr.mxu1 %v13963_v43 }
 0x8eb   :  { %11253 = vmatprep.subr.mxu0 %v13963_v43  ;;  %11287 = vmatpush3.msra.mxu1 %v12435_v23 }
 0x8ec   :  { %11254 = vmatpush3.msra.mxu0 %v12454_v5  ;;  %11288 = vmatprep.subr.mxu1 %v13963_v43 }
 0x8ed   :  { %11255 = vmatprep.subr.mxu0 %v13963_v43  ;;  %11289 = vmatpush3.msra.mxu1 %v12456_v27 }
 0x8ee   :  { %11256 = vmatpush3.msra.mxu0 %v12475_v32  ;;  %11290 = vmatprep.subr.mxu1 %v13963_v43 }
 0x8ef   :  { %11257 = vmatprep.subr.mxu0 %v13963_v43  ;;  %11259 = vmatprep.mubr.msk.f32.mxu0 %vm12025_vm2, %v13963_v43 }
 0x8f0   :  { %11258 = vmatpush3.msra.mxu0 %v12494_v40  ;;  %11291 = vmatpush3.msra.mxu1 %v12477_v35 }
 0x8f1   :  { %11292 = vmatprep.mubr.msk.f32.mxu1 %vm12025_vm2, %v13963_v43  ;;  %11260 = vmatmul.mubr.f32.vlgmr.msra.gmra.mxu0 %v4870_v51 }
 0x8f2   :  { %11273 = vmatprep.subr.mxu0 %v13963_v43  ;;  %11293 = vmatmul.mubr.f32.vlgmr.msra.gmra.mxu1 %v4869_v28 }
 0x8f3   :  { %11306 = vmatprep.subr.mxu1 %v13963_v43  ;;  %11274 = vmatpush3.msra.mxu0 %v12451_v26 }
 0x8f4   :  { %11307 = vmatpush3.msra.mxu1 %v12647_v6  ;;  %11275 = vmatprep.subr.mxu0 %v13963_v43 }
 0x8f5   :  { %11308 = vmatprep.subr.mxu1 %v13963_v43  ;;  %11276 = vmatpush3.msra.mxu0 %v12472_v29 }
 0x8f6   :  { %11309 = vmatpush3.msra.mxu1 %v12657_v9  ;;  %11277 = vmatprep.subr.mxu0 %v13963_v43 }
 0x8f7   :  { %11310 = vmatprep.subr.mxu1 %v13963_v43  ;;  %11278 = vmatpush3.msra.mxu0 %v12491_v39 }
 0x8f8   :  { %11311 = vmatpush3.msra.mxu1 %v12665_v58  ;;  %11279 = vmatprep.subr.mxu0 %v13963_v43 }
 0x8f9   :  { %v4795_v37 = vpop.permute.xlu1 %4794  ;;  %11312 = vmatprep.subr.mxu1 %v13963_v43  ;;  %11280 = vmatpush3.msra.mxu0 %v12511_v44 }
 0x8fa   :  { %4797 = vst.msk [vmem:[%s13907_s6 + $0x28] sm:$0xff] %vm62_vm1, %v4795_v37  ;;  %v5315_v61 = vsel %vm62_vm1, %v4795_v37, 0  ;;  %11281 = vmatprep.mubr.msk.f32.mxu0 %vm12025_vm2, %v13963_v43  ;;  %11313 = vmatpush3.msra.mxu1 %v12671_v14 }
 0x8fb   :  { %v5386_v15 = vand.u32 4294901760, %v5315_v61  ;;  %11282 = vmatmul.mubr.f32.vlgmr.msra.gmra.mxu0 %v4869_v28  ;;  %11295 = vmatprep.subr.mxu0 %v13963_v43 }
 0x8fc   :  { %11314 = vmatprep.mubr.msk.f32.mxu1 %vm12025_vm2, %v13963_v43  ;;  %11328 = vmatprep.subr.mxu1 %v13963_v43 }
 0x8fd   :  { %v5387_v62 = vsub.f32 %v5315_v61, %v5386_v15  ;;  %11296 = vmatpush3.msra.mxu0 %v12563_v49  ;;  %11315 = vmatmul.mubr.f32.vlgmr.msra.gmra.mxu1 %v5386_v15 }
 0x8fe   :  { %11329 = vmatpush3.msra.mxu1 %v12563_v49  ;;  %11297 = vmatprep.subr.mxu0 %v13963_v43 }
 0x8ff   :  { %v5388_v47 = vand.u32 4294901760, %v5387_v62  ;;  %11330 = vmatprep.subr.mxu1 %v13963_v43  ;;  %11298 = vmatpush3.msra.mxu0 %v12572_v50 }
 0x900   :  { %11331 = vmatpush3.msra.mxu1 %v12572_v50  ;;  %11299 = vmatprep.subr.mxu0 %v13963_v43 }
 0x901   :  { %v5389_v33 = vsub.f32 %v5387_v62, %v5388_v47  ;;  %11332 = vmatprep.subr.mxu1 %v13963_v43  ;;  %11300 = vmatpush3.msra.mxu0 %v12585_v54 }
 0x902   :  { %11333 = vmatpush3.msra.mxu1 %v12585_v54  ;;  %11301 = vmatprep.subr.mxu0 %v13963_v43 }
 0x903   :  { %11334 = vmatprep.subr.mxu1 %v13963_v43  ;;  %11302 = vmatpush3.msra.mxu0 %v12596_v21  ;;  %v5390_v63 = vand.u32 4294901760, %v5389_v33 }
 0x904   :  { %11335 = vmatpush3.msra.mxu1 %v12596_v21  ;;  %11336 = vmatprep.mubr.msk.f32.mxu1 %vm12025_vm2, %v13963_v43 }
 0x905   :  { %11303 = vmatprep.mubr.msk.f32.mxu0 %vm12025_vm2, %v13963_v43  ;;  %11317 = vmatprep.subr.mxu0 %v13963_v43 }
 0x906   :  { %11337 = vmatmul.mubr.f32.vlgmr.msra.gmra.mxu1 %v5388_v47  ;;  %11350 = vmatprep.subr.mxu1 %v13963_v43 }
 0x907   :  { %11304 = vmatmul.mubr.f32.vlgmr.msra.gmra.mxu0 %v5390_v63  ;;  %11351 = vmatpush3.msra.mxu1 %v12563_v49 }
 0x908   :  { %11318 = vmatpush3.msra.mxu0 %v12583_v53  ;;  %11352 = vmatprep.subr.mxu1 %v13963_v43 }
 0x909   :  { %11319 = vmatprep.subr.mxu0 %v13963_v43  ;;  %11353 = vmatpush3.msra.mxu1 %v12572_v50 }
 0x90a   :  { %11320 = vmatpush3.msra.mxu0 %v12594_v57  ;;  %11354 = vmatprep.subr.mxu1 %v13963_v43 }
 0x90b   :  { %11321 = vmatprep.subr.mxu0 %v13963_v43  ;;  %11355 = vmatpush3.msra.mxu1 %v12585_v54 }
 0x90c   :  { %11322 = vmatpush3.msra.mxu0 %v12608_v59  ;;  %11356 = vmatprep.subr.mxu1 %v13963_v43 }
 0x90d   :  { %11323 = vmatprep.subr.mxu0 %v13963_v43  ;;  %11325 = vmatprep.mubr.msk.f32.mxu0 %vm12025_vm2, %v13963_v43 }
 0x90e   :  { %11324 = vmatpush3.msra.mxu0 %v13964_v18  ;;  %11357 = vmatpush3.msra.mxu1 %v12596_v21 }
 0x90f   :  { %11358 = vmatprep.mubr.msk.f32.mxu1 %vm12025_vm2, %v13963_v43  ;;  %11326 = vmatmul.mubr.f32.vlgmr.msra.gmra.mxu0 %v5387_v62 }
 0x910   :  { %11339 = vmatprep.subr.mxu0 %v13963_v43  ;;  %11359 = vmatmul.mubr.f32.vlgmr.msra.gmra.mxu1 %v5386_v15 }
 0x911   :  { %11340 = vmatpush3.msra.mxu0 %v13965_v2  ;;  %11347 = vmatprep.mubr.msk.f32.mxu0 %vm12025_vm2, %v13963_v43 }
 0x912   :  { %11341 = vmatprep.subr.mxu0 %v13963_v43  ;;  %11372 = vmatprep.subr.mxu1 %v13963_v43 }
 0x913   :  { %11342 = vmatpush3.msra.mxu0 %v13966_v36  ;;  %11373 = vmatpush3.msra.mxu1 %v13967_v25 }
 0x914   :  { %11343 = vmatprep.subr.mxu0 %v13963_v43  ;;  %11374 = vmatprep.subr.mxu1 %v13963_v43 }
 0x915   :  { %11344 = vmatpush3.msra.mxu0 %v13968_v1  ;;  %11375 = vmatpush3.msra.mxu1 %v13969_v19 }
 0x916   :  { %11345 = vmatprep.subr.mxu0 %v13963_v43  ;;  %11376 = vmatprep.subr.mxu1 %v13963_v43 }
 0x917   :  { %11346 = vmatpush3.msra.mxu0 %v13970_v8  ;;  %11377 = vmatpush3.msra.mxu1 %v13971_v3 }
 0x918   :  { %11348 = vmatmul.mubr.f32.vlgmr.msra.gmra.mxu0 %v5386_v15  ;;  %11378 = vmatprep.subr.mxu1 %v13963_v43 }
 0x919   :  { %11379 = vmatpush3.msra.mxu1 %v13972_v10  ;;  %11361 = vmatprep.subr.mxu0 %v13963_v43 }
 0x91a   :  { %11380 = vmatprep.mubr.msk.f32.mxu1 %vm12025_vm2, %v13963_v43  ;;  %11394 = vmatprep.subr.mxu1 %v13963_v43 }
 0x91b   :  { %11362 = vmatpush3.msra.mxu0 %v12418_v20  ;;  %11369 = vmatprep.mubr.msk.f32.mxu0 %vm12025_vm2, %v13963_v43 }
 0x91c   :  { %11363 = vmatprep.subr.mxu0 %v13963_v43 }
 0x91d   :  { %11364 = vmatpush3.msra.mxu0 %v12435_v23 }
 0x91e   :  { %11365 = vmatprep.subr.mxu0 %v13963_v43 }
 0x91f   :  { %11366 = vmatpush3.msra.mxu0 %v12456_v27 }
 0x920   :  { %11367 = vmatprep.subr.mxu0 %v13963_v43 }
 0x921   :  { %11368 = vmatpush3.msra.mxu0 %v12477_v35 }
 0x922   :  { %11383 = vmatprep.subr.mxu0 %v13963_v43 }
 0x9a0   :  { %v4966_v12 = vpop.f32.mrf.mxu1 }
 0x9a2   :  { %v11250_v56 = vpop.f32.mrf.mxu1 }
 0x9a8   :  { %v5123_v42 = vpop.f32.mrf.mxu1 }
 0x9a9   :  { %v4875_v24 = vpop.f32.mrf.mxu0 }
 0x9aa   :  { %v11272_v46 = vpop.f32.mrf.mxu1  ;;  %v4967_v45 = vadd.f32 %v4966_v12, %v4875_v24 }
 0x9ab   :  { %v11239_v0 = vpop.f32.mrf.mxu0 }
 0x9b1   :  { %v5046_v16 = vpop.f32.mrf.mxu0 }
 0x9b2   :  { %v5281_v52 = vpop.f32.mrf.mxu1  ;;  %v5047_v48 = vadd.f32 %v5046_v16, %v4967_v45 }
 0x9b3   :  { %v11261_v13 = vpop.f32.mrf.mxu0 }
 0x9b4   :  { %v11294_v22 = vpop.f32.mrf.mxu1  ;;  %v5124_v11 = vadd.f32 %v5123_v42, %v5047_v48 }
 0x9bb   :  { %v5206_v60 = vpop.f32.mrf.mxu0 }
 0x9bc   :  { %v5207_v38 = vadd.f32 %v5206_v60, %v5124_v11 }
 0x9bd   :  { %v5483_v28 = vpop.f32.mrf.mxu1  ;;  %v11283_v51 = vpop.f32.mrf.mxu0 }
 0x9be   :  { %v5282_v34 = vadd.f32 %v5281_v52, %v5207_v38 }
 0x9bf   :  { %v11316_v31 = vpop.f32.mrf.mxu1 }
 0x9c0   :  { %v5285_v37 = vadd.f32 %v5282_v34, %v13980_v17 }
 0x9c2   :  { %11942 = vtanh.f32 %v5285_v37  ;;  %v10031_v11 = vmul.f32 -1.442695, %v5285_v37 }
 0x9c6   :  { %v5640_v61 = vpop.f32.mrf.mxu1 }
 0x9c7   :  { %v5392_v15 = vpop.f32.mrf.mxu0 }
 0x9c8   :  { %v11338_v62 = vpop.f32.mrf.mxu1  ;;  %v5484_v12 = vadd.f32 %v5483_v28, %v5392_v15 }
 0x9c9   :  { %v11305_v47 = vpop.f32.mrf.mxu0 }
 0x9cf   :  { %v11943_v33 = vpop.eup %11942  ;;  %v5563_v63 = vpop.f32.mrf.mxu0 }
 0x9d0   :  { %v5798_v56 = vpop.f32.mrf.mxu1  ;;  %5295 = vrot.lane.b32.xlu0 %v11943_v33, %s12026_s3  ;;  %v5564_v46 = vadd.f32 %v5563_v63, %v5484_v12 }
 0x9d1   :  { %v11327_v42 = vpop.f32.mrf.mxu0 }
 0x9d2   :  { %v11360_v24 = vpop.f32.mrf.mxu1  ;;  %v5641_v0 = vadd.f32 %v5640_v61, %v5564_v46 }
 0x9d8   :  { %v5723_v16 = vpop.f32.mrf.mxu0 }
 0x9d9   :  { %v5724_v52 = vadd.f32 %v5723_v16, %v5641_v0 }
 0x9da   :  { %v11349_v13 = vpop.f32.mrf.mxu0 }
 0x9db   :  { %v5799_v45 = vadd.f32 %v5798_v56, %v5724_v52 }
 0x9dd   :  { %v5802_v22 = vadd.f32 %v5799_v45, %v12829_v30 }
 0x9df   :  { %11944 = vtanh.f32 %v5802_v22  ;;  %v10032_v28 = vmul.f32 -1.442695, %v5802_v22 }
 0x9e0   :  { %11946 = vpow2.f32 %v10031_v11 }
 0x9ec   :  { %v11945_v48 = vpop.eup %11944 }
 0x9ed   :  { %5812 = vrot.lane.b32.xlu1 %v11945_v48, %s12026_s3  ;;  %v11947_v60 = vpop.eup %11946 }
 0x9ee   :  { %v5289_v38 = vadd.f32 1.0, %v11947_v60 }
 0x9f0   :  { %11948 = vrcp.f32 %v5289_v38 }
 0x9f1   :  { %11950 = vpow2.f32 %v10032_v28 }
 0x9fd   :  { %v11949_v51 = vpop.eup %11948 }
 0x9fe   :  { %v11951_v17 = vpop.eup %11950  ;;  %v5293_v37 = vmul.f32 %v11949_v51, %v13152_v55 }
 0x9ff   :  { %v5806_v61 = vadd.f32 1.0, %v11951_v17 }
 0xa01   :  { %11952 = vrcp.f32 %v5806_v61 }
 0xa0e   :  { %v11953_v30 = vpop.eup %11952 }
 0xa0f   :  { %v5810_v56 = vmul.f32 %v11953_v30, %v13157_v7 }
 0xa42   :  { %v5296_v34 = vpop.permute.xlu0 %5295 }
 0xa43   :  { %v5298_v31 = vmul.f32 %v11949_v51, %v5296_v34 }
 0xa45   :  { %5300 = vrot.lane.b32.xlu0 %v5298_v31, %s12026_s3 }
 0xa5f   :  { %v5813_v15 = vpop.permute.xlu1 %5812 }
 0xa60   :  { %v5815_v62 = vmul.f32 %v11953_v30, %v5813_v15 }
 0xa62   :  { %5817 = vrot.lane.b32.xlu1 %v5815_v62, %s12026_s3 }
 0xab7   :  { %v5301_v47 = vpop.permute.xlu0 %5300 }
 0xab8   :  { %v13300_v33 = vadd.f32 %v5301_v47, %v5293_v37 }
 0xaba   :  { %11954 = vtanh.f32 %v13300_v33 }
 0xac7   :  { %v11955_v63 = vpop.eup %11954 }
 0xac8   :  { %5306 = vrot.lane.b32.xlu0 %v11955_v63, %s12026_s3  ;;  %v13981_v63 = vld [vmem:[#allocation17_spill] sm:$0xff] }
 0xad4   :  { %v5818_v12 = vpop.permute.xlu1 %5817 }
 0xad5   :  { %v13305_v42 = vadd.f32 %v5818_v12, %v5810_v56  ;;  %v223_v56 = vadd.f32 %v13137_v41, %v13981_v63  ;;  %v13986_v41 = vld [vmem:[#allocation33_spill] sm:$0xff] }
 0xad7   :  { %11956 = vtanh.f32 %v13305_v42 }
 0xae4   :  { %v11957_v24 = vpop.eup %11956 }
 0xae5   :  { %5823 = vrot.lane.b32.xlu1 %v11957_v24, %s12026_s3  ;;  %v13982_v24 = vld [vmem:[#allocation18_spill] sm:$0xff] }
 0xb3a   :  { %v5307_v46 = vpop.permute.xlu0 %5306 }
 0xb3b   :  { %v5309_v55 = vmul.f32 %v11949_v51, %v5307_v46  ;;  %v358_v46 = vadd.f32 %v13982_v24, %v223_v56 }
 0xb3d   :  { %5311 = vrot.lane.b32.xlu0 %v5309_v55, %s12027_s28 }
 0xb57   :  { %v5824_v0 = vpop.permute.xlu1 %5823 }
 0xb58   :  { %v5826_v16 = vmul.f32 %v11953_v30, %v5824_v0 }
 0xb5a   :  { %5828 = vrot.lane.b32.xlu1 %v5826_v16, %s12027_s28  ;;  %v13983_v16 = vld [vmem:[#allocation23_spill] sm:$0xff] }
 0xbaf   :  { %v5312_v52 = vpop.permute.xlu0 %5311 }
 0xbb0   :  { %5314 = vst.msk [vmem:[%s13906_s5 + $0x18] sm:$0xff] %vm62_vm1, %v5312_v52  ;;  %v5832_v7 = vsel %vm62_vm1, %v5312_v52, 0  ;;  %v480_v52 = vadd.f32 %v13983_v16, %v358_v46 }
 0xbb1   :  { %v5903_v13 = vand.u32 4294901760, %v5832_v7 }
 0xbb3   :  { %v5904_v45 = vsub.f32 %v5832_v7, %v5903_v13  ;;  %11381 = vmatmul.mubr.f32.vlgmr.msra.gmra.mxu1 %v5903_v13 }
 0xbb4   :  { %11395 = vmatpush3.msra.mxu1 %v12418_v20  ;;  %11402 = vmatprep.mubr.msk.f32.mxu1 %vm12025_vm2, %v13963_v43 }
 0xbb5   :  { %v5905_v22 = vand.u32 4294901760, %v5904_v45  ;;  %11396 = vmatprep.subr.mxu1 %v13963_v43 }
 0xbb6   :  { %11397 = vmatpush3.msra.mxu1 %v12435_v23 }
 0xbb7   :  { %v5906_v48 = vsub.f32 %v5904_v45, %v5905_v22  ;;  %11398 = vmatprep.subr.mxu1 %v13963_v43 }
 0xbb8   :  { %11399 = vmatpush3.msra.mxu1 %v12456_v27 }
 0xbb9   :  { %11400 = vmatprep.subr.mxu1 %v13963_v43  ;;  %v5907_v11 = vand.u32 4294901760, %v5906_v48 }
 0xbba   :  { %11401 = vmatpush3.msra.mxu1 %v12477_v35 }
 0xbbb   :  { %11403 = vmatmul.mubr.f32.vlgmr.msra.gmra.mxu1 %v5905_v22  ;;  %11416 = vmatprep.subr.mxu1 %v13963_v43  ;;  %v13984_v22 = vld [vmem:[#allocation24_spill] sm:$0xff] }
 0xbbc   :  { %11370 = vmatmul.mubr.f32.vlgmr.msra.gmra.mxu0 %v5907_v11  ;;  %11417 = vmatpush3.msra.mxu1 %v12418_v20  ;;  %v608_v48 = vadd.f32 %v13984_v22, %v480_v52  ;;  %v13985_v11 = vld [vmem:[#allocation31_spill] sm:$0xff] }
 0xbbd   :  { %11384 = vmatpush3.msra.mxu0 %v12433_v4  ;;  %11418 = vmatprep.subr.mxu1 %v13963_v43 }
 0xbbe   :  { %11385 = vmatprep.subr.mxu0 %v13963_v43  ;;  %11419 = vmatpush3.msra.mxu1 %v12435_v23 }
 0xbbf   :  { %11386 = vmatpush3.msra.mxu0 %v12454_v5  ;;  %11420 = vmatprep.subr.mxu1 %v13963_v43 }
 0xbc0   :  { %11387 = vmatprep.subr.mxu0 %v13963_v43  ;;  %11421 = vmatpush3.msra.mxu1 %v12456_v27 }
 0xbc1   :  { %11388 = vmatpush3.msra.mxu0 %v12475_v32  ;;  %11422 = vmatprep.subr.mxu1 %v13963_v43 }
 0xbc2   :  { %11389 = vmatprep.subr.mxu0 %v13963_v43  ;;  %11391 = vmatprep.mubr.msk.f32.mxu0 %vm12025_vm2, %v13963_v43 }
 0xbc3   :  { %11390 = vmatpush3.msra.mxu0 %v12494_v40  ;;  %11423 = vmatpush3.msra.mxu1 %v12477_v35 }
 0xbc4   :  { %11424 = vmatprep.mubr.msk.f32.mxu1 %vm12025_vm2, %v13963_v43  ;;  %11392 = vmatmul.mubr.f32.vlgmr.msra.gmra.mxu0 %v5904_v45 }
 0xbc5   :  { %11405 = vmatprep.subr.mxu0 %v13963_v43  ;;  %11425 = vmatmul.mubr.f32.vlgmr.msra.gmra.mxu1 %v5903_v13 }
 0xbc6   :  { %11438 = vmatprep.subr.mxu1 %v13963_v43  ;;  %11406 = vmatpush3.msra.mxu0 %v12451_v26 }
 0xbc7   :  { %11439 = vmatpush3.msra.mxu1 %v12647_v6  ;;  %11407 = vmatprep.subr.mxu0 %v13963_v43 }
 0xbc8   :  { %11440 = vmatprep.subr.mxu1 %v13963_v43  ;;  %11408 = vmatpush3.msra.mxu0 %v12472_v29 }
 0xbc9   :  { %11441 = vmatpush3.msra.mxu1 %v12657_v9  ;;  %11409 = vmatprep.subr.mxu0 %v13963_v43 }
 0xbca   :  { %11442 = vmatprep.subr.mxu1 %v13963_v43  ;;  %11410 = vmatpush3.msra.mxu0 %v12491_v39 }
 0xbcb   :  { %11443 = vmatpush3.msra.mxu1 %v12665_v58  ;;  %11411 = vmatprep.subr.mxu0 %v13963_v43 }
 0xbcc   :  { %v5829_v60 = vpop.permute.xlu1 %5828  ;;  %11444 = vmatprep.subr.mxu1 %v13963_v43  ;;  %11412 = vmatpush3.msra.mxu0 %v12511_v44 }
 0xbcd   :  { %5831 = vst.msk [vmem:[%s13907_s6 + $0x20] sm:$0xff] %vm62_vm1, %v5829_v60  ;;  %v6349_v38 = vsel %vm62_vm1, %v5829_v60, 0  ;;  %11413 = vmatprep.mubr.msk.f32.mxu0 %vm12025_vm2, %v13963_v43  ;;  %11445 = vmatpush3.msra.mxu1 %v12671_v14  ;;  %v733_v60 = vadd.f32 %v13985_v11, %v608_v48  ;;  %v13987_v48 = vld [vmem:[#allocation39_spill] sm:$0xff] }
 0xbce   :  { %v6420_v28 = vand.u32 4294901760, %v6349_v38  ;;  %11414 = vmatmul.mubr.f32.vlgmr.msra.gmra.mxu0 %v5903_v13  ;;  %11427 = vmatprep.subr.mxu0 %v13963_v43 }
 0xbcf   :  { %11446 = vmatprep.mubr.msk.f32.mxu1 %vm12025_vm2, %v13963_v43  ;;  %11460 = vmatprep.subr.mxu1 %v13963_v43 }
 0xbd0   :  { %v6421_v51 = vsub.f32 %v6349_v38, %v6420_v28  ;;  %11428 = vmatpush3.msra.mxu0 %v12563_v49  ;;  %11447 = vmatmul.mubr.f32.vlgmr.msra.gmra.mxu1 %v6420_v28 }
 0xbd1   :  { %11461 = vmatpush3.msra.mxu1 %v12563_v49  ;;  %11429 = vmatprep.subr.mxu0 %v13963_v43 }
 0xbd2   :  { %v6422_v34 = vand.u32 4294901760, %v6421_v51  ;;  %11462 = vmatprep.subr.mxu1 %v13963_v43  ;;  %11430 = vmatpush3.msra.mxu0 %v12572_v50 }
 0xbd3   :  { %11463 = vmatpush3.msra.mxu1 %v12572_v50  ;;  %11431 = vmatprep.subr.mxu0 %v13963_v43 }
 0xbd4   :  { %v6423_v31 = vsub.f32 %v6421_v51, %v6422_v34  ;;  %11464 = vmatprep.subr.mxu1 %v13963_v43  ;;  %11432 = vmatpush3.msra.mxu0 %v12585_v54 }
 0xbd5   :  { %11465 = vmatpush3.msra.mxu1 %v12585_v54  ;;  %11433 = vmatprep.subr.mxu0 %v13963_v43 }
 0xbd6   :  { %11466 = vmatprep.subr.mxu1 %v13963_v43  ;;  %11434 = vmatpush3.msra.mxu0 %v12596_v21  ;;  %v6424_v17 = vand.u32 4294901760, %v6423_v31 }
 0xbd7   :  { %11467 = vmatpush3.msra.mxu1 %v12596_v21  ;;  %11468 = vmatprep.mubr.msk.f32.mxu1 %vm12025_vm2, %v13963_v43 }
 0xbd8   :  { %11435 = vmatprep.mubr.msk.f32.mxu0 %vm12025_vm2, %v13963_v43  ;;  %11449 = vmatprep.subr.mxu0 %v13963_v43 }
 0xbd9   :  { %11469 = vmatmul.mubr.f32.vlgmr.msra.gmra.mxu1 %v6422_v34  ;;  %11482 = vmatprep.subr.mxu1 %v13963_v43 }
 0xbda   :  { %11436 = vmatmul.mubr.f32.vlgmr.msra.gmra.mxu0 %v6424_v17  ;;  %11483 = vmatpush3.msra.mxu1 %v12563_v49  ;;  %v848_v17 = vadd.f32 %v13986_v41, %v733_v60 }
 0xbdb   :  { %11450 = vmatpush3.msra.mxu0 %v12583_v53  ;;  %11484 = vmatprep.subr.mxu1 %v13963_v43 }
 0xbdc   :  { %11451 = vmatprep.subr.mxu0 %v13963_v43  ;;  %11485 = vmatpush3.msra.mxu1 %v12572_v50 }
 0xbdd   :  { %11452 = vmatpush3.msra.mxu0 %v12594_v57  ;;  %11486 = vmatprep.subr.mxu1 %v13963_v43 }
 0xbde   :  { %11453 = vmatprep.subr.mxu0 %v13963_v43  ;;  %11487 = vmatpush3.msra.mxu1 %v12585_v54 }
 0xbdf   :  { %11454 = vmatpush3.msra.mxu0 %v12608_v59  ;;  %11488 = vmatprep.subr.mxu1 %v13963_v43 }
 0xbe0   :  { %11455 = vmatprep.subr.mxu0 %v13963_v43  ;;  %11457 = vmatprep.mubr.msk.f32.mxu0 %vm12025_vm2, %v13963_v43 }
 0xbe1   :  { %11456 = vmatpush3.msra.mxu0 %v13964_v18  ;;  %11489 = vmatpush3.msra.mxu1 %v12596_v21 }
 0xbe2   :  { %11490 = vmatprep.mubr.msk.f32.mxu1 %vm12025_vm2, %v13963_v43  ;;  %11458 = vmatmul.mubr.f32.vlgmr.msra.gmra.mxu0 %v6421_v51 }
 0xbe3   :  { %11471 = vmatprep.subr.mxu0 %v13963_v43  ;;  %11491 = vmatmul.mubr.f32.vlgmr.msra.gmra.mxu1 %v6420_v28 }
 0xbe4   :  { %11472 = vmatpush3.msra.mxu0 %v13965_v2  ;;  %11479 = vmatprep.mubr.msk.f32.mxu0 %vm12025_vm2, %v13963_v43 }
 0xbe5   :  { %11473 = vmatprep.subr.mxu0 %v13963_v43  ;;  %11504 = vmatprep.subr.mxu1 %v13963_v43 }
 0xbe6   :  { %11474 = vmatpush3.msra.mxu0 %v13966_v36  ;;  %11505 = vmatpush3.msra.mxu1 %v13967_v25 }
 0xbe7   :  { %11475 = vmatprep.subr.mxu0 %v13963_v43  ;;  %11506 = vmatprep.subr.mxu1 %v13963_v43 }
 0xbe8   :  { %11476 = vmatpush3.msra.mxu0 %v13968_v1  ;;  %11507 = vmatpush3.msra.mxu1 %v13969_v19 }
 0xbe9   :  { %11477 = vmatprep.subr.mxu0 %v13963_v43  ;;  %11508 = vmatprep.subr.mxu1 %v13963_v43 }
 0xbea   :  { %11478 = vmatpush3.msra.mxu0 %v13970_v8  ;;  %11509 = vmatpush3.msra.mxu1 %v13971_v3 }
 0xbeb   :  { %11480 = vmatmul.mubr.f32.vlgmr.msra.gmra.mxu0 %v6420_v28  ;;  %11510 = vmatprep.subr.mxu1 %v13963_v43 }
 0xbec   :  { %11511 = vmatpush3.msra.mxu1 %v13972_v10  ;;  %11493 = vmatprep.subr.mxu0 %v13963_v43 }
 0xbed   :  { %11512 = vmatprep.mubr.msk.f32.mxu1 %vm12025_vm2, %v13963_v43  ;;  %11526 = vmatprep.subr.mxu1 %v13963_v43 }
 0xbee   :  { %11494 = vmatpush3.msra.mxu0 %v12418_v20  ;;  %11501 = vmatprep.mubr.msk.f32.mxu0 %vm12025_vm2, %v13963_v43 }
 0xbef   :  { %11495 = vmatprep.subr.mxu0 %v13963_v43 }
 0xbf0   :  { %11496 = vmatpush3.msra.mxu0 %v12435_v23 }
 0xbf1   :  { %11497 = vmatprep.subr.mxu0 %v13963_v43 }
 0xbf2   :  { %11498 = vmatpush3.msra.mxu0 %v12456_v27 }
 0xbf3   :  { %11499 = vmatprep.subr.mxu0 %v13963_v43 }
 0xbf4   :  { %11500 = vmatpush3.msra.mxu0 %v12477_v35 }
 0xbf5   :  { %11515 = vmatprep.subr.mxu0 %v13963_v43 }
 0xc73   :  { %v6000_v61 = vpop.f32.mrf.mxu1 }
 0xc75   :  { %v11382_v30 = vpop.f32.mrf.mxu1 }
 0xc7b   :  { %v6157_v15 = vpop.f32.mrf.mxu1 }
 0xc7c   :  { %v5909_v62 = vpop.f32.mrf.mxu0 }
 0xc7d   :  { %v11404_v37 = vpop.f32.mrf.mxu1  ;;  %v6001_v7 = vadd.f32 %v6000_v61, %v5909_v62 }
 0xc7e   :  { %v11371_v47 = vpop.f32.mrf.mxu0 }
 0xc84   :  { %v6080_v12 = vpop.f32.mrf.mxu0 }
 0xc85   :  { %v6315_v55 = vpop.f32.mrf.mxu1  ;;  %v6081_v45 = vadd.f32 %v6080_v12, %v6001_v7 }
 0xc86   :  { %v11393_v0 = vpop.f32.mrf.mxu0 }
 0xc87   :  { %v11426_v13 = vpop.f32.mrf.mxu1  ;;  %v6158_v38 = vadd.f32 %v6157_v15, %v6081_v45 }
 0xc8e   :  { %v6240_v28 = vpop.f32.mrf.mxu0 }
 0xc8f   :  { %v6241_v51 = vadd.f32 %v6240_v28, %v6158_v38 }
 0xc90   :  { %v6517_v34 = vpop.f32.mrf.mxu1  ;;  %v11415_v31 = vpop.f32.mrf.mxu0 }
 0xc91   :  { %v6316_v30 = vadd.f32 %v6315_v55, %v6241_v51 }
 0xc92   :  { %v11448_v37 = vpop.f32.mrf.mxu1 }
 0xc93   :  { %v6319_v47 = vadd.f32 %v6316_v30, %v848_v17 }
 0xc95   :  { %11958 = vtanh.f32 %v6319_v47  ;;  %v10033_v38 = vmul.f32 -1.442695, %v6319_v47 }
 0xc99   :  { %v6674_v63 = vpop.f32.mrf.mxu1 }
 0xc9a   :  { %v6426_v56 = vpop.f32.mrf.mxu0 }
 0xc9b   :  { %v11470_v61 = vpop.f32.mrf.mxu1  ;;  %v6518_v15 = vadd.f32 %v6517_v34, %v6426_v56 }
 0xc9c   :  { %v11437_v62 = vpop.f32.mrf.mxu0 }
 0xca2   :  { %v11959_v12 = vpop.eup %11958  ;;  %v6597_v24 = vpop.f32.mrf.mxu0 }
 0xca3   :  { %v6832_v46 = vpop.f32.mrf.mxu1  ;;  %6329 = vrot.lane.b32.xlu0 %v11959_v12, %s12026_s3  ;;  %v6598_v52 = vadd.f32 %v6597_v24, %v6518_v15 }
 0xca4   :  { %v11459_v0 = vpop.f32.mrf.mxu0 }
 0xca5   :  { %v11492_v16 = vpop.f32.mrf.mxu1  ;;  %v6675_v7 = vadd.f32 %v6674_v63, %v6598_v52 }
 0xcab   :  { %v6757_v13 = vpop.f32.mrf.mxu0 }
 0xcac   :  { %v6758_v45 = vadd.f32 %v6757_v13, %v6675_v7 }
 0xcad   :  { %v11481_v55 = vpop.f32.mrf.mxu0 }
 0xcae   :  { %v6833_v22 = vadd.f32 %v6832_v46, %v6758_v45 }
 0xcb0   :  { %v6836_v11 = vadd.f32 %v6833_v22, %v13987_v48 }
 0xcb2   :  { %11960 = vtanh.f32 %v6836_v11  ;;  %v10034_v34 = vmul.f32 -1.442695, %v6836_v11 }
 0xcb3   :  { %11962 = vpow2.f32 %v10033_v38 }
 0xcbf   :  { %v11961_v60 = vpop.eup %11960 }
 0xcc0   :  { %6846 = vrot.lane.b32.xlu1 %v11961_v60, %s12026_s3  ;;  %v11963_v28 = vpop.eup %11962 }
 0xcc1   :  { %v6323_v51 = vadd.f32 1.0, %v11963_v28 }
 0xcc3   :  { %11964 = vrcp.f32 %v6323_v51 }
 0xcc4   :  { %11966 = vpow2.f32 %v10034_v34 }
 0xcd0   :  { %v11965_v31 = vpop.eup %11964 }
 0xcd1   :  { %v11967_v30 = vpop.eup %11966  ;;  %v6327_v47 = vmul.f32 %v11965_v31, %v13300_v33 }
 0xcd2   :  { %v6840_v37 = vadd.f32 1.0, %v11967_v30 }
 0xcd4   :  { %11968 = vrcp.f32 %v6840_v37 }
 0xce1   :  { %v11969_v63 = vpop.eup %11968 }
 0xce2   :  { %v6844_v46 = vmul.f32 %v11969_v63, %v13305_v42 }
 0xd15   :  { %v6330_v41 = vpop.permute.xlu0 %6329 }
 0xd16   :  { %v6332_v17 = vmul.f32 %v11965_v31, %v6330_v41 }
 0xd18   :  { %6334 = vrot.lane.b32.xlu0 %v6332_v17, %s12026_s3 }
 0xd32   :  { %v6847_v56 = vpop.permute.xlu1 %6846 }
 0xd33   :  { %v6849_v61 = vmul.f32 %v11969_v63, %v6847_v56 }
 0xd35   :  { %6851 = vrot.lane.b32.xlu1 %v6849_v61, %s12026_s3 }
 0xd8a   :  { %v6335_v62 = vpop.permute.xlu0 %6334 }
 0xd8b   :  { %v13454_v12 = vadd.f32 %v6335_v62, %v6327_v47 }
 0xd8d   :  { %11970 = vtanh.f32 %v13454_v12 }
 0xd9a   :  { %v11971_v24 = vpop.eup %11970 }
 0xd9b   :  { %6340 = vrot.lane.b32.xlu0 %v11971_v24, %s12026_s3 }
 0xda7   :  { %v6852_v15 = vpop.permute.xlu1 %6851 }
 0xda8   :  { %v13459_v0 = vadd.f32 %v6852_v15, %v6844_v46 }
 0xdaa   :  { %11972 = vtanh.f32 %v13459_v0 }
 0xdb7   :  { %v11973_v16 = vpop.eup %11972 }
 0xdb8   :  { %6857 = vrot.lane.b32.xlu1 %v11973_v16, %s12026_s3 }
 0xe0d   :  { %v6341_v52 = vpop.permute.xlu0 %6340 }
 0xe0e   :  { %v6343_v33 = vmul.f32 %v11965_v31, %v6341_v52 }
 0xe10   :  { %6345 = vrot.lane.b32.xlu0 %v6343_v33, %s12027_s28 }
 0xe2a   :  { %v6858_v7 = vpop.permute.xlu1 %6857 }
 0xe2b   :  { %v6860_v13 = vmul.f32 %v11969_v63, %v6858_v7 }
 0xe2d   :  { %6862 = vrot.lane.b32.xlu1 %v6860_v13, %s12027_s28 }
 0xe82   :  { %v6346_v45 = vpop.permute.xlu0 %6345 }
 0xe83   :  { %6348 = vst.msk [vmem:[%s13906_s5 + $0x20] sm:$0xff] %vm62_vm1, %v6346_v45  ;;  %v6866_v42 = vsel %vm62_vm1, %v6346_v45, 0 }
 0xe84   :  { %v6937_v55 = vand.u32 4294901760, %v6866_v42 }
 0xe86   :  { %v6938_v22 = vsub.f32 %v6866_v42, %v6937_v55  ;;  %11513 = vmatmul.mubr.f32.vlgmr.msra.gmra.mxu1 %v6937_v55 }
 0xe87   :  { %11527 = vmatpush3.msra.mxu1 %v12418_v20  ;;  %11534 = vmatprep.mubr.msk.f32.mxu1 %vm12025_vm2, %v13963_v43 }
 0xe88   :  { %v6939_v48 = vand.u32 4294901760, %v6938_v22  ;;  %11528 = vmatprep.subr.mxu1 %v13963_v43 }
 0xe89   :  { %11529 = vmatpush3.msra.mxu1 %v12435_v23 }
 0xe8a   :  { %v6940_v11 = vsub.f32 %v6938_v22, %v6939_v48  ;;  %11530 = vmatprep.subr.mxu1 %v13963_v43 }
 0xe8b   :  { %11531 = vmatpush3.msra.mxu1 %v12456_v27 }
 0xe8c   :  { %11532 = vmatprep.subr.mxu1 %v13963_v43  ;;  %v6941_v60 = vand.u32 4294901760, %v6940_v11 }
 0xe8d   :  { %11533 = vmatpush3.msra.mxu1 %v12477_v35 }
 0xe8e   :  { %11535 = vmatmul.mubr.f32.vlgmr.msra.gmra.mxu1 %v6939_v48  ;;  %11548 = vmatprep.subr.mxu1 %v13963_v43  ;;  %v13988_v48 = vld [vmem:[#allocation32_spill] sm:$0xff] }
 0xe8f   :  { %11502 = vmatmul.mubr.f32.vlgmr.msra.gmra.mxu0 %v6941_v60  ;;  %11549 = vmatpush3.msra.mxu1 %v12418_v20 }
 0xe90   :  { %11516 = vmatpush3.msra.mxu0 %v12433_v4  ;;  %11550 = vmatprep.subr.mxu1 %v13963_v43 }
 0xe91   :  { %11517 = vmatprep.subr.mxu0 %v13963_v43  ;;  %11551 = vmatpush3.msra.mxu1 %v12435_v23 }
 0xe92   :  { %11518 = vmatpush3.msra.mxu0 %v12454_v5  ;;  %11552 = vmatprep.subr.mxu1 %v13963_v43 }
 0xe93   :  { %11519 = vmatprep.subr.mxu0 %v13963_v43  ;;  %11553 = vmatpush3.msra.mxu1 %v12456_v27 }
 0xe94   :  { %11520 = vmatpush3.msra.mxu0 %v12475_v32  ;;  %11554 = vmatprep.subr.mxu1 %v13963_v43 }
 0xe95   :  { %11521 = vmatprep.subr.mxu0 %v13963_v43  ;;  %11523 = vmatprep.mubr.msk.f32.mxu0 %vm12025_vm2, %v13963_v43 }
 0xe96   :  { %11522 = vmatpush3.msra.mxu0 %v12494_v40  ;;  %11555 = vmatpush3.msra.mxu1 %v12477_v35 }
 0xe97   :  { %11556 = vmatprep.mubr.msk.f32.mxu1 %vm12025_vm2, %v13963_v43  ;;  %11524 = vmatmul.mubr.f32.vlgmr.msra.gmra.mxu0 %v6938_v22 }
 0xe98   :  { %11537 = vmatprep.subr.mxu0 %v13963_v43  ;;  %11557 = vmatmul.mubr.f32.vlgmr.msra.gmra.mxu1 %v6937_v55 }
 0xe99   :  { %11570 = vmatprep.subr.mxu1 %v13963_v43  ;;  %11538 = vmatpush3.msra.mxu0 %v12451_v26 }
 0xe9a   :  { %11571 = vmatpush3.msra.mxu1 %v12647_v6  ;;  %11539 = vmatprep.subr.mxu0 %v13963_v43 }
 0xe9b   :  { %11572 = vmatprep.subr.mxu1 %v13963_v43  ;;  %11540 = vmatpush3.msra.mxu0 %v12472_v29 }
 0xe9c   :  { %11573 = vmatpush3.msra.mxu1 %v12657_v9  ;;  %11541 = vmatprep.subr.mxu0 %v13963_v43 }
 0xe9d   :  { %11574 = vmatprep.subr.mxu1 %v13963_v43  ;;  %11542 = vmatpush3.msra.mxu0 %v12491_v39 }
 0xe9e   :  { %11575 = vmatpush3.msra.mxu1 %v12665_v58  ;;  %11543 = vmatprep.subr.mxu0 %v13963_v43 }
 0xe9f   :  { %v6863_v38 = vpop.permute.xlu1 %6862  ;;  %11576 = vmatprep.subr.mxu1 %v13963_v43  ;;  %11544 = vmatpush3.msra.mxu0 %v12511_v44 }
 0xea0   :  { %6865 = vst.msk [vmem:[%s13907_s6 + $0x18] sm:$0xff] %vm62_vm1, %v6863_v38  ;;  %v7383_v28 = vsel %vm62_vm1, %v6863_v38, 0  ;;  %11545 = vmatprep.mubr.msk.f32.mxu0 %vm12025_vm2, %v13963_v43  ;;  %11577 = vmatpush3.msra.mxu1 %v12671_v14 }
 0xea1   :  { %v7454_v51 = vand.u32 4294901760, %v7383_v28  ;;  %11546 = vmatmul.mubr.f32.vlgmr.msra.gmra.mxu0 %v6937_v55  ;;  %11559 = vmatprep.subr.mxu0 %v13963_v43 }
 0xea2   :  { %11578 = vmatprep.mubr.msk.f32.mxu1 %vm12025_vm2, %v13963_v43  ;;  %11592 = vmatprep.subr.mxu1 %v13963_v43 }
 0xea3   :  { %v7455_v34 = vsub.f32 %v7383_v28, %v7454_v51  ;;  %11560 = vmatpush3.msra.mxu0 %v12563_v49  ;;  %11579 = vmatmul.mubr.f32.vlgmr.msra.gmra.mxu1 %v7454_v51 }
 0xea4   :  { %11593 = vmatpush3.msra.mxu1 %v12563_v49  ;;  %11561 = vmatprep.subr.mxu0 %v13963_v43 }
 0xea5   :  { %v7456_v31 = vand.u32 4294901760, %v7455_v34  ;;  %11594 = vmatprep.subr.mxu1 %v13963_v43  ;;  %11562 = vmatpush3.msra.mxu0 %v12572_v50 }
 0xea6   :  { %11595 = vmatpush3.msra.mxu1 %v12572_v50  ;;  %11563 = vmatprep.subr.mxu0 %v13963_v43 }
 0xea7   :  { %v7457_v41 = vsub.f32 %v7455_v34, %v7456_v31  ;;  %11596 = vmatprep.subr.mxu1 %v13963_v43  ;;  %11564 = vmatpush3.msra.mxu0 %v12585_v54 }
 0xea8   :  { %11597 = vmatpush3.msra.mxu1 %v12585_v54  ;;  %11565 = vmatprep.subr.mxu0 %v13963_v43 }
 0xea9   :  { %v7458_v17 = vand.u32 4294901760, %v7457_v41  ;;  %11598 = vmatprep.subr.mxu1 %v13963_v43  ;;  %11566 = vmatpush3.msra.mxu0 %v12596_v21 }
 0xeaa   :  { %11599 = vmatpush3.msra.mxu1 %v12596_v21  ;;  %11600 = vmatprep.mubr.msk.f32.mxu1 %vm12025_vm2, %v13963_v43 }
 0xeab   :  { %11567 = vmatprep.mubr.msk.f32.mxu0 %vm12025_vm2, %v13963_v43  ;;  %11581 = vmatprep.subr.mxu0 %v13963_v43 }
 0xeac   :  { %11601 = vmatmul.mubr.f32.vlgmr.msra.gmra.mxu1 %v7456_v31  ;;  %11614 = vmatprep.subr.mxu1 %v13963_v43 }
 0xead   :  { %11568 = vmatmul.mubr.f32.vlgmr.msra.gmra.mxu0 %v7458_v17  ;;  %11615 = vmatpush3.msra.mxu1 %v12563_v49 }
 0xeae   :  { %11582 = vmatpush3.msra.mxu0 %v12583_v53  ;;  %11616 = vmatprep.subr.mxu1 %v13963_v43 }
 0xeaf   :  { %11583 = vmatprep.subr.mxu0 %v13963_v43  ;;  %11617 = vmatpush3.msra.mxu1 %v12572_v50 }
 0xeb0   :  { %11584 = vmatpush3.msra.mxu0 %v12594_v57  ;;  %11618 = vmatprep.subr.mxu1 %v13963_v43 }
 0xeb1   :  { %11585 = vmatprep.subr.mxu0 %v13963_v43  ;;  %11619 = vmatpush3.msra.mxu1 %v12585_v54 }
 0xeb2   :  { %11586 = vmatpush3.msra.mxu0 %v12608_v59  ;;  %11620 = vmatprep.subr.mxu1 %v13963_v43 }
 0xeb3   :  { %11587 = vmatprep.subr.mxu0 %v13963_v43  ;;  %11589 = vmatprep.mubr.msk.f32.mxu0 %vm12025_vm2, %v13963_v43 }
 0xeb4   :  { %11588 = vmatpush3.msra.mxu0 %v13964_v18  ;;  %11621 = vmatpush3.msra.mxu1 %v12596_v21 }
 0xeb5   :  { %11622 = vmatprep.mubr.msk.f32.mxu1 %vm12025_vm2, %v13963_v43  ;;  %11590 = vmatmul.mubr.f32.vlgmr.msra.gmra.mxu0 %v7455_v34 }
 0xeb6   :  { %11603 = vmatprep.subr.mxu0 %v13963_v43  ;;  %11623 = vmatmul.mubr.f32.vlgmr.msra.gmra.mxu1 %v7454_v51 }
 0xeb7   :  { %11604 = vmatpush3.msra.mxu0 %v13965_v2  ;;  %11611 = vmatprep.mubr.msk.f32.mxu0 %vm12025_vm2, %v13963_v43 }
 0xeb8   :  { %11605 = vmatprep.subr.mxu0 %v13963_v43  ;;  %11636 = vmatprep.subr.mxu1 %v13963_v43 }
 0xeb9   :  { %11606 = vmatpush3.msra.mxu0 %v13966_v36  ;;  %11637 = vmatpush3.msra.mxu1 %v13967_v25 }
 0xeba   :  { %11607 = vmatprep.subr.mxu0 %v13963_v43  ;;  %11638 = vmatprep.subr.mxu1 %v13963_v43 }
 0xebb   :  { %11608 = vmatpush3.msra.mxu0 %v13968_v1  ;;  %11639 = vmatpush3.msra.mxu1 %v13969_v19 }
 0xebc   :  { %11609 = vmatprep.subr.mxu0 %v13963_v43  ;;  %11640 = vmatprep.subr.mxu1 %v13963_v43 }
 0xebd   :  { %11610 = vmatpush3.msra.mxu0 %v13970_v8  ;;  %11641 = vmatpush3.msra.mxu1 %v13971_v3 }
 0xebe   :  { %11612 = vmatmul.mubr.f32.vlgmr.msra.gmra.mxu0 %v7454_v51  ;;  %11642 = vmatprep.subr.mxu1 %v13963_v43 }
 0xebf   :  { %11643 = vmatpush3.msra.mxu1 %v13972_v10  ;;  %11625 = vmatprep.subr.mxu0 %v13963_v43 }
 0xec0   :  { %11644 = vmatprep.mubr.msk.f32.mxu1 %vm12025_vm2, %v13963_v43  ;;  %11658 = vmatprep.subr.mxu1 %v13963_v43 }
 0xec1   :  { %11626 = vmatpush3.msra.mxu0 %v12418_v20  ;;  %11633 = vmatprep.mubr.msk.f32.mxu0 %vm12025_vm2, %v13963_v43 }
 0xec2   :  { %11627 = vmatprep.subr.mxu0 %v13963_v43 }
 0xec3   :  { %11628 = vmatpush3.msra.mxu0 %v12435_v23 }
 0xec4   :  { %11629 = vmatprep.subr.mxu0 %v13963_v43 }
 0xec5   :  { %11630 = vmatpush3.msra.mxu0 %v12456_v27 }
 0xec6   :  { %11631 = vmatprep.subr.mxu0 %v13963_v43 }
 0xec7   :  { %11632 = vmatpush3.msra.mxu0 %v12477_v35 }
 0xec8   :  { %11647 = vmatprep.subr.mxu0 %v13963_v43 }
 0xf46   :  { %v7034_v30 = vpop.f32.mrf.mxu1 }
 0xf48   :  { %v11514_v37 = vpop.f32.mrf.mxu1 }
 0xf4e   :  { %v7191_v63 = vpop.f32.mrf.mxu1 }
 0xf4f   :  { %v6943_v56 = vpop.f32.mrf.mxu0 }
 0xf50   :  { %v11536_v61 = vpop.f32.mrf.mxu1  ;;  %v7035_v15 = vadd.f32 %v7034_v30, %v6943_v56 }
 0xf51   :  { %v11503_v47 = vpop.f32.mrf.mxu0 }
 0xf57   :  { %v7114_v62 = vpop.f32.mrf.mxu0 }
 0xf58   :  { %v7349_v24 = vpop.f32.mrf.mxu1  ;;  %v7115_v52 = vadd.f32 %v7114_v62, %v7035_v15 }
 0xf59   :  { %v11525_v46 = vpop.f32.mrf.mxu0 }
 0xf5a   :  { %v11558_v16 = vpop.f32.mrf.mxu1  ;;  %v7192_v33 = vadd.f32 %v7191_v63, %v7115_v52  ;;  %v13989_v46 = vld [vmem:[#allocation40_spill] sm:$0xff] }
 0xf61   :  { %v7274_v7 = vpop.f32.mrf.mxu0 }
 0xf62   :  { %v7275_v13 = vadd.f32 %v7274_v7, %v7192_v33 }
 0xf63   :  { %v7551_v45 = vpop.f32.mrf.mxu1  ;;  %v11547_v42 = vpop.f32.mrf.mxu0 }
 0xf64   :  { %v7350_v55 = vadd.f32 %v7349_v24, %v7275_v13 }
 0xf65   :  { %v11580_v22 = vpop.f32.mrf.mxu1 }
 0xf66   :  { %v7353_v11 = vadd.f32 %v7350_v55, %v13988_v48 }
 0xf68   :  { %11974 = vtanh.f32 %v7353_v11  ;;  %v10035_v52 = vmul.f32 -1.442695, %v7353_v11 }
 0xf6c   :  { %v7708_v60 = vpop.f32.mrf.mxu1 }
 0xf6d   :  { %v7460_v38 = vpop.f32.mrf.mxu0 }
 0xf6e   :  { %v11602_v28 = vpop.f32.mrf.mxu1  ;;  %v7552_v17 = vadd.f32 %v7551_v45, %v7460_v38 }
 0xf6f   :  { %v11569_v51 = vpop.f32.mrf.mxu0 }
 0xf75   :  { %v11975_v34 = vpop.eup %11974  ;;  %v7631_v31 = vpop.f32.mrf.mxu0 }
 0xf76   :  { %v7866_v41 = vpop.f32.mrf.mxu1  ;;  %7363 = vrot.lane.b32.xlu0 %v11975_v34, %s12026_s3  ;;  %v7632_v63 = vadd.f32 %v7631_v31, %v7552_v17 }
 0xf77   :  { %v11591_v30 = vpop.f32.mrf.mxu0 }
 0xf78   :  { %v11624_v37 = vpop.f32.mrf.mxu1  ;;  %v7709_v56 = vadd.f32 %v7708_v60, %v7632_v63 }
 0xf7e   :  { %v7791_v61 = vpop.f32.mrf.mxu0 }
 0xf7f   :  { %v7792_v47 = vadd.f32 %v7791_v61, %v7709_v56 }
 0xf80   :  { %v11613_v62 = vpop.f32.mrf.mxu0 }
 0xf81   :  { %v7867_v24 = vadd.f32 %v7866_v41, %v7792_v47 }
 0xf83   :  { %v7870_v15 = vadd.f32 %v7867_v24, %v13989_v46 }
 0xf85   :  { %11976 = vtanh.f32 %v7870_v15  ;;  %v10036_v13 = vmul.f32 -1.442695, %v7870_v15 }
 0xf86   :  { %11978 = vpow2.f32 %v10035_v52 }
 0xf92   :  { %v11977_v16 = vpop.eup %11976 }
 0xf93   :  { %7880 = vrot.lane.b32.xlu1 %v11977_v16, %s12026_s3  ;;  %v11979_v33 = vpop.eup %11978 }
 0xf94   :  { %v7357_v7 = vadd.f32 1.0, %v11979_v33 }
 0xf96   :  { %11980 = vrcp.f32 %v7357_v7 }
 0xf97   :  { %11982 = vpow2.f32 %v10036_v13 }
 0xfa3   :  { %v11981_v45 = vpop.eup %11980 }
 0xfa4   :  { %v11983_v22 = vpop.eup %11982  ;;  %v7361_v11 = vmul.f32 %v11981_v45, %v13454_v12 }
 0xfa5   :  { %v7874_v48 = vadd.f32 1.0, %v11983_v22 }
 0xfa7   :  { %11984 = vrcp.f32 %v7874_v48 }
 0xfb4   :  { %v11985_v60 = vpop.eup %11984 }
 0xfb5   :  { %v7878_v41 = vmul.f32 %v11985_v60, %v13459_v0 }
 0xfe8   :  { %v7364_v42 = vpop.permute.xlu0 %7363 }
 0xfe9   :  { %v7366_v55 = vmul.f32 %v11981_v45, %v7364_v42 }
 0xfeb   :  { %7368 = vrot.lane.b32.xlu0 %v7366_v55, %s12026_s3 }
0x1005   :  { %v7881_v38 = vpop.permute.xlu1 %7880 }
0x1006   :  { %v7883_v28 = vmul.f32 %v11985_v60, %v7881_v38  ;;  %v13990_v38 = vld [vmem:[#allocation19_spill] sm:$0xff] }
0x1008   :  { %7885 = vrot.lane.b32.xlu1 %v7883_v28, %s12026_s3 }
0x105d   :  { %v7369_v51 = vpop.permute.xlu0 %7368 }
0x105e   :  { %v13602_v34 = vadd.f32 %v7369_v51, %v7361_v11  ;;  %v13991_v51 = vld [vmem:[#allocation20_spill] sm:$0xff] }
0x1060   :  { %11986 = vtanh.f32 %v13602_v34 }
0x106d   :  { %v11987_v31 = vpop.eup %11986 }
0x106e   :  { %7374 = vrot.lane.b32.xlu0 %v11987_v31, %s12026_s3 }
0x107a   :  { %v7886_v17 = vpop.permute.xlu1 %7885 }
0x107b   :  { %v13607_v30 = vadd.f32 %v7886_v17, %v7878_v41 }
0x107d   :  { %11988 = vtanh.f32 %v13607_v30 }
0x108a   :  { %v11989_v37 = vpop.eup %11988 }
0x108b   :  { %7891 = vrot.lane.b32.xlu1 %v11989_v37, %s12026_s3  ;;  %v13992_v37 = vld [vmem:[#allocation25_spill] sm:$0xff] }
0x10e0   :  { %v7375_v63 = vpop.permute.xlu0 %7374 }
0x10e1   :  { %v7377_v12 = vmul.f32 %v11981_v45, %v7375_v63 }
0x10e3   :  { %7379 = vrot.lane.b32.xlu0 %v7377_v12, %s12027_s28 }
0x10fd   :  { %v7892_v56 = vpop.permute.xlu1 %7891 }
0x10fe   :  { %v7894_v61 = vmul.f32 %v11985_v60, %v7892_v56  ;;  %v12023_v60 = vld [vmem:[%s13905_s4] ss:$0 sm:$0xff] }
0x10ff   :  { %v243_v28 = vadd.f32 %v12023_v60, %v13990_v38 }
0x1100   :  { %7896 = vrot.lane.b32.xlu1 %v7894_v61, %s12027_s28 }
0x1101   :  { %v370_v31 = vadd.f32 %v13991_v51, %v243_v28 }
0x1103   :  { %v494_v63 = vadd.f32 %v13992_v37, %v370_v31 }
0x1155   :  { %v7380_v47 = vpop.permute.xlu0 %7379 }
0x1156   :  { %7382 = vst.msk [vmem:[%s13906_s5 + $0x28] sm:$0xff] %vm62_vm1, %v7380_v47  ;;  %v7900_v0 = vsel %vm62_vm1, %v7380_v47, 0  ;;  %v13993_v47 = vld [vmem:[#allocation26_spill] sm:$0xff] }
0x1157   :  { %v7971_v62 = vand.u32 4294901760, %v7900_v0 }
0x1159   :  { %v7972_v24 = vsub.f32 %v7900_v0, %v7971_v62  ;;  %11645 = vmatmul.mubr.f32.vlgmr.msra.gmra.mxu1 %v7971_v62  ;;  %v624_v0 = vadd.f32 %v13993_v47, %v494_v63 }
0x115a   :  { %11659 = vmatpush3.msra.mxu1 %v12418_v20  ;;  %11666 = vmatprep.mubr.msk.f32.mxu1 %vm12025_vm2, %v13963_v43 }
0x115b   :  { %v7973_v46 = vand.u32 4294901760, %v7972_v24  ;;  %11660 = vmatprep.subr.mxu1 %v13963_v43 }
0x115c   :  { %11661 = vmatpush3.msra.mxu1 %v12435_v23 }
0x115d   :  { %v7974_v15 = vsub.f32 %v7972_v24, %v7973_v46  ;;  %11662 = vmatprep.subr.mxu1 %v13963_v43 }
0x115e   :  { %11663 = vmatpush3.msra.mxu1 %v12456_v27 }
0x115f   :  { %v7975_v16 = vand.u32 4294901760, %v7974_v15  ;;  %11664 = vmatprep.subr.mxu1 %v13963_v43 }
0x1160   :  { %11665 = vmatpush3.msra.mxu1 %v12477_v35 }
0x1161   :  { %11667 = vmatmul.mubr.f32.vlgmr.msra.gmra.mxu1 %v7973_v46  ;;  %11680 = vmatprep.subr.mxu1 %v13963_v43 }
0x1162   :  { %11634 = vmatmul.mubr.f32.vlgmr.msra.gmra.mxu0 %v7975_v16  ;;  %11681 = vmatpush3.msra.mxu1 %v12418_v20 }
0x1163   :  { %11648 = vmatpush3.msra.mxu0 %v12433_v4  ;;  %11682 = vmatprep.subr.mxu1 %v13963_v43 }
0x1164   :  { %11649 = vmatprep.subr.mxu0 %v13963_v43  ;;  %11683 = vmatpush3.msra.mxu1 %v12435_v23 }
0x1165   :  { %11650 = vmatpush3.msra.mxu0 %v12454_v5  ;;  %11684 = vmatprep.subr.mxu1 %v13963_v43 }
0x1166   :  { %11651 = vmatprep.subr.mxu0 %v13963_v43  ;;  %11685 = vmatpush3.msra.mxu1 %v12456_v27 }
0x1167   :  { %11652 = vmatpush3.msra.mxu0 %v12475_v32  ;;  %11686 = vmatprep.subr.mxu1 %v13963_v43 }
0x1168   :  { %11653 = vmatprep.subr.mxu0 %v13963_v43  ;;  %11655 = vmatprep.mubr.msk.f32.mxu0 %vm12025_vm2, %v13963_v43 }
0x1169   :  { %11654 = vmatpush3.msra.mxu0 %v12494_v40  ;;  %11687 = vmatpush3.msra.mxu1 %v12477_v35 }
0x116a   :  { %11688 = vmatprep.mubr.msk.f32.mxu1 %vm12025_vm2, %v13963_v43  ;;  %11656 = vmatmul.mubr.f32.vlgmr.msra.gmra.mxu0 %v7972_v24 }
0x116b   :  { %11669 = vmatprep.subr.mxu0 %v13963_v43  ;;  %11689 = vmatmul.mubr.f32.vlgmr.msra.gmra.mxu1 %v7971_v62 }
0x116c   :  { %11702 = vmatprep.subr.mxu1 %v13963_v43  ;;  %11670 = vmatpush3.msra.mxu0 %v12451_v26 }
0x116d   :  { %11703 = vmatpush3.msra.mxu1 %v12647_v6  ;;  %11671 = vmatprep.subr.mxu0 %v13963_v43 }
0x116e   :  { %11704 = vmatprep.subr.mxu1 %v13963_v43  ;;  %11672 = vmatpush3.msra.mxu0 %v12472_v29 }
0x116f   :  { %11705 = vmatpush3.msra.mxu1 %v12657_v9  ;;  %11673 = vmatprep.subr.mxu0 %v13963_v43 }
0x1170   :  { %11706 = vmatprep.subr.mxu1 %v13963_v43  ;;  %11674 = vmatpush3.msra.mxu0 %v12491_v39 }
0x1171   :  { %11707 = vmatpush3.msra.mxu1 %v12665_v58  ;;  %11675 = vmatprep.subr.mxu0 %v13963_v43 }
0x1172   :  { %v7897_v52 = vpop.permute.xlu1 %7896  ;;  %11708 = vmatprep.subr.mxu1 %v13963_v43  ;;  %11676 = vmatpush3.msra.mxu0 %v12511_v44 }
0x1173   :  { %7899 = vst.msk [vmem:[%s13907_s6 + $0x10] sm:$0xff] %vm62_vm1, %v7897_v52  ;;  %v8417_v33 = vsel %vm62_vm1, %v7897_v52, 0  ;;  %11677 = vmatprep.mubr.msk.f32.mxu0 %vm12025_vm2, %v13963_v43  ;;  %11709 = vmatpush3.msra.mxu1 %v12671_v14 }
0x1174   :  { %v8488_v7 = vand.u32 4294901760, %v8417_v33  ;;  %11678 = vmatmul.mubr.f32.vlgmr.msra.gmra.mxu0 %v7971_v62  ;;  %11691 = vmatprep.subr.mxu0 %v13963_v43  ;;  %v13994_v62 = vld [vmem:[#allocation34_spill] sm:$0xff] }
0x1175   :  { %11710 = vmatprep.mubr.msk.f32.mxu1 %vm12025_vm2, %v13963_v43  ;;  %11724 = vmatprep.subr.mxu1 %v13963_v43  ;;  %v745_v24 = vadd.f32 %v13994_v62, %v624_v0 }
0x1176   :  { %v8489_v13 = vsub.f32 %v8417_v33, %v8488_v7  ;;  %11692 = vmatpush3.msra.mxu0 %v12563_v49  ;;  %11711 = vmatmul.mubr.f32.vlgmr.msra.gmra.mxu1 %v8488_v7 }
0x1177   :  { %11725 = vmatpush3.msra.mxu1 %v12563_v49  ;;  %11693 = vmatprep.subr.mxu0 %v13963_v43 }
0x1178   :  { %v8490_v45 = vand.u32 4294901760, %v8489_v13  ;;  %11726 = vmatprep.subr.mxu1 %v13963_v43  ;;  %11694 = vmatpush3.msra.mxu0 %v12572_v50 }
0x1179   :  { %11727 = vmatpush3.msra.mxu1 %v12572_v50  ;;  %11695 = vmatprep.subr.mxu0 %v13963_v43 }
0x117a   :  { %v8491_v42 = vsub.f32 %v8489_v13, %v8490_v45  ;;  %11728 = vmatprep.subr.mxu1 %v13963_v43  ;;  %11696 = vmatpush3.msra.mxu0 %v12585_v54 }
0x117b   :  { %11729 = vmatpush3.msra.mxu1 %v12585_v54  ;;  %11697 = vmatprep.subr.mxu0 %v13963_v43 }
0x117c   :  { %v8492_v55 = vand.u32 4294901760, %v8491_v42  ;;  %11730 = vmatprep.subr.mxu1 %v13963_v43  ;;  %11698 = vmatpush3.msra.mxu0 %v12596_v21 }
0x117d   :  { %11731 = vmatpush3.msra.mxu1 %v12596_v21  ;;  %11732 = vmatprep.mubr.msk.f32.mxu1 %vm12025_vm2, %v13963_v43 }
0x117e   :  { %11699 = vmatprep.mubr.msk.f32.mxu0 %vm12025_vm2, %v13963_v43  ;;  %11713 = vmatprep.subr.mxu0 %v13963_v43 }
0x117f   :  { %11733 = vmatmul.mubr.f32.vlgmr.msra.gmra.mxu1 %v8490_v45  ;;  %11746 = vmatprep.subr.mxu1 %v13963_v43 }
0x1180   :  { %11700 = vmatmul.mubr.f32.vlgmr.msra.gmra.mxu0 %v8492_v55  ;;  %11747 = vmatpush3.msra.mxu1 %v12563_v49 }
0x1181   :  { %11714 = vmatpush3.msra.mxu0 %v12583_v53  ;;  %11748 = vmatprep.subr.mxu1 %v13963_v43 }
0x1182   :  { %11715 = vmatprep.subr.mxu0 %v13963_v43  ;;  %11749 = vmatpush3.msra.mxu1 %v12572_v50 }
0x1183   :  { %11716 = vmatpush3.msra.mxu0 %v12594_v57  ;;  %11750 = vmatprep.subr.mxu1 %v13963_v43 }
0x1184   :  { %11717 = vmatprep.subr.mxu0 %v13963_v43  ;;  %11751 = vmatpush3.msra.mxu1 %v12585_v54 }
0x1185   :  { %11718 = vmatpush3.msra.mxu0 %v12608_v59  ;;  %11752 = vmatprep.subr.mxu1 %v13963_v43 }
0x1186   :  { %11719 = vmatprep.subr.mxu0 %v13963_v43  ;;  %11721 = vmatprep.mubr.msk.f32.mxu0 %vm12025_vm2, %v13963_v43 }
0x1187   :  { %11720 = vmatpush3.msra.mxu0 %v13964_v18  ;;  %11753 = vmatpush3.msra.mxu1 %v12596_v21 }
0x1188   :  { %11754 = vmatprep.mubr.msk.f32.mxu1 %vm12025_vm2, %v13963_v43  ;;  %11722 = vmatmul.mubr.f32.vlgmr.msra.gmra.mxu0 %v8489_v13 }
0x1189   :  { %11735 = vmatprep.subr.mxu0 %v13963_v43  ;;  %11755 = vmatmul.mubr.f32.vlgmr.msra.gmra.mxu1 %v8488_v7 }
0x118a   :  { %11736 = vmatpush3.msra.mxu0 %v13965_v2  ;;  %11743 = vmatprep.mubr.msk.f32.mxu0 %vm12025_vm2, %v13963_v43 }
0x118b   :  { %11737 = vmatprep.subr.mxu0 %v13963_v43  ;;  %11768 = vmatprep.subr.mxu1 %v13963_v43 }
0x118c   :  { %11738 = vmatpush3.msra.mxu0 %v13966_v36  ;;  %11769 = vmatpush3.msra.mxu1 %v13967_v25 }
0x118d   :  { %11739 = vmatprep.subr.mxu0 %v13963_v43  ;;  %11770 = vmatprep.subr.mxu1 %v13963_v43 }
0x118e   :  { %11740 = vmatpush3.msra.mxu0 %v13968_v1  ;;  %11771 = vmatpush3.msra.mxu1 %v13969_v19 }
0x118f   :  { %11741 = vmatprep.subr.mxu0 %v13963_v43  ;;  %11772 = vmatprep.subr.mxu1 %v13963_v43 }
0x1190   :  { %11742 = vmatpush3.msra.mxu0 %v13970_v8  ;;  %11773 = vmatpush3.msra.mxu1 %v13971_v3 }
0x1191   :  { %11744 = vmatmul.mubr.f32.vlgmr.msra.gmra.mxu0 %v8488_v7  ;;  %11774 = vmatprep.subr.mxu1 %v13963_v43  ;;  %v13995_v7 = vld [vmem:[#allocation36_spill] sm:$0xff] }
0x1192   :  { %11775 = vmatpush3.msra.mxu1 %v13972_v10  ;;  %11757 = vmatprep.subr.mxu0 %v13963_v43  ;;  %v860_v13 = vadd.f32 %v13995_v7, %v745_v24 }
0x1193   :  { %11776 = vmatprep.mubr.msk.f32.mxu1 %vm12025_vm2, %v13963_v43  ;;  %11790 = vmatprep.subr.mxu1 %v13963_v43 }
0x1194   :  { %11758 = vmatpush3.msra.mxu0 %v12418_v20  ;;  %11765 = vmatprep.mubr.msk.f32.mxu0 %vm12025_vm2, %v13963_v43 }
0x1195   :  { %11759 = vmatprep.subr.mxu0 %v13963_v43 }
0x1196   :  { %11760 = vmatpush3.msra.mxu0 %v12435_v23 }
0x1197   :  { %11761 = vmatprep.subr.mxu0 %v13963_v43 }
0x1198   :  { %11762 = vmatpush3.msra.mxu0 %v12456_v27 }
0x1199   :  { %11763 = vmatprep.subr.mxu0 %v13963_v43 }
0x119a   :  { %11764 = vmatpush3.msra.mxu0 %v12477_v35 }
0x119b   :  { %11779 = vmatprep.subr.mxu0 %v13963_v43 }
0x1219   :  { %v8068_v25 = vpop.f32.mrf.mxu1 }
0x121b   :  { %v11646_v19 = vpop.f32.mrf.mxu1 }
0x1221   :  { %v8225_v3 = vpop.f32.mrf.mxu1 }
0x1222   :  { %v7977_v10 = vpop.f32.mrf.mxu0 }
0x1223   :  { %v11668_v22 = vpop.f32.mrf.mxu1  ;;  %v8069_v12 = vadd.f32 %v8068_v25, %v7977_v10 }
0x1224   :  { %v11635_v48 = vpop.f32.mrf.mxu0 }
0x122a   :  { %v8148_v11 = vpop.f32.mrf.mxu0 }
0x122b   :  { %v8383_v41 = vpop.f32.mrf.mxu1  ;;  %v8149_v61 = vadd.f32 %v8148_v11, %v8069_v12  ;;  %v13996_v12 = vld [vmem:[#allocation37_spill] sm:$0xff] }
0x122c   :  { %v11657_v17 = vpop.f32.mrf.mxu0 }
0x122d   :  { %v11690_v56 = vpop.f32.mrf.mxu1  ;;  %v8226_v46 = vadd.f32 %v8225_v3, %v8149_v61 }
0x1234   :  { %v8308_v15 = vpop.f32.mrf.mxu0 }
0x1235   :  { %v8309_v16 = vadd.f32 %v8308_v15, %v8226_v46 }
0x1236   :  { %v8585_v52 = vpop.f32.mrf.mxu1  ;;  %v11679_v33 = vpop.f32.mrf.mxu0 }
0x1237   :  { %v8384_v45 = vadd.f32 %v8383_v41, %v8309_v16 }
0x1238   :  { %v11712_v42 = vpop.f32.mrf.mxu1 }
0x1239   :  { %v8387_v55 = vadd.f32 %v8384_v45, %v860_v13 }
0x123b   :  { %11990 = vtanh.f32 %v8387_v55  ;;  %v10037_v47 = vmul.f32 -1.442695, %v8387_v55 }
0x123f   :  { %v8742_v19 = vpop.f32.mrf.mxu1 }
0x1240   :  { %v8494_v22 = vpop.f32.mrf.mxu0 }
0x1241   :  { %v11734_v25 = vpop.f32.mrf.mxu1  ;;  %v8586_v3 = vadd.f32 %v8585_v52, %v8494_v22 }
0x1242   :  { %v11701_v10 = vpop.f32.mrf.mxu0 }
0x1248   :  { %v11991_v48 = vpop.eup %11990  ;;  %v8665_v60 = vpop.f32.mrf.mxu0 }
0x1249   :  { %v8900_v38 = vpop.f32.mrf.mxu1  ;;  %8397 = vrot.lane.b32.xlu0 %v11991_v48, %s12026_s3  ;;  %v8666_v51 = vadd.f32 %v8665_v60, %v8586_v3 }
0x124a   :  { %v11723_v28 = vpop.f32.mrf.mxu0 }
0x124b   :  { %v11756_v11 = vpop.f32.mrf.mxu1  ;;  %v8743_v31 = vadd.f32 %v8742_v19, %v8666_v51 }
0x1251   :  { %v8825_v17 = vpop.f32.mrf.mxu0 }
0x1252   :  { %v8826_v37 = vadd.f32 %v8825_v17, %v8743_v31 }
0x1253   :  { %v11745_v41 = vpop.f32.mrf.mxu0 }
0x1254   :  { %v8901_v63 = vadd.f32 %v8900_v38, %v8826_v37 }
0x1256   :  { %v8904_v56 = vadd.f32 %v8901_v63, %v13996_v12 }
0x1258   :  { %11992 = vtanh.f32 %v8904_v56  ;;  %v10038_v24 = vmul.f32 -1.442695, %v8904_v56 }
0x1259   :  { %11994 = vpow2.f32 %v10037_v47 }
0x1265   :  { %v11993_v61 = vpop.eup %11992 }
0x1266   :  { %8914 = vrot.lane.b32.xlu1 %v11993_v61, %s12026_s3  ;;  %v11995_v0 = vpop.eup %11994 }
0x1267   :  { %v8391_v62 = vadd.f32 1.0, %v11995_v0 }
0x1269   :  { %11996 = vrcp.f32 %v8391_v62 }
0x126a   :  { %11998 = vpow2.f32 %v10038_v24 }
0x1276   :  { %v11997_v46 = vpop.eup %11996 }
0x1277   :  { %v11999_v52 = vpop.eup %11998  ;;  %v8395_v42 = vmul.f32 %v11997_v46, %v13602_v34 }
0x1278   :  { %v8908_v33 = vadd.f32 1.0, %v11999_v52 }
0x127a   :  { %12000 = vrcp.f32 %v8908_v33 }
0x1287   :  { %v12001_v7 = vpop.eup %12000 }
0x1288   :  { %v8912_v25 = vmul.f32 %v12001_v7, %v13607_v30 }
0x12bb   :  { %v8398_v15 = vpop.permute.xlu0 %8397 }
0x12bc   :  { %v8400_v16 = vmul.f32 %v11997_v46, %v8398_v15 }
0x12be   :  { %8402 = vrot.lane.b32.xlu0 %v8400_v16, %s12026_s3 }
0x12d8   :  { %v8915_v13 = vpop.permute.xlu1 %8914 }
0x12d9   :  { %v8917_v45 = vmul.f32 %v12001_v7, %v8915_v13 }
0x12db   :  { %8919 = vrot.lane.b32.xlu1 %v8917_v45, %s12026_s3  ;;  %v13998_v45 = vld [vmem:[#allocation38_spill] sm:$0xff] }
0x1330   :  { %v8403_v55 = vpop.permute.xlu0 %8402 }
0x1331   :  { %v13758_v19 = vadd.f32 %v8403_v55, %v8395_v42 }
0x1333   :  { %12002 = vtanh.f32 %v13758_v19 }
0x1340   :  { %v12003_v22 = vpop.eup %12002 }
0x1341   :  { %8408 = vrot.lane.b32.xlu0 %v12003_v22, %s12026_s3 }
0x134d   :  { %v8920_v10 = vpop.permute.xlu1 %8919 }
0x134e   :  { %v13763_v48 = vadd.f32 %v8920_v10, %v8912_v25 }
0x1350   :  { %12004 = vtanh.f32 %v13763_v48 }
0x135d   :  { %v12005_v60 = vpop.eup %12004 }
0x135e   :  { %8925 = vrot.lane.b32.xlu1 %v12005_v60, %s12026_s3 }
0x13b3   :  { %v8409_v38 = vpop.permute.xlu0 %8408 }
0x13b4   :  { %v8411_v34 = vmul.f32 %v11997_v46, %v8409_v38 }
0x13b6   :  { %8413 = vrot.lane.b32.xlu0 %v8411_v34, %s12027_s28 }
0x13d0   :  { %v8926_v3 = vpop.permute.xlu1 %8925 }
0x13d1   :  { %v8928_v28 = vmul.f32 %v12001_v7, %v8926_v3 }
0x13d3   :  { %8930 = vrot.lane.b32.xlu1 %v8928_v28, %s12027_s28 }
0x1428   :  { %v8414_v11 = vpop.permute.xlu0 %8413 }
0x1429   :  { %8416 = vst.msk [vmem:[%s13906_s5 + $0x30] sm:$0xff] %vm62_vm1, %v8414_v11  ;;  %v8934_v30 = vsel %vm62_vm1, %v8414_v11, 0 }
0x142a   :  { %v9005_v51 = vand.u32 4294901760, %v8934_v30 }
0x142c   :  { %v9006_v31 = vsub.f32 %v8934_v30, %v9005_v51  ;;  %11777 = vmatmul.mubr.f32.vlgmr.msra.gmra.mxu1 %v9005_v51 }
0x142d   :  { %11791 = vmatpush3.msra.mxu1 %v12418_v20  ;;  %11798 = vmatprep.mubr.msk.f32.mxu1 %vm12025_vm2, %v13963_v43 }
0x142e   :  { %v9007_v17 = vand.u32 4294901760, %v9006_v31  ;;  %11792 = vmatprep.subr.mxu1 %v13963_v43 }
0x142f   :  { %11793 = vmatpush3.msra.mxu1 %v12435_v23 }
0x1430   :  { %v9008_v37 = vsub.f32 %v9006_v31, %v9007_v17  ;;  %11794 = vmatprep.subr.mxu1 %v13963_v43 }
0x1431   :  { %11795 = vmatpush3.msra.mxu1 %v12456_v27 }
0x1432   :  { %v9009_v41 = vand.u32 4294901760, %v9008_v37  ;;  %11796 = vmatprep.subr.mxu1 %v13963_v43 }
0x1433   :  { %11797 = vmatpush3.msra.mxu1 %v12477_v35 }
0x1434   :  { %11799 = vmatmul.mubr.f32.vlgmr.msra.gmra.mxu1 %v9007_v17  ;;  %11812 = vmatprep.subr.mxu1 %v13963_v43 }
0x1435   :  { %11766 = vmatmul.mubr.f32.vlgmr.msra.gmra.mxu0 %v9009_v41  ;;  %11813 = vmatpush3.msra.mxu1 %v12418_v20 }
0x1436   :  { %11780 = vmatpush3.msra.mxu0 %v12433_v4  ;;  %11814 = vmatprep.subr.mxu1 %v13963_v43 }
0x1437   :  { %11781 = vmatprep.subr.mxu0 %v13963_v43  ;;  %11815 = vmatpush3.msra.mxu1 %v12435_v23 }
0x1438   :  { %11782 = vmatpush3.msra.mxu0 %v12454_v5  ;;  %11816 = vmatprep.subr.mxu1 %v13963_v43 }
0x1439   :  { %11783 = vmatprep.subr.mxu0 %v13963_v43  ;;  %11817 = vmatpush3.msra.mxu1 %v12456_v27 }
0x143a   :  { %11784 = vmatpush3.msra.mxu0 %v12475_v32  ;;  %11818 = vmatprep.subr.mxu1 %v13963_v43 }
0x143b   :  { %11785 = vmatprep.subr.mxu0 %v13963_v43  ;;  %11787 = vmatprep.mubr.msk.f32.mxu0 %vm12025_vm2, %v13963_v43 }
0x143c   :  { %11786 = vmatpush3.msra.mxu0 %v12494_v40  ;;  %11819 = vmatpush3.msra.mxu1 %v12477_v35 }
0x143d   :  { %11820 = vmatprep.mubr.msk.f32.mxu1 %vm12025_vm2, %v13963_v43  ;;  %11788 = vmatmul.mubr.f32.vlgmr.msra.gmra.mxu0 %v9006_v31 }
0x143e   :  { %11801 = vmatprep.subr.mxu0 %v13963_v43  ;;  %11821 = vmatmul.mubr.f32.vlgmr.msra.gmra.mxu1 %v9005_v51 }
0x143f   :  { %11834 = vmatprep.subr.mxu1 %v13963_v43  ;;  %11802 = vmatpush3.msra.mxu0 %v12451_v26 }
0x1440   :  { %11835 = vmatpush3.msra.mxu1 %v12647_v6  ;;  %11803 = vmatprep.subr.mxu0 %v13963_v43 }
0x1441   :  { %11836 = vmatprep.subr.mxu1 %v13963_v43  ;;  %11804 = vmatpush3.msra.mxu0 %v12472_v29 }
0x1442   :  { %11837 = vmatpush3.msra.mxu1 %v12657_v9  ;;  %11805 = vmatprep.subr.mxu0 %v13963_v43 }
0x1443   :  { %11838 = vmatprep.subr.mxu1 %v13963_v43  ;;  %11806 = vmatpush3.msra.mxu0 %v12491_v39 }
0x1444   :  { %11839 = vmatpush3.msra.mxu1 %v12665_v58  ;;  %11807 = vmatprep.subr.mxu0 %v13963_v43 }
0x1445   :  { %v8931_v20 = vpop.permute.xlu1 %8930  ;;  %11840 = vmatprep.subr.mxu1 %v13963_v43  ;;  %11808 = vmatpush3.msra.mxu0 %v12511_v44 }
0x1446   :  { %8933 = vst.msk [vmem:[%s13907_s6 + $0x8] sm:$0xff] %vm62_vm1, %v8931_v20  ;;  %v9451_v4 = vsel %vm62_vm1, %v8931_v20, 0  ;;  %11809 = vmatprep.mubr.msk.f32.mxu0 %vm12025_vm2, %v13963_v43  ;;  %11841 = vmatpush3.msra.mxu1 %v12671_v14 }
0x1447   :  { %v9522_v23 = vand.u32 4294901760, %v9451_v4  ;;  %11810 = vmatmul.mubr.f32.vlgmr.msra.gmra.mxu0 %v9005_v51  ;;  %11823 = vmatprep.subr.mxu0 %v13963_v43 }
0x1448   :  { %11842 = vmatprep.mubr.msk.f32.mxu1 %vm12025_vm2, %v13963_v43  ;;  %11856 = vmatprep.subr.mxu1 %v13963_v43 }
0x1449   :  { %v9523_v26 = vsub.f32 %v9451_v4, %v9522_v23  ;;  %11824 = vmatpush3.msra.mxu0 %v12563_v49  ;;  %11843 = vmatmul.mubr.f32.vlgmr.msra.gmra.mxu1 %v9522_v23 }
0x144a   :  { %11857 = vmatpush3.msra.mxu1 %v12563_v49  ;;  %11825 = vmatprep.subr.mxu0 %v13963_v43 }
0x144b   :  { %v9524_v5 = vand.u32 4294901760, %v9523_v26  ;;  %11858 = vmatprep.subr.mxu1 %v13963_v43  ;;  %11826 = vmatpush3.msra.mxu0 %v12572_v50 }
0x144c   :  { %11859 = vmatpush3.msra.mxu1 %v12572_v50  ;;  %11827 = vmatprep.subr.mxu0 %v13963_v43 }
0x144d   :  { %v9525_v27 = vsub.f32 %v9523_v26, %v9524_v5  ;;  %11860 = vmatprep.subr.mxu1 %v13963_v43  ;;  %11828 = vmatpush3.msra.mxu0 %v12585_v54 }
0x144e   :  { %11861 = vmatpush3.msra.mxu1 %v12585_v54  ;;  %11829 = vmatprep.subr.mxu0 %v13963_v43 }
0x144f   :  { %v9526_v29 = vand.u32 4294901760, %v9525_v27  ;;  %11862 = vmatprep.subr.mxu1 %v13963_v43  ;;  %11830 = vmatpush3.msra.mxu0 %v12596_v21 }
0x1450   :  { %11863 = vmatpush3.msra.mxu1 %v12596_v21  ;;  %11864 = vmatprep.mubr.msk.f32.mxu1 %vm12025_vm2, %v13963_v43 }
0x1451   :  { %11831 = vmatprep.mubr.msk.f32.mxu0 %vm12025_vm2, %v13963_v43  ;;  %11845 = vmatprep.subr.mxu0 %v13963_v43 }
0x1452   :  { %11865 = vmatmul.mubr.f32.vlgmr.msra.gmra.mxu1 %v9524_v5  ;;  %11878 = vmatprep.subr.mxu1 %v13963_v43 }
0x1453   :  { %11832 = vmatmul.mubr.f32.vlgmr.msra.gmra.mxu0 %v9526_v29  ;;  %11879 = vmatpush3.msra.mxu1 %v12563_v49 }
0x1454   :  { %11846 = vmatpush3.msra.mxu0 %v12583_v53  ;;  %11880 = vmatprep.subr.mxu1 %v13963_v43 }
0x1455   :  { %11847 = vmatprep.subr.mxu0 %v13963_v43  ;;  %11881 = vmatpush3.msra.mxu1 %v12572_v50 }
0x1456   :  { %11848 = vmatpush3.msra.mxu0 %v12594_v57  ;;  %11882 = vmatprep.subr.mxu1 %v13963_v43 }
0x1457   :  { %11849 = vmatprep.subr.mxu0 %v13963_v43  ;;  %11883 = vmatpush3.msra.mxu1 %v12585_v54 }
0x1458   :  { %11850 = vmatpush3.msra.mxu0 %v12608_v59  ;;  %11884 = vmatprep.subr.mxu1 %v13963_v43 }
0x1459   :  { %11851 = vmatprep.subr.mxu0 %v13963_v43  ;;  %11853 = vmatprep.mubr.msk.f32.mxu0 %vm12025_vm2, %v13963_v43 }
0x145a   :  { %11852 = vmatpush3.msra.mxu0 %v13964_v18  ;;  %11885 = vmatpush3.msra.mxu1 %v12596_v21 }
0x145b   :  { %11886 = vmatprep.mubr.msk.f32.mxu1 %vm12025_vm2, %v13963_v43  ;;  %11854 = vmatmul.mubr.f32.vlgmr.msra.gmra.mxu0 %v9523_v26 }
0x145c   :  { %11867 = vmatprep.subr.mxu0 %v13963_v43  ;;  %11887 = vmatmul.mubr.f32.vlgmr.msra.gmra.mxu1 %v9522_v23 }
0x145d   :  { %11868 = vmatpush3.msra.mxu0 %v13965_v2  ;;  %11875 = vmatprep.mubr.msk.f32.mxu0 %vm12025_vm2, %v13963_v43 }
0x145e   :  { %11869 = vmatprep.subr.mxu0 %v13963_v43 }
0x145f   :  { %11870 = vmatpush3.msra.mxu0 %v13966_v36  ;;  %v13997_v36 = vld [vmem:[#allocation35_spill] sm:$0xff] }
0x1460   :  { %11871 = vmatprep.subr.mxu0 %v13963_v43 }
0x1461   :  { %11872 = vmatpush3.msra.mxu0 %v13968_v1 }
0x1462   :  { %11873 = vmatprep.subr.mxu0 %v13963_v43 }
0x1463   :  { %11874 = vmatpush3.msra.mxu0 %v13970_v8 }
0x1464   :  { %11876 = vmatmul.mubr.f32.vlgmr.msra.gmra.mxu0 %v9522_v23 }
0x14ec   :  { %v9102_v32 = vpop.f32.mrf.mxu1 }
0x14ee   :  { %v11778_v35 = vpop.f32.mrf.mxu1 }
0x14f4   :  { %v9259_v39 = vpop.f32.mrf.mxu1 }
0x14f5   :  { %v9011_v40 = vpop.f32.mrf.mxu0 }
0x14f6   :  { %v11800_v44 = vpop.f32.mrf.mxu1  ;;  %v9103_v57 = vadd.f32 %v9102_v32, %v9011_v40 }
0x14f7   :  { %v11767_v49 = vpop.f32.mrf.mxu0 }
0x14fd   :  { %v9182_v50 = vpop.f32.mrf.mxu0 }
0x14fe   :  { %v9417_v53 = vpop.f32.mrf.mxu1  ;;  %v9183_v59 = vadd.f32 %v9182_v50, %v9103_v57 }
0x14ff   :  { %v11789_v54 = vpop.f32.mrf.mxu0 }
0x1500   :  { %v11822_v21 = vpop.f32.mrf.mxu1  ;;  %v9260_v6 = vadd.f32 %v9259_v39, %v9183_v59 }
0x1507   :  { %v9342_v9 = vpop.f32.mrf.mxu0 }
0x1508   :  { %v9343_v58 = vadd.f32 %v9342_v9, %v9260_v6 }
0x1509   :  { %v9619_v14 = vpop.f32.mrf.mxu1  ;;  %v11811_v43 = vpop.f32.mrf.mxu0 }
0x150a   :  { %v9418_v18 = vadd.f32 %v9417_v53, %v9343_v58 }
0x150b   :  { %v11844_v2 = vpop.f32.mrf.mxu1 }
0x150c   :  { %v9421_v1 = vadd.f32 %v9418_v18, %v13997_v36 }
0x150e   :  { %12006 = vtanh.f32 %v9421_v1  ;;  %v10039_v22 = vmul.f32 -1.442695, %v9421_v1 }
0x1512   :  { %v9776_v8 = vpop.f32.mrf.mxu1 }
0x1513   :  { %v9528_v63 = vpop.f32.mrf.mxu0 }
0x1514   :  { %v11866_v12 = vpop.f32.mrf.mxu1  ;;  %v9620_v62 = vadd.f32 %v9619_v14, %v9528_v63 }
0x1515   :  { %v11833_v56 = vpop.f32.mrf.mxu0 }
0x151b   :  { %v12007_v61 = vpop.eup %12006  ;;  %v9699_v47 = vpop.f32.mrf.mxu0 }
0x151c   :  { %v9934_v0 = vpop.f32.mrf.mxu1  ;;  %9431 = vrot.lane.b32.xlu0 %v12007_v61, %s12026_s3  ;;  %v9700_v15 = vadd.f32 %v9699_v47, %v9620_v62 }
0x151d   :  { %v11855_v24 = vpop.f32.mrf.mxu0 }
0x151e   :  { %v11888_v46 = vpop.f32.mrf.mxu1  ;;  %v9777_v16 = vadd.f32 %v9776_v8, %v9700_v15 }
0x1524   :  { %v9859_v52 = vpop.f32.mrf.mxu0 }
0x1525   :  { %v9860_v33 = vadd.f32 %v9859_v52, %v9777_v16 }
0x1526   :  { %v11877_v7 = vpop.f32.mrf.mxu0 }
0x1527   :  { %v9935_v13 = vadd.f32 %v9934_v0, %v9860_v33 }
0x1529   :  { %v9938_v42 = vadd.f32 %v9935_v13, %v13998_v45 }
0x152b   :  { %12008 = vtanh.f32 %v9938_v42  ;;  %v10040_v60 = vmul.f32 -1.442695, %v9938_v42 }
0x152c   :  { %12010 = vpow2.f32 %v10039_v22 }
0x1538   :  { %v12009_v55 = vpop.eup %12008 }
0x1539   :  { %9948 = vrot.lane.b32.xlu1 %v12009_v55, %s12026_s3  ;;  %v12011_v25 = vpop.eup %12010 }
0x153a   :  { %v9425_v10 = vadd.f32 1.0, %v12011_v25 }
0x153c   :  { %12012 = vrcp.f32 %v9425_v10 }
0x153d   :  { %12014 = vpow2.f32 %v10040_v60 }
0x1549   :  { %v12013_v38 = vpop.eup %12012 }
0x154a   :  { %v12015_v28 = vpop.eup %12014  ;;  %v9429_v17 = vmul.f32 %v12013_v38, %v13758_v19 }
0x154b   :  { %v9942_v11 = vadd.f32 1.0, %v12015_v28 }
0x154d   :  { %12016 = vrcp.f32 %v9942_v11 }
0x155a   :  { %v12017_v30 = vpop.eup %12016 }
0x155b   :  { %v9946_v4 = vmul.f32 %v12017_v30, %v13763_v48 }
0x158e   :  { %v9432_v34 = vpop.permute.xlu0 %9431 }
0x158f   :  { %v9434_v3 = vmul.f32 %v12013_v38, %v9432_v34 }
0x1591   :  { %9436 = vrot.lane.b32.xlu0 %v9434_v3, %s12026_s3 }
0x15ab   :  { %v9949_v51 = vpop.permute.xlu1 %9948 }
0x15ac   :  { %v9951_v31 = vmul.f32 %v12017_v30, %v9949_v51 }
0x15ae   :  { %9953 = vrot.lane.b32.xlu1 %v9951_v31, %s12026_s3 }
0x1603   :  { %v9437_v37 = vpop.permute.xlu0 %9436 }
0x1604   :  { %v9439_v41 = vadd.f32 %v9437_v37, %v9429_v17 }
0x1606   :  { %12018 = vtanh.f32 %v9439_v41 }
0x1613   :  { %v12019_v20 = vpop.eup %12018 }
0x1614   :  { %9442 = vrot.lane.b32.xlu0 %v12019_v20, %s12026_s3 }
0x1620   :  { %v9954_v23 = vpop.permute.xlu1 %9953 }
0x1621   :  { %v9956_v26 = vadd.f32 %v9954_v23, %v9946_v4 }
0x1623   :  { %12020 = vtanh.f32 %v9956_v26 }
0x1630   :  { %v12021_v5 = vpop.eup %12020 }
0x1631   :  { %9959 = vrot.lane.b32.xlu1 %v12021_v5, %s12026_s3 }
0x1686   :  { %v9443_v27 = vpop.permute.xlu0 %9442 }
0x1687   :  { %v9445_v29 = vmul.f32 %v12013_v38, %v9443_v27 }
0x1689   :  { %9447 = vrot.lane.b32.xlu0 %v9445_v29, %s12027_s28 }
0x168d   :  { %9970 = vrot.lane.b32.xlu0 %v9439_v41, %s12028_s10 }
0x16a3   :  { %v9960_v19 = vpop.permute.xlu1 %9959 }
0x16a4   :  { %v9962_v32 = vmul.f32 %v12017_v30, %v9960_v19 }
0x16a6   :  { %9964 = vrot.lane.b32.xlu1 %v9962_v32, %s12027_s28 }
0x16aa   :  { %9976 = vrot.lane.b32.xlu1 %v9956_v26, %s12028_s10 }
0x16fb   :  { %v9448_v35 = vpop.permute.xlu0 %9447 }
0x16fc   :  { %9450 = vst.msk [vmem:[%s13906_s5 + $0x38] sm:$0xff] %vm62_vm1, %v9448_v35  ;;  %9968 = vst.msk [vmem:[#allocation2] sm:$0xff] %vm62_vm1, %v9448_v35 }
0x16ff   :  { %v9971_v48 = vpop.permute.xlu0 %9970 }
0x1700   :  { %9973 = vst.msk [vmem:[#allocation3] sm:$0xff] %vm62_vm1, %v9971_v48 }
0x1718   :  { %v9965_v39 = vpop.permute.xlu1 %9964 }
0x1719   :  { %9967 = vst.msk [vmem:[%s13907_s6] sm:$0xff] %vm62_vm1, %v9965_v39  ;;  %9974 = vst.msk [vmem:[#allocation4] sm:$0xff] %vm62_vm1, %v9965_v39 }
0x171c   :  { %v9977_v40 = vpop.permute.xlu1 %9976 }
0x171d   :  { %9979 = vst.msk [vmem:[#allocation5] sm:$0xff] %vm62_vm1, %v9977_v40 }

</bundles_post_ra>
